<compile_context>
chip_gen: v7x
topology: tpu7x:2x2x1
jax: 0.10.0
libtpu: 0.0.40
codegen_flags: <defaults>
</compile_context>

<pallas_src>
import functools

import jax
import jax.numpy as jnp
from jax.experimental import pallas as pl
from jax.experimental.pallas import tpu as pltpu

BN_EPS = 1e-5
SUBLANE = 8
VMEM_LIMIT_BYTES = 32 * 1024 * 1024  # conservative: fine on v5e/v6e/v7x


def _round_up(x, m):
    return (x + m - 1) // m * m


def _conv_rows(x_ref, w_ref, *, m_rows, tap_offsets):
    """In-kernel conv: sum of K*K shifted (m_rows, Cin) @ (Cin, Cout) dots.

    x_ref block: (1, p_in, cin)  -- one spatially padded image, flattened to
                                    (pixel, channel) rows.
    w_ref block: (K*K, cin, cout) -- per-tap weight matrices.
    Returns (m_rows, cout) f32 pre-BN conv output over the *padded* width.
    """
    acc = None
    for t, off in enumerate(tap_offsets):
        lhs = x_ref[0, pl.ds(off, m_rows), :]
        part = jnp.dot(lhs, w_ref[t], preferred_element_type=jnp.float32)
        acc = part if acc is None else acc + part
    return acc


# ---- Pass 1: conv (recomputable) -> per-image partial sum / sum-of-squares ----
def _stats_kernel(x_ref, w_ref, sum_ref, ssq_ref, *,
                  m_rows, w_pad, w_out, tap_offsets):
    y = _conv_rows(x_ref, w_ref, m_rows=m_rows, tap_offsets=tap_offsets)
    # Rows cover the padded width; mask out the (w >= w_out) garbage columns so
    # they never enter the batch statistics.
    col = jax.lax.broadcasted_iota(jnp.int32, (m_rows, 1), 0) % w_pad
    valid = col < w_out
    yv = jnp.where(valid, y, 0.0)
    s = jnp.sum(yv, axis=0, keepdims=True)        # (1, cout)
    q = jnp.sum(yv * yv, axis=0, keepdims=True)   # (1, cout)
    sum_ref[...] = jnp.broadcast_to(s[None], sum_ref.shape)
    ssq_ref[...] = jnp.broadcast_to(q[None], ssq_ref.shape)


# ---- Pass 2: recompute conv, apply folded BN (one per-channel FMA) + ReLU ----
def _conv_bn_relu_kernel(x_ref, w_ref, a_ref, c_ref, o_ref, *,
                         m_rows, tap_offsets):
    y = _conv_rows(x_ref, w_ref, m_rows=m_rows, tap_offsets=tap_offsets)
    o_ref[0] = jnp.maximum(y * a_ref[...] + c_ref[...], 0.0)


def conv_bn_relu(x, weight, bias, gamma, beta, *, ksize, pad):
    """x: (N,H,W,Cin) NHWC f32; weight: (Cout,Cin,KH,KW) (PyTorch layout).

    `bias` is accepted for API parity with nn.Conv2d but intentionally not
    applied: training-mode BatchNorm's mean subtraction cancels it exactly.
    """
    del bias
    n, h, w, cin = x.shape
    cout = weight.shape[0]
    h_pad, w_pad = h + 2 * pad, w + 2 * pad
    h_out, w_out = h_pad - ksize + 1, w_pad - ksize + 1
    m_rows = h_out * w_pad                       # output rows per image (padded width)
    p_in = _round_up(h_pad * w_pad + ksize - 1, SUBLANE)
    cin_pad = _round_up(cin, SUBLANE)            # cheap insurance for tiny-K dots

    # Spatially pad + flatten each image to (p_in, cin_pad) pixel rows.
    xp = jnp.pad(x, ((0, 0), (pad, pad), (pad, pad), (0, cin_pad - cin)))
    x_flat = xp.reshape(n, h_pad * w_pad, cin_pad)
    x_flat = jnp.pad(x_flat, ((0, 0), (0, p_in - h_pad * w_pad), (0, 0)))

    # Per-tap (cin, cout) weight matrices; tap t = kh*ksize + kw pairs with the
    # flattened row offset kh*w_pad + kw.
    w_taps = jnp.transpose(weight, (2, 3, 1, 0))                 # (K,K,Cin,Cout)
    w_taps = jnp.pad(w_taps, ((0, 0), (0, 0), (0, cin_pad - cin), (0, 0)))
    w_taps = w_taps.reshape(ksize * ksize, cin_pad, cout)
    tap_offsets = tuple(kh * w_pad + kw
                        for kh in range(ksize) for kw in range(ksize))

    grid = (n,)
    x_spec = pl.BlockSpec((1, p_in, cin_pad), lambda i: (i, 0, 0))
    w_spec = pl.BlockSpec((ksize * ksize, cin_pad, cout), lambda i: (0, 0, 0))
    conv_flops = 2 * n * m_rows * ksize * ksize * cin_pad * cout

    # ---------------- Pass 1: stats only (no y written to HBM) ----------------
    sums, ssqs = pl.pallas_call(
        functools.partial(_stats_kernel, m_rows=m_rows, w_pad=w_pad,
                          w_out=w_out, tap_offsets=tap_offsets),
        out_shape=(
            jax.ShapeDtypeStruct((n, SUBLANE, cout), jnp.float32),
            jax.ShapeDtypeStruct((n, SUBLANE, cout), jnp.float32),
        ),
        grid_spec=pltpu.PrefetchScalarGridSpec(
            num_scalar_prefetch=0,
            grid=grid,
            in_specs=[x_spec, w_spec],
            out_specs=[
                pl.BlockSpec((1, SUBLANE, cout), lambda i: (i, 0, 0)),
                pl.BlockSpec((1, SUBLANE, cout), lambda i: (i, 0, 0)),
            ],
        ),
        compiler_params=pltpu.CompilerParams(
            dimension_semantics=("parallel",),   # per-image partials -> megacore OK
            vmem_limit_bytes=VMEM_LIMIT_BYTES,
        ),
        cost_estimate=pl.CostEstimate(
            flops=conv_flops,
            transcendentals=0,
            bytes_accessed=4 * (n * p_in * cin_pad + ksize * ksize * cin_pad * cout
                                + 2 * n * SUBLANE * cout),
        ),
    )(x_flat, w_taps)

    # Reduce the tiny per-image partials in XLA and fold BN into one FMA.
    count = n * h_out * w_out
    ch_sum = jnp.sum(sums[:, 0, :], axis=0)
    ch_ssq = jnp.sum(ssqs[:, 0, :], axis=0)
    mean = ch_sum / count
    # TODO(synk): E[x^2]-E[x]^2 loses precision when |mean| >> std; switch to a
    # shifted sum-of-squares if inputs are not roughly centered.
    var = jnp.maximum(ch_ssq / count - mean * mean, 0.0)
    scale = gamma * jax.lax.rsqrt(var + BN_EPS)
    a = scale.reshape(1, cout)
    c = (beta - mean * scale).reshape(1, cout)

    # ------------- Pass 2: recompute conv, BN FMA + ReLU, true-width out -------------
    out_flat = pl.pallas_call(
        functools.partial(_conv_bn_relu_kernel, m_rows=m_rows,
                          tap_offsets=tap_offsets),
        out_shape=jax.ShapeDtypeStruct((n, m_rows, cout), jnp.float32),
        grid_spec=pltpu.PrefetchScalarGridSpec(
            num_scalar_prefetch=0,
            grid=grid,
            in_specs=[
                x_spec,
                w_spec,
                pl.BlockSpec((1, cout), lambda i: (0, 0)),
                pl.BlockSpec((1, cout), lambda i: (0, 0)),
            ],
            out_specs=pl.BlockSpec((1, m_rows, cout), lambda i: (i, 0, 0)),
        ),
        compiler_params=pltpu.CompilerParams(
            dimension_semantics=("parallel",),
            vmem_limit_bytes=VMEM_LIMIT_BYTES,
        ),
        cost_estimate=pl.CostEstimate(
            flops=conv_flops,
            transcendentals=0,
            bytes_accessed=4 * (n * p_in * cin_pad + ksize * ksize * cin_pad * cout
                                + 2 * cout + n * m_rows * cout),
        ),
    )(x_flat, w_taps, a, c)

    # Drop the padded-width garbage columns; channels are already true width.
    out = out_flat.reshape(n, h_out, w_pad, cout)[:, :, :w_out, :]
    return out


def encoder_forward(x_nchw, params, *, ksize, pad):
    """Matches Encoder.forward: ConvBNReLU(in->mid) then ConvBNReLU(mid->out)."""
    x = jnp.transpose(x_nchw, (0, 2, 3, 1))  # NCHW -> NHWC
    y = conv_bn_relu(x, *params["layer1"], ksize=ksize, pad=pad)
    y = conv_bn_relu(y, *params["layer2"], ksize=ksize, pad=pad)
    return jnp.transpose(y, (0, 3, 1, 2))    # NHWC -> NCHW


def init_params(key, in_chs, mid_chs, out_chs, ksize):
    ks = jax.random.split(key, 8)

    def layer(k_w, k_b, k_g, k_beta, co, ci):
        return (0.1 * jax.random.normal(k_w, (co, ci, ksize, ksize), jnp.float32),
                0.1 * jax.random.normal(k_b, (co,), jnp.float32),
                1.0 + 0.1 * jax.random.normal(k_g, (co,), jnp.float32),
                0.1 * jax.random.normal(k_beta, (co,), jnp.float32))

    return {"layer1": layer(ks[0], ks[1], ks[2], ks[3], mid_chs, in_chs),
            "layer2": layer(ks[4], ks[5], ks[6], ks[7], out_chs, mid_chs)}


# ---- pure-JAX reference (correctness check only; keeps the conv bias) ----
def _ref_layer(x, weight, bias, gamma, beta, pad):
    w_hwio = jnp.transpose(weight, (2, 3, 1, 0))
    y = jax.lax.conv_general_dilated(
        x, w_hwio, window_strides=(1, 1), padding=[(pad, pad), (pad, pad)],
        dimension_numbers=("NHWC", "HWIO", "NHWC"))
    y = y + bias
    mean = jnp.mean(y, axis=(0, 1, 2), keepdims=True)
    var = jnp.mean((y - mean) ** 2, axis=(0, 1, 2), keepdims=True)
    y = (y - mean) * jax.lax.rsqrt(var + BN_EPS) * gamma + beta
    return jnp.maximum(y, 0.0)


def _ref_encoder(x_nchw, params, pad):
    x = jnp.transpose(x_nchw, (0, 2, 3, 1))
    y = _ref_layer(x, *params["layer1"], pad)
    y = _ref_layer(y, *params["layer2"], pad)
    return jnp.transpose(y, (0, 3, 1, 2))


if __name__ == "__main__":
    # Small shapes consistent with the module: batch=2, in_chs=4, mid_chs=8,
    # out_chs=16, spatial=16x16, kernel_size=3, padding=1.
    N, IN_CHS, MID_CHS, OUT_CHS, H, W = 2, 4, 8, 16, 16, 16
    KSIZE, PAD = 3, 1

    key = jax.random.PRNGKey(0)
    k_x, k_p = jax.random.split(key)
    x = jax.random.normal(k_x, (N, IN_CHS, H, W), jnp.float32)  # NCHW, like torch
    params = init_params(k_p, IN_CHS, MID_CHS, OUT_CHS, KSIZE)

    fwd = jax.jit(functools.partial(encoder_forward, ksize=KSIZE, pad=PAD))
    out = jax.block_until_ready(fwd(x, params))
    assert out.shape == (N, OUT_CHS, H, W), out.shape

    ref = jax.block_until_ready(_ref_encoder(x, params, PAD))
    max_err = float(jnp.max(jnp.abs(out - ref)))
    assert jnp.allclose(out, ref, atol=1e-3, rtol=1e-3), max_err

    print("KERNEL_OK")
</pallas_src>

<mosaic_0001>
module attributes {stable_mosaic.version = 11 : i64} {
  func.func @_conv_bn_relu_kernel(%arg0: i32, %arg1: memref<1x328x8xf32, #tpu.memory_space<vmem>>, %arg2: memref<9x8x8xf32, #tpu.memory_space<vmem>>, %arg3: memref<1x8xf32, #tpu.memory_space<vmem>>, %arg4: memref<1x8xf32, #tpu.memory_space<vmem>>, %arg5: memref<1x288x8xf32, #tpu.memory_space<vmem>>) attributes {dimension_semantics = [#tpu.dimension_semantics<parallel>], iteration_bounds = array<i64: 2>, scalar_prefetch = 0 : i64, scratch_operands = 0 : i64, tpu.core_type = #tpu.core_type<tc>, window_params = [{transform_indices = @transform_0, window_bounds = array<i64: 1, 328, 8>}, {pipeline_mode = #tpu.pipeline_mode<synchronous>, transform_indices = @transform_1, window_bounds = array<i64: 9, 8, 8>}, {pipeline_mode = #tpu.pipeline_mode<synchronous>, transform_indices = @transform_2, window_bounds = array<i64: 1, 8>}, {pipeline_mode = #tpu.pipeline_mode<synchronous>, transform_indices = @transform_3, window_bounds = array<i64: 1, 8>}, {transform_indices = @transform_4, window_bounds = array<i64: 1, 288, 8>}]} {
    %c0 = arith.constant 0 : index
    %c0_0 = arith.constant 0 : index
    %c0_1 = arith.constant 0 : index
    %0 = vector.load %arg1[%c0, %c0_0, %c0_1] : memref<1x328x8xf32, #tpu.memory_space<vmem>>, vector<1x288x8xf32>
    %1 = vector.shape_cast %0 : vector<1x288x8xf32> to vector<288x8xf32>
    %c0_2 = arith.constant 0 : index
    %c0_3 = arith.constant 0 : index
    %c0_4 = arith.constant 0 : index
    %2 = vector.load %arg2[%c0_2, %c0_3, %c0_4] : memref<9x8x8xf32, #tpu.memory_space<vmem>>, vector<1x8x8xf32>
    %3 = vector.shape_cast %2 : vector<1x8x8xf32> to vector<8x8xf32>
    %cst = arith.constant dense<0.000000e+00> : vector<288x8xf32>
    %4 = tpu.matmul %1, %3, %cst {dimension_numbers = #tpu.dot_dimension_numbers<[1], [0], [0], [1], [0, 0, 1, 1], [], []>} : vector<288x8xf32>, vector<8x8xf32>, vector<288x8xf32> -> vector<288x8xf32>
    %c0_5 = arith.constant 0 : index
    %c1 = arith.constant 1 : index
    %c0_6 = arith.constant 0 : index
    %5 = vector.load %arg1[%c0_5, %c1, %c0_6] : memref<1x328x8xf32, #tpu.memory_space<vmem>>, vector<1x288x8xf32>
    %6 = vector.shape_cast %5 : vector<1x288x8xf32> to vector<288x8xf32>
    %c1_7 = arith.constant 1 : index
    %c0_8 = arith.constant 0 : index
    %c0_9 = arith.constant 0 : index
    %7 = vector.load %arg2[%c1_7, %c0_8, %c0_9] : memref<9x8x8xf32, #tpu.memory_space<vmem>>, vector<1x8x8xf32>
    %8 = vector.shape_cast %7 : vector<1x8x8xf32> to vector<8x8xf32>
    %cst_10 = arith.constant dense<0.000000e+00> : vector<288x8xf32>
    %9 = tpu.matmul %6, %8, %cst_10 {dimension_numbers = #tpu.dot_dimension_numbers<[1], [0], [0], [1], [0, 0, 1, 1], [], []>} : vector<288x8xf32>, vector<8x8xf32>, vector<288x8xf32> -> vector<288x8xf32>
    %10 = arith.addf %4, %9 : vector<288x8xf32>
    %c0_11 = arith.constant 0 : index
    %c2 = arith.constant 2 : index
    %c0_12 = arith.constant 0 : index
    %11 = vector.load %arg1[%c0_11, %c2, %c0_12] : memref<1x328x8xf32, #tpu.memory_space<vmem>>, vector<1x288x8xf32>
    %12 = vector.shape_cast %11 : vector<1x288x8xf32> to vector<288x8xf32>
    %c2_13 = arith.constant 2 : index
    %c0_14 = arith.constant 0 : index
    %c0_15 = arith.constant 0 : index
    %13 = vector.load %arg2[%c2_13, %c0_14, %c0_15] : memref<9x8x8xf32, #tpu.memory_space<vmem>>, vector<1x8x8xf32>
    %14 = vector.shape_cast %13 : vector<1x8x8xf32> to vector<8x8xf32>
    %cst_16 = arith.constant dense<0.000000e+00> : vector<288x8xf32>
    %15 = tpu.matmul %12, %14, %cst_16 {dimension_numbers = #tpu.dot_dimension_numbers<[1], [0], [0], [1], [0, 0, 1, 1], [], []>} : vector<288x8xf32>, vector<8x8xf32>, vector<288x8xf32> -> vector<288x8xf32>
    %16 = arith.addf %10, %15 : vector<288x8xf32>
    %c0_17 = arith.constant 0 : index
    %c18 = arith.constant 18 : index
    %c0_18 = arith.constant 0 : index
    %17 = vector.load %arg1[%c0_17, %c18, %c0_18] : memref<1x328x8xf32, #tpu.memory_space<vmem>>, vector<1x288x8xf32>
    %18 = vector.shape_cast %17 : vector<1x288x8xf32> to vector<288x8xf32>
    %c3 = arith.constant 3 : index
    %c0_19 = arith.constant 0 : index
    %c0_20 = arith.constant 0 : index
    %19 = vector.load %arg2[%c3, %c0_19, %c0_20] : memref<9x8x8xf32, #tpu.memory_space<vmem>>, vector<1x8x8xf32>
    %20 = vector.shape_cast %19 : vector<1x8x8xf32> to vector<8x8xf32>
    %cst_21 = arith.constant dense<0.000000e+00> : vector<288x8xf32>
    %21 = tpu.matmul %18, %20, %cst_21 {dimension_numbers = #tpu.dot_dimension_numbers<[1], [0], [0], [1], [0, 0, 1, 1], [], []>} : vector<288x8xf32>, vector<8x8xf32>, vector<288x8xf32> -> vector<288x8xf32>
    %22 = arith.addf %16, %21 : vector<288x8xf32>
    %c0_22 = arith.constant 0 : index
    %c19 = arith.constant 19 : index
    %c0_23 = arith.constant 0 : index
    %23 = vector.load %arg1[%c0_22, %c19, %c0_23] : memref<1x328x8xf32, #tpu.memory_space<vmem>>, vector<1x288x8xf32>
    %24 = vector.shape_cast %23 : vector<1x288x8xf32> to vector<288x8xf32>
    %c4 = arith.constant 4 : index
    %c0_24 = arith.constant 0 : index
    %c0_25 = arith.constant 0 : index
    %25 = vector.load %arg2[%c4, %c0_24, %c0_25] : memref<9x8x8xf32, #tpu.memory_space<vmem>>, vector<1x8x8xf32>
    %26 = vector.shape_cast %25 : vector<1x8x8xf32> to vector<8x8xf32>
    %cst_26 = arith.constant dense<0.000000e+00> : vector<288x8xf32>
    %27 = tpu.matmul %24, %26, %cst_26 {dimension_numbers = #tpu.dot_dimension_numbers<[1], [0], [0], [1], [0, 0, 1, 1], [], []>} : vector<288x8xf32>, vector<8x8xf32>, vector<288x8xf32> -> vector<288x8xf32>
    %28 = arith.addf %22, %27 : vector<288x8xf32>
    %c0_27 = arith.constant 0 : index
    %c20 = arith.constant 20 : index
    %c0_28 = arith.constant 0 : index
    %29 = vector.load %arg1[%c0_27, %c20, %c0_28] : memref<1x328x8xf32, #tpu.memory_space<vmem>>, vector<1x288x8xf32>
    %30 = vector.shape_cast %29 : vector<1x288x8xf32> to vector<288x8xf32>
    %c5 = arith.constant 5 : index
    %c0_29 = arith.constant 0 : index
    %c0_30 = arith.constant 0 : index
    %31 = vector.load %arg2[%c5, %c0_29, %c0_30] : memref<9x8x8xf32, #tpu.memory_space<vmem>>, vector<1x8x8xf32>
    %32 = vector.shape_cast %31 : vector<1x8x8xf32> to vector<8x8xf32>
    %cst_31 = arith.constant dense<0.000000e+00> : vector<288x8xf32>
    %33 = tpu.matmul %30, %32, %cst_31 {dimension_numbers = #tpu.dot_dimension_numbers<[1], [0], [0], [1], [0, 0, 1, 1], [], []>} : vector<288x8xf32>, vector<8x8xf32>, vector<288x8xf32> -> vector<288x8xf32>
    %34 = arith.addf %28, %33 : vector<288x8xf32>
    %c0_32 = arith.constant 0 : index
    %c36 = arith.constant 36 : index
    %c0_33 = arith.constant 0 : index
    %35 = vector.load %arg1[%c0_32, %c36, %c0_33] : memref<1x328x8xf32, #tpu.memory_space<vmem>>, vector<1x288x8xf32>
    %36 = vector.shape_cast %35 : vector<1x288x8xf32> to vector<288x8xf32>
    %c6 = arith.constant 6 : index
    %c0_34 = arith.constant 0 : index
    %c0_35 = arith.constant 0 : index
    %37 = vector.load %arg2[%c6, %c0_34, %c0_35] : memref<9x8x8xf32, #tpu.memory_space<vmem>>, vector<1x8x8xf32>
    %38 = vector.shape_cast %37 : vector<1x8x8xf32> to vector<8x8xf32>
    %cst_36 = arith.constant dense<0.000000e+00> : vector<288x8xf32>
    %39 = tpu.matmul %36, %38, %cst_36 {dimension_numbers = #tpu.dot_dimension_numbers<[1], [0], [0], [1], [0, 0, 1, 1], [], []>} : vector<288x8xf32>, vector<8x8xf32>, vector<288x8xf32> -> vector<288x8xf32>
    %40 = arith.addf %34, %39 : vector<288x8xf32>
    %c0_37 = arith.constant 0 : index
    %c37 = arith.constant 37 : index
    %c0_38 = arith.constant 0 : index
    %41 = vector.load %arg1[%c0_37, %c37, %c0_38] : memref<1x328x8xf32, #tpu.memory_space<vmem>>, vector<1x288x8xf32>
    %42 = vector.shape_cast %41 : vector<1x288x8xf32> to vector<288x8xf32>
    %c7 = arith.constant 7 : index
    %c0_39 = arith.constant 0 : index
    %c0_40 = arith.constant 0 : index
    %43 = vector.load %arg2[%c7, %c0_39, %c0_40] : memref<9x8x8xf32, #tpu.memory_space<vmem>>, vector<1x8x8xf32>
    %44 = vector.shape_cast %43 : vector<1x8x8xf32> to vector<8x8xf32>
    %cst_41 = arith.constant dense<0.000000e+00> : vector<288x8xf32>
    %45 = tpu.matmul %42, %44, %cst_41 {dimension_numbers = #tpu.dot_dimension_numbers<[1], [0], [0], [1], [0, 0, 1, 1], [], []>} : vector<288x8xf32>, vector<8x8xf32>, vector<288x8xf32> -> vector<288x8xf32>
    %46 = arith.addf %40, %45 : vector<288x8xf32>
    %c0_42 = arith.constant 0 : index
    %c38 = arith.constant 38 : index
    %c0_43 = arith.constant 0 : index
    %47 = vector.load %arg1[%c0_42, %c38, %c0_43] : memref<1x328x8xf32, #tpu.memory_space<vmem>>, vector<1x288x8xf32>
    %48 = vector.shape_cast %47 : vector<1x288x8xf32> to vector<288x8xf32>
    %c8 = arith.constant 8 : index
    %c0_44 = arith.constant 0 : index
    %c0_45 = arith.constant 0 : index
    %49 = vector.load %arg2[%c8, %c0_44, %c0_45] : memref<9x8x8xf32, #tpu.memory_space<vmem>>, vector<1x8x8xf32>
    %50 = vector.shape_cast %49 : vector<1x8x8xf32> to vector<8x8xf32>
    %cst_46 = arith.constant dense<0.000000e+00> : vector<288x8xf32>
    %51 = tpu.matmul %48, %50, %cst_46 {dimension_numbers = #tpu.dot_dimension_numbers<[1], [0], [0], [1], [0, 0, 1, 1], [], []>} : vector<288x8xf32>, vector<8x8xf32>, vector<288x8xf32> -> vector<288x8xf32>
    %52 = arith.addf %46, %51 : vector<288x8xf32>
    %c0_47 = arith.constant 0 : index
    %c0_48 = arith.constant 0 : index
    %53 = vector.load %arg3[%c0_47, %c0_48] : memref<1x8xf32, #tpu.memory_space<vmem>>, vector<1x8xf32>
    %54 = vector.broadcast %53 : vector<1x8xf32> to vector<288x8xf32>
    %55 = arith.mulf %52, %54 : vector<288x8xf32>
    %c0_49 = arith.constant 0 : index
    %c0_50 = arith.constant 0 : index
    %56 = vector.load %arg4[%c0_49, %c0_50] : memref<1x8xf32, #tpu.memory_space<vmem>>, vector<1x8xf32>
    %57 = vector.broadcast %56 : vector<1x8xf32> to vector<288x8xf32>
    %58 = arith.addf %55, %57 : vector<288x8xf32>
    %cst_51 = arith.constant 0.000000e+00 : f32
    %59 = vector.broadcast %cst_51 : f32 to vector<288x8xf32>
    %60 = arith.maximumf %58, %59 : vector<288x8xf32>
    %c0_52 = arith.constant 0 : index
    %c0_53 = arith.constant 0 : index
    %c0_54 = arith.constant 0 : index
    %61 = vector.load %arg5[%c0_52, %c0_53, %c0_54] : memref<1x288x8xf32, #tpu.memory_space<vmem>>, vector<1x288x8xf32>
    %62 = vector.shape_cast %61 : vector<1x288x8xf32> to vector<288x8xf32>
    %63 = vector.shape_cast %60 : vector<288x8xf32> to vector<1x288x8xf32>
    tpu.vector_store %arg5[%c0_52, %c0_53, %c0_54], %63 {strides = array<i32>} : memref<1x288x8xf32, #tpu.memory_space<vmem>>, vector<1x288x8xf32>,
    return
  }
  func.func @transform_0(%arg0: i32) -> (i32, i32, i32) {
    %c0_i32 = arith.constant 0 : i32
    %c0_i32_0 = arith.constant 0 : i32
    %c0_i32_1 = arith.constant 0 : i32
    return %arg0, %c0_i32, %c0_i32_0 : i32, i32, i32
  }
  func.func @transform_1(%arg0: i32) -> (i32, i32, i32) {
    %c0_i32 = arith.constant 0 : i32
    %c0_i32_0 = arith.constant 0 : i32
    %c0_i32_1 = arith.constant 0 : i32
    %c0_i32_2 = arith.constant 0 : i32
    return %c0_i32, %c0_i32_0, %c0_i32_1 : i32, i32, i32
  }
  func.func @transform_2(%arg0: i32) -> (i32, i32) {
    %c0_i32 = arith.constant 0 : i32
    %c0_i32_0 = arith.constant 0 : i32
    %c0_i32_1 = arith.constant 0 : i32
    return %c0_i32, %c0_i32_0 : i32, i32
  }
  func.func @transform_3(%arg0: i32) -> (i32, i32) {
    %c0_i32 = arith.constant 0 : i32
    %c0_i32_0 = arith.constant 0 : i32
    %c0_i32_1 = arith.constant 0 : i32
    return %c0_i32, %c0_i32_0 : i32, i32
  }
  func.func @transform_4(%arg0: i32) -> (i32, i32, i32) {
    %c0_i32 = arith.constant 0 : i32
    %c0_i32_0 = arith.constant 0 : i32
    %c0_i32_1 = arith.constant 0 : i32
    return %arg0, %c0_i32, %c0_i32_0 : i32, i32, i32
  }
}

module attributes {stable_mosaic.version = 11 : i64} {
  func.func @_stats_kernel(%arg0: i32, %arg1: memref<1x328x8xf32, #tpu.memory_space<vmem>>, %arg2: memref<9x8x8xf32, #tpu.memory_space<vmem>>, %arg3: memref<1x8x8xf32, #tpu.memory_space<vmem>>, %arg4: memref<1x8x8xf32, #tpu.memory_space<vmem>>) attributes {dimension_semantics = [#tpu.dimension_semantics<parallel>], iteration_bounds = array<i64: 2>, scalar_prefetch = 0 : i64, scratch_operands = 0 : i64, tpu.core_type = #tpu.core_type<tc>, window_params = [{transform_indices = @transform_0, window_bounds = array<i64: 1, 328, 8>}, {pipeline_mode = #tpu.pipeline_mode<synchronous>, transform_indices = @transform_1, window_bounds = array<i64: 9, 8, 8>}, {transform_indices = @transform_2, window_bounds = array<i64: 1, 8, 8>}, {transform_indices = @transform_3, window_bounds = array<i64: 1, 8, 8>}]} {
    %c0 = arith.constant 0 : index
    %c0_0 = arith.constant 0 : index
    %c0_1 = arith.constant 0 : index
    %0 = vector.load %arg1[%c0, %c0_0, %c0_1] : memref<1x328x8xf32, #tpu.memory_space<vmem>>, vector<1x288x8xf32>
    %1 = vector.shape_cast %0 : vector<1x288x8xf32> to vector<288x8xf32>
    %c0_2 = arith.constant 0 : index
    %c0_3 = arith.constant 0 : index
    %c0_4 = arith.constant 0 : index
    %2 = vector.load %arg2[%c0_2, %c0_3, %c0_4] : memref<9x8x8xf32, #tpu.memory_space<vmem>>, vector<1x8x8xf32>
    %3 = vector.shape_cast %2 : vector<1x8x8xf32> to vector<8x8xf32>
    %cst = arith.constant dense<0.000000e+00> : vector<288x8xf32>
    %4 = tpu.matmul %1, %3, %cst {dimension_numbers = #tpu.dot_dimension_numbers<[1], [0], [0], [1], [0, 0, 1, 1], [], []>} : vector<288x8xf32>, vector<8x8xf32>, vector<288x8xf32> -> vector<288x8xf32>
    %c0_5 = arith.constant 0 : index
    %c1 = arith.constant 1 : index
    %c0_6 = arith.constant 0 : index
    %5 = vector.load %arg1[%c0_5, %c1, %c0_6] : memref<1x328x8xf32, #tpu.memory_space<vmem>>, vector<1x288x8xf32>
    %6 = vector.shape_cast %5 : vector<1x288x8xf32> to vector<288x8xf32>
    %c1_7 = arith.constant 1 : index
    %c0_8 = arith.constant 0 : index
    %c0_9 = arith.constant 0 : index
    %7 = vector.load %arg2[%c1_7, %c0_8, %c0_9] : memref<9x8x8xf32, #tpu.memory_space<vmem>>, vector<1x8x8xf32>
    %8 = vector.shape_cast %7 : vector<1x8x8xf32> to vector<8x8xf32>
    %cst_10 = arith.constant dense<0.000000e+00> : vector<288x8xf32>
    %9 = tpu.matmul %6, %8, %cst_10 {dimension_numbers = #tpu.dot_dimension_numbers<[1], [0], [0], [1], [0, 0, 1, 1], [], []>} : vector<288x8xf32>, vector<8x8xf32>, vector<288x8xf32> -> vector<288x8xf32>
    %10 = arith.addf %4, %9 : vector<288x8xf32>
    %c0_11 = arith.constant 0 : index
    %c2 = arith.constant 2 : index
    %c0_12 = arith.constant 0 : index
    %11 = vector.load %arg1[%c0_11, %c2, %c0_12] : memref<1x328x8xf32, #tpu.memory_space<vmem>>, vector<1x288x8xf32>
    %12 = vector.shape_cast %11 : vector<1x288x8xf32> to vector<288x8xf32>
    %c2_13 = arith.constant 2 : index
    %c0_14 = arith.constant 0 : index
    %c0_15 = arith.constant 0 : index
    %13 = vector.load %arg2[%c2_13, %c0_14, %c0_15] : memref<9x8x8xf32, #tpu.memory_space<vmem>>, vector<1x8x8xf32>
    %14 = vector.shape_cast %13 : vector<1x8x8xf32> to vector<8x8xf32>
    %cst_16 = arith.constant dense<0.000000e+00> : vector<288x8xf32>
    %15 = tpu.matmul %12, %14, %cst_16 {dimension_numbers = #tpu.dot_dimension_numbers<[1], [0], [0], [1], [0, 0, 1, 1], [], []>} : vector<288x8xf32>, vector<8x8xf32>, vector<288x8xf32> -> vector<288x8xf32>
    %16 = arith.addf %10, %15 : vector<288x8xf32>
    %c0_17 = arith.constant 0 : index
    %c18 = arith.constant 18 : index
    %c0_18 = arith.constant 0 : index
    %17 = vector.load %arg1[%c0_17, %c18, %c0_18] : memref<1x328x8xf32, #tpu.memory_space<vmem>>, vector<1x288x8xf32>
    %18 = vector.shape_cast %17 : vector<1x288x8xf32> to vector<288x8xf32>
    %c3 = arith.constant 3 : index
    %c0_19 = arith.constant 0 : index
    %c0_20 = arith.constant 0 : index
    %19 = vector.load %arg2[%c3, %c0_19, %c0_20] : memref<9x8x8xf32, #tpu.memory_space<vmem>>, vector<1x8x8xf32>
    %20 = vector.shape_cast %19 : vector<1x8x8xf32> to vector<8x8xf32>
    %cst_21 = arith.constant dense<0.000000e+00> : vector<288x8xf32>
    %21 = tpu.matmul %18, %20, %cst_21 {dimension_numbers = #tpu.dot_dimension_numbers<[1], [0], [0], [1], [0, 0, 1, 1], [], []>} : vector<288x8xf32>, vector<8x8xf32>, vector<288x8xf32> -> vector<288x8xf32>
    %22 = arith.addf %16, %21 : vector<288x8xf32>
    %c0_22 = arith.constant 0 : index
    %c19 = arith.constant 19 : index
    %c0_23 = arith.constant 0 : index
    %23 = vector.load %arg1[%c0_22, %c19, %c0_23] : memref<1x328x8xf32, #tpu.memory_space<vmem>>, vector<1x288x8xf32>
    %24 = vector.shape_cast %23 : vector<1x288x8xf32> to vector<288x8xf32>
    %c4 = arith.constant 4 : index
    %c0_24 = arith.constant 0 : index
    %c0_25 = arith.constant 0 : index
    %25 = vector.load %arg2[%c4, %c0_24, %c0_25] : memref<9x8x8xf32, #tpu.memory_space<vmem>>, vector<1x8x8xf32>
    %26 = vector.shape_cast %25 : vector<1x8x8xf32> to vector<8x8xf32>
    %cst_26 = arith.constant dense<0.000000e+00> : vector<288x8xf32>
    %27 = tpu.matmul %24, %26, %cst_26 {dimension_numbers = #tpu.dot_dimension_numbers<[1], [0], [0], [1], [0, 0, 1, 1], [], []>} : vector<288x8xf32>, vector<8x8xf32>, vector<288x8xf32> -> vector<288x8xf32>
    %28 = arith.addf %22, %27 : vector<288x8xf32>
    %c0_27 = arith.constant 0 : index
    %c20 = arith.constant 20 : index
    %c0_28 = arith.constant 0 : index
    %29 = vector.load %arg1[%c0_27, %c20, %c0_28] : memref<1x328x8xf32, #tpu.memory_space<vmem>>, vector<1x288x8xf32>
    %30 = vector.shape_cast %29 : vector<1x288x8xf32> to vector<288x8xf32>
    %c5 = arith.constant 5 : index
    %c0_29 = arith.constant 0 : index
    %c0_30 = arith.constant 0 : index
    %31 = vector.load %arg2[%c5, %c0_29, %c0_30] : memref<9x8x8xf32, #tpu.memory_space<vmem>>, vector<1x8x8xf32>
    %32 = vector.shape_cast %31 : vector<1x8x8xf32> to vector<8x8xf32>
    %cst_31 = arith.constant dense<0.000000e+00> : vector<288x8xf32>
    %33 = tpu.matmul %30, %32, %cst_31 {dimension_numbers = #tpu.dot_dimension_numbers<[1], [0], [0], [1], [0, 0, 1, 1], [], []>} : vector<288x8xf32>, vector<8x8xf32>, vector<288x8xf32> -> vector<288x8xf32>
    %34 = arith.addf %28, %33 : vector<288x8xf32>
    %c0_32 = arith.constant 0 : index
    %c36 = arith.constant 36 : index
    %c0_33 = arith.constant 0 : index
    %35 = vector.load %arg1[%c0_32, %c36, %c0_33] : memref<1x328x8xf32, #tpu.memory_space<vmem>>, vector<1x288x8xf32>
    %36 = vector.shape_cast %35 : vector<1x288x8xf32> to vector<288x8xf32>
    %c6 = arith.constant 6 : index
    %c0_34 = arith.constant 0 : index
    %c0_35 = arith.constant 0 : index
    %37 = vector.load %arg2[%c6, %c0_34, %c0_35] : memref<9x8x8xf32, #tpu.memory_space<vmem>>, vector<1x8x8xf32>
    %38 = vector.shape_cast %37 : vector<1x8x8xf32> to vector<8x8xf32>
    %cst_36 = arith.constant dense<0.000000e+00> : vector<288x8xf32>
    %39 = tpu.matmul %36, %38, %cst_36 {dimension_numbers = #tpu.dot_dimension_numbers<[1], [0], [0], [1], [0, 0, 1, 1], [], []>} : vector<288x8xf32>, vector<8x8xf32>, vector<288x8xf32> -> vector<288x8xf32>
    %40 = arith.addf %34, %39 : vector<288x8xf32>
    %c0_37 = arith.constant 0 : index
    %c37 = arith.constant 37 : index
    %c0_38 = arith.constant 0 : index
    %41 = vector.load %arg1[%c0_37, %c37, %c0_38] : memref<1x328x8xf32, #tpu.memory_space<vmem>>, vector<1x288x8xf32>
    %42 = vector.shape_cast %41 : vector<1x288x8xf32> to vector<288x8xf32>
    %c7 = arith.constant 7 : index
    %c0_39 = arith.constant 0 : index
    %c0_40 = arith.constant 0 : index
    %43 = vector.load %arg2[%c7, %c0_39, %c0_40] : memref<9x8x8xf32, #tpu.memory_space<vmem>>, vector<1x8x8xf32>
    %44 = vector.shape_cast %43 : vector<1x8x8xf32> to vector<8x8xf32>
    %cst_41 = arith.constant dense<0.000000e+00> : vector<288x8xf32>
    %45 = tpu.matmul %42, %44, %cst_41 {dimension_numbers = #tpu.dot_dimension_numbers<[1], [0], [0], [1], [0, 0, 1, 1], [], []>} : vector<288x8xf32>, vector<8x8xf32>, vector<288x8xf32> -> vector<288x8xf32>
    %46 = arith.addf %40, %45 : vector<288x8xf32>
    %c0_42 = arith.constant 0 : index
    %c38 = arith.constant 38 : index
    %c0_43 = arith.constant 0 : index
    %47 = vector.load %arg1[%c0_42, %c38, %c0_43] : memref<1x328x8xf32, #tpu.memory_space<vmem>>, vector<1x288x8xf32>
    %48 = vector.shape_cast %47 : vector<1x288x8xf32> to vector<288x8xf32>
    %c8 = arith.constant 8 : index
    %c0_44 = arith.constant 0 : index
    %c0_45 = arith.constant 0 : index
    %49 = vector.load %arg2[%c8, %c0_44, %c0_45] : memref<9x8x8xf32, #tpu.memory_space<vmem>>, vector<1x8x8xf32>
    %50 = vector.shape_cast %49 : vector<1x8x8xf32> to vector<8x8xf32>
    %cst_46 = arith.constant dense<0.000000e+00> : vector<288x8xf32>
    %51 = tpu.matmul %48, %50, %cst_46 {dimension_numbers = #tpu.dot_dimension_numbers<[1], [0], [0], [1], [0, 0, 1, 1], [], []>} : vector<288x8xf32>, vector<8x8xf32>, vector<288x8xf32> -> vector<288x8xf32>
    %52 = arith.addf %46, %51 : vector<288x8xf32>
    %53 = tpu.iota {dimensions = array<i32: 0>} : vector<288x1xi32>
    %c18_i32 = arith.constant 18 : i32
    %c0_i32 = arith.constant 0 : i32
    %54 = arith.cmpi eq, %c18_i32, %c0_i32 : i32
    %c1_i32 = arith.constant 1 : i32
    %55 = arith.select %54, %c1_i32, %c18_i32 : i32
    %56 = vector.broadcast %55 : i32 to vector<288x1xi32>
    %57 = arith.remsi %53, %56 : vector<288x1xi32>
    %c0_i32_47 = arith.constant 0 : i32
    %58 = vector.broadcast %c0_i32_47 : i32 to vector<288x1xi32>
    %59 = arith.cmpi ne, %57, %58 : vector<288x1xi32>
    %c0_i32_48 = arith.constant 0 : i32
    %60 = vector.broadcast %c0_i32_48 : i32 to vector<288x1xi32>
    %61 = arith.cmpi slt, %57, %60 : vector<288x1xi32>
    %c0_i32_49 = arith.constant 0 : i32
    %62 = arith.cmpi slt, %55, %c0_i32_49 : i32
    %63 = vector.broadcast %62 : i1 to vector<288x1xi1>
    %64 = vector.broadcast %63 : vector<288x1xi1> to vector<288x1xi1>
    %65 = arith.xori %61, %64 : vector<288x1xi1>
    %66 = arith.andi %65, %59 : vector<288x1xi1>
    %67 = vector.broadcast %55 : i32 to vector<288x1xi32>
    %68 = arith.addi %57, %67 : vector<288x1xi32>
    %69 = arith.select %66, %68, %57 : vector<288x1xi1>, vector<288x1xi32>
    %c16_i32 = arith.constant 16 : i32
    %70 = vector.broadcast %c16_i32 : i32 to vector<288x1xi32>
    %71 = arith.cmpi slt, %69, %70 : vector<288x1xi32>
    %cst_50 = arith.constant 0.000000e+00 : f32
    %72 = vector.shape_cast %71 : vector<288x1xi1> to vector<288x1xi1>
    %73 = vector.broadcast %72 : vector<288x1xi1> to vector<288x8xi1>
    %74 = vector.broadcast %cst_50 : f32 to vector<288x8xf32>
    %75 = arith.select %73, %52, %74 : vector<288x8xi1>, vector<288x8xf32>
    %cst_51 = arith.constant dense<0.000000e+00> : vector<8xf32>
    %76 = vector.multi_reduction <add>, %75, %cst_51 [0] : vector<288x8xf32> to vector<8xf32>
    %77 = vector.shape_cast %76 : vector<8xf32> to vector<1x8xf32>
    %78 = arith.mulf %75, %75 : vector<288x8xf32>
    %cst_52 = arith.constant dense<0.000000e+00> : vector<8xf32>
    %79 = vector.multi_reduction <add>, %78, %cst_52 [0] : vector<288x8xf32> to vector<8xf32>
    %80 = vector.shape_cast %79 : vector<8xf32> to vector<1x8xf32>
    %81 = vector.shape_cast %77 : vector<1x8xf32> to vector<1x1x8xf32>
    %82 = vector.shape_cast %81 : vector<1x1x8xf32> to vector<1x1x8xf32>
    %83 = vector.broadcast %82 : vector<1x1x8xf32> to vector<1x8x8xf32>
    %c0_53 = arith.constant 0 : index
    %c0_54 = arith.constant 0 : index
    %c0_55 = arith.constant 0 : index
    %84 = vector.load %arg3[%c0_53, %c0_54, %c0_55] : memref<1x8x8xf32, #tpu.memory_space<vmem>>, vector<1x8x8xf32>
    tpu.vector_store %arg3[%c0_53, %c0_54, %c0_55], %83 {strides = array<i32>} : memref<1x8x8xf32, #tpu.memory_space<vmem>>, vector<1x8x8xf32>,
    %85 = vector.shape_cast %80 : vector<1x8xf32> to vector<1x1x8xf32>
    %86 = vector.shape_cast %85 : vector<1x1x8xf32> to vector<1x1x8xf32>
    %87 = vector.broadcast %86 : vector<1x1x8xf32> to vector<1x8x8xf32>
    %c0_56 = arith.constant 0 : index
    %c0_57 = arith.constant 0 : index
    %c0_58 = arith.constant 0 : index
    %88 = vector.load %arg4[%c0_56, %c0_57, %c0_58] : memref<1x8x8xf32, #tpu.memory_space<vmem>>, vector<1x8x8xf32>
    tpu.vector_store %arg4[%c0_56, %c0_57, %c0_58], %87 {strides = array<i32>} : memref<1x8x8xf32, #tpu.memory_space<vmem>>, vector<1x8x8xf32>,
    return
  }
  func.func @transform_0(%arg0: i32) -> (i32, i32, i32) {
    %c0_i32 = arith.constant 0 : i32
    %c0_i32_0 = arith.constant 0 : i32
    %c0_i32_1 = arith.constant 0 : i32
    return %arg0, %c0_i32, %c0_i32_0 : i32, i32, i32
  }
  func.func @transform_1(%arg0: i32) -> (i32, i32, i32) {
    %c0_i32 = arith.constant 0 : i32
    %c0_i32_0 = arith.constant 0 : i32
    %c0_i32_1 = arith.constant 0 : i32
    %c0_i32_2 = arith.constant 0 : i32
    return %c0_i32, %c0_i32_0, %c0_i32_1 : i32, i32, i32
  }
  func.func @transform_2(%arg0: i32) -> (i32, i32, i32) {
    %c0_i32 = arith.constant 0 : i32
    %c0_i32_0 = arith.constant 0 : i32
    %c0_i32_1 = arith.constant 0 : i32
    return %arg0, %c0_i32, %c0_i32_0 : i32, i32, i32
  }
  func.func @transform_3(%arg0: i32) -> (i32, i32, i32) {
    %c0_i32 = arith.constant 0 : i32
    %c0_i32_0 = arith.constant 0 : i32
    %c0_i32_1 = arith.constant 0 : i32
    return %arg0, %c0_i32, %c0_i32_0 : i32, i32, i32
  }
}

module attributes {stable_mosaic.version = 11 : i64} {
  func.func @_stats_kernel(%arg0: i32, %arg1: memref<1x328x8xf32, #tpu.memory_space<vmem>>, %arg2: memref<9x8x16xf32, #tpu.memory_space<vmem>>, %arg3: memref<1x8x16xf32, #tpu.memory_space<vmem>>, %arg4: memref<1x8x16xf32, #tpu.memory_space<vmem>>) attributes {dimension_semantics = [#tpu.dimension_semantics<parallel>], iteration_bounds = array<i64: 2>, scalar_prefetch = 0 : i64, scratch_operands = 0 : i64, tpu.core_type = #tpu.core_type<tc>, window_params = [{transform_indices = @transform_0, window_bounds = array<i64: 1, 328, 8>}, {pipeline_mode = #tpu.pipeline_mode<synchronous>, transform_indices = @transform_1, window_bounds = array<i64: 9, 8, 16>}, {transform_indices = @transform_2, window_bounds = array<i64: 1, 8, 16>}, {transform_indices = @transform_3, window_bounds = array<i64: 1, 8, 16>}]} {
    %c0 = arith.constant 0 : index
    %c0_0 = arith.constant 0 : index
    %c0_1 = arith.constant 0 : index
    %0 = vector.load %arg1[%c0, %c0_0, %c0_1] : memref<1x328x8xf32, #tpu.memory_space<vmem>>, vector<1x288x8xf32>
    %1 = vector.shape_cast %0 : vector<1x288x8xf32> to vector<288x8xf32>
    %c0_2 = arith.constant 0 : index
    %c0_3 = arith.constant 0 : index
    %c0_4 = arith.constant 0 : index
    %2 = vector.load %arg2[%c0_2, %c0_3, %c0_4] : memref<9x8x16xf32, #tpu.memory_space<vmem>>, vector<1x8x16xf32>
    %3 = vector.shape_cast %2 : vector<1x8x16xf32> to vector<8x16xf32>
    %cst = arith.constant dense<0.000000e+00> : vector<288x16xf32>
    %4 = tpu.matmul %1, %3, %cst {dimension_numbers = #tpu.dot_dimension_numbers<[1], [0], [0], [1], [0, 0, 1, 1], [], []>} : vector<288x8xf32>, vector<8x16xf32>, vector<288x16xf32> -> vector<288x16xf32>
    %c0_5 = arith.constant 0 : index
    %c1 = arith.constant 1 : index
    %c0_6 = arith.constant 0 : index
    %5 = vector.load %arg1[%c0_5, %c1, %c0_6] : memref<1x328x8xf32, #tpu.memory_space<vmem>>, vector<1x288x8xf32>
    %6 = vector.shape_cast %5 : vector<1x288x8xf32> to vector<288x8xf32>
    %c1_7 = arith.constant 1 : index
    %c0_8 = arith.constant 0 : index
    %c0_9 = arith.constant 0 : index
    %7 = vector.load %arg2[%c1_7, %c0_8, %c0_9] : memref<9x8x16xf32, #tpu.memory_space<vmem>>, vector<1x8x16xf32>
    %8 = vector.shape_cast %7 : vector<1x8x16xf32> to vector<8x16xf32>
    %cst_10 = arith.constant dense<0.000000e+00> : vector<288x16xf32>
    %9 = tpu.matmul %6, %8, %cst_10 {dimension_numbers = #tpu.dot_dimension_numbers<[1], [0], [0], [1], [0, 0, 1, 1], [], []>} : vector<288x8xf32>, vector<8x16xf32>, vector<288x16xf32> -> vector<288x16xf32>
    %10 = arith.addf %4, %9 : vector<288x16xf32>
    %c0_11 = arith.constant 0 : index
    %c2 = arith.constant 2 : index
    %c0_12 = arith.constant 0 : index
    %11 = vector.load %arg1[%c0_11, %c2, %c0_12] : memref<1x328x8xf32, #tpu.memory_space<vmem>>, vector<1x288x8xf32>
    %12 = vector.shape_cast %11 : vector<1x288x8xf32> to vector<288x8xf32>
    %c2_13 = arith.constant 2 : index
    %c0_14 = arith.constant 0 : index
    %c0_15 = arith.constant 0 : index
    %13 = vector.load %arg2[%c2_13, %c0_14, %c0_15] : memref<9x8x16xf32, #tpu.memory_space<vmem>>, vector<1x8x16xf32>
    %14 = vector.shape_cast %13 : vector<1x8x16xf32> to vector<8x16xf32>
    %cst_16 = arith.constant dense<0.000000e+00> : vector<288x16xf32>
    %15 = tpu.matmul %12, %14, %cst_16 {dimension_numbers = #tpu.dot_dimension_numbers<[1], [0], [0], [1], [0, 0, 1, 1], [], []>} : vector<288x8xf32>, vector<8x16xf32>, vector<288x16xf32> -> vector<288x16xf32>
    %16 = arith.addf %10, %15 : vector<288x16xf32>
    %c0_17 = arith.constant 0 : index
    %c18 = arith.constant 18 : index
    %c0_18 = arith.constant 0 : index
    %17 = vector.load %arg1[%c0_17, %c18, %c0_18] : memref<1x328x8xf32, #tpu.memory_space<vmem>>, vector<1x288x8xf32>
    %18 = vector.shape_cast %17 : vector<1x288x8xf32> to vector<288x8xf32>
    %c3 = arith.constant 3 : index
    %c0_19 = arith.constant 0 : index
    %c0_20 = arith.constant 0 : index
    %19 = vector.load %arg2[%c3, %c0_19, %c0_20] : memref<9x8x16xf32, #tpu.memory_space<vmem>>, vector<1x8x16xf32>
    %20 = vector.shape_cast %19 : vector<1x8x16xf32> to vector<8x16xf32>
    %cst_21 = arith.constant dense<0.000000e+00> : vector<288x16xf32>
    %21 = tpu.matmul %18, %20, %cst_21 {dimension_numbers = #tpu.dot_dimension_numbers<[1], [0], [0], [1], [0, 0, 1, 1], [], []>} : vector<288x8xf32>, vector<8x16xf32>, vector<288x16xf32> -> vector<288x16xf32>
    %22 = arith.addf %16, %21 : vector<288x16xf32>
    %c0_22 = arith.constant 0 : index
    %c19 = arith.constant 19 : index
    %c0_23 = arith.constant 0 : index
    %23 = vector.load %arg1[%c0_22, %c19, %c0_23] : memref<1x328x8xf32, #tpu.memory_space<vmem>>, vector<1x288x8xf32>
    %24 = vector.shape_cast %23 : vector<1x288x8xf32> to vector<288x8xf32>
    %c4 = arith.constant 4 : index
    %c0_24 = arith.constant 0 : index
    %c0_25 = arith.constant 0 : index
    %25 = vector.load %arg2[%c4, %c0_24, %c0_25] : memref<9x8x16xf32, #tpu.memory_space<vmem>>, vector<1x8x16xf32>
    %26 = vector.shape_cast %25 : vector<1x8x16xf32> to vector<8x16xf32>
    %cst_26 = arith.constant dense<0.000000e+00> : vector<288x16xf32>
    %27 = tpu.matmul %24, %26, %cst_26 {dimension_numbers = #tpu.dot_dimension_numbers<[1], [0], [0], [1], [0, 0, 1, 1], [], []>} : vector<288x8xf32>, vector<8x16xf32>, vector<288x16xf32> -> vector<288x16xf32>
    %28 = arith.addf %22, %27 : vector<288x16xf32>
    %c0_27 = arith.constant 0 : index
    %c20 = arith.constant 20 : index
    %c0_28 = arith.constant 0 : index
    %29 = vector.load %arg1[%c0_27, %c20, %c0_28] : memref<1x328x8xf32, #tpu.memory_space<vmem>>, vector<1x288x8xf32>
    %30 = vector.shape_cast %29 : vector<1x288x8xf32> to vector<288x8xf32>
    %c5 = arith.constant 5 : index
    %c0_29 = arith.constant 0 : index
    %c0_30 = arith.constant 0 : index
    %31 = vector.load %arg2[%c5, %c0_29, %c0_30] : memref<9x8x16xf32, #tpu.memory_space<vmem>>, vector<1x8x16xf32>
    %32 = vector.shape_cast %31 : vector<1x8x16xf32> to vector<8x16xf32>
    %cst_31 = arith.constant dense<0.000000e+00> : vector<288x16xf32>
    %33 = tpu.matmul %30, %32, %cst_31 {dimension_numbers = #tpu.dot_dimension_numbers<[1], [0], [0], [1], [0, 0, 1, 1], [], []>} : vector<288x8xf32>, vector<8x16xf32>, vector<288x16xf32> -> vector<288x16xf32>
    %34 = arith.addf %28, %33 : vector<288x16xf32>
    %c0_32 = arith.constant 0 : index
    %c36 = arith.constant 36 : index
    %c0_33 = arith.constant 0 : index
    %35 = vector.load %arg1[%c0_32, %c36, %c0_33] : memref<1x328x8xf32, #tpu.memory_space<vmem>>, vector<1x288x8xf32>
    %36 = vector.shape_cast %35 : vector<1x288x8xf32> to vector<288x8xf32>
    %c6 = arith.constant 6 : index
    %c0_34 = arith.constant 0 : index
    %c0_35 = arith.constant 0 : index
    %37 = vector.load %arg2[%c6, %c0_34, %c0_35] : memref<9x8x16xf32, #tpu.memory_space<vmem>>, vector<1x8x16xf32>
    %38 = vector.shape_cast %37 : vector<1x8x16xf32> to vector<8x16xf32>
    %cst_36 = arith.constant dense<0.000000e+00> : vector<288x16xf32>
    %39 = tpu.matmul %36, %38, %cst_36 {dimension_numbers = #tpu.dot_dimension_numbers<[1], [0], [0], [1], [0, 0, 1, 1], [], []>} : vector<288x8xf32>, vector<8x16xf32>, vector<288x16xf32> -> vector<288x16xf32>
    %40 = arith.addf %34, %39 : vector<288x16xf32>
    %c0_37 = arith.constant 0 : index
    %c37 = arith.constant 37 : index
    %c0_38 = arith.constant 0 : index
    %41 = vector.load %arg1[%c0_37, %c37, %c0_38] : memref<1x328x8xf32, #tpu.memory_space<vmem>>, vector<1x288x8xf32>
    %42 = vector.shape_cast %41 : vector<1x288x8xf32> to vector<288x8xf32>
    %c7 = arith.constant 7 : index
    %c0_39 = arith.constant 0 : index
    %c0_40 = arith.constant 0 : index
    %43 = vector.load %arg2[%c7, %c0_39, %c0_40] : memref<9x8x16xf32, #tpu.memory_space<vmem>>, vector<1x8x16xf32>
    %44 = vector.shape_cast %43 : vector<1x8x16xf32> to vector<8x16xf32>
    %cst_41 = arith.constant dense<0.000000e+00> : vector<288x16xf32>
    %45 = tpu.matmul %42, %44, %cst_41 {dimension_numbers = #tpu.dot_dimension_numbers<[1], [0], [0], [1], [0, 0, 1, 1], [], []>} : vector<288x8xf32>, vector<8x16xf32>, vector<288x16xf32> -> vector<288x16xf32>
    %46 = arith.addf %40, %45 : vector<288x16xf32>
    %c0_42 = arith.constant 0 : index
    %c38 = arith.constant 38 : index
    %c0_43 = arith.constant 0 : index
    %47 = vector.load %arg1[%c0_42, %c38, %c0_43] : memref<1x328x8xf32, #tpu.memory_space<vmem>>, vector<1x288x8xf32>
    %48 = vector.shape_cast %47 : vector<1x288x8xf32> to vector<288x8xf32>
    %c8 = arith.constant 8 : index
    %c0_44 = arith.constant 0 : index
    %c0_45 = arith.constant 0 : index
    %49 = vector.load %arg2[%c8, %c0_44, %c0_45] : memref<9x8x16xf32, #tpu.memory_space<vmem>>, vector<1x8x16xf32>
    %50 = vector.shape_cast %49 : vector<1x8x16xf32> to vector<8x16xf32>
    %cst_46 = arith.constant dense<0.000000e+00> : vector<288x16xf32>
    %51 = tpu.matmul %48, %50, %cst_46 {dimension_numbers = #tpu.dot_dimension_numbers<[1], [0], [0], [1], [0, 0, 1, 1], [], []>} : vector<288x8xf32>, vector<8x16xf32>, vector<288x16xf32> -> vector<288x16xf32>
    %52 = arith.addf %46, %51 : vector<288x16xf32>
    %53 = tpu.iota {dimensions = array<i32: 0>} : vector<288x1xi32>
    %c18_i32 = arith.constant 18 : i32
    %c0_i32 = arith.constant 0 : i32
    %54 = arith.cmpi eq, %c18_i32, %c0_i32 : i32
    %c1_i32 = arith.constant 1 : i32
    %55 = arith.select %54, %c1_i32, %c18_i32 : i32
    %56 = vector.broadcast %55 : i32 to vector<288x1xi32>
    %57 = arith.remsi %53, %56 : vector<288x1xi32>
    %c0_i32_47 = arith.constant 0 : i32
    %58 = vector.broadcast %c0_i32_47 : i32 to vector<288x1xi32>
    %59 = arith.cmpi ne, %57, %58 : vector<288x1xi32>
    %c0_i32_48 = arith.constant 0 : i32
    %60 = vector.broadcast %c0_i32_48 : i32 to vector<288x1xi32>
    %61 = arith.cmpi slt, %57, %60 : vector<288x1xi32>
    %c0_i32_49 = arith.constant 0 : i32
    %62 = arith.cmpi slt, %55, %c0_i32_49 : i32
    %63 = vector.broadcast %62 : i1 to vector<288x1xi1>
    %64 = vector.broadcast %63 : vector<288x1xi1> to vector<288x1xi1>
    %65 = arith.xori %61, %64 : vector<288x1xi1>
    %66 = arith.andi %65, %59 : vector<288x1xi1>
    %67 = vector.broadcast %55 : i32 to vector<288x1xi32>
    %68 = arith.addi %57, %67 : vector<288x1xi32>
    %69 = arith.select %66, %68, %57 : vector<288x1xi1>, vector<288x1xi32>
    %c16_i32 = arith.constant 16 : i32
    %70 = vector.broadcast %c16_i32 : i32 to vector<288x1xi32>
    %71 = arith.cmpi slt, %69, %70 : vector<288x1xi32>
    %cst_50 = arith.constant 0.000000e+00 : f32
    %72 = vector.shape_cast %71 : vector<288x1xi1> to vector<288x1xi1>
    %73 = vector.broadcast %72 : vector<288x1xi1> to vector<288x16xi1>
    %74 = vector.broadcast %cst_50 : f32 to vector<288x16xf32>
    %75 = arith.select %73, %52, %74 : vector<288x16xi1>, vector<288x16xf32>
    %cst_51 = arith.constant dense<0.000000e+00> : vector<16xf32>
    %76 = vector.multi_reduction <add>, %75, %cst_51 [0] : vector<288x16xf32> to vector<16xf32>
    %77 = vector.shape_cast %76 : vector<16xf32> to vector<1x16xf32>
    %78 = arith.mulf %75, %75 : vector<288x16xf32>
    %cst_52 = arith.constant dense<0.000000e+00> : vector<16xf32>
    %79 = vector.multi_reduction <add>, %78, %cst_52 [0] : vector<288x16xf32> to vector<16xf32>
    %80 = vector.shape_cast %79 : vector<16xf32> to vector<1x16xf32>
    %81 = vector.shape_cast %77 : vector<1x16xf32> to vector<1x1x16xf32>
    %82 = vector.shape_cast %81 : vector<1x1x16xf32> to vector<1x1x16xf32>
    %83 = vector.broadcast %82 : vector<1x1x16xf32> to vector<1x8x16xf32>
    %c0_53 = arith.constant 0 : index
    %c0_54 = arith.constant 0 : index
    %c0_55 = arith.constant 0 : index
    %84 = vector.load %arg3[%c0_53, %c0_54, %c0_55] : memref<1x8x16xf32, #tpu.memory_space<vmem>>, vector<1x8x16xf32>
    tpu.vector_store %arg3[%c0_53, %c0_54, %c0_55], %83 {strides = array<i32>} : memref<1x8x16xf32, #tpu.memory_space<vmem>>, vector<1x8x16xf32>,
    %85 = vector.shape_cast %80 : vector<1x16xf32> to vector<1x1x16xf32>
    %86 = vector.shape_cast %85 : vector<1x1x16xf32> to vector<1x1x16xf32>
    %87 = vector.broadcast %86 : vector<1x1x16xf32> to vector<1x8x16xf32>
    %c0_56 = arith.constant 0 : index
    %c0_57 = arith.constant 0 : index
    %c0_58 = arith.constant 0 : index
    %88 = vector.load %arg4[%c0_56, %c0_57, %c0_58] : memref<1x8x16xf32, #tpu.memory_space<vmem>>, vector<1x8x16xf32>
    tpu.vector_store %arg4[%c0_56, %c0_57, %c0_58], %87 {strides = array<i32>} : memref<1x8x16xf32, #tpu.memory_space<vmem>>, vector<1x8x16xf32>,
    return
  }
  func.func @transform_0(%arg0: i32) -> (i32, i32, i32) {
    %c0_i32 = arith.constant 0 : i32
    %c0_i32_0 = arith.constant 0 : i32
    %c0_i32_1 = arith.constant 0 : i32
    return %arg0, %c0_i32, %c0_i32_0 : i32, i32, i32
  }
  func.func @transform_1(%arg0: i32) -> (i32, i32, i32) {
    %c0_i32 = arith.constant 0 : i32
    %c0_i32_0 = arith.constant 0 : i32
    %c0_i32_1 = arith.constant 0 : i32
    %c0_i32_2 = arith.constant 0 : i32
    return %c0_i32, %c0_i32_0, %c0_i32_1 : i32, i32, i32
  }
  func.func @transform_2(%arg0: i32) -> (i32, i32, i32) {
    %c0_i32 = arith.constant 0 : i32
    %c0_i32_0 = arith.constant 0 : i32
    %c0_i32_1 = arith.constant 0 : i32
    return %arg0, %c0_i32, %c0_i32_0 : i32, i32, i32
  }
  func.func @transform_3(%arg0: i32) -> (i32, i32, i32) {
    %c0_i32 = arith.constant 0 : i32
    %c0_i32_0 = arith.constant 0 : i32
    %c0_i32_1 = arith.constant 0 : i32
    return %arg0, %c0_i32, %c0_i32_0 : i32, i32, i32
  }
}

module attributes {stable_mosaic.version = 11 : i64} {
  func.func @_conv_bn_relu_kernel(%arg0: i32, %arg1: memref<1x328x8xf32, #tpu.memory_space<vmem>>, %arg2: memref<9x8x16xf32, #tpu.memory_space<vmem>>, %arg3: memref<1x16xf32, #tpu.memory_space<vmem>>, %arg4: memref<1x16xf32, #tpu.memory_space<vmem>>, %arg5: memref<1x288x16xf32, #tpu.memory_space<vmem>>) attributes {dimension_semantics = [#tpu.dimension_semantics<parallel>], iteration_bounds = array<i64: 2>, scalar_prefetch = 0 : i64, scratch_operands = 0 : i64, tpu.core_type = #tpu.core_type<tc>, window_params = [{transform_indices = @transform_0, window_bounds = array<i64: 1, 328, 8>}, {pipeline_mode = #tpu.pipeline_mode<synchronous>, transform_indices = @transform_1, window_bounds = array<i64: 9, 8, 16>}, {pipeline_mode = #tpu.pipeline_mode<synchronous>, transform_indices = @transform_2, window_bounds = array<i64: 1, 16>}, {pipeline_mode = #tpu.pipeline_mode<synchronous>, transform_indices = @transform_3, window_bounds = array<i64: 1, 16>}, {transform_indices = @transform_4, window_bounds = array<i64: 1, 288, 16>}]} {
    %c0 = arith.constant 0 : index
    %c0_0 = arith.constant 0 : index
    %c0_1 = arith.constant 0 : index
    %0 = vector.load %arg1[%c0, %c0_0, %c0_1] : memref<1x328x8xf32, #tpu.memory_space<vmem>>, vector<1x288x8xf32>
    %1 = vector.shape_cast %0 : vector<1x288x8xf32> to vector<288x8xf32>
    %c0_2 = arith.constant 0 : index
    %c0_3 = arith.constant 0 : index
    %c0_4 = arith.constant 0 : index
    %2 = vector.load %arg2[%c0_2, %c0_3, %c0_4] : memref<9x8x16xf32, #tpu.memory_space<vmem>>, vector<1x8x16xf32>
    %3 = vector.shape_cast %2 : vector<1x8x16xf32> to vector<8x16xf32>
    %cst = arith.constant dense<0.000000e+00> : vector<288x16xf32>
    %4 = tpu.matmul %1, %3, %cst {dimension_numbers = #tpu.dot_dimension_numbers<[1], [0], [0], [1], [0, 0, 1, 1], [], []>} : vector<288x8xf32>, vector<8x16xf32>, vector<288x16xf32> -> vector<288x16xf32>
    %c0_5 = arith.constant 0 : index
    %c1 = arith.constant 1 : index
    %c0_6 = arith.constant 0 : index
    %5 = vector.load %arg1[%c0_5, %c1, %c0_6] : memref<1x328x8xf32, #tpu.memory_space<vmem>>, vector<1x288x8xf32>
    %6 = vector.shape_cast %5 : vector<1x288x8xf32> to vector<288x8xf32>
    %c1_7 = arith.constant 1 : index
    %c0_8 = arith.constant 0 : index
    %c0_9 = arith.constant 0 : index
    %7 = vector.load %arg2[%c1_7, %c0_8, %c0_9] : memref<9x8x16xf32, #tpu.memory_space<vmem>>, vector<1x8x16xf32>
    %8 = vector.shape_cast %7 : vector<1x8x16xf32> to vector<8x16xf32>
    %cst_10 = arith.constant dense<0.000000e+00> : vector<288x16xf32>
    %9 = tpu.matmul %6, %8, %cst_10 {dimension_numbers = #tpu.dot_dimension_numbers<[1], [0], [0], [1], [0, 0, 1, 1], [], []>} : vector<288x8xf32>, vector<8x16xf32>, vector<288x16xf32> -> vector<288x16xf32>
    %10 = arith.addf %4, %9 : vector<288x16xf32>
    %c0_11 = arith.constant 0 : index
    %c2 = arith.constant 2 : index
    %c0_12 = arith.constant 0 : index
    %11 = vector.load %arg1[%c0_11, %c2, %c0_12] : memref<1x328x8xf32, #tpu.memory_space<vmem>>, vector<1x288x8xf32>
    %12 = vector.shape_cast %11 : vector<1x288x8xf32> to vector<288x8xf32>
    %c2_13 = arith.constant 2 : index
    %c0_14 = arith.constant 0 : index
    %c0_15 = arith.constant 0 : index
    %13 = vector.load %arg2[%c2_13, %c0_14, %c0_15] : memref<9x8x16xf32, #tpu.memory_space<vmem>>, vector<1x8x16xf32>
    %14 = vector.shape_cast %13 : vector<1x8x16xf32> to vector<8x16xf32>
    %cst_16 = arith.constant dense<0.000000e+00> : vector<288x16xf32>
    %15 = tpu.matmul %12, %14, %cst_16 {dimension_numbers = #tpu.dot_dimension_numbers<[1], [0], [0], [1], [0, 0, 1, 1], [], []>} : vector<288x8xf32>, vector<8x16xf32>, vector<288x16xf32> -> vector<288x16xf32>
    %16 = arith.addf %10, %15 : vector<288x16xf32>
    %c0_17 = arith.constant 0 : index
    %c18 = arith.constant 18 : index
    %c0_18 = arith.constant 0 : index
    %17 = vector.load %arg1[%c0_17, %c18, %c0_18] : memref<1x328x8xf32, #tpu.memory_space<vmem>>, vector<1x288x8xf32>
    %18 = vector.shape_cast %17 : vector<1x288x8xf32> to vector<288x8xf32>
    %c3 = arith.constant 3 : index
    %c0_19 = arith.constant 0 : index
    %c0_20 = arith.constant 0 : index
    %19 = vector.load %arg2[%c3, %c0_19, %c0_20] : memref<9x8x16xf32, #tpu.memory_space<vmem>>, vector<1x8x16xf32>
    %20 = vector.shape_cast %19 : vector<1x8x16xf32> to vector<8x16xf32>
    %cst_21 = arith.constant dense<0.000000e+00> : vector<288x16xf32>
    %21 = tpu.matmul %18, %20, %cst_21 {dimension_numbers = #tpu.dot_dimension_numbers<[1], [0], [0], [1], [0, 0, 1, 1], [], []>} : vector<288x8xf32>, vector<8x16xf32>, vector<288x16xf32> -> vector<288x16xf32>
    %22 = arith.addf %16, %21 : vector<288x16xf32>
    %c0_22 = arith.constant 0 : index
    %c19 = arith.constant 19 : index
    %c0_23 = arith.constant 0 : index
    %23 = vector.load %arg1[%c0_22, %c19, %c0_23] : memref<1x328x8xf32, #tpu.memory_space<vmem>>, vector<1x288x8xf32>
    %24 = vector.shape_cast %23 : vector<1x288x8xf32> to vector<288x8xf32>
    %c4 = arith.constant 4 : index
    %c0_24 = arith.constant 0 : index
    %c0_25 = arith.constant 0 : index
    %25 = vector.load %arg2[%c4, %c0_24, %c0_25] : memref<9x8x16xf32, #tpu.memory_space<vmem>>, vector<1x8x16xf32>
    %26 = vector.shape_cast %25 : vector<1x8x16xf32> to vector<8x16xf32>
    %cst_26 = arith.constant dense<0.000000e+00> : vector<288x16xf32>
    %27 = tpu.matmul %24, %26, %cst_26 {dimension_numbers = #tpu.dot_dimension_numbers<[1], [0], [0], [1], [0, 0, 1, 1], [], []>} : vector<288x8xf32>, vector<8x16xf32>, vector<288x16xf32> -> vector<288x16xf32>
    %28 = arith.addf %22, %27 : vector<288x16xf32>
    %c0_27 = arith.constant 0 : index
    %c20 = arith.constant 20 : index
    %c0_28 = arith.constant 0 : index
    %29 = vector.load %arg1[%c0_27, %c20, %c0_28] : memref<1x328x8xf32, #tpu.memory_space<vmem>>, vector<1x288x8xf32>
    %30 = vector.shape_cast %29 : vector<1x288x8xf32> to vector<288x8xf32>
    %c5 = arith.constant 5 : index
    %c0_29 = arith.constant 0 : index
    %c0_30 = arith.constant 0 : index
    %31 = vector.load %arg2[%c5, %c0_29, %c0_30] : memref<9x8x16xf32, #tpu.memory_space<vmem>>, vector<1x8x16xf32>
    %32 = vector.shape_cast %31 : vector<1x8x16xf32> to vector<8x16xf32>
    %cst_31 = arith.constant dense<0.000000e+00> : vector<288x16xf32>
    %33 = tpu.matmul %30, %32, %cst_31 {dimension_numbers = #tpu.dot_dimension_numbers<[1], [0], [0], [1], [0, 0, 1, 1], [], []>} : vector<288x8xf32>, vector<8x16xf32>, vector<288x16xf32> -> vector<288x16xf32>
    %34 = arith.addf %28, %33 : vector<288x16xf32>
    %c0_32 = arith.constant 0 : index
    %c36 = arith.constant 36 : index
    %c0_33 = arith.constant 0 : index
    %35 = vector.load %arg1[%c0_32, %c36, %c0_33] : memref<1x328x8xf32, #tpu.memory_space<vmem>>, vector<1x288x8xf32>
    %36 = vector.shape_cast %35 : vector<1x288x8xf32> to vector<288x8xf32>
    %c6 = arith.constant 6 : index
    %c0_34 = arith.constant 0 : index
    %c0_35 = arith.constant 0 : index
    %37 = vector.load %arg2[%c6, %c0_34, %c0_35] : memref<9x8x16xf32, #tpu.memory_space<vmem>>, vector<1x8x16xf32>
    %38 = vector.shape_cast %37 : vector<1x8x16xf32> to vector<8x16xf32>
    %cst_36 = arith.constant dense<0.000000e+00> : vector<288x16xf32>
    %39 = tpu.matmul %36, %38, %cst_36 {dimension_numbers = #tpu.dot_dimension_numbers<[1], [0], [0], [1], [0, 0, 1, 1], [], []>} : vector<288x8xf32>, vector<8x16xf32>, vector<288x16xf32> -> vector<288x16xf32>
    %40 = arith.addf %34, %39 : vector<288x16xf32>
    %c0_37 = arith.constant 0 : index
    %c37 = arith.constant 37 : index
    %c0_38 = arith.constant 0 : index
    %41 = vector.load %arg1[%c0_37, %c37, %c0_38] : memref<1x328x8xf32, #tpu.memory_space<vmem>>, vector<1x288x8xf32>
    %42 = vector.shape_cast %41 : vector<1x288x8xf32> to vector<288x8xf32>
    %c7 = arith.constant 7 : index
    %c0_39 = arith.constant 0 : index
    %c0_40 = arith.constant 0 : index
    %43 = vector.load %arg2[%c7, %c0_39, %c0_40] : memref<9x8x16xf32, #tpu.memory_space<vmem>>, vector<1x8x16xf32>
    %44 = vector.shape_cast %43 : vector<1x8x16xf32> to vector<8x16xf32>
    %cst_41 = arith.constant dense<0.000000e+00> : vector<288x16xf32>
    %45 = tpu.matmul %42, %44, %cst_41 {dimension_numbers = #tpu.dot_dimension_numbers<[1], [0], [0], [1], [0, 0, 1, 1], [], []>} : vector<288x8xf32>, vector<8x16xf32>, vector<288x16xf32> -> vector<288x16xf32>
    %46 = arith.addf %40, %45 : vector<288x16xf32>
    %c0_42 = arith.constant 0 : index
    %c38 = arith.constant 38 : index
    %c0_43 = arith.constant 0 : index
    %47 = vector.load %arg1[%c0_42, %c38, %c0_43] : memref<1x328x8xf32, #tpu.memory_space<vmem>>, vector<1x288x8xf32>
    %48 = vector.shape_cast %47 : vector<1x288x8xf32> to vector<288x8xf32>
    %c8 = arith.constant 8 : index
    %c0_44 = arith.constant 0 : index
    %c0_45 = arith.constant 0 : index
    %49 = vector.load %arg2[%c8, %c0_44, %c0_45] : memref<9x8x16xf32, #tpu.memory_space<vmem>>, vector<1x8x16xf32>
    %50 = vector.shape_cast %49 : vector<1x8x16xf32> to vector<8x16xf32>
    %cst_46 = arith.constant dense<0.000000e+00> : vector<288x16xf32>
    %51 = tpu.matmul %48, %50, %cst_46 {dimension_numbers = #tpu.dot_dimension_numbers<[1], [0], [0], [1], [0, 0, 1, 1], [], []>} : vector<288x8xf32>, vector<8x16xf32>, vector<288x16xf32> -> vector<288x16xf32>
    %52 = arith.addf %46, %51 : vector<288x16xf32>
    %c0_47 = arith.constant 0 : index
    %c0_48 = arith.constant 0 : index
    %53 = vector.load %arg3[%c0_47, %c0_48] : memref<1x16xf32, #tpu.memory_space<vmem>>, vector<1x16xf32>
    %54 = vector.broadcast %53 : vector<1x16xf32> to vector<288x16xf32>
    %55 = arith.mulf %52, %54 : vector<288x16xf32>
    %c0_49 = arith.constant 0 : index
    %c0_50 = arith.constant 0 : index
    %56 = vector.load %arg4[%c0_49, %c0_50] : memref<1x16xf32, #tpu.memory_space<vmem>>, vector<1x16xf32>
    %57 = vector.broadcast %56 : vector<1x16xf32> to vector<288x16xf32>
    %58 = arith.addf %55, %57 : vector<288x16xf32>
    %cst_51 = arith.constant 0.000000e+00 : f32
    %59 = vector.broadcast %cst_51 : f32 to vector<288x16xf32>
    %60 = arith.maximumf %58, %59 : vector<288x16xf32>
    %c0_52 = arith.constant 0 : index
    %c0_53 = arith.constant 0 : index
    %c0_54 = arith.constant 0 : index
    %61 = vector.load %arg5[%c0_52, %c0_53, %c0_54] : memref<1x288x16xf32, #tpu.memory_space<vmem>>, vector<1x288x16xf32>
    %62 = vector.shape_cast %61 : vector<1x288x16xf32> to vector<288x16xf32>
    %63 = vector.shape_cast %60 : vector<288x16xf32> to vector<1x288x16xf32>
    tpu.vector_store %arg5[%c0_52, %c0_53, %c0_54], %63 {strides = array<i32>} : memref<1x288x16xf32, #tpu.memory_space<vmem>>, vector<1x288x16xf32>,
    return
  }
  func.func @transform_0(%arg0: i32) -> (i32, i32, i32) {
    %c0_i32 = arith.constant 0 : i32
    %c0_i32_0 = arith.constant 0 : i32
    %c0_i32_1 = arith.constant 0 : i32
    return %arg0, %c0_i32, %c0_i32_0 : i32, i32, i32
  }
  func.func @transform_1(%arg0: i32) -> (i32, i32, i32) {
    %c0_i32 = arith.constant 0 : i32
    %c0_i32_0 = arith.constant 0 : i32
    %c0_i32_1 = arith.constant 0 : i32
    %c0_i32_2 = arith.constant 0 : i32
    return %c0_i32, %c0_i32_0, %c0_i32_1 : i32, i32, i32
  }
  func.func @transform_2(%arg0: i32) -> (i32, i32) {
    %c0_i32 = arith.constant 0 : i32
    %c0_i32_0 = arith.constant 0 : i32
    %c0_i32_1 = arith.constant 0 : i32
    return %c0_i32, %c0_i32_0 : i32, i32
  }
  func.func @transform_3(%arg0: i32) -> (i32, i32) {
    %c0_i32 = arith.constant 0 : i32
    %c0_i32_0 = arith.constant 0 : i32
    %c0_i32_1 = arith.constant 0 : i32
    return %c0_i32, %c0_i32_0 : i32, i32
  }
  func.func @transform_4(%arg0: i32) -> (i32, i32, i32) {
    %c0_i32 = arith.constant 0 : i32
    %c0_i32_0 = arith.constant 0 : i32
    %c0_i32_1 = arith.constant 0 : i32
    return %arg0, %c0_i32, %c0_i32_0 : i32, i32, i32
  }
}

</mosaic_0001>

<bundles_post_ra>
// kernel: encoder_forward.5
= control target key start
LH: loop header
LB: loop body
LE: loop exit
PB: predicated region body
PF: predicated region fallthrough
CT: control target
= control target key end

     0   :  { %s5695_s15 = smov 0   ;;  %s6803_s0 = inlined_call_operand.vmem [shape: f32[2,328,8], index: 0, kind: input, shape index: {}]   ;;  %s6804_s1 = inlined_call_operand.vmem [shape: f32[9,8,8], index: 1, kind: input, shape index: {}]   ;;  %s6805_s2 = inlined_call_operand.vmem [shape: f32[1,8], index: 2, kind: input, shape index: {}]   ;;  %s6806_s3 = inlined_call_operand.vmem [shape: f32[1,8], index: 3, kind: input, shape index: {}]   ;;  %s6807_s4 = inlined_call_operand.vmem [shape: f32[2,288,8], index: 4, kind: output, shape index: {}]  }
   0x1 LB: > { %s4182_s16 = sadd.s32 4294967295, %s5668_s15   ;;  %p4186_p0 = scmp.ge.s32.totalorder %s5668_s15, 1  ;;  %s5668_s15 = sphi %s5695_s15, %s14_s15  }
   0x2   : > { %p162_p1 = scmp.lt.s32.totalorder %s5668_s15, 3 }
   0x4   : > { %p163_p2 = pnand %p4186_p0, %p162_p1 }
   0x5   : > { %v4189_v0 = vld [vmem:[%s6804_s1 + $0x8] sm:$0xff] (!%p163_p2)  ;;  %v5709_v1 = vld [vmem:[%s6804_s1 + $0x20] sm:$0xff] (!%p163_p2)  ;;  %p188_p3 = scmp.lt.s32.totalorder (!%p163_p2), %s4182_s16, 1  ;;  %vm273_vm0 = vcmask (!%p163_p2), 64512   ;;  %v5740_v10 = vld [vmem:[%s6804_s1 + $0x30] sm:$0xff] (!%p163_p2) }
   0x6   : > { %166 = sbr.rel (%p163_p2) target bundleno = 561 (0x231), region = 36  ;;  %v234_v2 = vld [vmem:[%s6804_s1] sm:$0xff] (!%p163_p2)  ;;  %4858 = vmatprep.subr.mxu1 (!%p163_p2), %v4189_v0  ;;  %5082 = vmatprep.subr.mxu0 (!%p163_p2), %v5709_v1  ;;  %v4373_v3 = vld [vmem:[%s6804_s1 + $0x28] sm:$0xff] (!%p163_p2)  ;;  %v5745_v11 = vld [vmem:[%s6804_s1 + $0x10] sm:$0xff] (!%p163_p2) }
   0x7   : > { %4859 = vmatpush3.msra.mxu1 (!%p163_p2), %v4189_v0  ;;  %5083 = vmatpush3.msra.mxu0 (!%p163_p2), %v5709_v1  ;;  %v5824_v48 = vld [vmem:[%s6804_s1 + $0x38] sm:$0xff] (!%p163_p2) }
   0x8   : > { %4914 = vmatprep.subr.mxu1 (!%p163_p2), %v234_v2  ;;  %5138 = vmatprep.subr.mxu0 (!%p163_p2), %v4373_v3 }
   0xd   : > { %s6809_s16 = smov (!%p188_p3, %s4182_s16), 1 }
   0xe   : > { %s5652_s25 = smul.u32 328, %s6809_s16 }
   0xf   : > { %s5653_s17 = smul.u32 288, %s6809_s16 }
  0x10   : > { %s5725_s28 = scalar_lea.vmem %s6803_s0, %s5652_s25 }
  0x11   : > { %v235_v4 = vld [vmem:[%s5725_s28 + $0x1] sm:$0xff]  ;;  %v1834_v5 = vld [vmem:[%s5725_s28 + $0x13] sm:$0xff]  ;;  %v236_v6 = vld [vmem:[%s5725_s28 + $0x9] sm:$0xff]  ;;  %s6649_s22 = scalar_lea.vmem %s6807_s4, %s5653_s17 }
  0x12   : > { %4860 = vmatprep.mubr.msk.f32.mxu1 %vm273_vm0, %v235_v4  ;;  %5084 = vmatprep.mubr.msk.f32.mxu0 %vm273_vm0, %v1834_v5  ;;  %v1835_v7 = vld [vmem:[%s5725_s28 + $0x1b] sm:$0xff]  ;;  %v237_v8 = vld [vmem:[%s5725_s28 + $0x11] sm:$0xff]  ;;  %v1836_v9 = vld [vmem:[%s5725_s28 + $0x23] sm:$0xff] }
  0x13   : > { %4861 = vmatmul.mubr.msk.f32.vlgmr.msra.gmra.mrb[0].mxu1 %vm273_vm0, %v236_v6  ;;  %5085 = vmatmul.mubr.msk.f32.vlgmr.msra.gmra.mrb[0].mxu0 %vm273_vm0, %v1835_v7  ;;  %v238_v12 = vld [vmem:[%s5725_s28 + $0x19] sm:$0xff]  ;;  %v1837_v13 = vld [vmem:[%s5725_s28 + $0x2b] sm:$0xff]  ;;  %v239_v14 = vld [vmem:[%s5725_s28 + $0x21] sm:$0xff] }
  0x14   : > { %4915 = vmatpush3.msra.mxu1 %v234_v2  ;;  %5139 = vmatpush3.msra.mxu0 %v4373_v3  ;;  %v1838_v15 = vld [vmem:[%s5725_s28 + $0x33] sm:$0xff]  ;;  %v240_v16 = vld [vmem:[%s5725_s28 + $0x29] sm:$0xff]  ;;  %v1839_v17 = vld [vmem:[%s5725_s28 + $0x3b] sm:$0xff] }
  0x15   : > { %4863 = vmatprep.mubr.msk.f32.mxu1 %vm273_vm0, %v237_v8  ;;  %5087 = vmatprep.mubr.msk.f32.mxu0 %vm273_vm0, %v1836_v9  ;;  %v241_v18 = vld [vmem:[%s5725_s28 + $0x31] sm:$0xff]  ;;  %v1840_v19 = vld [vmem:[%s5725_s28 + $0x43] sm:$0xff]  ;;  %v242_v20 = vld [vmem:[%s5725_s28 + $0x39] sm:$0xff] }
  0x16   : > { %5194 = vmatprep.subr.mxu0 %v5740_v10  ;;  %4970 = vmatprep.subr.mxu1 %v5745_v11  ;;  %v1841_v21 = vld [vmem:[%s5725_s28 + $0x4b] sm:$0xff]  ;;  %v243_v22 = vld [vmem:[%s5725_s28 + $0x41] sm:$0xff]  ;;  %v1842_v23 = vld [vmem:[%s5725_s28 + $0x53] sm:$0xff] }
  0x17   : > { %4864 = vmatmul.mubr.msk.f32.gmra.mrb[2].mxu1 %vm273_vm0, %v238_v12  ;;  %5088 = vmatmul.mubr.msk.f32.gmra.mrb[2].mxu0 %vm273_vm0, %v1837_v13  ;;  %v244_v24 = vld [vmem:[%s5725_s28 + $0x49] sm:$0xff]  ;;  %v1843_v25 = vld [vmem:[%s5725_s28 + $0x5b] sm:$0xff]  ;;  %v245_v26 = vld [vmem:[%s5725_s28 + $0x51] sm:$0xff] }
  0x18   : > { %4866 = vmatprep.mubr.msk.f32.mxu1 %vm273_vm0, %v239_v14  ;;  %5090 = vmatprep.mubr.msk.f32.mxu0 %vm273_vm0, %v1838_v15  ;;  %v1844_v27 = vld [vmem:[%s5725_s28 + $0x63] sm:$0xff]  ;;  %v246_v28 = vld [vmem:[%s5725_s28 + $0x59] sm:$0xff]  ;;  %v1845_v29 = vld [vmem:[%s5725_s28 + $0x6b] sm:$0xff] }
  0x19   : > { %v247_v30 = vld [vmem:[%s5725_s28 + $0x61] sm:$0xff]  ;;  %v1846_v31 = vld [vmem:[%s5725_s28 + $0x73] sm:$0xff]  ;;  %v248_v32 = vld [vmem:[%s5725_s28 + $0x69] sm:$0xff] }
  0x1a   : > { %v1847_v33 = vld [vmem:[%s5725_s28 + $0x7b] sm:$0xff]  ;;  %v249_v34 = vld [vmem:[%s5725_s28 + $0x71] sm:$0xff]  ;;  %v1848_v35 = vld [vmem:[%s5725_s28 + $0x83] sm:$0xff] }
  0x1b   : > { %4867 = vmatmul.mubr.msk.f32.gmra.mrb[4].mxu1 %vm273_vm0, %v240_v16  ;;  %5091 = vmatmul.mubr.msk.f32.gmra.mrb[4].mxu0 %vm273_vm0, %v1839_v17  ;;  %v250_v36 = vld [vmem:[%s5725_s28 + $0x79] sm:$0xff]  ;;  %v1849_v37 = vld [vmem:[%s5725_s28 + $0x8b] sm:$0xff]  ;;  %v251_v38 = vld [vmem:[%s5725_s28 + $0x81] sm:$0xff] }
  0x1c   : > { %4869 = vmatprep.mubr.msk.f32.mxu1 %vm273_vm0, %v241_v18  ;;  %5093 = vmatprep.mubr.msk.f32.mxu0 %vm273_vm0, %v1840_v19  ;;  %v1850_v39 = vld [vmem:[%s5725_s28 + $0x93] sm:$0xff]  ;;  %v252_v40 = vld [vmem:[%s5725_s28 + $0x89] sm:$0xff]  ;;  %v1851_v41 = vld [vmem:[%s5725_s28 + $0x9b] sm:$0xff] }
  0x1d   : > { %v253_v42 = vld [vmem:[%s5725_s28 + $0x91] sm:$0xff]  ;;  %v254_v44 = vld [vmem:[%s5725_s28 + $0x99] sm:$0xff]  ;;  %v255_v46 = vld [vmem:[%s5725_s28 + $0xa1] sm:$0xff] }
  0x1e   : > { %v2261_v43 = vld [vmem:[%s5725_s28 + $0x14] sm:$0xff]  ;;  %v2262_v45 = vld [vmem:[%s5725_s28 + $0x1c] sm:$0xff]  ;;  %v5819_v47 = vld [vmem:[%s5725_s28 + $0x24] sm:$0xff] }
  0x1f   : > { %4870 = vmatmul.mubr.msk.f32.gmra.mrb[6].mxu1 %vm273_vm0, %v242_v20  ;;  %5094 = vmatmul.mubr.msk.f32.gmra.mrb[6].mxu0 %vm273_vm0, %v1841_v21  ;;  %v256_v49 = vld [vmem:[%s5725_s28 + $0xa9] sm:$0xff]  ;;  %v257_v51 = vld [vmem:[%s5725_s28 + $0xb1] sm:$0xff]  ;;  %v258_v53 = vld [vmem:[%s5725_s28 + $0xb9] sm:$0xff] }
  0x20   : > { %4872 = vmatprep.mubr.msk.f32.mxu1 %vm273_vm0, %v243_v22  ;;  %5096 = vmatprep.mubr.msk.f32.mxu0 %vm273_vm0, %v1842_v23  ;;  %v5832_v50 = vld [vmem:[%s5725_s28 + $0x2c] sm:$0xff]  ;;  %v5838_v52 = vld [vmem:[%s5725_s28 + $0x34] sm:$0xff]  ;;  %v5849_v54 = vld [vmem:[%s5725_s28 + $0x3c] sm:$0xff] }
  0x21   : > { %v259_v55 = vld [vmem:[%s5725_s28 + $0xc1] sm:$0xff]  ;;  %v260_v57 = vld [vmem:[%s5725_s28 + $0xc9] sm:$0xff]  ;;  %v261_v59 = vld [vmem:[%s5725_s28 + $0xd1] sm:$0xff] }
  0x22   : > { %v5853_v56 = vld [vmem:[%s5725_s28 + $0x44] sm:$0xff]  ;;  %v5863_v58 = vld [vmem:[%s5725_s28 + $0x4c] sm:$0xff]  ;;  %v5867_v60 = vld [vmem:[%s5725_s28 + $0x54] sm:$0xff] }
  0x23   : > { %4873 = vmatmul.mubr.msk.f32.gmra.mrb[8].mxu1 %vm273_vm0, %v244_v24  ;;  %5097 = vmatmul.mubr.msk.f32.gmra.mrb[8].mxu0 %vm273_vm0, %v1843_v25  ;;  %v262_v61 = vld [vmem:[%s5725_s28 + $0xd9] sm:$0xff]  ;;  %v263_v63 = vld [vmem:[%s5725_s28 + $0xe1] sm:$0xff]  ;;  %v264_v2 = vld [vmem:[%s5725_s28 + $0xe9] sm:$0xff] }
  0x24   : > { %4875 = vmatprep.mubr.msk.f32.mxu1 %vm273_vm0, %v245_v26  ;;  %5099 = vmatprep.mubr.msk.f32.mxu0 %vm273_vm0, %v1844_v27  ;;  %v5877_v62 = vld [vmem:[%s5725_s28 + $0x5c] sm:$0xff]  ;;  %v5881_v0 = vld [vmem:[%s5725_s28 + $0x64] sm:$0xff]  ;;  %v5891_v3 = vld [vmem:[%s5725_s28 + $0x6c] sm:$0xff] }
  0x25   : > { %v265_v4 = vld [vmem:[%s5725_s28 + $0xf1] sm:$0xff]  ;;  %v266_v6 = vld [vmem:[%s5725_s28 + $0xf9] sm:$0xff]  ;;  %v267_v8 = vld [vmem:[%s5725_s28 + $0x101] sm:$0xff] }
  0x26   : > { %v5895_v5 = vld [vmem:[%s5725_s28 + $0x74] sm:$0xff]  ;;  %v5905_v7 = vld [vmem:[%s5725_s28 + $0x7c] sm:$0xff]  ;;  %v5909_v9 = vld [vmem:[%s5725_s28 + $0x84] sm:$0xff] }
  0x27   : > { %4876 = vmatmul.mubr.msk.f32.gmra.mrb[10].mxu1 %vm273_vm0, %v246_v28  ;;  %5100 = vmatmul.mubr.msk.f32.gmra.mrb[10].mxu0 %vm273_vm0, %v1845_v29  ;;  %v5919_v12 = vld [vmem:[%s5725_s28 + $0x8c] sm:$0xff]  ;;  %v5923_v14 = vld [vmem:[%s5725_s28 + $0x94] sm:$0xff]  ;;  %v5933_v16 = vld [vmem:[%s5725_s28 + $0x9c] sm:$0xff] }
  0x28   : > { %4878 = vmatprep.mubr.msk.f32.mxu1 %vm273_vm0, %v247_v30  ;;  %5102 = vmatprep.mubr.msk.f32.mxu0 %vm273_vm0, %v1846_v31  ;;  %v269_v13 = vld [vmem:[%s5725_s28 + $0x111] sm:$0xff]  ;;  %v270_v15 = vld [vmem:[%s5725_s28 + $0x119] sm:$0xff]  ;;  %v5937_v18 = vld [vmem:[%s5725_s28 + $0xa4] sm:$0xff] }
  0x29   : > { %v198_v17 = vld [vmem:[%s5725_s28] sm:$0xff]  ;;  %v199_v19 = vld [vmem:[%s5725_s28 + $0x8] sm:$0xff]  ;;  %v200_v21 = vld [vmem:[%s5725_s28 + $0x10] sm:$0xff] }
  0x2a   : > { %v5947_v20 = vld [vmem:[%s5725_s28 + $0xac] sm:$0xff]  ;;  %v5951_v22 = vld [vmem:[%s5725_s28 + $0xb4] sm:$0xff]  ;;  %v5965_v25 = vld [vmem:[%s5725_s28 + $0xbc] sm:$0xff] }
  0x2b   : > { %4879 = vmatmul.mubr.msk.f32.gmra.mrb[12].mxu1 %vm273_vm0, %v248_v32  ;;  %5103 = vmatmul.mubr.msk.f32.gmra.mrb[12].mxu0 %vm273_vm0, %v1847_v33  ;;  %v5956_v23 = vld [vmem:[%s6804_s1 + $0x18] sm:$0xff]  ;;  %v202_v26 = vld [vmem:[%s5725_s28 + $0x20] sm:$0xff]  ;;  %v5982_v28 = vld [vmem:[%s5725_s28 + $0xcc] sm:$0xff] }
  0x2c   : > { %4881 = vmatprep.mubr.msk.f32.mxu1 %vm273_vm0, %v249_v34  ;;  %5105 = vmatprep.mubr.msk.f32.mxu0 %vm273_vm0, %v1848_v35  ;;  %v201_v24 = vld [vmem:[%s5725_s28 + $0x18] sm:$0xff]  ;;  %v5971_v27 = vld [vmem:[%s5725_s28 + $0xc4] sm:$0xff]  ;;  %v204_v29 = vld [vmem:[%s5725_s28 + $0x30] sm:$0xff] }
  0x2d   : > { %v5986_v30 = vld [vmem:[%s5725_s28 + $0xd4] sm:$0xff]  ;;  %v5996_v32 = vld [vmem:[%s5725_s28 + $0xdc] sm:$0xff]  ;;  %v6000_v34 = vld [vmem:[%s5725_s28 + $0xe4] sm:$0xff] }
  0x2e   : > { %v205_v31 = vld [vmem:[%s5725_s28 + $0x38] sm:$0xff]  ;;  %v206_v33 = vld [vmem:[%s5725_s28 + $0x40] sm:$0xff]  ;;  %v207_v35 = vld [vmem:[%s5725_s28 + $0x48] sm:$0xff] }
  0x2f   : > { %4882 = vmatmul.mubr.msk.f32.gmra.mrb[14].mxu1 %vm273_vm0, %v250_v36  ;;  %5106 = vmatmul.mubr.msk.f32.gmra.mrb[14].mxu0 %vm273_vm0, %v1849_v37  ;;  %v6010_v36 = vld [vmem:[%s5725_s28 + $0xec] sm:$0xff] }
  0x30   : > { %4884 = vmatprep.mubr.msk.f32.mxu1 %vm273_vm0, %v251_v38  ;;  %5108 = vmatprep.mubr.msk.f32.mxu0 %vm273_vm0, %v1850_v39  ;;  %v208_v37 = vld [vmem:[%s5725_s28 + $0x50] sm:$0xff]  ;;  %v209_v39 = vld [vmem:[%s5725_s28 + $0x58] sm:$0xff] }
  0x31   : > { %v6014_v38 = vld [vmem:[%s5725_s28 + $0xf4] sm:$0xff] }
  0x33   : > { %4885 = vmatmul.mubr.msk.f32.gmra.mrb[16].mxu1 %vm273_vm0, %v252_v40  ;;  %5109 = vmatmul.mubr.msk.f32.gmra.mrb[16].mxu0 %vm273_vm0, %v1851_v41  ;;  %v6024_v40 = vld [vmem:[%s5725_s28 + $0xfc] sm:$0xff] }
  0x34   : > { %4887 = vmatprep.mubr.msk.f32.mxu1 %vm273_vm0, %v253_v42  ;;  %5140 = vmatprep.mubr.msk.f32.mxu0 %vm273_vm0, %v2261_v43  ;;  %v210_v41 = vld [vmem:[%s5725_s28 + $0x60] sm:$0xff]  ;;  %v211_v43 = vld [vmem:[%s5725_s28 + $0x68] sm:$0xff] }
  0x35   : > { %v6028_v42 = vld [vmem:[%s5725_s28 + $0x104] sm:$0xff] }
  0x37   : > { %4888 = vmatmul.mubr.msk.f32.gmra.mrb[18].mxu1 %vm273_vm0, %v254_v44  ;;  %5141 = vmatmul.mubr.msk.f32.vlgmr.msra.gmra.mrb[0].mxu0 %vm273_vm0, %v2262_v45  ;;  %v6038_v44 = vld [vmem:[%s5725_s28 + $0x10c] sm:$0xff] }
  0x38   : > { %5195 = vmatpush3.msra.mxu0 %v5740_v10  ;;  %4890 = vmatprep.mubr.msk.f32.mxu1 %vm273_vm0, %v255_v46  ;;  %v268_v10 = vld [vmem:[%s5725_s28 + $0x109] sm:$0xff]  ;;  %v6042_v46 = vld [vmem:[%s5725_s28 + $0x114] sm:$0xff] }
  0x39   : > { %5143 = vmatprep.mubr.msk.f32.mxu0 %vm273_vm0, %v5819_v47  ;;  %5250 = vmatprep.subr.mxu0 %v5824_v48  ;;  %v212_v45 = vld [vmem:[%s5725_s28 + $0x70] sm:$0xff] }
  0x3b   : > { %4891 = vmatmul.mubr.msk.f32.gmra.mrb[20].mxu1 %vm273_vm0, %v256_v49  ;;  %5144 = vmatmul.mubr.msk.f32.gmra.mrb[2].mxu0 %vm273_vm0, %v5832_v50  ;;  %v213_v49 = vld [vmem:[%s5725_s28 + $0x78] sm:$0xff] }
  0x3c   : > { %4893 = vmatprep.mubr.msk.f32.mxu1 %vm273_vm0, %v257_v51  ;;  %5146 = vmatprep.mubr.msk.f32.mxu0 %vm273_vm0, %v5838_v52  ;;  %v6052_v51 = vld [vmem:[%s5725_s28 + $0x11c] sm:$0xff] }
  0x3f   : > { %4894 = vmatmul.mubr.msk.f32.gmra.mrb[22].mxu1 %vm273_vm0, %v258_v53  ;;  %5147 = vmatmul.mubr.msk.f32.gmra.mrb[4].mxu0 %vm273_vm0, %v5849_v54  ;;  %v214_v53 = vld [vmem:[%s5725_s28 + $0x80] sm:$0xff] }
  0x40   : > { %4896 = vmatprep.mubr.msk.f32.mxu1 %vm273_vm0, %v259_v55  ;;  %5149 = vmatprep.mubr.msk.f32.mxu0 %vm273_vm0, %v5853_v56  ;;  %v6056_v55 = vld [vmem:[%s5725_s28 + $0x124] sm:$0xff] }
  0x43   : > { %4897 = vmatmul.mubr.msk.f32.gmra.mrb[24].mxu1 %vm273_vm0, %v260_v57  ;;  %5150 = vmatmul.mubr.msk.f32.gmra.mrb[6].mxu0 %vm273_vm0, %v5863_v58  ;;  %v215_v57 = vld [vmem:[%s5725_s28 + $0x88] sm:$0xff] }
  0x44   : > { %4899 = vmatprep.mubr.msk.f32.mxu1 %vm273_vm0, %v261_v59  ;;  %5152 = vmatprep.mubr.msk.f32.mxu0 %vm273_vm0, %v5867_v60  ;;  %v6066_v59 = vld [vmem:[%s5725_s28 + $0x12c] sm:$0xff] }
  0x47   : > { %4900 = vmatmul.mubr.msk.f32.gmra.mrb[26].mxu1 %vm273_vm0, %v262_v61  ;;  %5153 = vmatmul.mubr.msk.f32.gmra.mrb[8].mxu0 %vm273_vm0, %v5877_v62  ;;  %v216_v61 = vld [vmem:[%s5725_s28 + $0x90] sm:$0xff] }
  0x48   : > { %4902 = vmatprep.mubr.msk.f32.mxu1 %vm273_vm0, %v263_v63  ;;  %5155 = vmatprep.mubr.msk.f32.mxu0 %vm273_vm0, %v5881_v0  ;;  %v217_v63 = vld [vmem:[%s5725_s28 + $0x98] sm:$0xff] }
  0x4b   : > { %4903 = vmatmul.mubr.msk.f32.gmra.mrb[28].mxu1 %vm273_vm0, %v264_v2  ;;  %5156 = vmatmul.mubr.msk.f32.gmra.mrb[10].mxu0 %vm273_vm0, %v5891_v3  ;;  %v218_v2 = vld [vmem:[%s5725_s28 + $0xa0] sm:$0xff] }
  0x4c   : > { %4905 = vmatprep.mubr.msk.f32.mxu1 %vm273_vm0, %v265_v4  ;;  %5158 = vmatprep.mubr.msk.f32.mxu0 %vm273_vm0, %v5895_v5  ;;  %v6080_v4 = vld [vmem:[%s6804_s1 + $0x40] sm:$0xff] }
  0x4f   : > { %4906 = vmatmul.mubr.msk.f32.gmra.mrb[30].mxu1 %vm273_vm0, %v266_v6  ;;  %5159 = vmatmul.mubr.msk.f32.gmra.mrb[12].mxu0 %vm273_vm0, %v5905_v7  ;;  %v220_v6 = vld [vmem:[%s5725_s28 + $0xb0] sm:$0xff] }
  0x50   : > { %4908 = vmatprep.mubr.msk.f32.mxu1 %vm273_vm0, %v267_v8  ;;  %5161 = vmatprep.mubr.msk.f32.mxu0 %vm273_vm0, %v5909_v9  ;;  %v233_v8 = vld [vmem:[%s5725_s28 + $0x118] sm:$0xff] }
  0x53   : > { %4909 = vmatmul.mubr.msk.f32.gmra.mrb[32].mxu1 %vm273_vm0, %v268_v10  ;;  %5162 = vmatmul.mubr.msk.f32.gmra.mrb[14].mxu0 %vm273_vm0, %v5919_v12  ;;  %v981_v10 = vld [vmem:[%s5725_s28 + $0xa] sm:$0xff] }
  0x54   : > { %4911 = vmatprep.mubr.msk.f32.mxu1 %vm273_vm0, %v269_v13  ;;  %5164 = vmatprep.mubr.msk.f32.mxu0 %vm273_vm0, %v5923_v14  ;;  %v6165_v13 = vld [vmem:[%s5725_s28 + $0x1a] sm:$0xff] }
  0x57   : > { %4912 = vmatmul.mubr.msk.f32.gmra.mrb[34].mxu1 %vm273_vm0, %v270_v15  ;;  %5165 = vmatmul.mubr.msk.f32.gmra.mrb[16].mxu0 %vm273_vm0, %v5933_v16  ;;  %v6182_v15 = vld [vmem:[%s5725_s28 + $0x2a] sm:$0xff] }
  0x58   : > { %4916 = vmatprep.mubr.msk.f32.mxu1 %vm273_vm0, %v198_v17  ;;  %5167 = vmatprep.mubr.msk.f32.mxu0 %vm273_vm0, %v5937_v18  ;;  %v6196_v17 = vld [vmem:[%s5725_s28 + $0x3a] sm:$0xff] }
  0x5b   : > { %4917 = vmatmul.mubr.msk.f32.vlgmr.msra.gmra.mrb[0].mxu1 %vm273_vm0, %v199_v19  ;;  %5168 = vmatmul.mubr.msk.f32.gmra.mrb[18].mxu0 %vm273_vm0, %v5947_v20  ;;  %v6210_v19 = vld [vmem:[%s5725_s28 + $0x4a] sm:$0xff] }
  0x5c   : > { %4971 = vmatpush3.msra.mxu1 %v5745_v11  ;;  %4919 = vmatprep.mubr.msk.f32.mxu1 %vm273_vm0, %v200_v21  ;;  %v203_v11 = vld [vmem:[%s5725_s28 + $0x28] sm:$0xff]  ;;  %v6224_v21 = vld [vmem:[%s5725_s28 + $0x5a] sm:$0xff] }
  0x5d   : > { %5170 = vmatprep.mubr.msk.f32.mxu0 %vm273_vm0, %v5951_v22  ;;  %5026 = vmatprep.subr.mxu1 %v5956_v23 }
  0x5f   : > { %4920 = vmatmul.mubr.msk.f32.gmra.mrb[2].mxu1 %vm273_vm0, %v201_v24  ;;  %5171 = vmatmul.mubr.msk.f32.gmra.mrb[20].mxu0 %vm273_vm0, %v5965_v25  ;;  %v6241_v24 = vld [vmem:[%s5725_s28 + $0x72] sm:$0xff] }
  0x60   : > { %4922 = vmatprep.mubr.msk.f32.mxu1 %vm273_vm0, %v202_v26  ;;  %5173 = vmatprep.mubr.msk.f32.mxu0 %vm273_vm0, %v5971_v27  ;;  %v6255_v26 = vld [vmem:[%s5725_s28 + $0x82] sm:$0xff] }
  0x63   : > { %4923 = vmatmul.mubr.msk.f32.gmra.mrb[4].mxu1 %vm273_vm0, %v203_v11  ;;  %5174 = vmatmul.mubr.msk.f32.gmra.mrb[22].mxu0 %vm273_vm0, %v5982_v28  ;;  %v6266_v11 = vld [vmem:[%s5725_s28 + $0x8a] sm:$0xff] }
  0x64   : > { %4925 = vmatprep.mubr.msk.f32.mxu1 %vm273_vm0, %v204_v29  ;;  %5176 = vmatprep.mubr.msk.f32.mxu0 %vm273_vm0, %v5986_v30  ;;  %v6270_v29 = vld [vmem:[%s5725_s28 + $0x92] sm:$0xff] }
  0x67   : > { %4926 = vmatmul.mubr.msk.f32.gmra.mrb[6].mxu1 %vm273_vm0, %v205_v31  ;;  %5177 = vmatmul.mubr.msk.f32.gmra.mrb[24].mxu0 %vm273_vm0, %v5996_v32  ;;  %v6280_v31 = vld [vmem:[%s5725_s28 + $0x9a] sm:$0xff] }
  0x68   : > { %4928 = vmatprep.mubr.msk.f32.mxu1 %vm273_vm0, %v206_v33  ;;  %5179 = vmatprep.mubr.msk.f32.mxu0 %vm273_vm0, %v6000_v34  ;;  %v6284_v33 = vld [vmem:[%s5725_s28 + $0xa2] sm:$0xff] }
  0x6b   : > { %4929 = vmatmul.mubr.msk.f32.gmra.mrb[8].mxu1 %vm273_vm0, %v207_v35  ;;  %5180 = vmatmul.mubr.msk.f32.gmra.mrb[26].mxu0 %vm273_vm0, %v6010_v36  ;;  %v6294_v35 = vld [vmem:[%s5725_s28 + $0xaa] sm:$0xff] }
  0x6c   : > { %4931 = vmatprep.mubr.msk.f32.mxu1 %vm273_vm0, %v208_v37  ;;  %5182 = vmatprep.mubr.msk.f32.mxu0 %vm273_vm0, %v6014_v38  ;;  %v6299_v37 = vld [vmem:[%s5725_s28 + $0xb2] sm:$0xff] }
  0x6f   : > { %4932 = vmatmul.mubr.msk.f32.gmra.mrb[10].mxu1 %vm273_vm0, %v209_v39  ;;  %5183 = vmatmul.mubr.msk.f32.gmra.mrb[28].mxu0 %vm273_vm0, %v6024_v40  ;;  %v6309_v39 = vld [vmem:[%s5725_s28 + $0xba] sm:$0xff] }
  0x70   : > { %4934 = vmatprep.mubr.msk.f32.mxu1 %vm273_vm0, %v210_v41  ;;  %5185 = vmatprep.mubr.msk.f32.mxu0 %vm273_vm0, %v6028_v42  ;;  %v6313_v41 = vld [vmem:[%s5725_s28 + $0xc2] sm:$0xff] }
  0x73   : > { %4935 = vmatmul.mubr.msk.f32.gmra.mrb[12].mxu1 %vm273_vm0, %v211_v43  ;;  %5186 = vmatmul.mubr.msk.f32.gmra.mrb[30].mxu0 %vm273_vm0, %v6038_v44  ;;  %v6323_v43 = vld [vmem:[%s5725_s28 + $0xca] sm:$0xff] }
  0x74   : > { %4937 = vmatprep.mubr.msk.f32.mxu1 %vm273_vm0, %v212_v45  ;;  %5188 = vmatprep.mubr.msk.f32.mxu0 %vm273_vm0, %v6042_v46  ;;  %v6327_v45 = vld [vmem:[%s5725_s28 + $0xd2] sm:$0xff] }
  0x77   : > { %4938 = vmatmul.mubr.msk.f32.gmra.mrb[14].mxu1 %vm273_vm0, %v213_v49  ;;  %5189 = vmatmul.mubr.msk.f32.gmra.mrb[32].mxu0 %vm273_vm0, %v6052_v51  ;;  %v6337_v49 = vld [vmem:[%s5725_s28 + $0xda] sm:$0xff] }
  0x78   : > { %4940 = vmatprep.mubr.msk.f32.mxu1 %vm273_vm0, %v214_v53  ;;  %5191 = vmatprep.mubr.msk.f32.mxu0 %vm273_vm0, %v6056_v55  ;;  %v6341_v53 = vld [vmem:[%s5725_s28 + $0xe2] sm:$0xff] }
  0x7b   : > { %4941 = vmatmul.mubr.msk.f32.gmra.mrb[16].mxu1 %vm273_vm0, %v215_v57  ;;  %5192 = vmatmul.mubr.msk.f32.gmra.mrb[34].mxu0 %vm273_vm0, %v6066_v59  ;;  %v6351_v57 = vld [vmem:[%s5725_s28 + $0xea] sm:$0xff] }
  0x7c   : > { %4943 = vmatprep.mubr.msk.f32.mxu1 %vm273_vm0, %v216_v61  ;;  %5196 = vmatprep.mubr.msk.f32.mxu0 %vm273_vm0, %v5819_v47  ;;  %v219_v47 = vld [vmem:[%s5725_s28 + $0xa8] sm:$0xff]  ;;  %v6355_v61 = vld [vmem:[%s5725_s28 + $0xf2] sm:$0xff] }
  0x7f   : > { %4944 = vmatmul.mubr.msk.f32.gmra.mrb[18].mxu1 %vm273_vm0, %v217_v63  ;;  %5197 = vmatmul.mubr.msk.f32.vlgmr.msra.gmra.mrb[0].mxu0 %vm273_vm0, %v5832_v50  ;;  %v222_v50 = vld [vmem:[%s5725_s28 + $0xc0] sm:$0xff] }
  0x80   : > { %5251 = vmatpush3.msra.mxu0 %v5824_v48  ;;  %4946 = vmatprep.mubr.msk.f32.mxu1 %vm273_vm0, %v218_v2  ;;  %v221_v48 = vld [vmem:[%s5725_s28 + $0xb8] sm:$0xff]  ;;  %v3127_v63 = vld [vmem:[%s5725_s28 + $0x85] sm:$0xff] }
  0x81   : > { %5199 = vmatprep.mubr.msk.f32.mxu0 %vm273_vm0, %v5838_v52  ;;  %5306 = vmatprep.subr.mxu0 %v6080_v4  ;;  %v223_v52 = vld [vmem:[%s5725_s28 + $0xc8] sm:$0xff]  ;;  %v6365_v2 = vld [vmem:[%s5725_s28 + $0xfa] sm:$0xff] }
  0x83   : > { %4947 = vmatmul.mubr.msk.f32.gmra.mrb[20].mxu1 %vm273_vm0, %v219_v47  ;;  %5200 = vmatmul.mubr.msk.f32.gmra.mrb[2].mxu0 %vm273_vm0, %v5849_v54  ;;  %v224_v54 = vld [vmem:[%s5725_s28 + $0xd0] sm:$0xff]  ;;  %v6369_v47 = vld [vmem:[%s5725_s28 + $0x102] sm:$0xff] }
  0x84   : > { %4949 = vmatprep.mubr.msk.f32.mxu1 %vm273_vm0, %v220_v6  ;;  %5202 = vmatprep.mubr.msk.f32.mxu0 %vm273_vm0, %v5853_v56  ;;  %v225_v56 = vld [vmem:[%s5725_s28 + $0xd8] sm:$0xff] }
  0x85   : > { %v3129_v6 = vld [vmem:[%s5725_s28 + $0x95] sm:$0xff] }
  0x87   : > { %4950 = vmatmul.mubr.msk.f32.gmra.mrb[22].mxu1 %vm273_vm0, %v221_v48  ;;  %5203 = vmatmul.mubr.msk.f32.gmra.mrb[4].mxu0 %vm273_vm0, %v5863_v58  ;;  %v226_v58 = vld [vmem:[%s5725_s28 + $0xe0] sm:$0xff]  ;;  %v6379_v48 = vld [vmem:[%s5725_s28 + $0x10a] sm:$0xff] }
  0x88   : > { %4952 = vmatprep.mubr.msk.f32.mxu1 %vm273_vm0, %v222_v50  ;;  %5205 = vmatprep.mubr.msk.f32.mxu0 %vm273_vm0, %v5867_v60  ;;  %v227_v60 = vld [vmem:[%s5725_s28 + $0xe8] sm:$0xff]  ;;  %v3130_v50 = vld [vmem:[%s5725_s28 + $0x9d] sm:$0xff] }
  0x8b   : > { %4953 = vmatmul.mubr.msk.f32.gmra.mrb[24].mxu1 %vm273_vm0, %v223_v52  ;;  %5206 = vmatmul.mubr.msk.f32.gmra.mrb[6].mxu0 %vm273_vm0, %v5877_v62  ;;  %v228_v62 = vld [vmem:[%s5725_s28 + $0xf0] sm:$0xff] }
  0x8c   : > { %4955 = vmatprep.mubr.msk.f32.mxu1 %vm273_vm0, %v224_v54  ;;  %5208 = vmatprep.mubr.msk.f32.mxu0 %vm273_vm0, %v5881_v0  ;;  %v229_v0 = vld [vmem:[%s5725_s28 + $0xf8] sm:$0xff]  ;;  %v3131_v54 = vld [vmem:[%s5725_s28 + $0xa5] sm:$0xff] }
  0x8d   : > { %v6383_v52 = vld [vmem:[%s5725_s28 + $0x112] sm:$0xff] }
  0x8f   : > { %4956 = vmatmul.mubr.msk.f32.gmra.mrb[26].mxu1 %vm273_vm0, %v225_v56  ;;  %5209 = vmatmul.mubr.msk.f32.gmra.mrb[8].mxu0 %vm273_vm0, %v5891_v3  ;;  %v230_v3 = vld [vmem:[%s5725_s28 + $0x100] sm:$0xff] }
  0x90   : > { %4958 = vmatprep.mubr.msk.f32.mxu1 %vm273_vm0, %v226_v58  ;;  %5211 = vmatprep.mubr.msk.f32.mxu0 %vm273_vm0, %v5895_v5  ;;  %v231_v5 = vld [vmem:[%s5725_s28 + $0x108] sm:$0xff]  ;;  %v6393_v56 = vld [vmem:[%s5725_s28 + $0x11a] sm:$0xff] }
  0x91   : > { %v3132_v58 = vld [vmem:[%s5725_s28 + $0xad] sm:$0xff] }
  0x93   : > { %4959 = vmatmul.mubr.msk.f32.gmra.mrb[28].mxu1 %vm273_vm0, %v227_v60  ;;  %5212 = vmatmul.mubr.msk.f32.gmra.mrb[10].mxu0 %vm273_vm0, %v5905_v7  ;;  %v232_v7 = vld [vmem:[%s5725_s28 + $0x110] sm:$0xff] }
  0x94   : > { %4961 = vmatprep.mubr.msk.f32.mxu1 %vm273_vm0, %v228_v62  ;;  %5214 = vmatprep.mubr.msk.f32.mxu0 %vm273_vm0, %v5909_v9  ;;  %v980_v9 = vld [vmem:[%s5725_s28 + $0x2] sm:$0xff]  ;;  %v3133_v60 = vld [vmem:[%s5725_s28 + $0xb5] sm:$0xff] }
  0x95   : > { %v3134_v62 = vld [vmem:[%s5725_s28 + $0xbd] sm:$0xff] }
  0x97   : > { %4962 = vmatmul.mubr.msk.f32.gmra.mrb[30].mxu1 %vm273_vm0, %v229_v0  ;;  %5215 = vmatmul.mubr.msk.f32.gmra.mrb[12].mxu0 %vm273_vm0, %v5919_v12  ;;  %v6156_v12 = vld [vmem:[%s5725_s28 + $0x12] sm:$0xff]  ;;  %v3135_v0 = vld [vmem:[%s5725_s28 + $0xc5] sm:$0xff] }
  0x98   : > { %4964 = vmatprep.mubr.msk.f32.mxu1 %vm273_vm0, %v230_v3  ;;  %5217 = vmatprep.mubr.msk.f32.mxu0 %vm273_vm0, %v5923_v14  ;;  %v6170_v14 = vld [vmem:[%s5725_s28 + $0x22] sm:$0xff]  ;;  %v3136_v3 = vld [vmem:[%s5725_s28 + $0xcd] sm:$0xff] }
  0x9b   : > { %4965 = vmatmul.mubr.msk.f32.gmra.mrb[32].mxu1 %vm273_vm0, %v231_v5  ;;  %5218 = vmatmul.mubr.msk.f32.gmra.mrb[14].mxu0 %vm273_vm0, %v5933_v16  ;;  %v6185_v16 = vld [vmem:[%s5725_s28 + $0x32] sm:$0xff] }
  0x9c   : > { %4967 = vmatprep.mubr.msk.f32.mxu1 %vm273_vm0, %v232_v7  ;;  %5220 = vmatprep.mubr.msk.f32.mxu0 %vm273_vm0, %v5937_v18  ;;  %v6199_v18 = vld [vmem:[%s5725_s28 + $0x42] sm:$0xff]  ;;  %v3137_v5 = vld [vmem:[%s5725_s28 + $0xd5] sm:$0xff] }
  0x9d   : > { %v3139_v7 = vld [vmem:[%s5725_s28 + $0xe5] sm:$0xff] }
  0x9f   : > { %4968 = vmatmul.mubr.msk.f32.gmra.mrb[34].mxu1 %vm273_vm0, %v233_v8  ;;  %5221 = vmatmul.mubr.msk.f32.gmra.mrb[16].mxu0 %vm273_vm0, %v5947_v20  ;;  %v6213_v20 = vld [vmem:[%s5725_s28 + $0x52] sm:$0xff] }
  0xa0   : > { %4972 = vmatprep.mubr.msk.f32.mxu1 %vm273_vm0, %v980_v9  ;;  %5223 = vmatprep.mubr.msk.f32.mxu0 %vm273_vm0, %v5951_v22  ;;  %v6227_v22 = vld [vmem:[%s5725_s28 + $0x62] sm:$0xff]  ;;  %v3140_v8 = vld [vmem:[%s5725_s28 + $0xed] sm:$0xff]  ;;  %v3141_v9 = vld [vmem:[%s5725_s28 + $0xf5] sm:$0xff] }
  0xa3   : > { %4973 = vmatmul.mubr.msk.f32.vlgmr.msra.gmra.mrb[0].mxu1 %vm273_vm0, %v981_v10  ;;  %5224 = vmatmul.mubr.msk.f32.gmra.mrb[18].mxu0 %vm273_vm0, %v5965_v25  ;;  %v6252_v25 = vld [vmem:[%s5725_s28 + $0x7a] sm:$0xff] }
  0xa4   : > { %5027 = vmatpush3.msra.mxu1 %v5956_v23  ;;  %4975 = vmatprep.mubr.msk.f32.mxu1 %vm273_vm0, %v6156_v12  ;;  %v6238_v23 = vld [vmem:[%s5725_s28 + $0x6a] sm:$0xff]  ;;  %v3142_v10 = vld [vmem:[%s5725_s28 + $0xfd] sm:$0xff] }
  0xa5   : > { %5226 = vmatprep.mubr.msk.f32.mxu0 %vm273_vm0, %v5971_v27  ;;  %5362 = vmatprep.subr.mxu1 %v5709_v1  ;;  %v2722_v27 = vld [vmem:[%s5725_s28 + $0x134] sm:$0xff] }
  0xa7   : > { %4976 = vmatmul.mubr.msk.f32.gmra.mrb[2].mxu1 %vm273_vm0, %v6165_v13  ;;  %5227 = vmatmul.mubr.msk.f32.gmra.mrb[20].mxu0 %vm273_vm0, %v5982_v28  ;;  %v2723_v28 = vld [vmem:[%s5725_s28 + $0x13c] sm:$0xff] }
  0xa8   : > { %4978 = vmatprep.mubr.msk.f32.mxu1 %vm273_vm0, %v6170_v14  ;;  %5229 = vmatprep.mubr.msk.f32.mxu0 %vm273_vm0, %v5986_v30  ;;  %v3115_v30 = vld [vmem:[%s5725_s28 + $0x25] sm:$0xff] }
  0xab   : > { %4979 = vmatmul.mubr.msk.f32.gmra.mrb[4].mxu1 %vm273_vm0, %v6182_v15  ;;  %5230 = vmatmul.mubr.msk.f32.gmra.mrb[22].mxu0 %vm273_vm0, %v5996_v32  ;;  %v3116_v32 = vld [vmem:[%s5725_s28 + $0x2d] sm:$0xff] }
  0xac   : > { %4981 = vmatprep.mubr.msk.f32.mxu1 %vm273_vm0, %v6185_v16  ;;  %5232 = vmatprep.mubr.msk.f32.mxu0 %vm273_vm0, %v6000_v34  ;;  %v3117_v34 = vld [vmem:[%s5725_s28 + $0x35] sm:$0xff] }
  0xaf   : > { %4982 = vmatmul.mubr.msk.f32.gmra.mrb[6].mxu1 %vm273_vm0, %v6196_v17  ;;  %5233 = vmatmul.mubr.msk.f32.gmra.mrb[24].mxu0 %vm273_vm0, %v6010_v36  ;;  %v3118_v36 = vld [vmem:[%s5725_s28 + $0x3d] sm:$0xff] }
  0xb0   : > { %4984 = vmatprep.mubr.msk.f32.mxu1 %vm273_vm0, %v6199_v18  ;;  %5235 = vmatprep.mubr.msk.f32.mxu0 %vm273_vm0, %v6014_v38  ;;  %v3119_v38 = vld [vmem:[%s5725_s28 + $0x45] sm:$0xff] }
  0xb3   : > { %4985 = vmatmul.mubr.msk.f32.gmra.mrb[8].mxu1 %vm273_vm0, %v6210_v19  ;;  %5236 = vmatmul.mubr.msk.f32.gmra.mrb[26].mxu0 %vm273_vm0, %v6024_v40  ;;  %v3120_v40 = vld [vmem:[%s5725_s28 + $0x4d] sm:$0xff] }
  0xb4   : > { %4987 = vmatprep.mubr.msk.f32.mxu1 %vm273_vm0, %v6213_v20  ;;  %5238 = vmatprep.mubr.msk.f32.mxu0 %vm273_vm0, %v6028_v42  ;;  %v3121_v42 = vld [vmem:[%s5725_s28 + $0x55] sm:$0xff] }
  0xb7   : > { %4988 = vmatmul.mubr.msk.f32.gmra.mrb[10].mxu1 %vm273_vm0, %v6224_v21  ;;  %5239 = vmatmul.mubr.msk.f32.gmra.mrb[28].mxu0 %vm273_vm0, %v6038_v44  ;;  %v3122_v44 = vld [vmem:[%s5725_s28 + $0x5d] sm:$0xff] }
  0xb8   : > { %4990 = vmatprep.mubr.msk.f32.mxu1 %vm273_vm0, %v6227_v22  ;;  %5241 = vmatprep.mubr.msk.f32.mxu0 %vm273_vm0, %v6042_v46  ;;  %v3123_v46 = vld [vmem:[%s5725_s28 + $0x65] sm:$0xff] }
  0xbb   : > { %4991 = vmatmul.mubr.msk.f32.gmra.mrb[12].mxu1 %vm273_vm0, %v6238_v23  ;;  %5242 = vmatmul.mubr.msk.f32.gmra.mrb[30].mxu0 %vm273_vm0, %v6052_v51  ;;  %v3124_v51 = vld [vmem:[%s5725_s28 + $0x6d] sm:$0xff] }
  0xbc   : > { %4993 = vmatprep.mubr.msk.f32.mxu1 %vm273_vm0, %v6241_v24  ;;  %5244 = vmatprep.mubr.msk.f32.mxu0 %vm273_vm0, %v6056_v55  ;;  %v3125_v55 = vld [vmem:[%s5725_s28 + $0x75] sm:$0xff] }
  0xbf   : > { %4994 = vmatmul.mubr.msk.f32.gmra.mrb[14].mxu1 %vm273_vm0, %v6252_v25  ;;  %5245 = vmatmul.mubr.msk.f32.gmra.mrb[32].mxu0 %vm273_vm0, %v6066_v59  ;;  %v3126_v59 = vld [vmem:[%s5725_s28 + $0x7d] sm:$0xff] }
  0xc0   : > { %4996 = vmatprep.mubr.msk.f32.mxu1 %vm273_vm0, %v6255_v26  ;;  %5247 = vmatprep.mubr.msk.f32.mxu0 %vm273_vm0, %v2722_v27  ;;  %v3549_v27 = vld [vmem:[%s5725_s28 + $0x5e] sm:$0xff] }
  0xc3   : > { %4997 = vmatmul.mubr.msk.f32.gmra.mrb[16].mxu1 %vm273_vm0, %v6266_v11  ;;  %5248 = vmatmul.mubr.msk.f32.gmra.mrb[34].mxu0 %vm273_vm0, %v2723_v28  ;;  %v3551_v28 = vld [vmem:[%s5725_s28 + $0x6e] sm:$0xff] }
  0xc4   : > { %4999 = vmatprep.mubr.msk.f32.mxu1 %vm273_vm0, %v6270_v29  ;;  %5252 = vmatprep.mubr.msk.f32.mxu0 %vm273_vm0, %v3115_v30  ;;  %v3553_v30 = vld [vmem:[%s5725_s28 + $0x7e] sm:$0xff] }
  0xc7   : > { %5000 = vmatmul.mubr.msk.f32.gmra.mrb[18].mxu1 %vm273_vm0, %v6280_v31  ;;  %5253 = vmatmul.mubr.msk.f32.vlgmr.msra.gmra.mrb[0].mxu0 %vm273_vm0, %v3116_v32  ;;  %v3555_v32 = vld [vmem:[%s5725_s28 + $0x8e] sm:$0xff] }
  0xc8   : > { %5307 = vmatpush3.msra.mxu0 %v6080_v4  ;;  %5002 = vmatprep.mubr.msk.f32.mxu1 %vm273_vm0, %v6284_v33  ;;  %v3128_v4 = vld [vmem:[%s5725_s28 + $0x8d] sm:$0xff] }
  0xc9   : > { %5255 = vmatprep.mubr.msk.f32.mxu0 %vm273_vm0, %v3117_v34  ;;  %v3557_v34 = vld [vmem:[%s5725_s28 + $0x9e] sm:$0xff] }
  0xcb   : > { %5003 = vmatmul.mubr.msk.f32.gmra.mrb[20].mxu1 %vm273_vm0, %v6294_v35  ;;  %5256 = vmatmul.mubr.msk.f32.gmra.mrb[2].mxu0 %vm273_vm0, %v3118_v36  ;;  %v3558_v36 = vld [vmem:[%s5725_s28 + $0xa6] sm:$0xff] }
  0xcc   : > { %5005 = vmatprep.mubr.msk.f32.mxu1 %vm273_vm0, %v6299_v37  ;;  %5258 = vmatprep.mubr.msk.f32.mxu0 %vm273_vm0, %v3119_v38  ;;  %v3559_v38 = vld [vmem:[%s5725_s28 + $0xae] sm:$0xff] }
  0xcf   : > { %5006 = vmatmul.mubr.msk.f32.gmra.mrb[22].mxu1 %vm273_vm0, %v6309_v39  ;;  %5259 = vmatmul.mubr.msk.f32.gmra.mrb[4].mxu0 %vm273_vm0, %v3120_v40  ;;  %v3560_v40 = vld [vmem:[%s5725_s28 + $0xb6] sm:$0xff] }
  0xd0   : > { %5008 = vmatprep.mubr.msk.f32.mxu1 %vm273_vm0, %v6313_v41  ;;  %5261 = vmatprep.mubr.msk.f32.mxu0 %vm273_vm0, %v3121_v42  ;;  %v3561_v42 = vld [vmem:[%s5725_s28 + $0xbe] sm:$0xff] }
  0xd3   : > { %5009 = vmatmul.mubr.msk.f32.gmra.mrb[24].mxu1 %vm273_vm0, %v6323_v43  ;;  %5262 = vmatmul.mubr.msk.f32.gmra.mrb[6].mxu0 %vm273_vm0, %v3122_v44  ;;  %v3562_v44 = vld [vmem:[%s5725_s28 + $0xc6] sm:$0xff] }
  0xd4   : > { %5011 = vmatprep.mubr.msk.f32.mxu1 %vm273_vm0, %v6327_v45  ;;  %5264 = vmatprep.mubr.msk.f32.mxu0 %vm273_vm0, %v3123_v46  ;;  %v3563_v46 = vld [vmem:[%s5725_s28 + $0xce] sm:$0xff] }
  0xd7   : > { %5012 = vmatmul.mubr.msk.f32.gmra.mrb[26].mxu1 %vm273_vm0, %v6337_v49  ;;  %5265 = vmatmul.mubr.msk.f32.gmra.mrb[8].mxu0 %vm273_vm0, %v3124_v51  ;;  %v3564_v51 = vld [vmem:[%s5725_s28 + $0xd6] sm:$0xff] }
  0xd8   : > { %5014 = vmatprep.mubr.msk.f32.mxu1 %vm273_vm0, %v6341_v53  ;;  %5267 = vmatprep.mubr.msk.f32.mxu0 %vm273_vm0, %v3125_v55  ;;  %v3565_v55 = vld [vmem:[%s5725_s28 + $0xde] sm:$0xff] }
  0xdb   : > { %5015 = vmatmul.mubr.msk.f32.gmra.mrb[28].mxu1 %vm273_vm0, %v6351_v57  ;;  %5268 = vmatmul.mubr.msk.f32.gmra.mrb[10].mxu0 %vm273_vm0, %v3126_v59  ;;  %v3566_v59 = vld [vmem:[%s5725_s28 + $0xe6] sm:$0xff] }
  0xdc   : > { %5017 = vmatprep.mubr.msk.f32.mxu1 %vm273_vm0, %v6355_v61  ;;  %5270 = vmatprep.mubr.msk.f32.mxu0 %vm273_vm0, %v3127_v63  ;;  %v3567_v63 = vld [vmem:[%s5725_s28 + $0xee] sm:$0xff] }
  0xdf   : > { %5018 = vmatmul.mubr.msk.f32.gmra.mrb[30].mxu1 %vm273_vm0, %v6365_v2  ;;  %5271 = vmatmul.mubr.msk.f32.gmra.mrb[12].mxu0 %vm273_vm0, %v3128_v4  ;;  %v3568_v4 = vld [vmem:[%s5725_s28 + $0xf6] sm:$0xff] }
  0xe0   : > { %5020 = vmatprep.mubr.msk.f32.mxu1 %vm273_vm0, %v6369_v47  ;;  %5273 = vmatprep.mubr.msk.f32.mxu0 %vm273_vm0, %v3129_v6  ;;  %v3569_v6 = vld [vmem:[%s5725_s28 + $0xfe] sm:$0xff] }
  0xe3   : > { %5021 = vmatmul.mubr.msk.f32.gmra.mrb[32].mxu1 %vm273_vm0, %v6379_v48  ;;  %5274 = vmatmul.mubr.msk.f32.gmra.mrb[14].mxu0 %vm273_vm0, %v3130_v50  ;;  %v3570_v50 = vld [vmem:[%s5725_s28 + $0x106] sm:$0xff] }
  0xe4   : > { %5023 = vmatprep.mubr.msk.f32.mxu1 %vm273_vm0, %v6383_v52  ;;  %5276 = vmatprep.mubr.msk.f32.mxu0 %vm273_vm0, %v3131_v54  ;;  %v3571_v54 = vld [vmem:[%s5725_s28 + $0x10e] sm:$0xff] }
  0xe7   : > { %5024 = vmatmul.mubr.msk.f32.gmra.mrb[34].mxu1 %vm273_vm0, %v6393_v56  ;;  %5277 = vmatmul.mubr.msk.f32.gmra.mrb[16].mxu0 %vm273_vm0, %v3132_v58  ;;  %v3572_v58 = vld [vmem:[%s5725_s28 + $0x116] sm:$0xff] }
  0xe8   : > { %5028 = vmatprep.mubr.msk.f32.mxu1 %vm273_vm0, %v6156_v12  ;;  %5279 = vmatprep.mubr.msk.f32.mxu0 %vm273_vm0, %v3133_v60  ;;  %v3143_v12 = vld [vmem:[%s5725_s28 + $0x105] sm:$0xff] }
  0xe9   : > { %v1865_v60 = vld [vmem:[%s5725_s28 + $0x10b] sm:$0xff] }
  0xeb   : > { %5029 = vmatmul.mubr.msk.f32.vlgmr.msra.gmra.mrb[0].mxu1 %vm273_vm0, %v6165_v13  ;;  %5280 = vmatmul.mubr.msk.f32.gmra.mrb[18].mxu0 %vm273_vm0, %v3134_v62  ;;  %v3144_v13 = vld [vmem:[%s5725_s28 + $0x10d] sm:$0xff]  ;;  %v3573_v62 = vld [vmem:[%s5725_s28 + $0x11e] sm:$0xff] }
  0xec   : > { %5363 = vmatpush3.msra.mxu1 %v5709_v1  ;;  %5031 = vmatprep.mubr.msk.f32.mxu1 %vm273_vm0, %v6170_v14  ;;  %v3138_v1 = vld [vmem:[%s5725_s28 + $0xdd] sm:$0xff]  ;;  %v3145_v14 = vld [vmem:[%s5725_s28 + $0x115] sm:$0xff] }
  0xed   : > { %5282 = vmatprep.mubr.msk.f32.mxu0 %vm273_vm0, %v3135_v0  ;;  %v1866_v0 = vld [vmem:[%s5725_s28 + $0x113] sm:$0xff] }
  0xef   : > { %5032 = vmatmul.mubr.msk.f32.gmra.mrb[2].mxu1 %vm273_vm0, %v6182_v15  ;;  %5283 = vmatmul.mubr.msk.f32.gmra.mrb[20].mxu0 %vm273_vm0, %v3136_v3  ;;  %v3146_v15 = vld [vmem:[%s5725_s28 + $0x11d] sm:$0xff]  ;;  %v3574_v3 = vld [vmem:[%s5725_s28 + $0x126] sm:$0xff] }
  0xf0   : > { %5034 = vmatprep.mubr.msk.f32.mxu1 %vm273_vm0, %v6185_v16  ;;  %5285 = vmatprep.mubr.msk.f32.mxu0 %vm273_vm0, %v3137_v5  ;;  %v3147_v16 = vld [vmem:[%s5725_s28 + $0x125] sm:$0xff]  ;;  %v1867_v5 = vld [vmem:[%s5725_s28 + $0x11b] sm:$0xff] }
  0xf3   : > { %5035 = vmatmul.mubr.msk.f32.gmra.mrb[4].mxu1 %vm273_vm0, %v6196_v17  ;;  %5286 = vmatmul.mubr.msk.f32.gmra.mrb[22].mxu0 %vm273_vm0, %v3138_v1  ;;  %v3148_v17 = vld [vmem:[%s5725_s28 + $0x12d] sm:$0xff] }
  0xf4   : > { %5037 = vmatprep.mubr.msk.f32.mxu1 %vm273_vm0, %v6199_v18  ;;  %5288 = vmatprep.mubr.msk.f32.mxu0 %vm273_vm0, %v3139_v7  ;;  %v3149_v18 = vld [vmem:[%s5725_s28 + $0x135] sm:$0xff]  ;;  %v1868_v7 = vld [vmem:[%s5725_s28 + $0x123] sm:$0xff] }
  0xf5   : > { %v3575_v1 = vld [vmem:[%s5725_s28 + $0x12e] sm:$0xff] }
  0xf7   : > { %5038 = vmatmul.mubr.msk.f32.gmra.mrb[6].mxu1 %vm273_vm0, %v6210_v19  ;;  %5289 = vmatmul.mubr.msk.f32.gmra.mrb[24].mxu0 %vm273_vm0, %v3140_v8  ;;  %v3150_v19 = vld [vmem:[%s5725_s28 + $0x13d] sm:$0xff] }
  0xf8   : > { %5040 = vmatprep.mubr.msk.f32.mxu1 %vm273_vm0, %v6213_v20  ;;  %5291 = vmatprep.mubr.msk.f32.mxu0 %vm273_vm0, %v3141_v9  ;;  %v3542_v20 = vld [vmem:[%s5725_s28 + $0x26] sm:$0xff]  ;;  %v3576_v8 = vld [vmem:[%s5725_s28 + $0x136] sm:$0xff] }
  0xf9   : > { %v1869_v9 = vld [vmem:[%s5725_s28 + $0x12b] sm:$0xff] }
  0xfb   : > { %5041 = vmatmul.mubr.msk.f32.gmra.mrb[8].mxu1 %vm273_vm0, %v6224_v21  ;;  %5292 = vmatmul.mubr.msk.f32.gmra.mrb[26].mxu0 %vm273_vm0, %v3142_v10  ;;  %v3543_v21 = vld [vmem:[%s5725_s28 + $0x2e] sm:$0xff]  ;;  %v3577_v10 = vld [vmem:[%s5725_s28 + $0x13e] sm:$0xff] }
  0xfc   : > { %5043 = vmatprep.mubr.msk.f32.mxu1 %vm273_vm0, %v6227_v22  ;;  %5294 = vmatprep.mubr.msk.f32.mxu0 %vm273_vm0, %v3143_v12  ;;  %v3544_v22 = vld [vmem:[%s5725_s28 + $0x36] sm:$0xff] }
  0xff   : > { %5044 = vmatmul.mubr.msk.f32.gmra.mrb[10].mxu1 %vm273_vm0, %v6238_v23  ;;  %5295 = vmatmul.mubr.msk.f32.gmra.mrb[28].mxu0 %vm273_vm0, %v3144_v13  ;;  %v3545_v23 = vld [vmem:[%s5725_s28 + $0x3e] sm:$0xff] }
 0x100   : > { %5046 = vmatprep.mubr.msk.f32.mxu1 %vm273_vm0, %v6241_v24  ;;  %5297 = vmatprep.mubr.msk.f32.mxu0 %vm273_vm0, %v3145_v14  ;;  %v3546_v24 = vld [vmem:[%s5725_s28 + $0x46] sm:$0xff] }
 0x103   : > { %5047 = vmatmul.mubr.msk.f32.gmra.mrb[12].mxu1 %vm273_vm0, %v6252_v25  ;;  %5298 = vmatmul.mubr.msk.f32.gmra.mrb[30].mxu0 %vm273_vm0, %v3146_v15  ;;  %v3547_v25 = vld [vmem:[%s5725_s28 + $0x4e] sm:$0xff] }
 0x104   : > { %5049 = vmatprep.mubr.msk.f32.mxu1 %vm273_vm0, %v6255_v26  ;;  %5300 = vmatprep.mubr.msk.f32.mxu0 %vm273_vm0, %v3147_v16  ;;  %v3548_v26 = vld [vmem:[%s5725_s28 + $0x56] sm:$0xff] }
 0x107   : > { %5050 = vmatmul.mubr.msk.f32.gmra.mrb[14].mxu1 %vm273_vm0, %v6266_v11  ;;  %5301 = vmatmul.mubr.msk.f32.gmra.mrb[32].mxu0 %vm273_vm0, %v3148_v17  ;;  %v3550_v11 = vld [vmem:[%s5725_s28 + $0x66] sm:$0xff] }
 0x108   : > { %5052 = vmatprep.mubr.msk.f32.mxu1 %vm273_vm0, %v6270_v29  ;;  %5303 = vmatprep.mubr.msk.f32.mxu0 %vm273_vm0, %v3149_v18  ;;  %v3552_v29 = vld [vmem:[%s5725_s28 + $0x76] sm:$0xff] }
 0x10b   : > { %5053 = vmatmul.mubr.msk.f32.gmra.mrb[16].mxu1 %vm273_vm0, %v6280_v31  ;;  %5304 = vmatmul.mubr.msk.f32.gmra.mrb[34].mxu0 %vm273_vm0, %v3150_v19  ;;  %v3554_v31 = vld [vmem:[%s5725_s28 + $0x86] sm:$0xff] }
 0x10c   : > { %5055 = vmatprep.mubr.msk.f32.mxu1 %vm273_vm0, %v6284_v33  ;;  %5308 = vmatprep.mubr.msk.f32.mxu0 %vm273_vm0, %v3542_v20  ;;  %v3556_v33 = vld [vmem:[%s5725_s28 + $0x96] sm:$0xff] }
 0x10f   : > { %5056 = vmatmul.mubr.msk.f32.gmra.mrb[18].mxu1 %vm273_vm0, %v6294_v35  ;;  %5309 = vmatmul.mubr.msk.f32.vlgmr.msra.gmra.mrb[0].mxu0 %vm273_vm0, %v3543_v21  ;;  %v1441_v35 = vld [vmem:[%s5725_s28 + $0x122] sm:$0xff] }
 0x110   : > { %5058 = vmatprep.mubr.msk.f32.mxu1 %vm273_vm0, %v6299_v37  ;;  %5311 = vmatprep.mubr.msk.f32.mxu0 %vm273_vm0, %v3544_v22  ;;  %v1442_v37 = vld [vmem:[%s5725_s28 + $0x12a] sm:$0xff] }
 0x113   : > { %5059 = vmatmul.mubr.msk.f32.gmra.mrb[20].mxu1 %vm273_vm0, %v6309_v39  ;;  %5312 = vmatmul.mubr.msk.f32.gmra.mrb[2].mxu0 %vm273_vm0, %v3545_v23  ;;  %v1852_v39 = vld [vmem:[%s5725_s28 + $0xa3] sm:$0xff] }
 0x114   : > { %5061 = vmatprep.mubr.msk.f32.mxu1 %vm273_vm0, %v6313_v41  ;;  %5314 = vmatprep.mubr.msk.f32.mxu0 %vm273_vm0, %v3546_v24  ;;  %v1853_v41 = vld [vmem:[%s5725_s28 + $0xab] sm:$0xff] }
 0x117   : > { %5062 = vmatmul.mubr.msk.f32.gmra.mrb[22].mxu1 %vm273_vm0, %v6323_v43  ;;  %5315 = vmatmul.mubr.msk.f32.gmra.mrb[4].mxu0 %vm273_vm0, %v3547_v25  ;;  %v1854_v43 = vld [vmem:[%s5725_s28 + $0xb3] sm:$0xff] }
 0x118   : > { %5064 = vmatprep.mubr.msk.f32.mxu1 %vm273_vm0, %v6327_v45  ;;  %5317 = vmatprep.mubr.msk.f32.mxu0 %vm273_vm0, %v3548_v26  ;;  %v1855_v45 = vld [vmem:[%s5725_s28 + $0xbb] sm:$0xff] }
 0x11b   : > { %5065 = vmatmul.mubr.msk.f32.gmra.mrb[24].mxu1 %vm273_vm0, %v6337_v49  ;;  %5318 = vmatmul.mubr.msk.f32.gmra.mrb[6].mxu0 %vm273_vm0, %v3549_v27  ;;  %v1856_v49 = vld [vmem:[%s5725_s28 + $0xc3] sm:$0xff] }
 0x11c   : > { %5067 = vmatprep.mubr.msk.f32.mxu1 %vm273_vm0, %v6341_v53  ;;  %5320 = vmatprep.mubr.msk.f32.mxu0 %vm273_vm0, %v3550_v11  ;;  %v1857_v53 = vld [vmem:[%s5725_s28 + $0xcb] sm:$0xff] }
 0x11f   : > { %5068 = vmatmul.mubr.msk.f32.gmra.mrb[26].mxu1 %vm273_vm0, %v6351_v57  ;;  %5321 = vmatmul.mubr.msk.f32.gmra.mrb[8].mxu0 %vm273_vm0, %v3551_v28  ;;  %v1858_v57 = vld [vmem:[%s5725_s28 + $0xd3] sm:$0xff] }
 0x120   : > { %5070 = vmatprep.mubr.msk.f32.mxu1 %vm273_vm0, %v6355_v61  ;;  %5323 = vmatprep.mubr.msk.f32.mxu0 %vm273_vm0, %v3552_v29  ;;  %v1859_v61 = vld [vmem:[%s5725_s28 + $0xdb] sm:$0xff] }
 0x123   : > { %5071 = vmatmul.mubr.msk.f32.gmra.mrb[28].mxu1 %vm273_vm0, %v6365_v2  ;;  %5324 = vmatmul.mubr.msk.f32.gmra.mrb[10].mxu0 %vm273_vm0, %v3553_v30  ;;  %v1860_v2 = vld [vmem:[%s5725_s28 + $0xe3] sm:$0xff]  ;;  %v6635_v30 = vld [vmem:[%s6805_s2] ss:$0 sm:$0xff] }
 0x124   : > { %5073 = vmatprep.mubr.msk.f32.mxu1 %vm273_vm0, %v6369_v47  ;;  %5326 = vmatprep.mubr.msk.f32.mxu0 %vm273_vm0, %v3554_v31  ;;  %v1861_v47 = vld [vmem:[%s5725_s28 + $0xeb] sm:$0xff] }
 0x127   : > { %5074 = vmatmul.mubr.msk.f32.gmra.mrb[30].mxu1 %vm273_vm0, %v6379_v48  ;;  %5327 = vmatmul.mubr.msk.f32.gmra.mrb[12].mxu0 %vm273_vm0, %v3555_v32  ;;  %v1862_v48 = vld [vmem:[%s5725_s28 + $0xf3] sm:$0xff] }
 0x128   : > { %5076 = vmatprep.mubr.msk.f32.mxu1 %vm273_vm0, %v6383_v52  ;;  %5329 = vmatprep.mubr.msk.f32.mxu0 %vm273_vm0, %v3556_v33  ;;  %v1863_v52 = vld [vmem:[%s5725_s28 + $0xfb] sm:$0xff] }
 0x129   : > { %v6641_v33 = vld [vmem:[%s6806_s3] ss:$0 sm:$0xff] }
 0x12b   : > { %5077 = vmatmul.mubr.msk.f32.gmra.mrb[32].mxu1 %vm273_vm0, %v6393_v56  ;;  %5330 = vmatmul.mubr.msk.f32.gmra.mrb[14].mxu0 %vm273_vm0, %v3557_v34  ;;  %v1864_v56 = vld [vmem:[%s5725_s28 + $0x103] sm:$0xff] }
 0x12c   : > { %5079 = vmatprep.mubr.msk.f32.mxu1 %vm273_vm0, %v1441_v35  ;;  %5332 = vmatprep.mubr.msk.f32.mxu0 %vm273_vm0, %v3558_v36 }
 0x12f   : > { %5080 = vmatmul.mubr.msk.f32.gmra.mrb[34].mxu1 %vm273_vm0, %v1442_v37  ;;  %5333 = vmatmul.mubr.msk.f32.gmra.mrb[16].mxu0 %vm273_vm0, %v3559_v38 }
 0x130   : > { %5111 = vmatprep.mubr.msk.f32.mxu1 %vm273_vm0, %v1852_v39  ;;  %5335 = vmatprep.mubr.msk.f32.mxu0 %vm273_vm0, %v3560_v40 }
 0x133   : > { %5112 = vmatmul.mubr.msk.f32.vlgmr.msra.gmra.mrb[18].mxu1 %vm273_vm0, %v1853_v41  ;;  %5336 = vmatmul.mubr.msk.f32.gmra.mrb[18].mxu0 %vm273_vm0, %v3561_v42 }
 0x134   : > { %5114 = vmatprep.mubr.msk.f32.mxu1 %vm273_vm0, %v1854_v43  ;;  %5338 = vmatprep.mubr.msk.f32.mxu0 %vm273_vm0, %v3562_v44 }
 0x137   : > { %5115 = vmatmul.mubr.msk.f32.gmra.mrb[20].mxu1 %vm273_vm0, %v1855_v45  ;;  %5339 = vmatmul.mubr.msk.f32.gmra.mrb[20].mxu0 %vm273_vm0, %v3563_v46 }
 0x138   : > { %5117 = vmatprep.mubr.msk.f32.mxu1 %vm273_vm0, %v1856_v49  ;;  %5341 = vmatprep.mubr.msk.f32.mxu0 %vm273_vm0, %v3564_v51 }
 0x13b   : > { %5118 = vmatmul.mubr.msk.f32.gmra.mrb[22].mxu1 %vm273_vm0, %v1857_v53  ;;  %5342 = vmatmul.mubr.msk.f32.gmra.mrb[22].mxu0 %vm273_vm0, %v3565_v55 }
 0x13c   : > { %5120 = vmatprep.mubr.msk.f32.mxu1 %vm273_vm0, %v1858_v57  ;;  %5344 = vmatprep.mubr.msk.f32.mxu0 %vm273_vm0, %v3566_v59 }
 0x13f   : > { %5121 = vmatmul.mubr.msk.f32.gmra.mrb[24].mxu1 %vm273_vm0, %v1859_v61  ;;  %5345 = vmatmul.mubr.msk.f32.gmra.mrb[24].mxu0 %vm273_vm0, %v3567_v63 }
 0x140   : > { %5123 = vmatprep.mubr.msk.f32.mxu1 %vm273_vm0, %v1860_v2  ;;  %5347 = vmatprep.mubr.msk.f32.mxu0 %vm273_vm0, %v3568_v4 }
 0x143   : > { %5124 = vmatmul.mubr.msk.f32.gmra.mrb[26].mxu1 %vm273_vm0, %v1861_v47  ;;  %5348 = vmatmul.mubr.msk.f32.gmra.mrb[26].mxu0 %vm273_vm0, %v3569_v6 }
 0x144   : > { %5126 = vmatprep.mubr.msk.f32.mxu1 %vm273_vm0, %v1862_v48  ;;  %5350 = vmatprep.mubr.msk.f32.mxu0 %vm273_vm0, %v3570_v50 }
 0x147   : > { %5127 = vmatmul.mubr.msk.f32.gmra.mrb[28].mxu1 %vm273_vm0, %v1863_v52  ;;  %5351 = vmatmul.mubr.msk.f32.gmra.mrb[28].mxu0 %vm273_vm0, %v3571_v54 }
 0x148   : > { %5129 = vmatprep.mubr.msk.f32.mxu1 %vm273_vm0, %v1864_v56  ;;  %5353 = vmatprep.mubr.msk.f32.mxu0 %vm273_vm0, %v3572_v58 }
 0x14b   : > { %5130 = vmatmul.mubr.msk.f32.gmra.mrb[30].mxu1 %vm273_vm0, %v1865_v60  ;;  %5354 = vmatmul.mubr.msk.f32.gmra.mrb[30].mxu0 %vm273_vm0, %v3573_v62 }
 0x14c   : > { %5132 = vmatprep.mubr.msk.f32.mxu1 %vm273_vm0, %v1866_v0  ;;  %5356 = vmatprep.mubr.msk.f32.mxu0 %vm273_vm0, %v3574_v3 }
 0x14f   : > { %5133 = vmatmul.mubr.msk.f32.gmra.mrb[32].mxu1 %vm273_vm0, %v1867_v5  ;;  %5357 = vmatmul.mubr.msk.f32.gmra.mrb[32].mxu0 %vm273_vm0, %v3575_v1 }
 0x150   : > { %5135 = vmatprep.mubr.msk.f32.mxu1 %vm273_vm0, %v1868_v7  ;;  %5359 = vmatprep.mubr.msk.f32.mxu0 %vm273_vm0, %v3576_v8 }
 0x153   : > { %5136 = vmatmul.mubr.msk.f32.gmra.mrb[34].mxu1 %vm273_vm0, %v1869_v9  ;;  %5360 = vmatmul.mubr.msk.f32.gmra.mrb[34].mxu0 %vm273_vm0, %v3577_v10 }
 0x1be   : > { %v5030_v12 = vpop.f32.mrb[0].mxu1 }
 0x1bf   : > { %v1619_v13 = vpop.f32.mrb[1].mxu1 }
 0x1c2   : > { %v5033_v14 = vpop.f32.mrb[2].mxu1 }
 0x1c3   : > { %v1629_v15 = vpop.f32.mrb[3].mxu1 }
 0x1c6   : > { %v5036_v16 = vpop.f32.mrb[4].mxu1 }
 0x1c7   : > { %v1639_v17 = vpop.f32.mrb[5].mxu1 }
 0x1ca   : > { %v5039_v18 = vpop.f32.mrb[6].mxu1 }
 0x1cb   : > { %v1649_v19 = vpop.f32.mrb[7].mxu1 }
 0x1ce   : > { %v5042_v20 = vpop.f32.mrb[8].mxu1 }
 0x1cf   : > { %v1659_v21 = vpop.f32.mrb[9].mxu1 }
 0x1d2   : > { %v6616_v22 = vpop.f32.mrb[10].mxu1 }
 0x1d3   : > { %v6618_v23 = vpop.f32.mrb[11].mxu1 }
 0x1d6   : > { %v6620_v24 = vpop.f32.mrb[12].mxu1 }
 0x1d7   : > { %v6622_v25 = vpop.f32.mrb[13].mxu1 }
 0x1da   : > { %v6624_v26 = vpop.f32.mrb[14].mxu1 }
 0x1db   : > { %v6626_v27 = vpop.f32.mrb[15].mxu1 }
 0x1de   : > { %v6628_v11 = vpop.f32.mrb[16].mxu1 }
 0x1df   : > { %v6630_v28 = vpop.f32.mrb[17].mxu1 }
 0x1e2   : > { %v5310_v29 = vpop.f32.mrb[0].mxu0 }
 0x1e3   : > { %v5364_v31 = vadd.f32 %v5310_v29, %v5030_v12  ;;  %v3754_v32 = vpop.f32.mrb[1].mxu0 }
 0x1e4   : > { %v5365_v34 = vadd.f32 %v3754_v32, %v1619_v13 }
 0x1e5   : > { %v3977_v35 = vmul.f32 %v5364_v31, %v6635_v30 }
 0x1e6   : > { %v3976_v36 = vmul.f32 %v5365_v34, %v6635_v30  ;;  %v5313_v37 = vpop.f32.mrb[2].mxu0 }
 0x1e7   : > { %v4020_v38 = vadd.f32 %v6641_v33, %v3977_v35  ;;  %v5366_v39 = vadd.f32 %v5313_v37, %v5033_v14  ;;  %v3764_v40 = vpop.f32.mrb[3].mxu0 }
 0x1e8   : > { %v4019_v41 = vadd.f32 %v6641_v33, %v3976_v36  ;;  %v5367_v42 = vadd.f32 %v3764_v40, %v1629_v15 }
 0x1e9   : > { %v4056_v43 = vmax.f32 %v4020_v38, 0.0  ;;  %v3979_v44 = vmul.f32 %v5366_v39, %v6635_v30 }
 0x1ea   : > { %v4055_v45 = vmax.f32 %v4019_v41, 0.0  ;;  %v3978_v46 = vmul.f32 %v5367_v42, %v6635_v30  ;;  %v5316_v49 = vpop.f32.mrb[4].mxu0 }
 0x1eb   : > { %4092 = vst.msk [vmem:[%s6649_s22 + $0x8] sm:$0xff] %vm273_vm0, %v4056_v43  ;;  %v4022_v51 = vadd.f32 %v6641_v33, %v3979_v44  ;;  %v5368_v53 = vadd.f32 %v5316_v49, %v5036_v16  ;;  %v3774_v55 = vpop.f32.mrb[5].mxu0 }
 0x1ec   : > { %4091 = vst.msk [vmem:[%s6649_s22] sm:$0xff] %vm273_vm0, %v4055_v45  ;;  %v4021_v57 = vadd.f32 %v6641_v33, %v3978_v46  ;;  %v5369_v59 = vadd.f32 %v3774_v55, %v1639_v17 }
 0x1ed   : > { %v4058_v61 = vmax.f32 %v4022_v51, 0.0  ;;  %v3981_v63 = vmul.f32 %v5368_v53, %v6635_v30 }
 0x1ee   : > { %v4057_v2 = vmax.f32 %v4021_v57, 0.0  ;;  %v3980_v4 = vmul.f32 %v5369_v59, %v6635_v30  ;;  %v5319_v47 = vpop.f32.mrb[6].mxu0 }
 0x1ef   : > { %4094 = vst.msk [vmem:[%s6649_s22 + $0x18] sm:$0xff] %vm273_vm0, %v4058_v61  ;;  %v4024_v6 = vadd.f32 %v6641_v33, %v3981_v63  ;;  %v5370_v48 = vadd.f32 %v5319_v47, %v5039_v18  ;;  %v3784_v50 = vpop.f32.mrb[7].mxu0 }
 0x1f0   : > { %4093 = vst.msk [vmem:[%s6649_s22 + $0x10] sm:$0xff] %vm273_vm0, %v4057_v2  ;;  %v4023_v52 = vadd.f32 %v6641_v33, %v3980_v4  ;;  %v5371_v54 = vadd.f32 %v3784_v50, %v1649_v19 }
 0x1f1   : > { %v4060_v56 = vmax.f32 %v4024_v6, 0.0  ;;  %v3983_v58 = vmul.f32 %v5370_v48, %v6635_v30 }
 0x1f2   : > { %v4059_v60 = vmax.f32 %v4023_v52, 0.0  ;;  %v3982_v62 = vmul.f32 %v5371_v54, %v6635_v30  ;;  %v5322_v0 = vpop.f32.mrb[8].mxu0 }
 0x1f3   : > { %4096 = vst.msk [vmem:[%s6649_s22 + $0x28] sm:$0xff] %vm273_vm0, %v4060_v56  ;;  %v4026_v3 = vadd.f32 %v6641_v33, %v3983_v58  ;;  %v5372_v5 = vadd.f32 %v5322_v0, %v5042_v20  ;;  %v3794_v1 = vpop.f32.mrb[9].mxu0 }
 0x1f4   : > { %4095 = vst.msk [vmem:[%s6649_s22 + $0x20] sm:$0xff] %vm273_vm0, %v4059_v60  ;;  %v4025_v7 = vadd.f32 %v6641_v33, %v3982_v62  ;;  %v5373_v8 = vadd.f32 %v3794_v1, %v1659_v21 }
 0x1f5   : > { %v4062_v9 = vmax.f32 %v4026_v3, 0.0  ;;  %v3985_v10 = vmul.f32 %v5372_v5, %v6635_v30 }
 0x1f6   : > { %v4061_v12 = vmax.f32 %v4025_v7, 0.0  ;;  %v3984_v13 = vmul.f32 %v5373_v8, %v6635_v30  ;;  %v5325_v14 = vpop.f32.mrb[10].mxu0 }
 0x1f7   : > { %4098 = vst.msk [vmem:[%s6649_s22 + $0x38] sm:$0xff] %vm273_vm0, %v4062_v9  ;;  %v4028_v15 = vadd.f32 %v6641_v33, %v3985_v10  ;;  %v5374_v16 = vadd.f32 %v5325_v14, %v6616_v22  ;;  %v3804_v17 = vpop.f32.mrb[11].mxu0 }
 0x1f8   : > { %4097 = vst.msk [vmem:[%s6649_s22 + $0x30] sm:$0xff] %vm273_vm0, %v4061_v12  ;;  %v4027_v18 = vadd.f32 %v6641_v33, %v3984_v13  ;;  %v5375_v19 = vadd.f32 %v3804_v17, %v6618_v23 }
 0x1f9   : > { %v4064_v20 = vmax.f32 %v4028_v15, 0.0  ;;  %v3987_v21 = vmul.f32 %v5374_v16, %v6635_v30 }
 0x1fa   : > { %v4063_v29 = vmax.f32 %v4027_v18, 0.0  ;;  %v3986_v31 = vmul.f32 %v5375_v19, %v6635_v30  ;;  %v5328_v32 = vpop.f32.mrb[12].mxu0 }
 0x1fb   : > { %4100 = vst.msk [vmem:[%s6649_s22 + $0x48] sm:$0xff] %vm273_vm0, %v4064_v20  ;;  %v4030_v22 = vadd.f32 %v6641_v33, %v3987_v21  ;;  %v5376_v34 = vadd.f32 %v5328_v32, %v6620_v24  ;;  %v3814_v35 = vpop.f32.mrb[13].mxu0 }
 0x1fc   : > { %4099 = vst.msk [vmem:[%s6649_s22 + $0x40] sm:$0xff] %vm273_vm0, %v4063_v29  ;;  %v4029_v23 = vadd.f32 %v6641_v33, %v3986_v31  ;;  %v5377_v36 = vadd.f32 %v3814_v35, %v6622_v25 }
 0x1fd   : > { %v4066_v37 = vmax.f32 %v4030_v22, 0.0  ;;  %v3989_v38 = vmul.f32 %v5376_v34, %v6635_v30 }
 0x1fe   : > { %v4065_v39 = vmax.f32 %v4029_v23, 0.0  ;;  %v3988_v40 = vmul.f32 %v5377_v36, %v6635_v30  ;;  %v5331_v41 = vpop.f32.mrb[14].mxu0 }
 0x1ff   : > { %4102 = vst.msk [vmem:[%s6649_s22 + $0x58] sm:$0xff] %vm273_vm0, %v4066_v37  ;;  %v4032_v24 = vadd.f32 %v6641_v33, %v3989_v38  ;;  %v5378_v42 = vadd.f32 %v5331_v41, %v6624_v26  ;;  %v3824_v43 = vpop.f32.mrb[15].mxu0 }
 0x200   : > { %4101 = vst.msk [vmem:[%s6649_s22 + $0x50] sm:$0xff] %vm273_vm0, %v4065_v39  ;;  %v4031_v25 = vadd.f32 %v6641_v33, %v3988_v40  ;;  %v5379_v44 = vadd.f32 %v3824_v43, %v6626_v27 }
 0x201   : > { %v4068_v45 = vmax.f32 %v4032_v24, 0.0  ;;  %v3991_v46 = vmul.f32 %v5378_v42, %v6635_v30 }
 0x202   : > { %v4067_v49 = vmax.f32 %v4031_v25, 0.0  ;;  %v3990_v51 = vmul.f32 %v5379_v44, %v6635_v30  ;;  %v5334_v53 = vpop.f32.mrb[16].mxu0 }
 0x203   : > { %4104 = vst.msk [vmem:[%s6649_s22 + $0x68] sm:$0xff] %vm273_vm0, %v4068_v45  ;;  %v4034_v55 = vadd.f32 %v6641_v33, %v3991_v46  ;;  %v5380_v26 = vadd.f32 %v5334_v53, %v6628_v11  ;;  %v3834_v57 = vpop.f32.mrb[17].mxu0 }
 0x204   : > { %4103 = vst.msk [vmem:[%s6649_s22 + $0x60] sm:$0xff] %vm273_vm0, %v4067_v49  ;;  %v4033_v27 = vadd.f32 %v6641_v33, %v3990_v51  ;;  %v5381_v59 = vadd.f32 %v3834_v57, %v6630_v28 }
 0x205   : > { %v4070_v61 = vmax.f32 %v4034_v55, 0.0  ;;  %v3993_v63 = vmul.f32 %v5380_v26, %v6635_v30 }
 0x206   : > { %v4069_v2 = vmax.f32 %v4033_v27, 0.0  ;;  %v3992_v4 = vmul.f32 %v5381_v59, %v6635_v30  ;;  %v5113_v47 = vpop.f32.mrb[18].mxu1  ;;  %v5337_v6 = vpop.f32.mrb[18].mxu0 }
 0x207   : > { %4106 = vst.msk [vmem:[%s6649_s22 + $0x78] sm:$0xff] %vm273_vm0, %v4070_v61  ;;  %v4036_v11 = vadd.f32 %v6641_v33, %v3993_v63  ;;  %v5382_v48 = vadd.f32 %v5337_v6, %v5113_v47  ;;  %v2136_v50 = vpop.f32.mrb[19].mxu1  ;;  %v3844_v52 = vpop.f32.mrb[19].mxu0 }
 0x208   : > { %4105 = vst.msk [vmem:[%s6649_s22 + $0x70] sm:$0xff] %vm273_vm0, %v4069_v2  ;;  %v4035_v28 = vadd.f32 %v6641_v33, %v3992_v4  ;;  %v5383_v54 = vadd.f32 %v3844_v52, %v2136_v50 }
 0x209   : > { %v4072_v56 = vmax.f32 %v4036_v11, 0.0  ;;  %v3995_v58 = vmul.f32 %v5382_v48, %v6635_v30 }
 0x20a   : > { %v4071_v60 = vmax.f32 %v4035_v28, 0.0  ;;  %v3994_v62 = vmul.f32 %v5383_v54, %v6635_v30  ;;  %v5116_v0 = vpop.f32.mrb[20].mxu1  ;;  %v5340_v3 = vpop.f32.mrb[20].mxu0 }
 0x20b   : > { %4108 = vst.msk [vmem:[%s6649_s22 + $0x88] sm:$0xff] %vm273_vm0, %v4072_v56  ;;  %v4038_v5 = vadd.f32 %v6641_v33, %v3995_v58  ;;  %v5384_v1 = vadd.f32 %v5340_v3, %v5116_v0  ;;  %v2146_v7 = vpop.f32.mrb[21].mxu1  ;;  %v3854_v8 = vpop.f32.mrb[21].mxu0 }
 0x20c   : > { %4107 = vst.msk [vmem:[%s6649_s22 + $0x80] sm:$0xff] %vm273_vm0, %v4071_v60  ;;  %v4037_v9 = vadd.f32 %v6641_v33, %v3994_v62  ;;  %v5385_v10 = vadd.f32 %v3854_v8, %v2146_v7 }
 0x20d   : > { %v4074_v12 = vmax.f32 %v4038_v5, 0.0  ;;  %v3997_v13 = vmul.f32 %v5384_v1, %v6635_v30 }
 0x20e   : > { %v4073_v14 = vmax.f32 %v4037_v9, 0.0  ;;  %v3996_v15 = vmul.f32 %v5385_v10, %v6635_v30  ;;  %v5119_v16 = vpop.f32.mrb[22].mxu1  ;;  %v5343_v17 = vpop.f32.mrb[22].mxu0 }
 0x20f   : > { %4110 = vst.msk [vmem:[%s6649_s22 + $0x98] sm:$0xff] %vm273_vm0, %v4074_v12  ;;  %v4040_v18 = vadd.f32 %v6641_v33, %v3997_v13  ;;  %v5386_v19 = vadd.f32 %v5343_v17, %v5119_v16  ;;  %v2156_v20 = vpop.f32.mrb[23].mxu1  ;;  %v3864_v21 = vpop.f32.mrb[23].mxu0 }
 0x210   : > { %4109 = vst.msk [vmem:[%s6649_s22 + $0x90] sm:$0xff] %vm273_vm0, %v4073_v14  ;;  %v4039_v29 = vadd.f32 %v6641_v33, %v3996_v15  ;;  %v5387_v31 = vadd.f32 %v3864_v21, %v2156_v20 }
 0x211   : > { %v4076_v32 = vmax.f32 %v4040_v18, 0.0  ;;  %v3999_v22 = vmul.f32 %v5386_v19, %v6635_v30 }
 0x212   : > { %v4075_v34 = vmax.f32 %v4039_v29, 0.0  ;;  %v3998_v35 = vmul.f32 %v5387_v31, %v6635_v30  ;;  %v5122_v23 = vpop.f32.mrb[24].mxu1  ;;  %v5346_v36 = vpop.f32.mrb[24].mxu0 }
 0x213   : > { %4112 = vst.msk [vmem:[%s6649_s22 + $0xa8] sm:$0xff] %vm273_vm0, %v4076_v32  ;;  %v4042_v37 = vadd.f32 %v6641_v33, %v3999_v22  ;;  %v5388_v38 = vadd.f32 %v5346_v36, %v5122_v23  ;;  %v2166_v39 = vpop.f32.mrb[25].mxu1  ;;  %v3874_v40 = vpop.f32.mrb[25].mxu0 }
 0x214   : > { %4111 = vst.msk [vmem:[%s6649_s22 + $0xa0] sm:$0xff] %vm273_vm0, %v4075_v34  ;;  %v4041_v41 = vadd.f32 %v6641_v33, %v3998_v35  ;;  %v5389_v24 = vadd.f32 %v3874_v40, %v2166_v39 }
 0x215   : > { %v4078_v42 = vmax.f32 %v4042_v37, 0.0  ;;  %v4001_v43 = vmul.f32 %v5388_v38, %v6635_v30 }
 0x216   : > { %v4077_v25 = vmax.f32 %v4041_v41, 0.0  ;;  %v4000_v44 = vmul.f32 %v5389_v24, %v6635_v30  ;;  %v5125_v45 = vpop.f32.mrb[26].mxu1  ;;  %v5349_v46 = vpop.f32.mrb[26].mxu0 }
 0x217   : > { %4114 = vst.msk [vmem:[%s6649_s22 + $0xb8] sm:$0xff] %vm273_vm0, %v4078_v42  ;;  %v4044_v49 = vadd.f32 %v6641_v33, %v4001_v43  ;;  %v5390_v51 = vadd.f32 %v5349_v46, %v5125_v45  ;;  %v2176_v53 = vpop.f32.mrb[27].mxu1  ;;  %v3884_v55 = vpop.f32.mrb[27].mxu0 }
 0x218   : > { %4113 = vst.msk [vmem:[%s6649_s22 + $0xb0] sm:$0xff] %vm273_vm0, %v4077_v25  ;;  %v4043_v26 = vadd.f32 %v6641_v33, %v4000_v44  ;;  %v5391_v57 = vadd.f32 %v3884_v55, %v2176_v53 }
 0x219   : > { %v4080_v27 = vmax.f32 %v4044_v49, 0.0  ;;  %v4003_v59 = vmul.f32 %v5390_v51, %v6635_v30 }
 0x21a   : > { %v4079_v61 = vmax.f32 %v4043_v26, 0.0  ;;  %v4002_v63 = vmul.f32 %v5391_v57, %v6635_v30  ;;  %v5128_v2 = vpop.f32.mrb[28].mxu1  ;;  %v5352_v4 = vpop.f32.mrb[28].mxu0 }
 0x21b   : > { %4116 = vst.msk [vmem:[%s6649_s22 + $0xc8] sm:$0xff] %vm273_vm0, %v4080_v27  ;;  %v4046_v47 = vadd.f32 %v6641_v33, %v4003_v59  ;;  %v5392_v6 = vadd.f32 %v5352_v4, %v5128_v2  ;;  %v2186_v11 = vpop.f32.mrb[29].mxu1  ;;  %v3894_v48 = vpop.f32.mrb[29].mxu0 }
 0x21c   : > { %4115 = vst.msk [vmem:[%s6649_s22 + $0xc0] sm:$0xff] %vm273_vm0, %v4079_v61  ;;  %v4045_v50 = vadd.f32 %v6641_v33, %v4002_v63  ;;  %v5393_v52 = vadd.f32 %v3894_v48, %v2186_v11 }
 0x21d   : > { %v4082_v28 = vmax.f32 %v4046_v47, 0.0  ;;  %v4005_v54 = vmul.f32 %v5392_v6, %v6635_v30 }
 0x21e   : > { %v4081_v56 = vmax.f32 %v4045_v50, 0.0  ;;  %v4004_v58 = vmul.f32 %v5393_v52, %v6635_v30  ;;  %v5131_v60 = vpop.f32.mrb[30].mxu1  ;;  %v5355_v62 = vpop.f32.mrb[30].mxu0 }
 0x21f   : > { %4118 = vst.msk [vmem:[%s6649_s22 + $0xd8] sm:$0xff] %vm273_vm0, %v4082_v28  ;;  %v4048_v0 = vadd.f32 %v6641_v33, %v4005_v54  ;;  %v5394_v3 = vadd.f32 %v5355_v62, %v5131_v60  ;;  %v2196_v5 = vpop.f32.mrb[31].mxu1  ;;  %v3904_v1 = vpop.f32.mrb[31].mxu0 }
 0x220   : > { %4117 = vst.msk [vmem:[%s6649_s22 + $0xd0] sm:$0xff] %vm273_vm0, %v4081_v56  ;;  %v4047_v7 = vadd.f32 %v6641_v33, %v4004_v58  ;;  %v5395_v8 = vadd.f32 %v3904_v1, %v2196_v5 }
 0x221   : > { %v4084_v9 = vmax.f32 %v4048_v0, 0.0  ;;  %v4007_v10 = vmul.f32 %v5394_v3, %v6635_v30 }
 0x222   : > { %v4083_v12 = vmax.f32 %v4047_v7, 0.0  ;;  %v4006_v13 = vmul.f32 %v5395_v8, %v6635_v30  ;;  %v5134_v14 = vpop.f32.mrb[32].mxu1  ;;  %v5358_v15 = vpop.f32.mrb[32].mxu0 }
 0x223   : > { %4120 = vst.msk [vmem:[%s6649_s22 + $0xe8] sm:$0xff] %vm273_vm0, %v4084_v9  ;;  %v4050_v16 = vadd.f32 %v6641_v33, %v4007_v10  ;;  %v5396_v17 = vadd.f32 %v5358_v15, %v5134_v14  ;;  %v2206_v18 = vpop.f32.mrb[33].mxu1  ;;  %v3914_v19 = vpop.f32.mrb[33].mxu0 }
 0x224   : > { %4119 = vst.msk [vmem:[%s6649_s22 + $0xe0] sm:$0xff] %vm273_vm0, %v4083_v12  ;;  %v4049_v20 = vadd.f32 %v6641_v33, %v4006_v13  ;;  %v5397_v21 = vadd.f32 %v3914_v19, %v2206_v18 }
 0x225   : > { %v4086_v29 = vmax.f32 %v4050_v16, 0.0  ;;  %v4009_v31 = vmul.f32 %v5396_v17, %v6635_v30 }
 0x226   : > { %v4085_v32 = vmax.f32 %v4049_v20, 0.0  ;;  %v4008_v22 = vmul.f32 %v5397_v21, %v6635_v30  ;;  %v5137_v34 = vpop.f32.mrb[34].mxu1  ;;  %v5361_v35 = vpop.f32.mrb[34].mxu0 }
 0x227   : > { %4122 = vst.msk [vmem:[%s6649_s22 + $0xf8] sm:$0xff] %vm273_vm0, %v4086_v29  ;;  %v4052_v23 = vadd.f32 %v6641_v33, %v4009_v31  ;;  %v5398_v36 = vadd.f32 %v5361_v35, %v5137_v34  ;;  %v2216_v37 = vpop.f32.mrb[35].mxu1  ;;  %v3924_v38 = vpop.f32.mrb[35].mxu0 }
 0x228   : > { %4121 = vst.msk [vmem:[%s6649_s22 + $0xf0] sm:$0xff] %vm273_vm0, %v4085_v32  ;;  %v4051_v39 = vadd.f32 %v6641_v33, %v4008_v22  ;;  %v5399_v40 = vadd.f32 %v3924_v38, %v2216_v37 }
 0x229   : > { %v4088_v41 = vmax.f32 %v4052_v23, 0.0  ;;  %v4011_v24 = vmul.f32 %v5398_v36, %v6635_v30 }
 0x22a   : > { %v4087_v42 = vmax.f32 %v4051_v39, 0.0  ;;  %v4010_v43 = vmul.f32 %v5399_v40, %v6635_v30 }
 0x22b   : > { %4124 = vst.msk [vmem:[%s6649_s22 + $0x108] sm:$0xff] %vm273_vm0, %v4088_v41  ;;  %v4054_v25 = vadd.f32 %v6641_v33, %v4011_v24 }
 0x22c   : > { %4123 = vst.msk [vmem:[%s6649_s22 + $0x100] sm:$0xff] %vm273_vm0, %v4087_v42  ;;  %v4053_v44 = vadd.f32 %v6641_v33, %v4010_v43 }
 0x22d   : > { %v4090_v45 = vmax.f32 %v4054_v25, 0.0 }
 0x22e   : > { %v4089_v46 = vmax.f32 %v4053_v44, 0.0 }
 0x22f   : > { %4126 = vst.msk [vmem:[%s6649_s22 + $0x118] sm:$0xff] %vm273_vm0, %v4090_v45 }
 0x230   : > { %4125 = vst.msk [vmem:[%s6649_s22 + $0x110] sm:$0xff] %vm273_vm0, %v4089_v46 }
 0x231 PF: > { %s14_s15 = sadd.s32 1, %s5668_s15  }
 0x232   : > { %p11_p4 = scmp.ge.s32.totalorder %s14_s15, 4  }
 0x234   :  { %13 = sbr.rel (!%p11_p4) target bundleno = 1 (0x1), region = 74 }

// kernel: encoder_forward.6
= control target key start
LH: loop header
LB: loop body
LE: loop exit
PB: predicated region body
PF: predicated region fallthrough
CT: control target
= control target key end

     0   :  { %s6563_s12 = smov 0   ;;  %s8970_s0 = inlined_call_operand.vmem [shape: f32[2,328,8], index: 0, kind: input, shape index: {}]   ;;  %s8971_s1 = inlined_call_operand.vmem [shape: f32[9,8,16], index: 1, kind: input, shape index: {}]   ;;  %s8972_s2 = inlined_call_operand.vmem [shape: f32[2,8,16], index: 2, kind: output, shape index: {0}]   ;;  %s8973_s3 = inlined_call_operand.vmem [shape: f32[2,8,16], index: 3, kind: output, shape index: {1}]  }
   0x1 LB: > { %s4985_s13 = sadd.s32 4294967295, %s6541_s12   ;;  %p4989_p0 = scmp.ge.s32.totalorder %s6541_s12, 1  ;;  %s6541_s12 = sphi %s6563_s12, %s14_s12  }
   0x2   : > { %p140_p1 = scmp.lt.s32.totalorder %s6541_s12, 3 }
   0x4   : > { %p141_p2 = pnand %p4989_p0, %p140_p1 }
   0x6   : > { %144 = sbr.rel (%p141_p2) target bundleno = 595 (0x253), region = 28 }
   0xd   : > { %v4993_v0 = vld [vmem:[%s8971_s1 + $0x8] sm:$0xff]  ;;  %v6577_v1 = vld [vmem:[%s8971_s1 + $0x20] sm:$0xff]  ;;  %p167_p3 = scmp.lt.s32.totalorder %s4985_s13, 1  ;;  %vm255_vm0 = vcmask 64512   ;;  %v6608_v10 = vld [vmem:[%s8971_s1 + $0x30] sm:$0xff] }
   0xe   : > { %v216_v2 = vld [vmem:[%s8971_s1] sm:$0xff]  ;;  %5660 = vmatprep.subr.mxu1 %v4993_v0  ;;  %5884 = vmatprep.subr.mxu0 %v6577_v1  ;;  %v5177_v3 = vld [vmem:[%s8971_s1 + $0x28] sm:$0xff]  ;;  %v6613_v11 = vld [vmem:[%s8971_s1 + $0x10] sm:$0xff] }
   0xf   : > { %5661 = vmatpush3.msra.mxu1 %v4993_v0  ;;  %5885 = vmatpush3.msra.mxu0 %v6577_v1  ;;  %s9462_s13 = smov (!%p167_p3, %s4985_s13), 1  ;;  %v6692_v48 = vld [vmem:[%s8971_s1 + $0x38] sm:$0xff] }
  0x10   : > { %5716 = vmatprep.subr.mxu1 %v216_v2  ;;  %5940 = vmatprep.subr.mxu0 %v5177_v3  ;;  %s6454_s22 = smul.u32 328, %s9462_s13  ;;  %s4991_s9 = sshll.u32 %s9462_s13, 3 }
  0x11   : > { %s175_s14 = scalar_lea.vmem %s8972_s2, %s4991_s9  ;;  %s179_s17 = scalar_lea.vmem %s8973_s3, %s4991_s9 }
  0x12   : > { %s6593_s25 = scalar_lea.vmem %s8970_s0, %s6454_s22 }
  0x13   : > { %v217_v4 = vld [vmem:[%s6593_s25 + $0x1] sm:$0xff]  ;;  %v1816_v5 = vld [vmem:[%s6593_s25 + $0x13] sm:$0xff]  ;;  %v218_v6 = vld [vmem:[%s6593_s25 + $0x9] sm:$0xff] }
  0x14   : > { %5662 = vmatprep.mubr.msk.f32.mxu1 %vm255_vm0, %v217_v4  ;;  %5886 = vmatprep.mubr.msk.f32.mxu0 %vm255_vm0, %v1816_v5  ;;  %v1817_v7 = vld [vmem:[%s6593_s25 + $0x1b] sm:$0xff]  ;;  %v219_v8 = vld [vmem:[%s6593_s25 + $0x11] sm:$0xff]  ;;  %v1818_v9 = vld [vmem:[%s6593_s25 + $0x23] sm:$0xff] }
  0x15   : > { %5663 = vmatmul.mubr.msk.f32.vlgmr.msra.gmra.mrb[0].mxu1 %vm255_vm0, %v218_v6  ;;  %5887 = vmatmul.mubr.msk.f32.vlgmr.msra.gmra.mrb[0].mxu0 %vm255_vm0, %v1817_v7  ;;  %v220_v12 = vld [vmem:[%s6593_s25 + $0x19] sm:$0xff]  ;;  %v1819_v13 = vld [vmem:[%s6593_s25 + $0x2b] sm:$0xff]  ;;  %v221_v14 = vld [vmem:[%s6593_s25 + $0x21] sm:$0xff] }
  0x16   : > { %5717 = vmatpush3.msra.mxu1 %v216_v2  ;;  %5941 = vmatpush3.msra.mxu0 %v5177_v3  ;;  %v1820_v15 = vld [vmem:[%s6593_s25 + $0x33] sm:$0xff]  ;;  %v222_v16 = vld [vmem:[%s6593_s25 + $0x29] sm:$0xff]  ;;  %v1821_v17 = vld [vmem:[%s6593_s25 + $0x3b] sm:$0xff] }
  0x17   : > { %5665 = vmatprep.mubr.msk.f32.mxu1 %vm255_vm0, %v219_v8  ;;  %5889 = vmatprep.mubr.msk.f32.mxu0 %vm255_vm0, %v1818_v9  ;;  %v223_v18 = vld [vmem:[%s6593_s25 + $0x31] sm:$0xff]  ;;  %v1822_v19 = vld [vmem:[%s6593_s25 + $0x43] sm:$0xff]  ;;  %v224_v20 = vld [vmem:[%s6593_s25 + $0x39] sm:$0xff] }
  0x18   : > { %5996 = vmatprep.subr.mxu0 %v6608_v10  ;;  %5772 = vmatprep.subr.mxu1 %v6613_v11  ;;  %v1823_v21 = vld [vmem:[%s6593_s25 + $0x4b] sm:$0xff]  ;;  %v225_v22 = vld [vmem:[%s6593_s25 + $0x41] sm:$0xff]  ;;  %v1824_v23 = vld [vmem:[%s6593_s25 + $0x53] sm:$0xff] }
  0x19   : > { %5666 = vmatmul.mubr.msk.f32.gmra.mrb[2].mxu1 %vm255_vm0, %v220_v12  ;;  %5890 = vmatmul.mubr.msk.f32.gmra.mrb[2].mxu0 %vm255_vm0, %v1819_v13  ;;  %v226_v24 = vld [vmem:[%s6593_s25 + $0x49] sm:$0xff]  ;;  %v1825_v25 = vld [vmem:[%s6593_s25 + $0x5b] sm:$0xff]  ;;  %v227_v26 = vld [vmem:[%s6593_s25 + $0x51] sm:$0xff] }
  0x1a   : > { %5668 = vmatprep.mubr.msk.f32.mxu1 %vm255_vm0, %v221_v14  ;;  %5892 = vmatprep.mubr.msk.f32.mxu0 %vm255_vm0, %v1820_v15  ;;  %v1826_v27 = vld [vmem:[%s6593_s25 + $0x63] sm:$0xff]  ;;  %v228_v28 = vld [vmem:[%s6593_s25 + $0x59] sm:$0xff]  ;;  %v1827_v29 = vld [vmem:[%s6593_s25 + $0x6b] sm:$0xff] }
  0x1b   : > { %v229_v30 = vld [vmem:[%s6593_s25 + $0x61] sm:$0xff]  ;;  %v1828_v31 = vld [vmem:[%s6593_s25 + $0x73] sm:$0xff]  ;;  %v230_v32 = vld [vmem:[%s6593_s25 + $0x69] sm:$0xff] }
  0x1c   : > { %v1829_v33 = vld [vmem:[%s6593_s25 + $0x7b] sm:$0xff]  ;;  %v231_v34 = vld [vmem:[%s6593_s25 + $0x71] sm:$0xff]  ;;  %v1830_v35 = vld [vmem:[%s6593_s25 + $0x83] sm:$0xff] }
  0x1d   : > { %5669 = vmatmul.mubr.msk.f32.gmra.mrb[4].mxu1 %vm255_vm0, %v222_v16  ;;  %5893 = vmatmul.mubr.msk.f32.gmra.mrb[4].mxu0 %vm255_vm0, %v1821_v17  ;;  %v232_v36 = vld [vmem:[%s6593_s25 + $0x79] sm:$0xff]  ;;  %v1831_v37 = vld [vmem:[%s6593_s25 + $0x8b] sm:$0xff]  ;;  %v233_v38 = vld [vmem:[%s6593_s25 + $0x81] sm:$0xff] }
  0x1e   : > { %5671 = vmatprep.mubr.msk.f32.mxu1 %vm255_vm0, %v223_v18  ;;  %5895 = vmatprep.mubr.msk.f32.mxu0 %vm255_vm0, %v1822_v19  ;;  %v1832_v39 = vld [vmem:[%s6593_s25 + $0x93] sm:$0xff]  ;;  %v234_v40 = vld [vmem:[%s6593_s25 + $0x89] sm:$0xff]  ;;  %v1833_v41 = vld [vmem:[%s6593_s25 + $0x9b] sm:$0xff] }
  0x1f   : > { %v235_v42 = vld [vmem:[%s6593_s25 + $0x91] sm:$0xff]  ;;  %v236_v44 = vld [vmem:[%s6593_s25 + $0x99] sm:$0xff]  ;;  %v237_v46 = vld [vmem:[%s6593_s25 + $0xa1] sm:$0xff] }
  0x20   : > { %v2243_v43 = vld [vmem:[%s6593_s25 + $0x14] sm:$0xff]  ;;  %v2244_v45 = vld [vmem:[%s6593_s25 + $0x1c] sm:$0xff]  ;;  %v6687_v47 = vld [vmem:[%s6593_s25 + $0x24] sm:$0xff] }
  0x21   : > { %5672 = vmatmul.mubr.msk.f32.gmra.mrb[6].mxu1 %vm255_vm0, %v224_v20  ;;  %5896 = vmatmul.mubr.msk.f32.gmra.mrb[6].mxu0 %vm255_vm0, %v1823_v21  ;;  %v238_v49 = vld [vmem:[%s6593_s25 + $0xa9] sm:$0xff]  ;;  %v239_v51 = vld [vmem:[%s6593_s25 + $0xb1] sm:$0xff]  ;;  %v240_v53 = vld [vmem:[%s6593_s25 + $0xb9] sm:$0xff] }
  0x22   : > { %5674 = vmatprep.mubr.msk.f32.mxu1 %vm255_vm0, %v225_v22  ;;  %5898 = vmatprep.mubr.msk.f32.mxu0 %vm255_vm0, %v1824_v23  ;;  %v6700_v50 = vld [vmem:[%s6593_s25 + $0x2c] sm:$0xff]  ;;  %v6706_v52 = vld [vmem:[%s6593_s25 + $0x34] sm:$0xff]  ;;  %v6717_v54 = vld [vmem:[%s6593_s25 + $0x3c] sm:$0xff] }
  0x23   : > { %v241_v55 = vld [vmem:[%s6593_s25 + $0xc1] sm:$0xff]  ;;  %v242_v57 = vld [vmem:[%s6593_s25 + $0xc9] sm:$0xff]  ;;  %v243_v59 = vld [vmem:[%s6593_s25 + $0xd1] sm:$0xff] }
  0x24   : > { %v6721_v56 = vld [vmem:[%s6593_s25 + $0x44] sm:$0xff]  ;;  %v6731_v58 = vld [vmem:[%s6593_s25 + $0x4c] sm:$0xff]  ;;  %v6735_v60 = vld [vmem:[%s6593_s25 + $0x54] sm:$0xff] }
  0x25   : > { %5675 = vmatmul.mubr.msk.f32.gmra.mrb[8].mxu1 %vm255_vm0, %v226_v24  ;;  %5899 = vmatmul.mubr.msk.f32.gmra.mrb[8].mxu0 %vm255_vm0, %v1825_v25  ;;  %v244_v61 = vld [vmem:[%s6593_s25 + $0xd9] sm:$0xff]  ;;  %v245_v63 = vld [vmem:[%s6593_s25 + $0xe1] sm:$0xff]  ;;  %v246_v2 = vld [vmem:[%s6593_s25 + $0xe9] sm:$0xff] }
  0x26   : > { %5677 = vmatprep.mubr.msk.f32.mxu1 %vm255_vm0, %v227_v26  ;;  %5901 = vmatprep.mubr.msk.f32.mxu0 %vm255_vm0, %v1826_v27  ;;  %v6745_v62 = vld [vmem:[%s6593_s25 + $0x5c] sm:$0xff]  ;;  %v6749_v0 = vld [vmem:[%s6593_s25 + $0x64] sm:$0xff]  ;;  %v6759_v3 = vld [vmem:[%s6593_s25 + $0x6c] sm:$0xff] }
  0x27   : > { %v247_v4 = vld [vmem:[%s6593_s25 + $0xf1] sm:$0xff]  ;;  %v248_v6 = vld [vmem:[%s6593_s25 + $0xf9] sm:$0xff]  ;;  %v249_v8 = vld [vmem:[%s6593_s25 + $0x101] sm:$0xff] }
  0x28   : > { %v6763_v5 = vld [vmem:[%s6593_s25 + $0x74] sm:$0xff]  ;;  %v6773_v7 = vld [vmem:[%s6593_s25 + $0x7c] sm:$0xff]  ;;  %v6777_v9 = vld [vmem:[%s6593_s25 + $0x84] sm:$0xff] }
  0x29   : > { %5678 = vmatmul.mubr.msk.f32.gmra.mrb[10].mxu1 %vm255_vm0, %v228_v28  ;;  %5902 = vmatmul.mubr.msk.f32.gmra.mrb[10].mxu0 %vm255_vm0, %v1827_v29  ;;  %v6787_v12 = vld [vmem:[%s6593_s25 + $0x8c] sm:$0xff]  ;;  %v6791_v14 = vld [vmem:[%s6593_s25 + $0x94] sm:$0xff]  ;;  %v6801_v16 = vld [vmem:[%s6593_s25 + $0x9c] sm:$0xff] }
  0x2a   : > { %5680 = vmatprep.mubr.msk.f32.mxu1 %vm255_vm0, %v229_v30  ;;  %5904 = vmatprep.mubr.msk.f32.mxu0 %vm255_vm0, %v1828_v31  ;;  %v251_v13 = vld [vmem:[%s6593_s25 + $0x111] sm:$0xff]  ;;  %v252_v15 = vld [vmem:[%s6593_s25 + $0x119] sm:$0xff]  ;;  %v6805_v18 = vld [vmem:[%s6593_s25 + $0xa4] sm:$0xff] }
  0x2b   : > { %v180_v17 = vld [vmem:[%s6593_s25] sm:$0xff]  ;;  %v181_v19 = vld [vmem:[%s6593_s25 + $0x8] sm:$0xff]  ;;  %v182_v21 = vld [vmem:[%s6593_s25 + $0x10] sm:$0xff] }
  0x2c   : > { %v6815_v20 = vld [vmem:[%s6593_s25 + $0xac] sm:$0xff]  ;;  %v6819_v22 = vld [vmem:[%s6593_s25 + $0xb4] sm:$0xff]  ;;  %v6833_v25 = vld [vmem:[%s6593_s25 + $0xbc] sm:$0xff] }
  0x2d   : > { %5681 = vmatmul.mubr.msk.f32.gmra.mrb[12].mxu1 %vm255_vm0, %v230_v32  ;;  %5905 = vmatmul.mubr.msk.f32.gmra.mrb[12].mxu0 %vm255_vm0, %v1829_v33  ;;  %v6824_v23 = vld [vmem:[%s8971_s1 + $0x18] sm:$0xff]  ;;  %v184_v26 = vld [vmem:[%s6593_s25 + $0x20] sm:$0xff]  ;;  %v6850_v28 = vld [vmem:[%s6593_s25 + $0xcc] sm:$0xff] }
  0x2e   : > { %5683 = vmatprep.mubr.msk.f32.mxu1 %vm255_vm0, %v231_v34  ;;  %5907 = vmatprep.mubr.msk.f32.mxu0 %vm255_vm0, %v1830_v35  ;;  %v183_v24 = vld [vmem:[%s6593_s25 + $0x18] sm:$0xff]  ;;  %v6839_v27 = vld [vmem:[%s6593_s25 + $0xc4] sm:$0xff]  ;;  %v186_v29 = vld [vmem:[%s6593_s25 + $0x30] sm:$0xff] }
  0x2f   : > { %v6854_v30 = vld [vmem:[%s6593_s25 + $0xd4] sm:$0xff]  ;;  %v6864_v32 = vld [vmem:[%s6593_s25 + $0xdc] sm:$0xff]  ;;  %v6868_v34 = vld [vmem:[%s6593_s25 + $0xe4] sm:$0xff] }
  0x30   : > { %v187_v31 = vld [vmem:[%s6593_s25 + $0x38] sm:$0xff]  ;;  %v188_v33 = vld [vmem:[%s6593_s25 + $0x40] sm:$0xff]  ;;  %v189_v35 = vld [vmem:[%s6593_s25 + $0x48] sm:$0xff] }
  0x31   : > { %5684 = vmatmul.mubr.msk.f32.gmra.mrb[14].mxu1 %vm255_vm0, %v232_v36  ;;  %5908 = vmatmul.mubr.msk.f32.gmra.mrb[14].mxu0 %vm255_vm0, %v1831_v37  ;;  %v6878_v36 = vld [vmem:[%s6593_s25 + $0xec] sm:$0xff] }
  0x32   : > { %5686 = vmatprep.mubr.msk.f32.mxu1 %vm255_vm0, %v233_v38  ;;  %5910 = vmatprep.mubr.msk.f32.mxu0 %vm255_vm0, %v1832_v39  ;;  %v190_v37 = vld [vmem:[%s6593_s25 + $0x50] sm:$0xff]  ;;  %v191_v39 = vld [vmem:[%s6593_s25 + $0x58] sm:$0xff] }
  0x33   : > { %v6882_v38 = vld [vmem:[%s6593_s25 + $0xf4] sm:$0xff] }
  0x35   : > { %5687 = vmatmul.mubr.msk.f32.gmra.mrb[16].mxu1 %vm255_vm0, %v234_v40  ;;  %5911 = vmatmul.mubr.msk.f32.gmra.mrb[16].mxu0 %vm255_vm0, %v1833_v41  ;;  %v6892_v40 = vld [vmem:[%s6593_s25 + $0xfc] sm:$0xff] }
  0x36   : > { %5689 = vmatprep.mubr.msk.f32.mxu1 %vm255_vm0, %v235_v42  ;;  %5942 = vmatprep.mubr.msk.f32.mxu0 %vm255_vm0, %v2243_v43  ;;  %v192_v41 = vld [vmem:[%s6593_s25 + $0x60] sm:$0xff]  ;;  %v193_v43 = vld [vmem:[%s6593_s25 + $0x68] sm:$0xff] }
  0x37   : > { %v6896_v42 = vld [vmem:[%s6593_s25 + $0x104] sm:$0xff] }
  0x39   : > { %5690 = vmatmul.mubr.msk.f32.gmra.mrb[18].mxu1 %vm255_vm0, %v236_v44  ;;  %5943 = vmatmul.mubr.msk.f32.vlgmr.msra.gmra.mrb[0].mxu0 %vm255_vm0, %v2244_v45  ;;  %v6906_v44 = vld [vmem:[%s6593_s25 + $0x10c] sm:$0xff] }
  0x3a   : > { %5997 = vmatpush3.msra.mxu0 %v6608_v10  ;;  %5692 = vmatprep.mubr.msk.f32.mxu1 %vm255_vm0, %v237_v46  ;;  %v250_v10 = vld [vmem:[%s6593_s25 + $0x109] sm:$0xff]  ;;  %v6910_v46 = vld [vmem:[%s6593_s25 + $0x114] sm:$0xff] }
  0x3b   : > { %5945 = vmatprep.mubr.msk.f32.mxu0 %vm255_vm0, %v6687_v47  ;;  %6052 = vmatprep.subr.mxu0 %v6692_v48  ;;  %v194_v45 = vld [vmem:[%s6593_s25 + $0x70] sm:$0xff] }
  0x3d   : > { %5693 = vmatmul.mubr.msk.f32.gmra.mrb[20].mxu1 %vm255_vm0, %v238_v49  ;;  %5946 = vmatmul.mubr.msk.f32.gmra.mrb[2].mxu0 %vm255_vm0, %v6700_v50  ;;  %v195_v49 = vld [vmem:[%s6593_s25 + $0x78] sm:$0xff] }
  0x3e   : > { %5695 = vmatprep.mubr.msk.f32.mxu1 %vm255_vm0, %v239_v51  ;;  %5948 = vmatprep.mubr.msk.f32.mxu0 %vm255_vm0, %v6706_v52  ;;  %v6920_v51 = vld [vmem:[%s6593_s25 + $0x11c] sm:$0xff] }
  0x41   : > { %5696 = vmatmul.mubr.msk.f32.gmra.mrb[22].mxu1 %vm255_vm0, %v240_v53  ;;  %5949 = vmatmul.mubr.msk.f32.gmra.mrb[4].mxu0 %vm255_vm0, %v6717_v54  ;;  %v196_v53 = vld [vmem:[%s6593_s25 + $0x80] sm:$0xff] }
  0x42   : > { %5698 = vmatprep.mubr.msk.f32.mxu1 %vm255_vm0, %v241_v55  ;;  %5951 = vmatprep.mubr.msk.f32.mxu0 %vm255_vm0, %v6721_v56  ;;  %v6924_v55 = vld [vmem:[%s6593_s25 + $0x124] sm:$0xff] }
  0x45   : > { %5699 = vmatmul.mubr.msk.f32.gmra.mrb[24].mxu1 %vm255_vm0, %v242_v57  ;;  %5952 = vmatmul.mubr.msk.f32.gmra.mrb[6].mxu0 %vm255_vm0, %v6731_v58  ;;  %v197_v57 = vld [vmem:[%s6593_s25 + $0x88] sm:$0xff] }
  0x46   : > { %5701 = vmatprep.mubr.msk.f32.mxu1 %vm255_vm0, %v243_v59  ;;  %5954 = vmatprep.mubr.msk.f32.mxu0 %vm255_vm0, %v6735_v60  ;;  %v6934_v59 = vld [vmem:[%s6593_s25 + $0x12c] sm:$0xff] }
  0x49   : > { %5702 = vmatmul.mubr.msk.f32.gmra.mrb[26].mxu1 %vm255_vm0, %v244_v61  ;;  %5955 = vmatmul.mubr.msk.f32.gmra.mrb[8].mxu0 %vm255_vm0, %v6745_v62  ;;  %v198_v61 = vld [vmem:[%s6593_s25 + $0x90] sm:$0xff] }
  0x4a   : > { %5704 = vmatprep.mubr.msk.f32.mxu1 %vm255_vm0, %v245_v63  ;;  %5957 = vmatprep.mubr.msk.f32.mxu0 %vm255_vm0, %v6749_v0  ;;  %v199_v63 = vld [vmem:[%s6593_s25 + $0x98] sm:$0xff] }
  0x4d   : > { %5705 = vmatmul.mubr.msk.f32.gmra.mrb[28].mxu1 %vm255_vm0, %v246_v2  ;;  %5958 = vmatmul.mubr.msk.f32.gmra.mrb[10].mxu0 %vm255_vm0, %v6759_v3  ;;  %v200_v2 = vld [vmem:[%s6593_s25 + $0xa0] sm:$0xff] }
  0x4e   : > { %5707 = vmatprep.mubr.msk.f32.mxu1 %vm255_vm0, %v247_v4  ;;  %5960 = vmatprep.mubr.msk.f32.mxu0 %vm255_vm0, %v6763_v5  ;;  %v6948_v4 = vld [vmem:[%s8971_s1 + $0x40] sm:$0xff] }
  0x51   : > { %5708 = vmatmul.mubr.msk.f32.gmra.mrb[30].mxu1 %vm255_vm0, %v248_v6  ;;  %5961 = vmatmul.mubr.msk.f32.gmra.mrb[12].mxu0 %vm255_vm0, %v6773_v7  ;;  %v202_v6 = vld [vmem:[%s6593_s25 + $0xb0] sm:$0xff] }
  0x52   : > { %5710 = vmatprep.mubr.msk.f32.mxu1 %vm255_vm0, %v249_v8  ;;  %5963 = vmatprep.mubr.msk.f32.mxu0 %vm255_vm0, %v6777_v9  ;;  %v215_v8 = vld [vmem:[%s6593_s25 + $0x118] sm:$0xff] }
  0x55   : > { %5711 = vmatmul.mubr.msk.f32.gmra.mrb[32].mxu1 %vm255_vm0, %v250_v10  ;;  %5964 = vmatmul.mubr.msk.f32.gmra.mrb[14].mxu0 %vm255_vm0, %v6787_v12  ;;  %v963_v10 = vld [vmem:[%s6593_s25 + $0xa] sm:$0xff] }
  0x56   : > { %5713 = vmatprep.mubr.msk.f32.mxu1 %vm255_vm0, %v251_v13  ;;  %5966 = vmatprep.mubr.msk.f32.mxu0 %vm255_vm0, %v6791_v14  ;;  %v7033_v13 = vld [vmem:[%s6593_s25 + $0x1a] sm:$0xff] }
  0x59   : > { %5714 = vmatmul.mubr.msk.f32.gmra.mrb[34].mxu1 %vm255_vm0, %v252_v15  ;;  %5967 = vmatmul.mubr.msk.f32.gmra.mrb[16].mxu0 %vm255_vm0, %v6801_v16  ;;  %v7050_v15 = vld [vmem:[%s6593_s25 + $0x2a] sm:$0xff] }
  0x5a   : > { %5718 = vmatprep.mubr.msk.f32.mxu1 %vm255_vm0, %v180_v17  ;;  %5969 = vmatprep.mubr.msk.f32.mxu0 %vm255_vm0, %v6805_v18  ;;  %v7064_v17 = vld [vmem:[%s6593_s25 + $0x3a] sm:$0xff] }
  0x5d   : > { %5719 = vmatmul.mubr.msk.f32.vlgmr.msra.gmra.mrb[0].mxu1 %vm255_vm0, %v181_v19  ;;  %5970 = vmatmul.mubr.msk.f32.gmra.mrb[18].mxu0 %vm255_vm0, %v6815_v20  ;;  %v7078_v19 = vld [vmem:[%s6593_s25 + $0x4a] sm:$0xff] }
  0x5e   : > { %5773 = vmatpush3.msra.mxu1 %v6613_v11  ;;  %5721 = vmatprep.mubr.msk.f32.mxu1 %vm255_vm0, %v182_v21  ;;  %v185_v11 = vld [vmem:[%s6593_s25 + $0x28] sm:$0xff]  ;;  %v7092_v21 = vld [vmem:[%s6593_s25 + $0x5a] sm:$0xff] }
  0x5f   : > { %5972 = vmatprep.mubr.msk.f32.mxu0 %vm255_vm0, %v6819_v22  ;;  %5828 = vmatprep.subr.mxu1 %v6824_v23 }
  0x61   : > { %5722 = vmatmul.mubr.msk.f32.gmra.mrb[2].mxu1 %vm255_vm0, %v183_v24  ;;  %5973 = vmatmul.mubr.msk.f32.gmra.mrb[20].mxu0 %vm255_vm0, %v6833_v25  ;;  %v7109_v24 = vld [vmem:[%s6593_s25 + $0x72] sm:$0xff] }
  0x62   : > { %5724 = vmatprep.mubr.msk.f32.mxu1 %vm255_vm0, %v184_v26  ;;  %5975 = vmatprep.mubr.msk.f32.mxu0 %vm255_vm0, %v6839_v27  ;;  %v7123_v26 = vld [vmem:[%s6593_s25 + $0x82] sm:$0xff] }
  0x65   : > { %5725 = vmatmul.mubr.msk.f32.gmra.mrb[4].mxu1 %vm255_vm0, %v185_v11  ;;  %5976 = vmatmul.mubr.msk.f32.gmra.mrb[22].mxu0 %vm255_vm0, %v6850_v28  ;;  %v7134_v11 = vld [vmem:[%s6593_s25 + $0x8a] sm:$0xff] }
  0x66   : > { %5727 = vmatprep.mubr.msk.f32.mxu1 %vm255_vm0, %v186_v29  ;;  %5978 = vmatprep.mubr.msk.f32.mxu0 %vm255_vm0, %v6854_v30  ;;  %v7138_v29 = vld [vmem:[%s6593_s25 + $0x92] sm:$0xff] }
  0x69   : > { %5728 = vmatmul.mubr.msk.f32.gmra.mrb[6].mxu1 %vm255_vm0, %v187_v31  ;;  %5979 = vmatmul.mubr.msk.f32.gmra.mrb[24].mxu0 %vm255_vm0, %v6864_v32  ;;  %v7148_v31 = vld [vmem:[%s6593_s25 + $0x9a] sm:$0xff] }
  0x6a   : > { %5730 = vmatprep.mubr.msk.f32.mxu1 %vm255_vm0, %v188_v33  ;;  %5981 = vmatprep.mubr.msk.f32.mxu0 %vm255_vm0, %v6868_v34  ;;  %v7152_v33 = vld [vmem:[%s6593_s25 + $0xa2] sm:$0xff] }
  0x6d   : > { %5731 = vmatmul.mubr.msk.f32.gmra.mrb[8].mxu1 %vm255_vm0, %v189_v35  ;;  %5982 = vmatmul.mubr.msk.f32.gmra.mrb[26].mxu0 %vm255_vm0, %v6878_v36  ;;  %v7162_v35 = vld [vmem:[%s6593_s25 + $0xaa] sm:$0xff] }
  0x6e   : > { %5733 = vmatprep.mubr.msk.f32.mxu1 %vm255_vm0, %v190_v37  ;;  %5984 = vmatprep.mubr.msk.f32.mxu0 %vm255_vm0, %v6882_v38  ;;  %v7167_v37 = vld [vmem:[%s6593_s25 + $0xb2] sm:$0xff] }
  0x71   : > { %5734 = vmatmul.mubr.msk.f32.gmra.mrb[10].mxu1 %vm255_vm0, %v191_v39  ;;  %5985 = vmatmul.mubr.msk.f32.gmra.mrb[28].mxu0 %vm255_vm0, %v6892_v40  ;;  %v7177_v39 = vld [vmem:[%s6593_s25 + $0xba] sm:$0xff] }
  0x72   : > { %5736 = vmatprep.mubr.msk.f32.mxu1 %vm255_vm0, %v192_v41  ;;  %5987 = vmatprep.mubr.msk.f32.mxu0 %vm255_vm0, %v6896_v42  ;;  %v7181_v41 = vld [vmem:[%s6593_s25 + $0xc2] sm:$0xff] }
  0x75   : > { %5737 = vmatmul.mubr.msk.f32.gmra.mrb[12].mxu1 %vm255_vm0, %v193_v43  ;;  %5988 = vmatmul.mubr.msk.f32.gmra.mrb[30].mxu0 %vm255_vm0, %v6906_v44  ;;  %v7191_v43 = vld [vmem:[%s6593_s25 + $0xca] sm:$0xff] }
  0x76   : > { %5739 = vmatprep.mubr.msk.f32.mxu1 %vm255_vm0, %v194_v45  ;;  %5990 = vmatprep.mubr.msk.f32.mxu0 %vm255_vm0, %v6910_v46  ;;  %v7195_v45 = vld [vmem:[%s6593_s25 + $0xd2] sm:$0xff] }
  0x79   : > { %5740 = vmatmul.mubr.msk.f32.gmra.mrb[14].mxu1 %vm255_vm0, %v195_v49  ;;  %5991 = vmatmul.mubr.msk.f32.gmra.mrb[32].mxu0 %vm255_vm0, %v6920_v51  ;;  %v7205_v49 = vld [vmem:[%s6593_s25 + $0xda] sm:$0xff] }
  0x7a   : > { %5742 = vmatprep.mubr.msk.f32.mxu1 %vm255_vm0, %v196_v53  ;;  %5993 = vmatprep.mubr.msk.f32.mxu0 %vm255_vm0, %v6924_v55  ;;  %v7209_v53 = vld [vmem:[%s6593_s25 + $0xe2] sm:$0xff] }
  0x7d   : > { %5743 = vmatmul.mubr.msk.f32.gmra.mrb[16].mxu1 %vm255_vm0, %v197_v57  ;;  %5994 = vmatmul.mubr.msk.f32.gmra.mrb[34].mxu0 %vm255_vm0, %v6934_v59  ;;  %v7219_v57 = vld [vmem:[%s6593_s25 + $0xea] sm:$0xff] }
  0x7e   : > { %5745 = vmatprep.mubr.msk.f32.mxu1 %vm255_vm0, %v198_v61  ;;  %5998 = vmatprep.mubr.msk.f32.mxu0 %vm255_vm0, %v6687_v47  ;;  %v201_v47 = vld [vmem:[%s6593_s25 + $0xa8] sm:$0xff]  ;;  %v7223_v61 = vld [vmem:[%s6593_s25 + $0xf2] sm:$0xff] }
  0x81   : > { %5746 = vmatmul.mubr.msk.f32.gmra.mrb[18].mxu1 %vm255_vm0, %v199_v63  ;;  %5999 = vmatmul.mubr.msk.f32.vlgmr.msra.gmra.mrb[0].mxu0 %vm255_vm0, %v6700_v50  ;;  %v204_v50 = vld [vmem:[%s6593_s25 + $0xc0] sm:$0xff] }
  0x82   : > { %6053 = vmatpush3.msra.mxu0 %v6692_v48  ;;  %5748 = vmatprep.mubr.msk.f32.mxu1 %vm255_vm0, %v200_v2  ;;  %v203_v48 = vld [vmem:[%s6593_s25 + $0xb8] sm:$0xff]  ;;  %v3109_v63 = vld [vmem:[%s6593_s25 + $0x85] sm:$0xff] }
  0x83   : > { %6001 = vmatprep.mubr.msk.f32.mxu0 %vm255_vm0, %v6706_v52  ;;  %6108 = vmatprep.subr.mxu0 %v6948_v4  ;;  %v205_v52 = vld [vmem:[%s6593_s25 + $0xc8] sm:$0xff]  ;;  %v7233_v2 = vld [vmem:[%s6593_s25 + $0xfa] sm:$0xff] }
  0x85   : > { %5749 = vmatmul.mubr.msk.f32.gmra.mrb[20].mxu1 %vm255_vm0, %v201_v47  ;;  %6002 = vmatmul.mubr.msk.f32.gmra.mrb[2].mxu0 %vm255_vm0, %v6717_v54  ;;  %v206_v54 = vld [vmem:[%s6593_s25 + $0xd0] sm:$0xff]  ;;  %v7237_v47 = vld [vmem:[%s6593_s25 + $0x102] sm:$0xff] }
  0x86   : > { %5751 = vmatprep.mubr.msk.f32.mxu1 %vm255_vm0, %v202_v6  ;;  %6004 = vmatprep.mubr.msk.f32.mxu0 %vm255_vm0, %v6721_v56  ;;  %v207_v56 = vld [vmem:[%s6593_s25 + $0xd8] sm:$0xff] }
  0x87   : > { %v3111_v6 = vld [vmem:[%s6593_s25 + $0x95] sm:$0xff] }
  0x89   : > { %5752 = vmatmul.mubr.msk.f32.gmra.mrb[22].mxu1 %vm255_vm0, %v203_v48  ;;  %6005 = vmatmul.mubr.msk.f32.gmra.mrb[4].mxu0 %vm255_vm0, %v6731_v58  ;;  %v208_v58 = vld [vmem:[%s6593_s25 + $0xe0] sm:$0xff]  ;;  %v7247_v48 = vld [vmem:[%s6593_s25 + $0x10a] sm:$0xff] }
  0x8a   : > { %5754 = vmatprep.mubr.msk.f32.mxu1 %vm255_vm0, %v204_v50  ;;  %6007 = vmatprep.mubr.msk.f32.mxu0 %vm255_vm0, %v6735_v60  ;;  %v209_v60 = vld [vmem:[%s6593_s25 + $0xe8] sm:$0xff]  ;;  %v3112_v50 = vld [vmem:[%s6593_s25 + $0x9d] sm:$0xff] }
  0x8d   : > { %5755 = vmatmul.mubr.msk.f32.gmra.mrb[24].mxu1 %vm255_vm0, %v205_v52  ;;  %6008 = vmatmul.mubr.msk.f32.gmra.mrb[6].mxu0 %vm255_vm0, %v6745_v62  ;;  %v210_v62 = vld [vmem:[%s6593_s25 + $0xf0] sm:$0xff] }
  0x8e   : > { %5757 = vmatprep.mubr.msk.f32.mxu1 %vm255_vm0, %v206_v54  ;;  %6010 = vmatprep.mubr.msk.f32.mxu0 %vm255_vm0, %v6749_v0  ;;  %v211_v0 = vld [vmem:[%s6593_s25 + $0xf8] sm:$0xff]  ;;  %v3113_v54 = vld [vmem:[%s6593_s25 + $0xa5] sm:$0xff] }
  0x8f   : > { %v7251_v52 = vld [vmem:[%s6593_s25 + $0x112] sm:$0xff] }
  0x91   : > { %5758 = vmatmul.mubr.msk.f32.gmra.mrb[26].mxu1 %vm255_vm0, %v207_v56  ;;  %6011 = vmatmul.mubr.msk.f32.gmra.mrb[8].mxu0 %vm255_vm0, %v6759_v3  ;;  %v212_v3 = vld [vmem:[%s6593_s25 + $0x100] sm:$0xff] }
  0x92   : > { %5760 = vmatprep.mubr.msk.f32.mxu1 %vm255_vm0, %v208_v58  ;;  %6013 = vmatprep.mubr.msk.f32.mxu0 %vm255_vm0, %v6763_v5  ;;  %v213_v5 = vld [vmem:[%s6593_s25 + $0x108] sm:$0xff]  ;;  %v7261_v56 = vld [vmem:[%s6593_s25 + $0x11a] sm:$0xff] }
  0x93   : > { %v3114_v58 = vld [vmem:[%s6593_s25 + $0xad] sm:$0xff] }
  0x95   : > { %5761 = vmatmul.mubr.msk.f32.gmra.mrb[28].mxu1 %vm255_vm0, %v209_v60  ;;  %6014 = vmatmul.mubr.msk.f32.gmra.mrb[10].mxu0 %vm255_vm0, %v6773_v7  ;;  %v214_v7 = vld [vmem:[%s6593_s25 + $0x110] sm:$0xff] }
  0x96   : > { %5763 = vmatprep.mubr.msk.f32.mxu1 %vm255_vm0, %v210_v62  ;;  %6016 = vmatprep.mubr.msk.f32.mxu0 %vm255_vm0, %v6777_v9  ;;  %v962_v9 = vld [vmem:[%s6593_s25 + $0x2] sm:$0xff]  ;;  %v3115_v60 = vld [vmem:[%s6593_s25 + $0xb5] sm:$0xff] }
  0x97   : > { %v3116_v62 = vld [vmem:[%s6593_s25 + $0xbd] sm:$0xff] }
  0x99   : > { %5764 = vmatmul.mubr.msk.f32.gmra.mrb[30].mxu1 %vm255_vm0, %v211_v0  ;;  %6017 = vmatmul.mubr.msk.f32.gmra.mrb[12].mxu0 %vm255_vm0, %v6787_v12  ;;  %v7024_v12 = vld [vmem:[%s6593_s25 + $0x12] sm:$0xff]  ;;  %v3117_v0 = vld [vmem:[%s6593_s25 + $0xc5] sm:$0xff] }
  0x9a   : > { %5766 = vmatprep.mubr.msk.f32.mxu1 %vm255_vm0, %v212_v3  ;;  %6019 = vmatprep.mubr.msk.f32.mxu0 %vm255_vm0, %v6791_v14  ;;  %v7038_v14 = vld [vmem:[%s6593_s25 + $0x22] sm:$0xff]  ;;  %v3118_v3 = vld [vmem:[%s6593_s25 + $0xcd] sm:$0xff] }
  0x9d   : > { %5767 = vmatmul.mubr.msk.f32.gmra.mrb[32].mxu1 %vm255_vm0, %v213_v5  ;;  %6020 = vmatmul.mubr.msk.f32.gmra.mrb[14].mxu0 %vm255_vm0, %v6801_v16  ;;  %v7053_v16 = vld [vmem:[%s6593_s25 + $0x32] sm:$0xff] }
  0x9e   : > { %5769 = vmatprep.mubr.msk.f32.mxu1 %vm255_vm0, %v214_v7  ;;  %6022 = vmatprep.mubr.msk.f32.mxu0 %vm255_vm0, %v6805_v18  ;;  %v7067_v18 = vld [vmem:[%s6593_s25 + $0x42] sm:$0xff]  ;;  %v3119_v5 = vld [vmem:[%s6593_s25 + $0xd5] sm:$0xff] }
  0x9f   : > { %v3121_v7 = vld [vmem:[%s6593_s25 + $0xe5] sm:$0xff] }
  0xa1   : > { %5770 = vmatmul.mubr.msk.f32.gmra.mrb[34].mxu1 %vm255_vm0, %v215_v8  ;;  %6023 = vmatmul.mubr.msk.f32.gmra.mrb[16].mxu0 %vm255_vm0, %v6815_v20  ;;  %v7081_v20 = vld [vmem:[%s6593_s25 + $0x52] sm:$0xff] }
  0xa2   : > { %5774 = vmatprep.mubr.msk.f32.mxu1 %vm255_vm0, %v962_v9  ;;  %6025 = vmatprep.mubr.msk.f32.mxu0 %vm255_vm0, %v6819_v22  ;;  %v7095_v22 = vld [vmem:[%s6593_s25 + $0x62] sm:$0xff]  ;;  %v3122_v8 = vld [vmem:[%s6593_s25 + $0xed] sm:$0xff]  ;;  %v3123_v9 = vld [vmem:[%s6593_s25 + $0xf5] sm:$0xff] }
  0xa5   : > { %5775 = vmatmul.mubr.msk.f32.vlgmr.msra.gmra.mrb[0].mxu1 %vm255_vm0, %v963_v10  ;;  %6026 = vmatmul.mubr.msk.f32.gmra.mrb[18].mxu0 %vm255_vm0, %v6833_v25  ;;  %v7120_v25 = vld [vmem:[%s6593_s25 + $0x7a] sm:$0xff] }
  0xa6   : > { %5829 = vmatpush3.msra.mxu1 %v6824_v23  ;;  %5777 = vmatprep.mubr.msk.f32.mxu1 %vm255_vm0, %v7024_v12  ;;  %v7106_v23 = vld [vmem:[%s6593_s25 + $0x6a] sm:$0xff]  ;;  %v3124_v10 = vld [vmem:[%s6593_s25 + $0xfd] sm:$0xff] }
  0xa7   : > { %6028 = vmatprep.mubr.msk.f32.mxu0 %vm255_vm0, %v6839_v27  ;;  %6164 = vmatprep.subr.mxu1 %v6577_v1  ;;  %v2704_v27 = vld [vmem:[%s6593_s25 + $0x134] sm:$0xff] }
  0xa9   : > { %5778 = vmatmul.mubr.msk.f32.gmra.mrb[2].mxu1 %vm255_vm0, %v7033_v13  ;;  %6029 = vmatmul.mubr.msk.f32.gmra.mrb[20].mxu0 %vm255_vm0, %v6850_v28  ;;  %v2705_v28 = vld [vmem:[%s6593_s25 + $0x13c] sm:$0xff] }
  0xaa   : > { %5780 = vmatprep.mubr.msk.f32.mxu1 %vm255_vm0, %v7038_v14  ;;  %6031 = vmatprep.mubr.msk.f32.mxu0 %vm255_vm0, %v6854_v30  ;;  %v3097_v30 = vld [vmem:[%s6593_s25 + $0x25] sm:$0xff] }
  0xad   : > { %5781 = vmatmul.mubr.msk.f32.gmra.mrb[4].mxu1 %vm255_vm0, %v7050_v15  ;;  %6032 = vmatmul.mubr.msk.f32.gmra.mrb[22].mxu0 %vm255_vm0, %v6864_v32  ;;  %v3098_v32 = vld [vmem:[%s6593_s25 + $0x2d] sm:$0xff] }
  0xae   : > { %5783 = vmatprep.mubr.msk.f32.mxu1 %vm255_vm0, %v7053_v16  ;;  %6034 = vmatprep.mubr.msk.f32.mxu0 %vm255_vm0, %v6868_v34  ;;  %v3099_v34 = vld [vmem:[%s6593_s25 + $0x35] sm:$0xff] }
  0xb1   : > { %5784 = vmatmul.mubr.msk.f32.gmra.mrb[6].mxu1 %vm255_vm0, %v7064_v17  ;;  %6035 = vmatmul.mubr.msk.f32.gmra.mrb[24].mxu0 %vm255_vm0, %v6878_v36  ;;  %v3100_v36 = vld [vmem:[%s6593_s25 + $0x3d] sm:$0xff] }
  0xb2   : > { %5786 = vmatprep.mubr.msk.f32.mxu1 %vm255_vm0, %v7067_v18  ;;  %6037 = vmatprep.mubr.msk.f32.mxu0 %vm255_vm0, %v6882_v38  ;;  %v3101_v38 = vld [vmem:[%s6593_s25 + $0x45] sm:$0xff] }
  0xb5   : > { %5787 = vmatmul.mubr.msk.f32.gmra.mrb[8].mxu1 %vm255_vm0, %v7078_v19  ;;  %6038 = vmatmul.mubr.msk.f32.gmra.mrb[26].mxu0 %vm255_vm0, %v6892_v40  ;;  %v3102_v40 = vld [vmem:[%s6593_s25 + $0x4d] sm:$0xff] }
  0xb6   : > { %5789 = vmatprep.mubr.msk.f32.mxu1 %vm255_vm0, %v7081_v20  ;;  %6040 = vmatprep.mubr.msk.f32.mxu0 %vm255_vm0, %v6896_v42  ;;  %v3103_v42 = vld [vmem:[%s6593_s25 + $0x55] sm:$0xff] }
  0xb9   : > { %5790 = vmatmul.mubr.msk.f32.gmra.mrb[10].mxu1 %vm255_vm0, %v7092_v21  ;;  %6041 = vmatmul.mubr.msk.f32.gmra.mrb[28].mxu0 %vm255_vm0, %v6906_v44  ;;  %v3104_v44 = vld [vmem:[%s6593_s25 + $0x5d] sm:$0xff] }
  0xba   : > { %5792 = vmatprep.mubr.msk.f32.mxu1 %vm255_vm0, %v7095_v22  ;;  %6043 = vmatprep.mubr.msk.f32.mxu0 %vm255_vm0, %v6910_v46  ;;  %v3105_v46 = vld [vmem:[%s6593_s25 + $0x65] sm:$0xff] }
  0xbd   : > { %5793 = vmatmul.mubr.msk.f32.gmra.mrb[12].mxu1 %vm255_vm0, %v7106_v23  ;;  %6044 = vmatmul.mubr.msk.f32.gmra.mrb[30].mxu0 %vm255_vm0, %v6920_v51  ;;  %v3106_v51 = vld [vmem:[%s6593_s25 + $0x6d] sm:$0xff] }
  0xbe   : > { %5795 = vmatprep.mubr.msk.f32.mxu1 %vm255_vm0, %v7109_v24  ;;  %6046 = vmatprep.mubr.msk.f32.mxu0 %vm255_vm0, %v6924_v55  ;;  %v3107_v55 = vld [vmem:[%s6593_s25 + $0x75] sm:$0xff] }
  0xc1   : > { %5796 = vmatmul.mubr.msk.f32.gmra.mrb[14].mxu1 %vm255_vm0, %v7120_v25  ;;  %6047 = vmatmul.mubr.msk.f32.gmra.mrb[32].mxu0 %vm255_vm0, %v6934_v59  ;;  %v3108_v59 = vld [vmem:[%s6593_s25 + $0x7d] sm:$0xff] }
  0xc2   : > { %5798 = vmatprep.mubr.msk.f32.mxu1 %vm255_vm0, %v7123_v26  ;;  %6049 = vmatprep.mubr.msk.f32.mxu0 %vm255_vm0, %v2704_v27  ;;  %v3531_v27 = vld [vmem:[%s6593_s25 + $0x5e] sm:$0xff] }
  0xc5   : > { %5799 = vmatmul.mubr.msk.f32.gmra.mrb[16].mxu1 %vm255_vm0, %v7134_v11  ;;  %6050 = vmatmul.mubr.msk.f32.gmra.mrb[34].mxu0 %vm255_vm0, %v2705_v28  ;;  %v3533_v28 = vld [vmem:[%s6593_s25 + $0x6e] sm:$0xff] }
  0xc6   : > { %5801 = vmatprep.mubr.msk.f32.mxu1 %vm255_vm0, %v7138_v29  ;;  %6054 = vmatprep.mubr.msk.f32.mxu0 %vm255_vm0, %v3097_v30  ;;  %v3535_v30 = vld [vmem:[%s6593_s25 + $0x7e] sm:$0xff] }
  0xc9   : > { %5802 = vmatmul.mubr.msk.f32.gmra.mrb[18].mxu1 %vm255_vm0, %v7148_v31  ;;  %6055 = vmatmul.mubr.msk.f32.vlgmr.msra.gmra.mrb[0].mxu0 %vm255_vm0, %v3098_v32  ;;  %v3537_v32 = vld [vmem:[%s6593_s25 + $0x8e] sm:$0xff] }
  0xca   : > { %6109 = vmatpush3.msra.mxu0 %v6948_v4  ;;  %5804 = vmatprep.mubr.msk.f32.mxu1 %vm255_vm0, %v7152_v33  ;;  %v3110_v4 = vld [vmem:[%s6593_s25 + $0x8d] sm:$0xff] }
  0xcb   : > { %6057 = vmatprep.mubr.msk.f32.mxu0 %vm255_vm0, %v3099_v34  ;;  %v3539_v34 = vld [vmem:[%s6593_s25 + $0x9e] sm:$0xff] }
  0xcd   : > { %5805 = vmatmul.mubr.msk.f32.gmra.mrb[20].mxu1 %vm255_vm0, %v7162_v35  ;;  %6058 = vmatmul.mubr.msk.f32.gmra.mrb[2].mxu0 %vm255_vm0, %v3100_v36  ;;  %v3540_v36 = vld [vmem:[%s6593_s25 + $0xa6] sm:$0xff] }
  0xce   : > { %5807 = vmatprep.mubr.msk.f32.mxu1 %vm255_vm0, %v7167_v37  ;;  %6060 = vmatprep.mubr.msk.f32.mxu0 %vm255_vm0, %v3101_v38  ;;  %v3541_v38 = vld [vmem:[%s6593_s25 + $0xae] sm:$0xff] }
  0xd1   : > { %5808 = vmatmul.mubr.msk.f32.gmra.mrb[22].mxu1 %vm255_vm0, %v7177_v39  ;;  %6061 = vmatmul.mubr.msk.f32.gmra.mrb[4].mxu0 %vm255_vm0, %v3102_v40  ;;  %v3542_v40 = vld [vmem:[%s6593_s25 + $0xb6] sm:$0xff] }
  0xd2   : > { %5810 = vmatprep.mubr.msk.f32.mxu1 %vm255_vm0, %v7181_v41  ;;  %6063 = vmatprep.mubr.msk.f32.mxu0 %vm255_vm0, %v3103_v42  ;;  %v3543_v42 = vld [vmem:[%s6593_s25 + $0xbe] sm:$0xff] }
  0xd5   : > { %5811 = vmatmul.mubr.msk.f32.gmra.mrb[24].mxu1 %vm255_vm0, %v7191_v43  ;;  %6064 = vmatmul.mubr.msk.f32.gmra.mrb[6].mxu0 %vm255_vm0, %v3104_v44  ;;  %v3544_v44 = vld [vmem:[%s6593_s25 + $0xc6] sm:$0xff] }
  0xd6   : > { %5813 = vmatprep.mubr.msk.f32.mxu1 %vm255_vm0, %v7195_v45  ;;  %6066 = vmatprep.mubr.msk.f32.mxu0 %vm255_vm0, %v3105_v46  ;;  %v3545_v46 = vld [vmem:[%s6593_s25 + $0xce] sm:$0xff] }
  0xd9   : > { %5814 = vmatmul.mubr.msk.f32.gmra.mrb[26].mxu1 %vm255_vm0, %v7205_v49  ;;  %6067 = vmatmul.mubr.msk.f32.gmra.mrb[8].mxu0 %vm255_vm0, %v3106_v51  ;;  %v3546_v51 = vld [vmem:[%s6593_s25 + $0xd6] sm:$0xff] }
  0xda   : > { %5816 = vmatprep.mubr.msk.f32.mxu1 %vm255_vm0, %v7209_v53  ;;  %6069 = vmatprep.mubr.msk.f32.mxu0 %vm255_vm0, %v3107_v55  ;;  %v3547_v55 = vld [vmem:[%s6593_s25 + $0xde] sm:$0xff] }
  0xdd   : > { %5817 = vmatmul.mubr.msk.f32.gmra.mrb[28].mxu1 %vm255_vm0, %v7219_v57  ;;  %6070 = vmatmul.mubr.msk.f32.gmra.mrb[10].mxu0 %vm255_vm0, %v3108_v59  ;;  %v3548_v59 = vld [vmem:[%s6593_s25 + $0xe6] sm:$0xff] }
  0xde   : > { %5819 = vmatprep.mubr.msk.f32.mxu1 %vm255_vm0, %v7223_v61  ;;  %6072 = vmatprep.mubr.msk.f32.mxu0 %vm255_vm0, %v3109_v63  ;;  %v3549_v63 = vld [vmem:[%s6593_s25 + $0xee] sm:$0xff] }
  0xe1   : > { %5820 = vmatmul.mubr.msk.f32.gmra.mrb[30].mxu1 %vm255_vm0, %v7233_v2  ;;  %6073 = vmatmul.mubr.msk.f32.gmra.mrb[12].mxu0 %vm255_vm0, %v3110_v4  ;;  %v3550_v4 = vld [vmem:[%s6593_s25 + $0xf6] sm:$0xff] }
  0xe2   : > { %5822 = vmatprep.mubr.msk.f32.mxu1 %vm255_vm0, %v7237_v47  ;;  %6075 = vmatprep.mubr.msk.f32.mxu0 %vm255_vm0, %v3111_v6  ;;  %v3551_v6 = vld [vmem:[%s6593_s25 + $0xfe] sm:$0xff] }
  0xe5   : > { %5823 = vmatmul.mubr.msk.f32.gmra.mrb[32].mxu1 %vm255_vm0, %v7247_v48  ;;  %6076 = vmatmul.mubr.msk.f32.gmra.mrb[14].mxu0 %vm255_vm0, %v3112_v50  ;;  %v3552_v50 = vld [vmem:[%s6593_s25 + $0x106] sm:$0xff] }
  0xe6   : > { %5825 = vmatprep.mubr.msk.f32.mxu1 %vm255_vm0, %v7251_v52  ;;  %6078 = vmatprep.mubr.msk.f32.mxu0 %vm255_vm0, %v3113_v54  ;;  %v3553_v54 = vld [vmem:[%s6593_s25 + $0x10e] sm:$0xff] }
  0xe9   : > { %5826 = vmatmul.mubr.msk.f32.gmra.mrb[34].mxu1 %vm255_vm0, %v7261_v56  ;;  %6079 = vmatmul.mubr.msk.f32.gmra.mrb[16].mxu0 %vm255_vm0, %v3114_v58  ;;  %v3554_v58 = vld [vmem:[%s6593_s25 + $0x116] sm:$0xff] }
  0xea   : > { %5830 = vmatprep.mubr.msk.f32.mxu1 %vm255_vm0, %v7024_v12  ;;  %6081 = vmatprep.mubr.msk.f32.mxu0 %vm255_vm0, %v3115_v60  ;;  %v3125_v12 = vld [vmem:[%s6593_s25 + $0x105] sm:$0xff] }
  0xeb   : > { %v1847_v60 = vld [vmem:[%s6593_s25 + $0x10b] sm:$0xff] }
  0xed   : > { %5831 = vmatmul.mubr.msk.f32.vlgmr.msra.gmra.mrb[0].mxu1 %vm255_vm0, %v7033_v13  ;;  %6082 = vmatmul.mubr.msk.f32.gmra.mrb[18].mxu0 %vm255_vm0, %v3116_v62  ;;  %v3126_v13 = vld [vmem:[%s6593_s25 + $0x10d] sm:$0xff]  ;;  %v3555_v62 = vld [vmem:[%s6593_s25 + $0x11e] sm:$0xff] }
  0xee   : > { %6165 = vmatpush3.msra.mxu1 %v6577_v1  ;;  %5833 = vmatprep.mubr.msk.f32.mxu1 %vm255_vm0, %v7038_v14  ;;  %v3120_v1 = vld [vmem:[%s6593_s25 + $0xdd] sm:$0xff]  ;;  %v3127_v14 = vld [vmem:[%s6593_s25 + $0x115] sm:$0xff] }
  0xef   : > { %6084 = vmatprep.mubr.msk.f32.mxu0 %vm255_vm0, %v3117_v0  ;;  %v1848_v0 = vld [vmem:[%s6593_s25 + $0x113] sm:$0xff] }
  0xf1   : > { %5834 = vmatmul.mubr.msk.f32.gmra.mrb[2].mxu1 %vm255_vm0, %v7050_v15  ;;  %6085 = vmatmul.mubr.msk.f32.gmra.mrb[20].mxu0 %vm255_vm0, %v3118_v3  ;;  %v3128_v15 = vld [vmem:[%s6593_s25 + $0x11d] sm:$0xff]  ;;  %v3556_v3 = vld [vmem:[%s6593_s25 + $0x126] sm:$0xff] }
  0xf2   : > { %5836 = vmatprep.mubr.msk.f32.mxu1 %vm255_vm0, %v7053_v16  ;;  %6087 = vmatprep.mubr.msk.f32.mxu0 %vm255_vm0, %v3119_v5  ;;  %v3129_v16 = vld [vmem:[%s6593_s25 + $0x125] sm:$0xff]  ;;  %v1849_v5 = vld [vmem:[%s6593_s25 + $0x11b] sm:$0xff] }
  0xf5   : > { %5837 = vmatmul.mubr.msk.f32.gmra.mrb[4].mxu1 %vm255_vm0, %v7064_v17  ;;  %6088 = vmatmul.mubr.msk.f32.gmra.mrb[22].mxu0 %vm255_vm0, %v3120_v1  ;;  %v3130_v17 = vld [vmem:[%s6593_s25 + $0x12d] sm:$0xff] }
  0xf6   : > { %5839 = vmatprep.mubr.msk.f32.mxu1 %vm255_vm0, %v7067_v18  ;;  %6090 = vmatprep.mubr.msk.f32.mxu0 %vm255_vm0, %v3121_v7  ;;  %v3131_v18 = vld [vmem:[%s6593_s25 + $0x135] sm:$0xff]  ;;  %v1850_v7 = vld [vmem:[%s6593_s25 + $0x123] sm:$0xff] }
  0xf7   : > { %v3557_v1 = vld [vmem:[%s6593_s25 + $0x12e] sm:$0xff] }
  0xf9   : > { %5840 = vmatmul.mubr.msk.f32.gmra.mrb[6].mxu1 %vm255_vm0, %v7078_v19  ;;  %6091 = vmatmul.mubr.msk.f32.gmra.mrb[24].mxu0 %vm255_vm0, %v3122_v8  ;;  %v3132_v19 = vld [vmem:[%s6593_s25 + $0x13d] sm:$0xff] }
  0xfa   : > { %5842 = vmatprep.mubr.msk.f32.mxu1 %vm255_vm0, %v7081_v20  ;;  %6093 = vmatprep.mubr.msk.f32.mxu0 %vm255_vm0, %v3123_v9  ;;  %v3524_v20 = vld [vmem:[%s6593_s25 + $0x26] sm:$0xff]  ;;  %v3558_v8 = vld [vmem:[%s6593_s25 + $0x136] sm:$0xff] }
  0xfb   : > { %v1851_v9 = vld [vmem:[%s6593_s25 + $0x12b] sm:$0xff] }
  0xfd   : > { %5843 = vmatmul.mubr.msk.f32.gmra.mrb[8].mxu1 %vm255_vm0, %v7092_v21  ;;  %6094 = vmatmul.mubr.msk.f32.gmra.mrb[26].mxu0 %vm255_vm0, %v3124_v10  ;;  %v3525_v21 = vld [vmem:[%s6593_s25 + $0x2e] sm:$0xff]  ;;  %v3559_v10 = vld [vmem:[%s6593_s25 + $0x13e] sm:$0xff] }
  0xfe   : > { %5845 = vmatprep.mubr.msk.f32.mxu1 %vm255_vm0, %v7095_v22  ;;  %6096 = vmatprep.mubr.msk.f32.mxu0 %vm255_vm0, %v3125_v12  ;;  %v3526_v22 = vld [vmem:[%s6593_s25 + $0x36] sm:$0xff]  ;;  %v3951_v12 = vlaneseq }
 0x101   : > { %5846 = vmatmul.mubr.msk.f32.gmra.mrb[10].mxu1 %vm255_vm0, %v7106_v23  ;;  %6097 = vmatmul.mubr.msk.f32.gmra.mrb[28].mxu0 %vm255_vm0, %v3126_v13  ;;  %v3527_v23 = vld [vmem:[%s6593_s25 + $0x3e] sm:$0xff]  ;;  %v7484_v13 = vshrl.u32 %v3951_v12, 7 }
 0x102   : > { %5848 = vmatprep.mubr.msk.f32.mxu1 %vm255_vm0, %v7109_v24  ;;  %6099 = vmatprep.mubr.msk.f32.mxu0 %vm255_vm0, %v3127_v14  ;;  %v3528_v24 = vld [vmem:[%s6593_s25 + $0x46] sm:$0xff] }
 0x103   : > { %v3953_v14 = vadd.s32 8, %v7484_v13 }
 0x105   : > { %5849 = vmatmul.mubr.msk.f32.gmra.mrb[12].mxu1 %vm255_vm0, %v7120_v25  ;;  %6100 = vmatmul.mubr.msk.f32.gmra.mrb[30].mxu0 %vm255_vm0, %v3128_v15  ;;  %v3529_v25 = vld [vmem:[%s6593_s25 + $0x4e] sm:$0xff] }
 0x106   : > { %5851 = vmatprep.mubr.msk.f32.mxu1 %vm255_vm0, %v7123_v26  ;;  %6102 = vmatprep.mubr.msk.f32.mxu0 %vm255_vm0, %v3129_v16  ;;  %v3530_v26 = vld [vmem:[%s6593_s25 + $0x56] sm:$0xff]  ;;  %v7487_v15 = vmul.u32.u64.low 3817748708, %v3953_v14  ;;  %v7488_v16 = vmul.u32.u64.high 3817748708, %v3953_v14, %v7487_v15 }
 0x109   : > { %5852 = vmatmul.mubr.msk.f32.gmra.mrb[14].mxu1 %vm255_vm0, %v7134_v11  ;;  %6103 = vmatmul.mubr.msk.f32.gmra.mrb[32].mxu0 %vm255_vm0, %v3130_v17  ;;  %v3532_v11 = vld [vmem:[%s6593_s25 + $0x66] sm:$0xff] }
 0x10a   : > { %5854 = vmatprep.mubr.msk.f32.mxu1 %vm255_vm0, %v7138_v29  ;;  %6105 = vmatprep.mubr.msk.f32.mxu0 %vm255_vm0, %v3131_v18  ;;  %v3534_v29 = vld [vmem:[%s6593_s25 + $0x76] sm:$0xff]  ;;  %v7491_v17 = vmul.u32.u64.low 3817748708, %v7484_v13  ;;  %v7492_v18 = vmul.u32.u64.high 3817748708, %v7484_v13, %v7491_v17 }
 0x10d   : > { %5855 = vmatmul.mubr.msk.f32.gmra.mrb[16].mxu1 %vm255_vm0, %v7148_v31  ;;  %6106 = vmatmul.mubr.msk.f32.gmra.mrb[34].mxu0 %vm255_vm0, %v3132_v19  ;;  %v3536_v31 = vld [vmem:[%s6593_s25 + $0x86] sm:$0xff]  ;;  %v3955_v19 = vadd.s32 24, %v7484_v13 }
 0x10e   : > { %5857 = vmatprep.mubr.msk.f32.mxu1 %vm255_vm0, %v7152_v33  ;;  %6110 = vmatprep.mubr.msk.f32.mxu0 %vm255_vm0, %v3524_v20  ;;  %v3538_v33 = vld [vmem:[%s6593_s25 + $0x96] sm:$0xff]  ;;  %v3954_v20 = vadd.s32 16, %v7484_v13 }
 0x111   : > { %5858 = vmatmul.mubr.msk.f32.gmra.mrb[18].mxu1 %vm255_vm0, %v7162_v35  ;;  %6111 = vmatmul.mubr.msk.f32.vlgmr.msra.gmra.mrb[0].mxu0 %vm255_vm0, %v3525_v21  ;;  %v1423_v35 = vld [vmem:[%s6593_s25 + $0x122] sm:$0xff]  ;;  %v3957_v21 = vadd.s32 40, %v7484_v13 }
 0x112   : > { %5860 = vmatprep.mubr.msk.f32.mxu1 %vm255_vm0, %v7167_v37  ;;  %6113 = vmatprep.mubr.msk.f32.mxu0 %vm255_vm0, %v3526_v22  ;;  %v1424_v37 = vld [vmem:[%s6593_s25 + $0x12a] sm:$0xff] }
 0x115   : > { %5861 = vmatmul.mubr.msk.f32.gmra.mrb[20].mxu1 %vm255_vm0, %v7177_v39  ;;  %6114 = vmatmul.mubr.msk.f32.gmra.mrb[2].mxu0 %vm255_vm0, %v3527_v23  ;;  %v1834_v39 = vld [vmem:[%s6593_s25 + $0xa3] sm:$0xff]  ;;  %v7497_v22 = vmul.u32.u64.low 3817748708, %v3955_v19  ;;  %v7498_v23 = vmul.u32.u64.high 3817748708, %v3955_v19, %v7497_v22 }
 0x116   : > { %5863 = vmatprep.mubr.msk.f32.mxu1 %vm255_vm0, %v7181_v41  ;;  %6116 = vmatprep.mubr.msk.f32.mxu0 %vm255_vm0, %v3528_v24  ;;  %v1835_v41 = vld [vmem:[%s6593_s25 + $0xab] sm:$0xff]  ;;  %v4005_v24 = vshrl.u32 %v7488_v16, 4 }
 0x119   : > { %5864 = vmatmul.mubr.msk.f32.gmra.mrb[22].mxu1 %vm255_vm0, %v7191_v43  ;;  %6117 = vmatmul.mubr.msk.f32.gmra.mrb[4].mxu0 %vm255_vm0, %v3529_v25  ;;  %v1836_v43 = vld [vmem:[%s6593_s25 + $0xb3] sm:$0xff] }
 0x11a   : > { %5866 = vmatprep.mubr.msk.f32.mxu1 %vm255_vm0, %v7195_v45  ;;  %6119 = vmatprep.mubr.msk.f32.mxu0 %vm255_vm0, %v3530_v26  ;;  %v1837_v45 = vld [vmem:[%s6593_s25 + $0xbb] sm:$0xff]  ;;  %v7501_v25 = vmul.u32.u64.low 3817748708, %v3954_v20  ;;  %v7502_v26 = vmul.u32.u64.high 3817748708, %v3954_v20, %v7501_v25 }
 0x11d   : > { %5867 = vmatmul.mubr.msk.f32.gmra.mrb[24].mxu1 %vm255_vm0, %v7205_v49  ;;  %6120 = vmatmul.mubr.msk.f32.gmra.mrb[6].mxu0 %vm255_vm0, %v3531_v27  ;;  %v1838_v49 = vld [vmem:[%s6593_s25 + $0xc3] sm:$0xff]  ;;  %v3994_v27 = vshrl.u32 %v7492_v18, 4  ;;  %v7624_v18 = vadd.s32 120, %v7484_v13 }
 0x11e   : > { %5869 = vmatprep.mubr.msk.f32.mxu1 %vm255_vm0, %v7209_v53  ;;  %6122 = vmatprep.mubr.msk.f32.mxu0 %vm255_vm0, %v3532_v11  ;;  %v1839_v53 = vld [vmem:[%s6593_s25 + $0xcb] sm:$0xff] }
 0x121   : > { %5870 = vmatmul.mubr.msk.f32.gmra.mrb[26].mxu1 %vm255_vm0, %v7219_v57  ;;  %6123 = vmatmul.mubr.msk.f32.gmra.mrb[8].mxu0 %vm255_vm0, %v3533_v28  ;;  %v1840_v57 = vld [vmem:[%s6593_s25 + $0xd3] sm:$0xff]  ;;  %v7505_v11 = vmul.u32.u64.low 3817748708, %v3957_v21  ;;  %v7506_v28 = vmul.u32.u64.high 3817748708, %v3957_v21, %v7505_v11 }
 0x122   : > { %5872 = vmatprep.mubr.msk.f32.mxu1 %vm255_vm0, %v7223_v61  ;;  %6125 = vmatprep.mubr.msk.f32.mxu0 %vm255_vm0, %v3534_v29  ;;  %v1841_v61 = vld [vmem:[%s6593_s25 + $0xdb] sm:$0xff]  ;;  %v4006_v29 = vmul.u32 18, %v4005_v24 }
 0x125   : > { %5873 = vmatmul.mubr.msk.f32.gmra.mrb[28].mxu1 %vm255_vm0, %v7233_v2  ;;  %6126 = vmatmul.mubr.msk.f32.gmra.mrb[10].mxu0 %vm255_vm0, %v3535_v30  ;;  %v1842_v2 = vld [vmem:[%s6593_s25 + $0xe3] sm:$0xff]  ;;  %v7509_v30 = vadd.s32 32, %v7484_v13 }
 0x126   : > { %5875 = vmatprep.mubr.msk.f32.mxu1 %vm255_vm0, %v7237_v47  ;;  %6128 = vmatprep.mubr.msk.f32.mxu0 %vm255_vm0, %v3536_v31  ;;  %v1843_v47 = vld [vmem:[%s6593_s25 + $0xeb] sm:$0xff]  ;;  %v3995_v31 = vmul.u32 18, %v3994_v27 }
 0x129   : > { %5876 = vmatmul.mubr.msk.f32.gmra.mrb[30].mxu1 %vm255_vm0, %v7247_v48  ;;  %6129 = vmatmul.mubr.msk.f32.gmra.mrb[12].mxu0 %vm255_vm0, %v3537_v32  ;;  %v1844_v48 = vld [vmem:[%s6593_s25 + $0xf3] sm:$0xff]  ;;  %v7512_v32 = vadd.s32 56, %v7484_v13 }
 0x12a   : > { %5878 = vmatprep.mubr.msk.f32.mxu1 %vm255_vm0, %v7251_v52  ;;  %6131 = vmatprep.mubr.msk.f32.mxu0 %vm255_vm0, %v3538_v33  ;;  %v1845_v52 = vld [vmem:[%s6593_s25 + $0xfb] sm:$0xff]  ;;  %v4027_v33 = vshrl.u32 %v7498_v23, 4 }
 0x12d   : > { %5879 = vmatmul.mubr.msk.f32.gmra.mrb[32].mxu1 %vm255_vm0, %v7261_v56  ;;  %6132 = vmatmul.mubr.msk.f32.gmra.mrb[14].mxu0 %vm255_vm0, %v3539_v34  ;;  %v1846_v56 = vld [vmem:[%s6593_s25 + $0x103] sm:$0xff]  ;;  %v7515_v34 = vsub.s32 %v3953_v14, %v4006_v29  ;;  %v7616_v14 = vadd.s32 96, %v7484_v13 }
 0x12e   : > { %5881 = vmatprep.mubr.msk.f32.mxu1 %vm255_vm0, %v1423_v35  ;;  %6134 = vmatprep.mubr.msk.f32.mxu0 %vm255_vm0, %v3540_v36  ;;  %v7518_v35 = vmul.u32.u64.low 3817748708, %v7509_v30  ;;  %v7519_v36 = vmul.u32.u64.high 3817748708, %v7509_v30, %v7518_v35 }
 0x12f   : > { %vm4385_vm1 = vcmp.ne.s32.totalorder %v7515_v34, 0  ;;  %vm4421_vm2 = vcmp.lt.s32.totalorder %v7515_v34, 0 }
 0x130   : > { %vm7559_vm5 = vmand %vm4421_vm2, %vm4385_vm1 }
 0x131   : > { %5882 = vmatmul.mubr.msk.f32.gmra.mrb[34].mxu1 %vm255_vm0, %v1424_v37  ;;  %6135 = vmatmul.mubr.msk.f32.gmra.mrb[16].mxu0 %vm255_vm0, %v3541_v38  ;;  %v4016_v37 = vshrl.u32 %v7502_v26, 4  ;;  %v7523_v38 = vadd.s32 48, %v7484_v13 }
 0x132   : > { %5913 = vmatprep.mubr.msk.f32.mxu1 %vm255_vm0, %v1834_v39  ;;  %6137 = vmatprep.mubr.msk.f32.mxu0 %vm255_vm0, %v3542_v40  ;;  %v7526_v39 = vsub.s32 %v7484_v13, %v3995_v31  ;;  %v4049_v40 = vshrl.u32 %v7506_v28, 4  ;;  %v7660_v31 = vadd.s32 112, %v7484_v13 }
 0x134   : > { %vm4384_vm3 = vcmp.ne.s32.totalorder %v7526_v39, 0  ;;  %vm4420_vm4 = vcmp.lt.s32.totalorder %v7526_v39, 0 }
 0x135   : > { %5914 = vmatmul.mubr.msk.f32.vlgmr.msra.gmra.mrb[18].mxu1 %vm255_vm0, %v1835_v41  ;;  %6138 = vmatmul.mubr.msk.f32.gmra.mrb[18].mxu0 %vm255_vm0, %v3543_v42  ;;  %v7530_v41 = vmul.u32.u64.low 3817748708, %v7512_v32  ;;  %v7531_v42 = vmul.u32.u64.high 3817748708, %v7512_v32, %v7530_v41  ;;  %vm7571_vm6 = vmand %vm4420_vm4, %vm4384_vm3 }
 0x136   : > { %5916 = vmatprep.mubr.msk.f32.mxu1 %vm255_vm0, %v1836_v43  ;;  %6140 = vmatprep.mubr.msk.f32.mxu0 %vm255_vm0, %v3544_v44  ;;  %v4028_v43 = vmul.u32 18, %v4027_v33  ;;  %v7534_v44 = vadd.s32 72, %v7484_v13  ;;  %v7871_v33 = vadd.s32 176, %v7484_v13 }
 0x139   : > { %5917 = vmatmul.mubr.msk.f32.gmra.mrb[20].mxu1 %vm255_vm0, %v1837_v45  ;;  %6141 = vmatmul.mubr.msk.f32.gmra.mrb[20].mxu0 %vm255_vm0, %v3545_v46  ;;  %v7539_v45 = vadd.s32 64, %v7484_v13  ;;  %v4017_v46 = vmul.u32 18, %v4016_v37 }
 0x13a   : > { %5919 = vmatprep.mubr.msk.f32.mxu1 %vm255_vm0, %v1838_v49  ;;  %6143 = vmatprep.mubr.msk.f32.mxu0 %vm255_vm0, %v3546_v51  ;;  %v7542_v49 = vmul.u32.u64.low 3817748708, %v7523_v38  ;;  %v7543_v51 = vmul.u32.u64.high 3817748708, %v7523_v38, %v7542_v49 }
 0x13d   : > { %5920 = vmatmul.mubr.msk.f32.gmra.mrb[22].mxu1 %vm255_vm0, %v1839_v53  ;;  %6144 = vmatmul.mubr.msk.f32.gmra.mrb[22].mxu0 %vm255_vm0, %v3547_v55  ;;  %v7546_v53 = vadd.s32 88, %v7484_v13  ;;  %v4050_v55 = vmul.u32 18, %v4049_v40  ;;  %v7673_v40 = vadd.s32 136, %v7484_v13 }
 0x13e   : > { %5922 = vmatprep.mubr.msk.f32.mxu1 %vm255_vm0, %v1840_v57  ;;  %6146 = vmatprep.mubr.msk.f32.mxu0 %vm255_vm0, %v3548_v59  ;;  %v7551_v57 = vadd.s32 18, %v7515_v34  ;;  %v7553_v59 = vsub.s32 %v3955_v19, %v4028_v43 }
 0x140   : > { %vm4387_vm7 = vcmp.ne.s32.totalorder %v7553_v59, 0  ;;  %vm4423_vm8 = vcmp.lt.s32.totalorder %v7553_v59, 0 }
 0x141   : > { %5923 = vmatmul.mubr.msk.f32.gmra.mrb[24].mxu1 %vm255_vm0, %v1841_v61  ;;  %6147 = vmatmul.mubr.msk.f32.gmra.mrb[24].mxu0 %vm255_vm0, %v3549_v63  ;;  %v7556_v61 = vmul.u32.u64.low 3817748708, %v7534_v44  ;;  %v7557_v63 = vmul.u32.u64.high 3817748708, %v7534_v44, %v7556_v61  ;;  %vm7609_vm11 = vmand %vm4423_vm8, %vm4387_vm7 }
 0x142   : > { %5925 = vmatprep.mubr.msk.f32.mxu1 %vm255_vm0, %v1842_v2  ;;  %6149 = vmatprep.mubr.msk.f32.mxu0 %vm255_vm0, %v3550_v4  ;;  %v7564_v4 = vadd.s32 18, %v7526_v39 }
 0x143   : > { %v4093_v15 = vshrl.u32 %v7557_v63, 4 }
 0x144   : > { %v9158_v2 = vsel %vm7571_vm6, %v7564_v4, %v7526_v39  ;;  %v8233_v39 = vadd.s32 280, %v7484_v13 }
 0x145   : > { %5926 = vmatmul.mubr.msk.f32.gmra.mrb[26].mxu1 %vm255_vm0, %v1843_v47  ;;  %6150 = vmatmul.mubr.msk.f32.gmra.mrb[26].mxu0 %vm255_vm0, %v3551_v6  ;;  %v4038_v47 = vshrl.u32 %v7519_v36, 4  ;;  %v4094_v35 = vmul.u32 18, %v4093_v15  ;;  %v7667_v36 = vmul.u32.u64.low 3817748708, %v7624_v18  ;;  %v7668_v37 = vmul.u32.u64.high 3817748708, %v7624_v18, %v7667_v36 }
 0x146   : > { %5928 = vmatprep.mubr.msk.f32.mxu1 %vm255_vm0, %v1844_v48  ;;  %6152 = vmatprep.mubr.msk.f32.mxu0 %vm255_vm0, %v3552_v50  ;;  %v7568_v6 = vmul.u32.u64.low 3817748708, %v7539_v45  ;;  %v7569_v48 = vmul.u32.u64.high 3817748708, %v7539_v45, %v7568_v6  ;;  %9165 = vst [vmem:[#allocation53_spill] sm:$0xff] %v8233_v39 }
 0x147   : > { %v7698_v63 = vsub.s32 %v7534_v44, %v4094_v35  ;;  %v4159_v15 = vshrl.u32 %v7668_v37, 4 }
 0x149   : > { %5929 = vmatmul.mubr.msk.f32.gmra.mrb[28].mxu1 %vm255_vm0, %v1845_v52  ;;  %6153 = vmatmul.mubr.msk.f32.gmra.mrb[28].mxu0 %vm255_vm0, %v3553_v54  ;;  %v7575_v52 = vsub.s32 %v3954_v20, %v4017_v46  ;;  %9055 = vst [vmem:[#allocation5_spill] sm:$0xff] %v7698_v63 }
 0x14a   : > { %5931 = vmatprep.mubr.msk.f32.mxu1 %vm255_vm0, %v1846_v56  ;;  %6155 = vmatprep.mubr.msk.f32.mxu0 %vm255_vm0, %v3554_v58  ;;  %v7578_v54 = vmul.u32.u64.low 3817748708, %v7546_v53  ;;  %v7579_v56 = vmul.u32.u64.high 3817748708, %v7546_v53, %v7578_v54  ;;  %v7581_v58 = vsub.s32 %v3957_v21, %v4050_v55  ;;  %v4082_v21 = vshrl.u32 %v7569_v48, 4 }
 0x14b   : > { %vm4386_vm9 = vcmp.ne.s32.totalorder %v7575_v52, 0  ;;  %vm4422_vm10 = vcmp.lt.s32.totalorder %v7575_v52, 0  ;;  %v7691_v55 = vadd.s32 128, %v7484_v13 }
 0x14c   : > { %vm4389_vm12 = vcmp.ne.s32.totalorder %v7581_v58, 0  ;;  %vm4425_vm13 = vcmp.lt.s32.totalorder %v7581_v58, 0  ;;  %vm7626_vm14 = vmand %vm4422_vm10, %vm4386_vm9  ;;  %v7643_v25 = vadd.s32 18, %v7581_v58  ;;  %v4115_v27 = vshrl.u32 %v7579_v56, 4 }
 0x14d   : > { %5932 = vmatmul.mubr.msk.f32.gmra.mrb[30].mxu1 %vm255_vm0, %v1847_v60  ;;  %6156 = vmatmul.mubr.msk.f32.gmra.mrb[30].mxu0 %vm255_vm0, %v3555_v62  ;;  %v4071_v60 = vshrl.u32 %v7531_v42, 4  ;;  %vm7648_vm15 = vmand %vm4425_vm13, %vm4389_vm12  ;;  %v7706_v48 = vmul.u32.u64.low 3817748708, %v7673_v40  ;;  %v7707_v54 = vmul.u32.u64.high 3817748708, %v7673_v40, %v7706_v48  ;;  %vm4393_vm9 = vcmp.ne.s32.totalorder %v7698_v63, 0 }
 0x14e   : > { %5934 = vmatprep.mubr.msk.f32.mxu1 %vm255_vm0, %v1848_v0  ;;  %6158 = vmatprep.mubr.msk.f32.mxu0 %vm255_vm0, %v3556_v3  ;;  %v7591_v0 = vadd.s32 80, %v7484_v13  ;;  %v4116_v46 = vmul.u32 18, %v4115_v27  ;;  %vm4429_vm10 = vcmp.lt.s32.totalorder %v7698_v63, 0  ;;  %v9069_v27 = vmov 0 }
 0x14f   : > { %v4072_v12 = vmul.u32 18, %v4071_v60  ;;  %vm7767_vm13 = vmand %vm4429_vm10, %vm4393_vm9  ;;  %v9078_v48 = vmov 0 }
 0x150   : > { %v7620_v16 = vmul.u32.u64.low 3817748708, %v7591_v0  ;;  %v7621_v17 = vmul.u32.u64.high 3817748708, %v7591_v0, %v7620_v16  ;;  %v7715_v44 = vsub.s32 %v7546_v53, %v4116_v46  ;;  %v9070_v27 = vsel %vm7767_vm13, 4294967295, %v9069_v27 }
 0x151   : > { %5935 = vmatmul.mubr.msk.f32.gmra.mrb[32].mxu1 %vm255_vm0, %v1849_v5  ;;  %6159 = vmatmul.mubr.msk.f32.gmra.mrb[32].mxu0 %vm255_vm0, %v3557_v1  ;;  %v7598_v5 = vadd.s32 18, %v7553_v59  ;;  %v4039_v1 = vmul.u32 18, %v4038_v47  ;;  %v7653_v28 = vsub.s32 %v7512_v32, %v4072_v12  ;;  %v4083_v32 = vmul.u32 18, %v4082_v21  ;;  %9071 = vst [vmem:[#allocation13_spill] sm:$0xff] %v9070_v27 }
 0x152   : > { %5937 = vmatprep.mubr.msk.f32.mxu1 %vm255_vm0, %v1850_v7  ;;  %6161 = vmatprep.mubr.msk.f32.mxu0 %vm255_vm0, %v3558_v8  ;;  %v7601_v7 = vadd.s32 104, %v7484_v13  ;;  %v7606_v8 = vadd.s32 18, %v7575_v52  ;;  %9058 = vst [vmem:[#allocation8_spill] sm:$0xff] %v7715_v44  ;;  %v9061_v16 = vmov 0  ;;  %v7787_v46 = vadd.s32 18, %v7715_v44 }
 0x153   : > { %v7631_v20 = vsub.s32 %v7509_v30, %v4039_v1  ;;  %9052 = vst [vmem:[#allocation2_spill] sm:$0xff] %v7653_v28  ;;  %v7656_v29 = vmul.u32.u64.low 3817748708, %v7616_v14  ;;  %v7657_v30 = vmul.u32.u64.high 3817748708, %v7616_v14, %v7656_v29  ;;  %vm4391_vm2 = vcmp.ne.s32.totalorder %v7653_v28, 0 }
 0x154   : > { %v7635_v22 = vmul.u32.u64.low 3817748708, %v7601_v7  ;;  %v7636_v23 = vmul.u32.u64.high 3817748708, %v7601_v7, %v7635_v22  ;;  %vm4427_vm3 = vcmp.lt.s32.totalorder %v7653_v28, 0  ;;  %v7695_v61 = vadd.s32 18, %v7653_v28  ;;  %9076 = vst [vmem:[#allocation15_spill] sm:$0xff] %v7787_v46 }
 0x155   : > { %5938 = vmatmul.mubr.msk.f32.gmra.mrb[34].mxu1 %vm255_vm0, %v1851_v9  ;;  %6162 = vmatmul.mubr.msk.f32.gmra.mrb[34].mxu0 %vm255_vm0, %v3559_v10  ;;  %v4060_v9 = vshrl.u32 %v7543_v51, 4  ;;  %vm4388_vm0 = vcmp.ne.s32.totalorder %v7631_v20, 0  ;;  %vm4424_vm1 = vcmp.lt.s32.totalorder %v7631_v20, 0  ;;  %v7680_v42 = vadd.s32 18, %v7631_v20  ;;  %vm7740_vm12 = vmand %vm4427_vm3, %vm4391_vm2 }
 0x156   : > { %v7687_v49 = vmul.u32.u64.low 3817748708, %v7660_v31  ;;  %v7688_v51 = vmul.u32.u64.high 3817748708, %v7660_v31, %v7687_v49  ;;  %9054 = vst [vmem:[#allocation4_spill] sm:$0xff] %v7695_v61  ;;  %v7702_v47 = vsub.s32 %v7539_v45, %v4083_v32  ;;  %v4137_v6 = vshrl.u32 %v7636_v23, 4  ;;  %vm7729_vm8 = vmand %vm4424_vm1, %vm4388_vm0 }
 0x157   : > { %v4061_v26 = vmul.u32 18, %v4060_v9  ;;  %v4126_v60 = vshrl.u32 %v7657_v30, 4  ;;  %v7719_v45 = vmul.u32.u64.low 3817748708, %v7691_v55  ;;  %v7720_v1 = vmul.u32.u64.high 3817748708, %v7691_v55, %v7719_v45 }
 0x158   : > { %9056 = vst [vmem:[#allocation6_spill] sm:$0xff] %v7702_v47  ;;  %v7723_v9 = vadd.s32 152, %v7484_v13  ;;  %v9062_v16 = vsel %vm7740_vm12, 4294967295, %v9061_v16  ;;  %vm4428_vm0 = vcmp.lt.s32.totalorder %v7702_v47, 0  ;;  %v4138_v21 = vmul.u32 18, %v4137_v6 }
 0x159   : > { %v7683_v43 = vsub.s32 %v7523_v38, %v4061_v26  ;;  %v4104_v38 = vshrl.u32 %v7621_v17, 4  ;;  %9063 = vst [vmem:[#allocation9_spill] sm:$0xff] %v9062_v16  ;;  %v7745_v17 = vadd.s32 18, %v7698_v63  ;;  %v9065_v22 = vmov 0 }
 0x15a   : > { %v7758_v23 = vadd.s32 18, %v7702_v47  ;;  %vm4395_vm2 = vcmp.ne.s32.totalorder %v7715_v44, 0  ;;  %vm4431_vm3 = vcmp.lt.s32.totalorder %v7715_v44, 0  ;;  %v7763_v26 = vadd.s32 144, %v7484_v13 }
 0x15b   : > { %9053 = vst [vmem:[#allocation3_spill] sm:$0xff] %v7683_v43  ;;  %vm4390_vm4 = vcmp.ne.s32.totalorder %v7683_v43, 0  ;;  %vm4426_vm7 = vcmp.lt.s32.totalorder %v7683_v43, 0  ;;  %v7712_v56 = vadd.s32 18, %v7683_v43  ;;  %v4105_v53 = vmul.u32 18, %v4104_v38  ;;  %9064 = vst [vmem:[#allocation10_spill] sm:$0xff] %v7745_v17 }
 0x15c   : > { %vm7753_vm1 = vmand %vm4426_vm7, %vm4390_vm4  ;;  %9068 = vst [vmem:[#allocation12_spill] sm:$0xff] %v7758_v23  ;;  %v4127_v29 = vmul.u32 18, %v4126_v60  ;;  %v4148_v30 = vshrl.u32 %v7688_v51, 4  ;;  %v7773_v35 = vmul.u32.u64.low 3817748708, %v7723_v9  ;;  %v7774_v36 = vmul.u32.u64.high 3817748708, %v7723_v9, %v7773_v35 }
 0x15d   : > { %9057 = vst [vmem:[#allocation7_spill] sm:$0xff] %v7712_v56  ;;  %v9066_v22 = vsel %vm7753_vm1, 4294967295, %v9065_v22  ;;  %vm9072_vm4 = vcmp.ne.s32.totalorder %v7702_v47, 0  ;;  %v9073_v32 = vmov 0  ;;  %v7790_v49 = vsub.s32 %v7591_v0, %v4105_v53  ;;  %vm7802_vm9 = vmand %vm4431_vm3, %vm4395_vm2 }
 0x15e   : > { %9067 = vst [vmem:[#allocation11_spill] sm:$0xff] %v9066_v22  ;;  %vm7782_vm7 = vmand %vm4428_vm0, %vm9072_vm4  ;;  %v4160_v51 = vmul.u32 18, %v4159_v15  ;;  %v9079_v48 = vsel %vm7802_vm9, 4294967295, %v9078_v48  ;;  %v4181_v0 = vshrl.u32 %v7707_v54, 4  ;;  %v7808_v60 = vadd.s32 168, %v7484_v13 }
 0x15f   : > { %v9074_v32 = vsel %vm7782_vm7, 4294967295, %v9073_v32  ;;  %9077 = vst [vmem:[#allocation16_spill] sm:$0xff] %v7790_v49  ;;  %9080 = vst [vmem:[#allocation17_spill] sm:$0xff] %v9079_v48  ;;  %v7815_v53 = vsub.s32 %v7601_v7, %v4138_v21  ;;  %v7818_v15 = vmul.u32.u64.low 3817748708, %v7763_v26  ;;  %v7819_v35 = vmul.u32.u64.high 3817748708, %v7763_v26, %v7818_v15 }
 0x160   : > { %9075 = vst [vmem:[#allocation14_spill] sm:$0xff] %v9074_v32  ;;  %v7826_v6 = vsub.s32 %v7616_v14, %v4127_v29  ;;  %v4149_v38 = vmul.u32 18, %v4148_v30  ;;  %v4170_v37 = vshrl.u32 %v7720_v1, 4  ;;  %vm4394_vm10 = vcmp.ne.s32.totalorder %v7790_v49, 0 }
 0x161   : > { %9081 = vst [vmem:[#allocation18_spill] sm:$0xff] %v7815_v53  ;;  %vm4430_vm0 = vcmp.lt.s32.totalorder %v7790_v49, 0  ;;  %v7836_v21 = vadd.s32 18, %v7790_v49  ;;  %v7839_v15 = vsub.s32 %v7624_v18, %v4160_v51  ;;  %v4182_v14 = vmul.u32 18, %v4181_v0 }
 0x162   : > { %9082 = vst [vmem:[#allocation19_spill] sm:$0xff] %v7826_v6  ;;  %v7842_v29 = vmul.u32.u64.low 3817748708, %v7808_v60  ;;  %v7843_v30 = vmul.u32.u64.high 3817748708, %v7808_v60, %v7842_v29  ;;  %v7846_v1 = vadd.s32 160, %v7484_v13  ;;  %v7851_v7 = vadd.s32 18, %v7815_v53  ;;  %vm7929_vm4 = vmand %vm4430_vm0, %vm4394_vm10 }
 0x163   : > { %9083 = vst [vmem:[#allocation20_spill] sm:$0xff] %v7839_v15  ;;  %v7854_v54 = vadd.s32 184, %v7484_v13  ;;  %v7860_v51 = vsub.s32 %v7660_v31, %v4149_v38  ;;  %v4171_v0 = vmul.u32 18, %v4170_v37  ;;  %v4203_v29 = vshrl.u32 %v7774_v36, 4 }
 0x164   : > { %9084 = vst [vmem:[#allocation21_spill] sm:$0xff] %v7851_v7  ;;  %v7867_v41 = vadd.s32 18, %v7826_v6  ;;  %v7875_v31 = vsub.s32 %v7673_v40, %v4182_v14  ;;  %v7878_v37 = vmul.u32.u64.low 3817748708, %v7846_v1  ;;  %v7879_v36 = vmul.u32.u64.high 3817748708, %v7846_v1, %v7878_v37 }
 0x165   : > { %v7882_v38 = vadd.s32 18, %v7839_v15  ;;  %v4192_v24 = vshrl.u32 %v7819_v35, 4  ;;  %v7886_v3 = vmul.u32.u64.low 3817748708, %v7854_v54  ;;  %v7887_v62 = vmul.u32.u64.high 3817748708, %v7854_v54, %v7886_v3 }
 0x166   : > { %9085 = vst [vmem:[#allocation22_spill] sm:$0xff] %v7867_v41  ;;  %9086 = vst [vmem:[#allocation23_spill] sm:$0xff] %v7875_v31  ;;  %v7893_v40 = vsub.s32 %v7691_v55, %v4171_v0  ;;  %v4204_v14 = vmul.u32 18, %v4203_v29  ;;  %v7896_v46 = vadd.s32 200, %v7484_v13  ;;  %v7905_v47 = vadd.s32 192, %v7484_v13 }
 0x167   : > { %v7901_v48 = vmul.u32.u64.low 3817748708, %v7871_v33  ;;  %v7902_v35 = vmul.u32.u64.high 3817748708, %v7871_v33, %v7901_v48  ;;  %v7908_v3 = vadd.s32 216, %v7484_v13  ;;  %v7912_v55 = vadd.s32 18, %v7860_v51 }
 0x168   : > { %9088 = vst [vmem:[#allocation25_spill] sm:$0xff] %v7893_v40  ;;  %v4225_v0 = vshrl.u32 %v7843_v30, 4  ;;  %v7918_v29 = vadd.s32 18, %v7875_v31  ;;  %v4193_v48 = vmul.u32 18, %v4192_v24  ;;  %v7921_v23 = vadd.s32 208, %v7484_v13 }
 0x169   : > { %v9091_v63 = vmov 0  ;;  %v7934_v30 = vsub.s32 %v7723_v9, %v4204_v14  ;;  %v7937_v17 = vmul.u32.u64.low 3817748708, %v7896_v46  ;;  %v7938_v27 = vmul.u32.u64.high 3817748708, %v7896_v46, %v7937_v17 }
 0x16a   : > { %v9092_v63 = vsel %vm7929_vm4, 4294967295, %v9091_v63  ;;  %v7941_v24 = vadd.s32 232, %v7484_v13  ;;  %vm9095_vm3 = vcmp.ne.s32.totalorder %v7815_v53, 0  ;;  %vm9096_vm2 = vcmp.lt.s32.totalorder %v7815_v53, 0 }
 0x16b   : > { %9093 = vst [vmem:[#allocation28_spill] sm:$0xff] %v7934_v30  ;;  %vm7949_vm10 = vmand %vm9096_vm2, %vm9095_vm3  ;;  %v7954_v9 = vmul.u32.u64.low 3817748708, %v7905_v47  ;;  %v7955_v14 = vmul.u32.u64.high 3817748708, %v7905_v47, %v7954_v9  ;;  %v7958_v43 = vmul.u32.u64.low 3817748708, %v7908_v3  ;;  %v7959_v17 = vmul.u32.u64.high 3817748708, %v7908_v3, %v7958_v43 }
 0x16c   : > { %vm9100_vm0 = vcmp.ne.s32.totalorder %v7826_v6, 0  ;;  %vm9101_vm9 = vcmp.lt.s32.totalorder %v7826_v6, 0  ;;  %vm4400_vm2 = vcmp.ne.s32.totalorder %v7893_v40, 0  ;;  %v4226_v56 = vmul.u32 18, %v4225_v0 }
 0x16d   : > { %vm7965_vm7 = vmand %vm9101_vm9, %vm9100_vm0  ;;  %v4214_v22 = vshrl.u32 %v7879_v36, 4  ;;  %vm9105_vm13 = vcmp.ne.s32.totalorder %v7839_v15, 0  ;;  %vm9106_vm1 = vcmp.lt.s32.totalorder %v7839_v15, 0  ;;  %v9107_v43 = vmov 0 }
 0x16e   : > { %vm7976_vm12 = vmand %vm9106_vm1, %vm9105_vm13  ;;  %v7981_v9 = vsub.s32 %v7763_v26, %v4193_v48  ;;  %v7985_v28 = vmul.u32.u64.low 3817748708, %v7921_v23  ;;  %v7986_v61 = vmul.u32.u64.high 3817748708, %v7921_v23, %v7985_v28  ;;  %vm9111_vm9 = vcmp.ne.s32.totalorder %v7860_v51, 0 }
 0x16f   : > { %v9108_v43 = vsel %vm7976_vm12, 4294967295, %v9107_v43  ;;  %vm9112_vm0 = vcmp.lt.s32.totalorder %v7860_v51, 0  ;;  %v9113_v36 = vmov 0  ;;  %v4236_v28 = vshrl.u32 %v7902_v35, 4 }
 0x170   : > { %9109 = vst [vmem:[#allocation32_spill] sm:$0xff] %v7981_v9  ;;  %vm7994_vm3 = vmand %vm9112_vm0, %vm9111_vm9  ;;  %vm9116_vm9 = vcmp.ne.s32.totalorder %v7875_v31, 0  ;;  %vm9117_vm0 = vcmp.lt.s32.totalorder %v7875_v31, 0  ;;  %vm9120_vm13 = vcmp.lt.s32.totalorder %v7893_v40, 0  ;;  %v8036_v16 = vadd.s32 18, %v7893_v40 }
 0x171   : > { %v9114_v36 = vsel %vm7994_vm3, 4294967295, %v9113_v36  ;;  %vm8022_vm1 = vmand %vm9117_vm0, %vm9116_vm9  ;;  %v8039_v6 = vadd.s32 18, %v7934_v30  ;;  %v8042_v41 = vsub.s32 %v7808_v60, %v4226_v56  ;;  %vm9127_vm9 = vcmp.ne.s32.totalorder %v7934_v30, 0 }
 0x172   : > { %9124 = vst [vmem:[#allocation36_spill] sm:$0xff] %v8036_v16  ;;  %vm9128_vm0 = vcmp.lt.s32.totalorder %v7934_v30, 0  ;;  %v9129_v35 = vmov 0  ;;  %v8055_v7 = vadd.s32 224, %v7484_v13  ;;  %v4269_v60 = vshrl.u32 %v7938_v27, 4 }
 0x173   : > { %9125 = vst [vmem:[#allocation37_spill] sm:$0xff] %v8039_v6  ;;  %9126 = vst [vmem:[#allocation38_spill] sm:$0xff] %v8042_v41  ;;  %v4237_v49 = vmul.u32 18, %v4236_v28  ;;  %v4258_v56 = vshrl.u32 %v7955_v14, 4  ;;  %v4291_v15 = vshrl.u32 %v7959_v17, 4  ;;  %v9134_v28 = vmov 0 }
 0x174   : > { %v8111_v6 = vadd.s32 18, %v8042_v41 }
 0x1c0   : > { %v7856_v18 = vpop.f32.mrb[0].mxu1 }
 0x1c1   : > { %v7863_v45 = vpop.f32.mrb[1].mxu1 }
 0x1c4   : > { %v7889_v44 = vpop.f32.mrb[2].mxu1 }
 0x1c5   : > { %9087 = vst [vmem:[#allocation24_spill] sm:$0xff] %v7889_v44  ;;  %v7898_v37 = vpop.f32.mrb[3].mxu1  ;;  %v4247_v44 = vshrl.u32 %v7887_v62, 4  ;;  %v8001_v62 = vmul.u32.u64.low 3817748708, %v7941_v24  ;;  %v8002_v26 = vmul.u32.u64.high 3817748708, %v7941_v24, %v8001_v62 }
 0x1c6   : > { %9089 = vst [vmem:[#allocation26_spill] sm:$0xff] %v7898_v37  ;;  %v9118_v62 = vmov 0 }
 0x1c7   : > { %v9119_v62 = vsel %vm8022_vm1, 4294967295, %v9118_v62  ;;  %v4248_v53 = vmul.u32 18, %v4247_v44  ;;  %v8104_v27 = vmul.u32.u64.low 3817748708, %v8055_v7  ;;  %v8105_v44 = vmul.u32.u64.high 3817748708, %v8055_v7, %v8104_v27 }
 0x1c8   : > { %v7923_v32 = vpop.f32.mrb[4].mxu1  ;;  %v4292_v27 = vmul.u32 18, %v4291_v15 }
 0x1c9   : > { %9090 = vst [vmem:[#allocation27_spill] sm:$0xff] %v7923_v32  ;;  %v7943_v37 = vpop.f32.mrb[5].mxu1  ;;  %v9097_v32 = vmov 0  ;;  %v8100_v17 = vsub.s32 %v7854_v54, %v4248_v53  ;;  %v8121_v53 = vsub.s32 %v7871_v33, %v4237_v49  ;;  %v4259_v54 = vmul.u32 18, %v4258_v56 }
 0x1ca   : > { %9094 = vst [vmem:[#allocation29_spill] sm:$0xff] %v7943_v37  ;;  %v9098_v32 = vsel %vm7949_vm10, 4294967295, %v9097_v32  ;;  %v9102_v37 = vmov 0  ;;  %vm8031_vm10 = vmand %vm9120_vm13, %vm4400_vm2  ;;  %vm4402_vm2 = vcmp.ne.s32.totalorder %v7981_v9, 0  ;;  %vm4438_vm13 = vcmp.lt.s32.totalorder %v7981_v9, 0 }
 0x1cb   : > { %9099 = vst [vmem:[#allocation30_spill] sm:$0xff] %v9098_v32  ;;  %v9103_v37 = vsel %vm7965_vm7, 4294967295, %v9102_v37  ;;  %vm8048_vm7 = vmand %vm9128_vm0, %vm9127_vm9  ;;  %v8136_v33 = vadd.s32 264, %v7484_v13  ;;  %vm9166_vm6 = vcmp.ne.s32.totalorder %v8121_v53, 0  ;;  %vm9167_vm12 = vcmp.lt.s32.totalorder %v8121_v53, 0 }
 0x1cc   : > { %9104 = vst [vmem:[#allocation31_spill] sm:$0xff] %v9103_v37  ;;  %v7988_v0 = vpop.f32.mrb[6].mxu1  ;;  %v4215_v37 = vmul.u32 18, %v4214_v22  ;;  %v9130_v35 = vsel %vm8048_vm7, 4294967295, %v9129_v35  ;;  %vm8091_vm9 = vmand %vm4438_vm13, %vm4402_vm2  ;;  %v4280_v22 = vshrl.u32 %v7986_v61, 4  ;;  %vm9142_vm13 = vcmp.ne.s32.totalorder %v8042_v41, 0 }
 0x1cd   : > { %9110 = vst [vmem:[#allocation33_spill] sm:$0xff] %v7988_v0  ;;  %v8004_v48 = vpop.f32.mrb[7].mxu1  ;;  %v9121_v0 = vmov 0  ;;  %9131 = vst [vmem:[#allocation39_spill] sm:$0xff] %v9130_v35  ;;  %v9135_v28 = vsel %vm8091_vm9, 4294967295, %v9134_v28  ;;  %v4270_v35 = vmul.u32 18, %v4269_v60 }
 0x1ce   : > { %9115 = vst [vmem:[#allocation34_spill] sm:$0xff] %v8004_v48  ;;  %v9122_v0 = vsel %vm8031_vm10, 4294967295, %v9121_v0  ;;  %9136 = vst [vmem:[#allocation42_spill] sm:$0xff] %v9135_v28  ;;  %v8097_v14 = vsub.s32 %v7846_v1, %v4215_v37  ;;  %v4313_v1 = vshrl.u32 %v8002_v26, 4  ;;  %v8126_v60 = vadd.s32 248, %v7484_v13 }
 0x1cf   : > { %9123 = vst [vmem:[#allocation35_spill] sm:$0xff] %v9122_v0  ;;  %v8129_v26 = vadd.s32 240, %v7484_v13  ;;  %v4281_v61 = vmul.u32 18, %v4280_v22  ;;  %v8142_v15 = vsub.s32 %v7896_v46, %v4270_v35  ;;  %v8152_v22 = vsub.s32 %v7905_v47, %v4259_v54  ;;  %vm8239_vm4 = vmand %vm9167_vm12, %vm9166_vm6 }
 0x1d0   : > { %v8057_v32 = vpop.f32.mrb[8].mxu1  ;;  %9137 = vst [vmem:[#allocation43_spill] sm:$0xff] %v8097_v14  ;;  %v8132_v40 = vadd.s32 18, %v8097_v14  ;;  %v4314_v56 = vmul.u32 18, %v4313_v1  ;;  %v8155_v28 = vsub.s32 %v7908_v3, %v4292_v27  ;;  %vm9143_vm2 = vcmp.lt.s32.totalorder %v8042_v41, 0 }
 0x1d1   : > { %9132 = vst [vmem:[#allocation40_spill] sm:$0xff] %v8057_v32  ;;  %v8072_v48 = vpop.f32.mrb[9].mxu1  ;;  %v8075_v32 = vadd.s32 18, %v7981_v9  ;;  %v8145_v9 = vadd.s32 256, %v7484_v13  ;;  %v8158_v16 = vmul.u32.u64.low 3817748708, %v8126_v60  ;;  %v8159_v46 = vmul.u32.u64.high 3817748708, %v8126_v60, %v8158_v16  ;;  %vm8169_vm9 = vmand %vm9143_vm2, %vm9142_vm13 }
 0x1d2   : > { %9138 = vst [vmem:[#allocation44_spill] sm:$0xff] %v8132_v40  ;;  %v8162_v35 = vmul.u32.u64.low 3817748708, %v8129_v26  ;;  %v8163_v1 = vmul.u32.u64.high 3817748708, %v8129_v26, %v8162_v35  ;;  %v8174_v47 = vsub.s32 %v7921_v23, %v4281_v61  ;;  %v4302_v3 = vshrl.u32 %v8105_v44, 4 }
 0x1d3   : > { %9133 = vst [vmem:[#allocation41_spill] sm:$0xff] %v8075_v32  ;;  %9140 = vst [vmem:[#allocation46_spill] sm:$0xff] %v8145_v9  ;;  %v8178_v54 = vmul.u32.u64.low 3817748708, %v8136_v33  ;;  %v8179_v16 = vmul.u32.u64.high 3817748708, %v8136_v33, %v8178_v54  ;;  %v9148_v35 = vsel %vm7559_vm5, %v7551_v57, %v7515_v34  ;;  %vm9151_vm13 = vcmp.ne.s32.totalorder %v8097_v14, 0 }
 0x1d4   : > { %v8107_v30 = vpop.f32.mrb[10].mxu1  ;;  %9146 = vst [vmem:[#allocation48_spill] sm:$0xff] %v8174_v47  ;;  %vm8188_vm2 = vcmp.lt.s32.totalorder %v9148_v35, 16  ;;  %vm9152_vm0 = vcmp.lt.s32.totalorder %v8097_v14, 0  ;;  %v9153_v23 = vmov 0  ;;  %v8201_v44 = vadd.s32 18, %v8100_v17 }
 0x1d5   : > { %v8114_v37 = vpop.f32.mrb[11].mxu1  ;;  %vm8196_vm7 = vmand %vm9152_vm0, %vm9151_vm13  ;;  %v8206_v34 = vsub.s32 %v7941_v24, %v4314_v56  ;;  %vm8215_vm0 = vcmp.lt.s32.totalorder %v9158_v2, 16  ;;  %v9159_v61 = vmov 0  ;;  %vm9161_vm13 = vcmp.ne.s32.totalorder %v8100_v17, 0 }
 0x1d6   : > { %v9154_v23 = vsel %vm8196_vm7, 4294967295, %v9153_v23  ;;  %v9160_v61 = vsel %vm8215_vm0, 4294967295, %v9159_v61  ;;  %vm9162_vm10 = vcmp.lt.s32.totalorder %v8100_v17, 0  ;;  %v8228_v24 = vadd.s32 18, %v8121_v53 }
 0x1d7   : > { %9155 = vst [vmem:[#allocation50_spill] sm:$0xff] %v9154_v23  ;;  %9156 = vst [vmem:[#allocation51_spill] sm:$0xff] %v8206_v34  ;;  %v8246_v50 = vmul.u32.u64.low 3817748708, %v8145_v9  ;;  %v8247_v56 = vmul.u32.u64.high 3817748708, %v8145_v9, %v8246_v50  ;;  %vm9170_vm3 = vcmp.ne.s32.totalorder %v8142_v15, 0  ;;  %vm9171_vm5 = vcmp.lt.s32.totalorder %v8142_v15, 0 }
 0x1d8   : > { %v8138_v49 = vpop.f32.mrb[12].mxu1  ;;  %vm8223_vm1 = vmand %vm9162_vm10, %vm9161_vm13  ;;  %v8258_v2 = vadd.s32 18, %v8142_v15  ;;  %v9175_v50 = vsel %vm7609_vm11, %v7598_v5, %v7553_v59  ;;  %v9176_v9 = vmov 0  ;;  %v8285_v10 = vadd.s32 18, %v8155_v28 }
 0x1d9   : > { %9139 = vst [vmem:[#allocation45_spill] sm:$0xff] %v8138_v49  ;;  %v8147_v32 = vpop.f32.mrb[13].mxu1  ;;  %vm8253_vm0 = vmand %vm9171_vm5, %vm9170_vm3  ;;  %vm8269_vm13 = vcmp.lt.s32.totalorder %v9175_v50, 16  ;;  %vm9178_vm3 = vcmp.ne.s32.totalorder %v8152_v22, 0  ;;  %vm9179_vm5 = vcmp.lt.s32.totalorder %v8152_v22, 0  ;;  %v9180_v49 = vmov 0 }
 0x1da   : > { %9141 = vst [vmem:[#allocation47_spill] sm:$0xff] %v8147_v32  ;;  %v9177_v9 = vsel %vm8269_vm13, 4294967295, %v9176_v9  ;;  %vm8277_vm10 = vmand %vm9179_vm5, %vm9178_vm3  ;;  %vm4413_vm11 = vcmp.ne.s32.totalorder %v8206_v34, 0  ;;  %vm4449_vm6 = vcmp.lt.s32.totalorder %v8206_v34, 0  ;;  %v9183_v5 = vsel %vm7626_vm14, %v7606_v8, %v7575_v52 }
 0x1db   : > { %v9181_v49 = vsel %vm8277_vm10, 4294967295, %v9180_v49  ;;  %vm8296_vm3 = vcmp.lt.s32.totalorder %v9183_v5, 16  ;;  %vm9186_vm5 = vcmp.ne.s32.totalorder %v8155_v28, 0  ;;  %vm9187_vm12 = vcmp.lt.s32.totalorder %v8155_v28, 0  ;;  %vm8344_vm7 = vmand %vm4449_vm6, %vm4413_vm11 }
 0x1dc   : > { %v8181_v27 = vpop.f32.mrb[14].mxu1  ;;  %vm8304_vm13 = vmand %vm9187_vm12, %vm9186_vm5  ;;  %v8309_v31 = vadd.s32 18, %v8174_v47  ;;  %v8316_v52 = vadd.s32 272, %v7484_v13  ;;  %vm9192_vm14 = vcmp.ne.s32.totalorder %v8174_v47, 0  ;;  %vm9193_vm12 = vcmp.lt.s32.totalorder %v8174_v47, 0  ;;  %v9226_v47 = vld [vmem:[#allocation26_spill] sm:$0xff] }
 0x1dd   : > { %9147 = vst [vmem:[#allocation49_spill] sm:$0xff] %v8181_v27  ;;  %v8208_v57 = vpop.f32.mrb[15].mxu1  ;;  %vm8330_vm5 = vmand %vm9193_vm12, %vm9192_vm14  ;;  %v8335_v13 = vadd.s32 18, %v8206_v34  ;;  %v9197_v5 = vmov 0  ;;  %v4324_v40 = vshrl.u32 %v8163_v1, 4  ;;  %v4357_v23 = vshrl.u32 %v8179_v16, 4 }
 0x1de   : > { %9157 = vst [vmem:[#allocation52_spill] sm:$0xff] %v8208_v57  ;;  %v4303_v57 = vmul.u32 18, %v4302_v3  ;;  %v8282_v3 = vadd.s32 18, %v8152_v22  ;;  %9190 = vst [vmem:[#allocation56_spill] sm:$0xff] %v8309_v31  ;;  %v9198_v5 = vsel %vm8344_vm7, 4294967295, %v9197_v5  ;;  %v4346_v12 = vshrl.u32 %v8247_v56, 4 }
 0x1df   : > { %9191 = vst [vmem:[#allocation57_spill] sm:$0xff] %v8316_v52  ;;  %9196 = vst [vmem:[#allocation58_spill] sm:$0xff] %v8335_v13  ;;  %v4358_v11 = vmul.u32 18, %v4357_v23  ;;  %vm9207_vm6 = vcmask 130048   ;;  %vm9208_vm11 = vnez %v9160_v61  ;;  %v9217_v23 = vld [vmem:[#allocation24_spill] sm:$0xff]  ;;  %v9218_v61 = vld [vmem:[#allocation11_spill] sm:$0xff] }
 0x1e0   : > { %v8262_v27 = vpop.f32.mrb[16].mxu1  ;;  %9199 = vst [vmem:[#allocation59_spill] sm:$0xff] %v9198_v5  ;;  %v8349_v14 = vsub.s32 %v8055_v7, %v4303_v57  ;;  %v9204_v57 = vsel %vm7729_vm8, %v7680_v42, %v7631_v20  ;;  %v9211_v20 = vld [vmem:[#allocation4_spill] sm:$0xff]  ;;  %vm9216_vm8 = vmmov %vm9207_vm6  ;;  %v9221_v13 = vld [vmem:[#allocation3_spill] sm:$0xff] }
 0x1e1   : > { %9174 = vst [vmem:[#allocation54_spill] sm:$0xff] %v8262_v27  ;;  %v8289_v59 = vpop.f32.mrb[17].mxu1  ;;  %v9188_v27 = vmov 0 }
 0x1e2   : > { %9182 = vst [vmem:[#allocation55_spill] sm:$0xff] %v8289_v59  ;;  %v9189_v27 = vsel %vm8304_vm13, 4294967295, %v9188_v27  ;;  %v8312_v19 = vmul.u32.u64.low 3817748708, %v8233_v39  ;;  %v8313_v59 = vmul.u32.u64.high 3817748708, %v8233_v39, %v8312_v19  ;;  %v9194_v39 = vmov 0  ;;  %9200 = vst [vmem:[#allocation60_spill] sm:$0xff] %v8349_v14 }
 0x1e3   : > { %v9195_v39 = vsel %vm8330_vm5, 4294967295, %v9194_v39  ;;  %v4335_v19 = vshrl.u32 %v8159_v46, 4  ;;  %v9201_v46 = vsel %vm7648_vm15, %v7643_v25, %v7581_v58  ;;  %vm8384_vm15 = vcmp.lt.s32.totalorder %v9204_v57, 16 }
 0x1e4   : > { %v6112_v41 = vpop.f32.mrb[0].mxu0  ;;  %vm8358_vm14 = vcmp.lt.s32.totalorder %v9201_v46, 16  ;;  %v8393_v1 = vmul.u32.u64.low 3817748708, %v8316_v52  ;;  %v8394_v58 = vmul.u32.u64.high 3817748708, %v8316_v52, %v8393_v1  ;;  %v4325_v57 = vmul.u32 18, %v4324_v40  ;;  %v9209_v52 = vld [vmem:[#allocation9_spill] sm:$0xff] }
 0x1e5   : > { %v6166_v25 = vadd.f32 %v6112_v41, %v7856_v18  ;;  %v3736_v16 = vpop.f32.mrb[1].mxu0  ;;  %v4336_v42 = vmul.u32 18, %v4335_v19  ;;  %vm9210_vm12 = vnez %v9209_v52  ;;  %v9212_v19 = vld [vmem:[#allocation2_spill] sm:$0xff]  ;;  %vm9227_vm5 = vnez %v9177_v9  ;;  %v9231_v9 = vld [vmem:[#allocation13_spill] sm:$0xff]  ;;  %v9261_v46 = vld [vmem:[#allocation16_spill] sm:$0xff] }
 0x1e6   : > { %v6167_v41 = vadd.f32 %v3736_v16, %v7863_v45  ;;  %v9213_v34 = vsel %vm9210_vm12, %v9211_v20, %v9212_v19  ;;  %vm9225_vm12 = vmmov %vm9216_vm8  ;;  %v9392_v32 = vld [vmem:[#allocation56_spill] sm:$0xff] }
 0x1e7   : > { %v4673_v18 = vsel %vm8188_vm2, %v6166_v25, 0.0  ;;  %vm8414_vm7 = vcmp.lt.s32.totalorder %v9213_v34, 16  ;;  %vm4448_vm2 = vcmp.lt.s32.totalorder %v8349_v14, 0  ;;  %v4379_v34 = vshrl.u32 %v8313_v59, 4 }
 0x1e8   : > { %v4710_v7 = vsel %vm9207_vm6, %v4673_v18, 0.0  ;;  %v4787_v1 = vmul.f32 %v4673_v18, %v4673_v18  ;;  %v4672_v45 = vsel %vm9208_vm11, %v6167_v41, 0.0  ;;  %v6115_v16 = vpop.f32.mrb[2].mxu0  ;;  %vm9219_vm6 = vnez %v9218_v61  ;;  %v9220_v41 = vld [vmem:[#allocation7_spill] sm:$0xff] }
 0x1e9   : > { %v4709_v40 = vsel %vm9216_vm8, %v4672_v45, 0.0  ;;  %v4786_v0 = vmul.f32 %v4672_v45, %v4672_v45  ;;  %v6168_v25 = vadd.f32 %v6115_v16, %v9217_v23  ;;  %v3746_v18 = vpop.f32.mrb[3].mxu0  ;;  %v9222_v52 = vsel %vm9219_vm6, %v9220_v41, %v9221_v13  ;;  %v9290_v41 = vld [vmem:[#allocation20_spill] sm:$0xff] }
 0x1ea   : > { %vm8426_vm11 = vcmp.lt.s32.totalorder %v9222_v52, 16  ;;  %v4823_v20 = vsel %vm9225_vm12, %v4787_v1, 0.0  ;;  %v4711_v19 = vadd.f32 %v4710_v7, %v4709_v40  ;;  %v6169_v31 = vadd.f32 %v3746_v18, %v9226_v47  ;;  %v9234_v18 = vld [vmem:[#allocation5_spill] sm:$0xff]  ;;  %vm9238_vm12 = vmmov %vm9216_vm8  ;;  %v9410_v54 = vld [vmem:[#allocation60_spill] sm:$0xff] }
 0x1eb   : > { %v8434_v45 = vadd.s32 18, %v8349_v14  ;;  %v4822_v16 = vsel %vm9216_vm8, %v4786_v0, 0.0  ;;  %v4675_v23 = vsel %vm9227_vm5, %v6168_v25, 0.0  ;;  %vm9228_vm6 = vcmp.ne.s32.totalorder %v8349_v14, 0  ;;  %v9233_v25 = vld [vmem:[#allocation10_spill] sm:$0xff] }
 0x1ec   : > { %vm8441_vm13 = vmand %vm4448_vm2, %vm9228_vm6  ;;  %v9229_v13 = vmov 0  ;;  %v8446_v59 = vsub.s32 %v8126_v60, %v4336_v42  ;;  %v8449_v7 = vsub.s32 %v8129_v26, %v4325_v57  ;;  %v4824_v47 = vadd.f32 %v4823_v20, %v4822_v16  ;;  %v6118_v0 = vpop.f32.mrb[4].mxu0  ;;  %v9239_v57 = vld [vmem:[#allocation27_spill] sm:$0xff]  ;;  %v9242_v20 = vld [vmem:[#allocation12_spill] sm:$0xff] }
 0x1ed   : > { %v9230_v13 = vsel %vm8441_vm13, 4294967295, %v9229_v13  ;;  %v4789_v1 = vmul.f32 %v4675_v23, %v4675_v23  ;;  %v4674_v40 = vsel %vm8296_vm3, %v6169_v31, 0.0  ;;  %vm9232_vm5 = vnez %v9231_v9  ;;  %v3756_v50 = vpop.f32.mrb[5].mxu0  ;;  %v9240_v31 = vld [vmem:[#allocation14_spill] sm:$0xff]  ;;  %vm9248_vm6 = vmmov %vm9238_vm12 }
 0x1ee   : > { %v9235_v61 = vsel %vm9232_vm5, %v9233_v25, %v9234_v18  ;;  %v8463_v60 = vsub.s32 %v8136_v33, %v4358_v11  ;;  %v4712_v26 = vsel %vm9238_vm12, %v4674_v40, 0.0  ;;  %v4788_v42 = vmul.f32 %v4674_v40, %v4674_v40  ;;  %v9243_v16 = vld [vmem:[#allocation6_spill] sm:$0xff]  ;;  %v9247_v33 = vld [vmem:[#allocation29_spill] sm:$0xff]  ;;  %vm9249_vm5 = vmmov %vm9248_vm6 }
 0x1ef   : > { %vm8458_vm2 = vcmp.lt.s32.totalorder %v9235_v61, 16  ;;  %v6170_v52 = vadd.f32 %v6118_v0, %v9239_v57  ;;  %vm9241_vm3 = vnez %v9240_v31  ;;  %v8476_v18 = vmul.u32 18, %v4346_v12 }
 0x1f0   : > { %v9244_v9 = vsel %vm9241_vm3, %v9242_v20, %v9243_v16  ;;  %v4713_v61 = vadd.f32 %v4712_v26, %v4711_v19  ;;  %v6171_v11 = vadd.f32 %v3756_v50, %v9247_v33  ;;  %v8483_v0 = vmul.u32 18, %v4379_v34  ;;  %vm9250_vm3 = vmmov %vm9249_vm5  ;;  %v6121_v16 = vpop.f32.mrb[6].mxu0  ;;  %v9253_v34 = vld [vmem:[#allocation15_spill] sm:$0xff]  ;;  %v9254_v33 = vld [vmem:[#allocation8_spill] sm:$0xff] }
 0x1f1   : > { %vm8472_vm8 = vcmp.lt.s32.totalorder %v9244_v9, 16  ;;  %v4714_v57 = vsel %vm9248_vm6, %v4675_v23, 0.0  ;;  %v4825_v31 = vsel %vm9249_vm5, %v4788_v42, 0.0  ;;  %v4677_v20 = vsel %vm8358_vm14, %v6170_v52, 0.0  ;;  %v9251_v9 = vld [vmem:[#allocation17_spill] sm:$0xff]  ;;  %vm9258_vm14 = vmmov %vm9250_vm3 }
 0x1f2   : > { %vm4415_vm12 = vcmp.ne.s32.totalorder %v8446_v59, 0  ;;  %v4827_v12 = vsel %vm9250_vm3, %v4789_v1, 0.0  ;;  %v4826_v19 = vadd.f32 %v4825_v31, %v4824_v47  ;;  %v4791_v26 = vmul.f32 %v4677_v20, %v4677_v20  ;;  %v9259_v1 = vld [vmem:[#allocation33_spill] sm:$0xff]  ;;  %v3766_v31 = vpop.f32.mrb[7].mxu0 }
 0x1f3   : > { %v4676_v50 = vsel %vm8384_vm15, %v6171_v11, 0.0  ;;  %vm9252_vm13 = vnez %v9251_v9  ;;  %v4715_v8 = vadd.f32 %v4714_v57, %v4713_v61  ;;  %v6172_v47 = vadd.f32 %v6121_v16, %v9259_v1  ;;  %v9311_v9 = vld [vmem:[#allocation36_spill] sm:$0xff] }
 0x1f4   : > { %v9255_v23 = vsel %vm9252_vm13, %v9253_v34, %v9254_v33  ;;  %v4716_v52 = vsel %vm9258_vm14, %v4676_v50, 0.0  ;;  %v4790_v40 = vmul.f32 %v4676_v50, %v4676_v50  ;;  %vm9260_vm5 = vnez %v9092_v63  ;;  %v9265_v33 = vld [vmem:[#allocation34_spill] sm:$0xff]  ;;  %vm9266_vm14 = vmmov %vm9250_vm3 }
 0x1f5   : > { %vm8498_vm6 = vcmp.lt.s32.totalorder %v9255_v23, 16  ;;  %v9262_v11 = vsel %vm9260_vm5, %v7836_v21, %v9261_v46  ;;  %v4828_v34 = vadd.f32 %v4827_v12, %v4826_v19  ;;  %v6173_v23 = vadd.f32 %v3766_v31, %v9265_v33  ;;  %vm9267_vm5 = vmmov %vm9250_vm3  ;;  %v6124_v19 = vpop.f32.mrb[8].mxu0  ;;  %v9268_v31 = vld [vmem:[#allocation30_spill] sm:$0xff] }
 0x1f6   : > { %vm8509_vm15 = vcmp.lt.s32.totalorder %v9262_v11, 16  ;;  %v8516_v61 = vadd.s32 18, %v8446_v59  ;;  %v4718_v57 = vsel %vm9250_vm3, %v4677_v20, 0.0  ;;  %v4717_v50 = vadd.f32 %v4716_v52, %v4715_v8  ;;  %v9270_v11 = vld [vmem:[#allocation21_spill] sm:$0xff]  ;;  %v9271_v33 = vld [vmem:[#allocation18_spill] sm:$0xff]  ;;  %v9276_v8 = vld [vmem:[#allocation40_spill] sm:$0xff] }
 0x1f7   : > { %v4829_v63 = vsel %vm9266_vm14, %v4790_v40, 0.0  ;;  %v4679_v21 = vsel %vm8414_vm7, %v6172_v47, 0.0  ;;  %v4831_v16 = vsel %vm9267_vm5, %v4791_v26, 0.0  ;;  %v4678_v12 = vsel %vm8426_vm11, %v6173_v23, 0.0  ;;  %vm9275_vm7 = vmmov %vm9267_vm5  ;;  %v3776_v5 = vpop.f32.mrb[9].mxu0  ;;  %v9277_v47 = vld [vmem:[#allocation31_spill] sm:$0xff] }
 0x1f8   : > { %v4830_v1 = vadd.f32 %v4829_v63, %v4828_v34  ;;  %v4793_v46 = vmul.f32 %v4679_v21, %v4679_v21  ;;  %vm9269_vm13 = vnez %v9268_v31  ;;  %v4719_v56 = vadd.f32 %v4718_v57, %v4717_v50  ;;  %v9279_v34 = vld [vmem:[#allocation22_spill] sm:$0xff]  ;;  %v9280_v23 = vld [vmem:[#allocation19_spill] sm:$0xff]  ;;  %vm9284_vm14 = vmmov %vm9275_vm7 }
 0x1f9   : > { %v9272_v14 = vsel %vm9269_vm13, %v9270_v11, %v9271_v33  ;;  %v4720_v40 = vsel %vm9275_vm7, %v4678_v12, 0.0  ;;  %v4792_v26 = vmul.f32 %v4678_v12, %v4678_v12  ;;  %v6174_v52 = vadd.f32 %v6124_v19, %v9276_v8  ;;  %vm9288_vm13 = vmmov %vm9275_vm7  ;;  %v9325_v20 = vld [vmem:[#allocation37_spill] sm:$0xff] }
 0x1fa   : > { %vm8530_vm3 = vcmp.lt.s32.totalorder %v9272_v14, 16  ;;  %vm9278_vm11 = vnez %v9277_v47  ;;  %v4832_v14 = vadd.f32 %v4831_v16, %v4830_v1  ;;  %v6175_v11 = vadd.f32 %v3776_v5, %v8072_v48  ;;  %v9334_v31 = vld [vmem:[#allocation41_spill] sm:$0xff] }
 0x1fb   : > { %v9281_v63 = vsel %vm9278_vm11, %v9279_v34, %v9280_v23  ;;  %v8549_v57 = vadd.s32 18, %v8449_v7  ;;  %v4722_v50 = vsel %vm9275_vm7, %v4679_v21, 0.0  ;;  %v4721_v12 = vadd.f32 %v4720_v40, %v4719_v56  ;;  %v6127_v56 = vpop.f32.mrb[10].mxu0 }
 0x1fc   : > { %vm8542_vm5 = vcmp.lt.s32.totalorder %v9281_v63, 16  ;;  %v4833_v19 = vsel %vm9284_vm14, %v4792_v26, 0.0  ;;  %v4681_v33 = vsel %vm8458_vm2, %v6174_v52, 0.0  ;;  %vm9285_vm11 = vcmp.lt.s32.totalorder %v8446_v59, 0  ;;  %v3786_v34 = vpop.f32.mrb[11].mxu0  ;;  %v9348_v26 = vld [vmem:[#allocation38_spill] sm:$0xff] }
 0x1fd   : > { %vm8559_vm10 = vmand %vm9285_vm11, %vm4415_vm12  ;;  %v4835_v48 = vsel %vm9288_vm13, %v4793_v46, 0.0  ;;  %v4834_v1 = vadd.f32 %v4833_v19, %v4832_v14  ;;  %v4795_v8 = vmul.f32 %v4681_v33, %v4681_v33  ;;  %v4680_v21 = vsel %vm8472_vm8, %v6175_v11, 0.0  ;;  %v9303_v19 = vld [vmem:[#allocation23_spill] sm:$0xff] }
 0x1fe   : > { %vm9289_vm14 = vnez %v9108_v43  ;;  %v4723_v52 = vadd.f32 %v4722_v50, %v4721_v12  ;;  %vm9294_vm12 = vmmov %vm9275_vm7  ;;  %v4794_v47 = vmul.f32 %v4680_v21, %v4680_v21  ;;  %v6176_v46 = vadd.f32 %v6127_v56, %v8107_v30  ;;  %v6130_v12 = vpop.f32.mrb[12].mxu0  ;;  %v9356_v43 = vld [vmem:[#allocation44_spill] sm:$0xff] }
 0x1ff   : > { %v9291_v40 = vsel %vm9289_vm14, %v7882_v38, %v9290_v41  ;;  %v4724_v5 = vsel %vm9294_vm12, %v4680_v21, 0.0  ;;  %vm9295_vm13 = vnez %v9114_v36  ;;  %v4836_v38 = vadd.f32 %v4835_v48, %v4834_v1  ;;  %vm9299_vm11 = vmmov %vm9275_vm7  ;;  %v3796_v41 = vpop.f32.mrb[13].mxu0 }
 0x200   : > { %vm8571_vm2 = vcmp.lt.s32.totalorder %v9291_v40, 16  ;;  %v9296_v25 = vsel %vm9295_vm13, %v7912_v55, %v7860_v51  ;;  %v6177_v23 = vadd.f32 %v3786_v34, %v8114_v37  ;;  %v4559_v63 = vsel %vm8559_vm10, %v8516_v61, %v8446_v59  ;;  %vm9300_vm14 = vmmov %vm9275_vm7  ;;  %v9309_v40 = vld [vmem:[#allocation35_spill] sm:$0xff] }
 0x201   : > { %vm8582_vm8 = vcmp.lt.s32.totalorder %v9296_v25, 16  ;;  %v4726_v30 = vsel %vm9299_vm11, %v4681_v33, 0.0  ;;  %v4725_v36 = vadd.f32 %v4724_v5, %v4723_v52  ;;  %v4837_v14 = vsel %vm9300_vm14, %v4794_v47, 0.0  ;;  %vm9301_vm12 = vmmov %vm9275_vm7  ;;  %v9312_v52 = vld [vmem:[#allocation25_spill] sm:$0xff]  ;;  %v9316_v47 = vld [vmem:[#allocation47_spill] sm:$0xff] }
 0x202   : > { %v4683_v51 = vsel %vm8498_vm6, %v6176_v46, 0.0  ;;  %v4839_v55 = vsel %vm9301_vm12, %v4795_v8, 0.0  ;;  %v4838_v11 = vadd.f32 %v4837_v14, %v4836_v38  ;;  %v4682_v37 = vsel %vm8509_vm15, %v6177_v23, 0.0  ;;  %vm9307_vm14 = vmmov %vm9275_vm7  ;;  %v9308_v8 = vld [vmem:[#allocation45_spill] sm:$0xff] }
 0x203   : > { %v4797_v50 = vmul.f32 %v4683_v51, %v4683_v51  ;;  %vm9302_vm13 = vnez %v9119_v62  ;;  %v4727_v1 = vadd.f32 %v4726_v30, %v4725_v36  ;;  %v4728_v42 = vsel %vm9307_vm14, %v4682_v37, 0.0  ;;  %vm9318_vm14 = vmmov %vm9275_vm7 }
 0x204   : > { %v9304_v48 = vsel %vm9302_vm13, %v7918_v29, %v9303_v19  ;;  %v4796_v21 = vmul.f32 %v4682_v37, %v4682_v37  ;;  %v6178_v56 = vadd.f32 %v6130_v12, %v9308_v8  ;;  %vm9310_vm6 = vnez %v9309_v40  ;;  %vm9317_vm13 = vmmov %vm9275_vm7  ;;  %v6133_v37 = vpop.f32.mrb[14].mxu0  ;;  %v9323_v12 = vld [vmem:[#allocation39_spill] sm:$0xff]  ;;  %v9326_v19 = vld [vmem:[#allocation28_spill] sm:$0xff] }
 0x205   : > { %vm8604_vm11 = vcmp.lt.s32.totalorder %v9304_v48, 16  ;;  %v9313_v5 = vsel %vm9310_vm6, %v9311_v9, %v9312_v52  ;;  %v4840_v29 = vadd.f32 %v4839_v55, %v4838_v11  ;;  %v6179_v46 = vadd.f32 %v3796_v41, %v9316_v47  ;;  %v3806_v41 = vpop.f32.mrb[15].mxu0  ;;  %v9332_v40 = vld [vmem:[#allocation42_spill] sm:$0xff]  ;;  %v9335_v9 = vld [vmem:[#allocation32_spill] sm:$0xff] }
 0x206   : > { %vm8615_vm15 = vcmp.lt.s32.totalorder %v9313_v5, 16  ;;  %v8622_v34 = vadd.s32 18, %v8463_v60  ;;  %v4730_v25 = vsel %vm9317_vm13, %v4683_v51, 0.0  ;;  %v4729_v38 = vadd.f32 %v4728_v42, %v4727_v1  ;;  %v9339_v47 = vld [vmem:[#allocation52_spill] sm:$0xff] }
 0x207   : > { %v4841_v23 = vsel %vm9318_vm14, %v4796_v21, 0.0  ;;  %v4685_v30 = vsel %vm8530_vm3, %v6178_v56, 0.0  ;;  %vm9319_vm6 = vcmp.ne.s32.totalorder %v8449_v7, 0  ;;  %vm9320_vm7 = vcmp.lt.s32.totalorder %v8449_v7, 0 }
 0x208   : > { %vm8632_vm10 = vmand %vm9320_vm7, %vm9319_vm6  ;;  %v4843_v14 = vsel %vm9301_vm12, %v4797_v50, 0.0  ;;  %v4842_v55 = vadd.f32 %v4841_v23, %v4840_v29  ;;  %v4799_v11 = vmul.f32 %v4685_v30, %v4685_v30  ;;  %v4684_v51 = vsel %vm8542_vm5, %v6179_v46, 0.0  ;;  %v9331_v50 = vld [vmem:[#allocation49_spill] sm:$0xff] }
 0x209   : > { %vm9324_vm13 = vnez %v9323_v12  ;;  %v4731_v42 = vadd.f32 %v4730_v25, %v4729_v38  ;;  %vm9330_vm7 = vmmov %vm9301_vm12  ;;  %v4798_v8 = vmul.f32 %v4684_v51, %v4684_v51  ;;  %v6180_v56 = vadd.f32 %v6133_v37, %v9331_v50  ;;  %v9340_v38 = vld [vmem:[#allocation46_spill] sm:$0xff] }
 0x20a   : > { %v9327_v48 = vsel %vm9324_vm13, %v9325_v20, %v9326_v19  ;;  %v4732_v21 = vsel %vm9330_vm7, %v4684_v51, 0.0  ;;  %vm9333_vm12 = vnez %v9332_v40  ;;  %v4844_v29 = vadd.f32 %v4843_v14, %v4842_v55  ;;  %vm9341_vm14 = vmmov %vm9330_vm7 }
 0x20b   : > { %vm8644_vm3 = vcmp.lt.s32.totalorder %v9327_v48, 16  ;;  %v9336_v52 = vsel %vm9333_vm12, %v9334_v31, %v9335_v9  ;;  %v6181_v46 = vadd.f32 %v3806_v41, %v9339_v47  ;;  %v4558_v25 = vsel %vm8632_vm10, %v8549_v57, %v8449_v7  ;;  %vm9342_vm6 = vmmov %vm9330_vm7  ;;  %v6136_v48 = vpop.f32.mrb[16].mxu0  ;;  %v9354_v31 = vld [vmem:[#allocation50_spill] sm:$0xff]  ;;  %v9357_v9 = vld [vmem:[#allocation43_spill] sm:$0xff] }
 0x20c   : > { %vm8655_vm5 = vcmp.lt.s32.totalorder %v9336_v52, 16  ;;  %v8666_v23 = vsub.s32 %v9340_v38, %v8476_v18  ;;  %v4734_v51 = vsel %vm9341_vm14, %v4685_v30, 0.0  ;;  %v4733_v37 = vadd.f32 %v4732_v21, %v4731_v42  ;;  %vm9347_vm10 = vmmov %vm9342_vm6  ;;  %v3816_v40 = vpop.f32.mrb[17].mxu0  ;;  %v9362_v38 = vld [vmem:[#allocation53_spill] sm:$0xff] }
 0x20d   : > { %v4845_v12 = vsel %vm9342_vm6, %v4798_v8, 0.0  ;;  %v4687_v20 = vsel %vm8571_vm2, %v6180_v56, 0.0  ;;  %vm9343_vm13 = vcmp.ne.s32.totalorder %v8463_v60, 0  ;;  %vm9344_vm7 = vcmp.lt.s32.totalorder %v8463_v60, 0  ;;  %vm9352_vm14 = vmmov %vm9342_vm6 }
 0x20e   : > { %vm8676_vm12 = vmand %vm9344_vm7, %vm9343_vm13  ;;  %v4847_v55 = vsel %vm9347_vm10, %v4799_v11, 0.0  ;;  %v4846_v18 = vadd.f32 %v4845_v12, %v4844_v29  ;;  %v4801_v19 = vmul.f32 %v4687_v20, %v4687_v20  ;;  %v4686_v30 = vsel %vm8582_vm8, %v6181_v46, 0.0  ;;  %v9353_v11 = vld [vmem:[#allocation54_spill] sm:$0xff]  ;;  %v9361_v29 = vld [vmem:[#allocation55_spill] sm:$0xff] }
 0x20f   : > { %v9349_v42 = vsel %vm8169_vm9, %v8111_v6, %v9348_v26  ;;  %v4735_v8 = vadd.f32 %v4734_v51, %v4733_v37  ;;  %v4736_v50 = vsel %vm9352_vm14, %v4686_v30, 0.0  ;;  %v4800_v56 = vmul.f32 %v4686_v30, %v4686_v30  ;;  %vm9363_vm9 = vmmov %vm9342_vm6 }
 0x210   : > { %vm8688_vm2 = vcmp.lt.s32.totalorder %v9349_v42, 16  ;;  %v6182_v41 = vadd.f32 %v6136_v48, %v9353_v11  ;;  %vm9355_vm10 = vnez %v9354_v31  ;;  %v4848_v6 = vadd.f32 %v4847_v55, %v4846_v18  ;;  %vm9364_vm13 = vmmov %vm9342_vm6  ;;  %v5915_v11 = vpop.f32.mrb[18].mxu1 }
 0x211   : > { %v9358_v52 = vsel %vm9355_vm10, %v9356_v43, %v9357_v9  ;;  %v6183_v47 = vadd.f32 %v3816_v40, %v9361_v29  ;;  %v4561_v46 = vsel %vm8676_vm12, %v8622_v34, %v8463_v60  ;;  %v8710_v51 = vsub.s32 %v9362_v38, %v8483_v0  ;;  %v6139_v40 = vpop.f32.mrb[18].mxu0  ;;  %vm9372_vm14 = vmmov %vm9342_vm6 }
 0x212   : > { %vm8699_vm8 = vcmp.lt.s32.totalorder %v9358_v52, 16  ;;  %v4738_v37 = vsel %vm9363_vm9, %v4687_v20, 0.0  ;;  %v4737_v12 = vadd.f32 %v4736_v50, %v4735_v8  ;;  %v4849_v30 = vsel %vm9342_vm6, %v4800_v56, 0.0  ;;  %v2118_v56 = vpop.f32.mrb[19].mxu1  ;;  %vm9373_vm10 = vmmov %vm9342_vm6 }
 0x213   : > { %v4689_v48 = vsel %vm8604_vm11, %v6182_v41, 0.0  ;;  %v4851_v55 = vsel %vm9364_vm13, %v4801_v19, 0.0  ;;  %v4850_v18 = vadd.f32 %v4849_v30, %v4848_v6  ;;  %v4688_v42 = vsel %vm8615_vm15, %v6183_v47, 0.0  ;;  %vm9368_vm11 = vmmov %vm9342_vm6  ;;  %v3826_v41 = vpop.f32.mrb[19].mxu0  ;;  %v5918_v47 = vpop.f32.mrb[20].mxu1 }
 0x214   : > { %v4803_v26 = vmul.f32 %v4689_v48, %v4689_v48  ;;  %v9365_v0 = vsel %vm8223_vm1, %v8201_v44, %v8100_v17  ;;  %v4739_v33 = vadd.f32 %v4738_v37, %v4737_v12  ;;  %v4740_v8 = vsel %vm9368_vm11, %v4688_v42, 0.0  ;;  %vm9374_vm9 = vmmov %vm9342_vm6  ;;  %v6142_v38 = vpop.f32.mrb[20].mxu0 }
 0x215   : > { %vm8724_vm7 = vcmp.lt.s32.totalorder %v9365_v0, 16  ;;  %v4802_v19 = vmul.f32 %v4688_v42, %v4688_v42  ;;  %v6184_v50 = vadd.f32 %v6139_v40, %v5915_v11  ;;  %v9369_v62 = vsel %vm8239_vm4, %v8228_v24, %v8121_v53 }
 0x216   : > { %vm8734_vm15 = vcmp.lt.s32.totalorder %v9369_v62, 16  ;;  %v4852_v17 = vadd.f32 %v4851_v55, %v4850_v18  ;;  %v6185_v44 = vadd.f32 %v3826_v41, %v2118_v56  ;;  %vm4416_vm1 = vcmp.ne.s32.totalorder %v8666_v23, 0  ;;  %v2128_v55 = vpop.f32.mrb[21].mxu1  ;;  %v3836_v18 = vpop.f32.mrb[21].mxu0 }
 0x217   : > { %v4368_v31 = vshrl.u32 %v8394_v58, 4  ;;  %v4742_v43 = vsel %vm9372_vm14, %v4689_v48, 0.0  ;;  %v4741_v9 = vadd.f32 %v4740_v8, %v4739_v33  ;;  %v4853_v52 = vsel %vm9373_vm10, %v4802_v19, 0.0  ;;  %v5921_v8 = vpop.f32.mrb[22].mxu1  ;;  %v6145_v19 = vpop.f32.mrb[22].mxu0 }
 0x218   : > { %v4691_v4 = vsel %vm8644_vm3, %v6184_v50, 0.0  ;;  %v4855_v53 = vsel %vm9374_vm9, %v4803_v26, 0.0  ;;  %v4854_v24 = vadd.f32 %v4853_v52, %v4852_v17  ;;  %v4690_v29 = vsel %vm8655_vm5, %v6185_v44, 0.0  ;;  %vm9378_vm3 = vmmov %vm9342_vm6  ;;  %v2138_v44 = vpop.f32.mrb[23].mxu1 }
 0x219   : > { %v4805_v6 = vmul.f32 %v4691_v4, %v4691_v4  ;;  %v9375_v58 = vsel %vm8253_vm0, %v8258_v2, %v8142_v15  ;;  %v4743_v1 = vadd.f32 %v4742_v43, %v4741_v9  ;;  %v4744_v12 = vsel %vm9378_vm3, %v4690_v29, 0.0  ;;  %vm9383_vm13 = vmmov %vm9378_vm3  ;;  %v3846_v43 = vpop.f32.mrb[23].mxu0  ;;  %v9393_v9 = vld [vmem:[#allocation48_spill] sm:$0xff] }
 0x21a   : > { %vm8752_vm4 = vcmp.lt.s32.totalorder %v9375_v58, 16  ;;  %v4804_v30 = vmul.f32 %v4690_v29, %v4690_v29  ;;  %v6186_v48 = vadd.f32 %v6142_v38, %v5918_v47  ;;  %vm9379_vm5 = vnez %v9181_v49  ;;  %vm9384_vm11 = vmmov %vm9378_vm3 }
 0x21b   : > { %v9380_v5 = vsel %vm9379_vm5, %v8282_v3, %v8152_v22  ;;  %v4856_v15 = vadd.f32 %v4855_v53, %v4854_v24  ;;  %v6187_v2 = vadd.f32 %v3836_v18, %v2128_v55  ;;  %vm4452_vm0 = vcmp.lt.s32.totalorder %v8666_v23, 0  ;;  %vm9385_vm14 = vmmov %vm9378_vm3  ;;  %v9404_v55 = vld [vmem:[#allocation51_spill] sm:$0xff] }
 0x21c   : > { %vm8762_vm6 = vcmp.lt.s32.totalorder %v9380_v5, 16  ;;  %v8768_v26 = vadd.s32 18, %v8666_v23  ;;  %v4746_v42 = vsel %vm9383_vm13, %v4691_v4, 0.0  ;;  %v4745_v11 = vadd.f32 %v4744_v12, %v4743_v1  ;;  %v5924_v1 = vpop.f32.mrb[24].mxu1  ;;  %v6148_v12 = vpop.f32.mrb[24].mxu0 }
 0x21d   : > { %v4857_v40 = vsel %vm9384_vm11, %v4804_v30, 0.0  ;;  %v4693_v49 = vsel %vm8688_vm2, %v6186_v48, 0.0  ;;  %v4859_v22 = vsel %vm9385_vm14, %v4805_v6, 0.0  ;;  %v4692_v33 = vsel %vm8699_vm8, %v6187_v2, 0.0  ;;  %vm9390_vm2 = vmmov %vm9378_vm3  ;;  %v9401_v30 = vld [vmem:[#allocation59_spill] sm:$0xff]  ;;  %v9403_v48 = vld [vmem:[#allocation58_spill] sm:$0xff] }
 0x21e   : > { %v4858_v3 = vadd.f32 %v4857_v40, %v4856_v15  ;;  %v4807_v0 = vmul.f32 %v4693_v49, %v4693_v49  ;;  %vm9386_vm10 = vnez %v9189_v27  ;;  %v4747_v21 = vadd.f32 %v4746_v42, %v4745_v11  ;;  %vm9397_vm5 = vmmov %vm9390_vm2  ;;  %v2148_v40 = vpop.f32.mrb[25].mxu1 }
 0x21f   : > { %v9387_v50 = vsel %vm9386_vm10, %v8285_v10, %v8155_v28  ;;  %v4748_v41 = vsel %vm9390_vm2, %v4692_v33, 0.0  ;;  %v4806_v62 = vmul.f32 %v4692_v33, %v4692_v33  ;;  %v6188_v17 = vadd.f32 %v6145_v19, %v5921_v8  ;;  %vm9398_vm13 = vmmov %vm9390_vm2  ;;  %v9414_v19 = vld [vmem:[#allocation57_spill] sm:$0xff] }
 0x220   : > { %vm8782_vm9 = vcmp.lt.s32.totalorder %v9387_v50, 16  ;;  %vm9391_vm8 = vnez %v9195_v39  ;;  %v4860_v28 = vadd.f32 %v4859_v22, %v4858_v3  ;;  %v6189_v10 = vadd.f32 %v3846_v43, %v2138_v44  ;;  %vm8807_vm11 = vmand %vm4452_vm0, %vm4416_vm1 }
 0x221   : > { %v9394_v52 = vsel %vm9391_vm8, %v9392_v32, %v9393_v9  ;;  %v8797_v4 = vadd.s32 18, %v8710_v51  ;;  %v4369_v53 = vmul.u32 18, %v4368_v31  ;;  %v4750_v24 = vsel %vm9397_vm5, %v4693_v49, 0.0  ;;  %vm9408_vm0 = vmmov %vm9390_vm2  ;;  %v3856_v49 = vpop.f32.mrb[25].mxu0  ;;  %v5927_v32 = vpop.f32.mrb[26].mxu1 }
 0x222   : > { %vm8792_vm3 = vcmp.lt.s32.totalorder %v9394_v52, 16  ;;  %v4749_v6 = vadd.f32 %v4748_v41, %v4747_v21  ;;  %v4861_v29 = vsel %vm9398_vm13, %v4806_v62, 0.0  ;;  %v4695_v39 = vsel %vm8724_vm7, %v6188_v17, 0.0  ;;  %vm9415_vm5 = vmmov %vm9408_vm0 }
 0x223   : > { %vm4419_vm14 = vcmp.ne.s32.totalorder %v8710_v51, 0  ;;  %vm4455_vm10 = vcmp.lt.s32.totalorder %v8710_v51, 0  ;;  %v4863_v31 = vsel %vm9390_vm2, %v4807_v0, 0.0  ;;  %v4862_v38 = vadd.f32 %v4861_v29, %v4860_v28  ;;  %vm9416_vm13 = vmmov %vm9408_vm0 }
 0x224   : > { %v4809_v58 = vmul.f32 %v4695_v39, %v4695_v39  ;;  %v4694_v20 = vsel %vm8734_vm15, %v6189_v10, 0.0  ;;  %vm9402_vm7 = vnez %v9401_v30  ;;  %v4751_v15 = vadd.f32 %v4750_v24, %v4749_v6  ;;  %vm9417_vm2 = vmmov %vm9408_vm0  ;;  %v2158_v10 = vpop.f32.mrb[27].mxu1 }
 0x225   : > { %v9405_v18 = vsel %vm9402_vm7, %v9403_v48, %v9404_v55  ;;  %v4752_v2 = vsel %vm9408_vm0, %v4694_v20, 0.0  ;;  %v4808_v42 = vmul.f32 %v4694_v20, %v4694_v20  ;;  %v6190_v11 = vadd.f32 %v6148_v12, %v5924_v1  ;;  %v5930_v29 = vpop.f32.mrb[28].mxu1  ;;  %vm8895_vm12 = vmand %vm4455_vm10, %vm4419_vm14 }
 0x226   : > { %vm8821_vm1 = vcmp.lt.s32.totalorder %v9405_v18, 16  ;;  %vm9409_vm15 = vnez %v9230_v13  ;;  %v4864_v0 = vadd.f32 %v4863_v31, %v4862_v38  ;;  %v6191_v33 = vadd.f32 %v3856_v49, %v2148_v40  ;;  %v2168_v20 = vpop.f32.mrb[29].mxu1 }
 0x227   : > { %v9411_v22 = vsel %vm9409_vm15, %v8434_v45, %v9410_v54  ;;  %v4560_v8 = vsel %vm8807_vm11, %v8768_v26, %v8666_v23  ;;  %v8840_v50 = vsub.s32 %v9414_v19, %v4369_v53  ;;  %v4754_v21 = vsel %vm9415_vm5, %v4695_v39, 0.0  ;;  %v6151_v23 = vpop.f32.mrb[26].mxu0  ;;  %vm9426_vm11 = vmmov %vm9417_vm2  ;;  %v5933_v40 = vpop.f32.mrb[30].mxu1 }
 0x228   : > { %vm8831_vm8 = vcmp.lt.s32.totalorder %v9411_v22, 16  ;;  %v4753_v13 = vadd.f32 %v4752_v2, %v4751_v15  ;;  %v4865_v41 = vsel %vm9416_vm13, %v4808_v42, 0.0  ;;  %v4697_v45 = vsel %vm8752_vm4, %v6190_v11, 0.0  ;;  %vm9421_vm4 = vmmov %vm9408_vm0  ;;  %v3866_v53 = vpop.f32.mrb[27].mxu0 }
 0x229   : > { %v4867_v62 = vsel %vm9417_vm2, %v4809_v58, 0.0  ;;  %v4866_v17 = vadd.f32 %v4865_v41, %v4864_v0  ;;  %v4811_v44 = vmul.f32 %v4697_v45, %v4697_v45  ;;  %v4696_v43 = vsel %vm8762_vm6, %v6191_v33, 0.0  ;;  %vm9425_vm13 = vmmov %vm9417_vm2  ;;  %v6154_v39 = vpop.f32.mrb[28].mxu0  ;;  %v2178_v33 = vpop.f32.mrb[31].mxu1 }
 0x22a   : > { %vm8854_vm7 = vcmp.lt.s32.totalorder %v4559_v63, 16  ;;  %v4755_v37 = vadd.f32 %v4754_v21, %v4753_v13  ;;  %v4756_v9 = vsel %vm9421_vm4, %v4696_v43, 0.0  ;;  %v4810_v52 = vmul.f32 %v4696_v43, %v4696_v43  ;;  %v3876_v1 = vpop.f32.mrb[29].mxu0  ;;  %vm9434_vm6 = vmmov %vm9417_vm2 }
 0x22b   : > { %v6192_v28 = vadd.f32 %v6151_v23, %v5927_v32  ;;  %vm8864_vm0 = vcmp.lt.s32.totalorder %v4558_v25, 16  ;;  %v4868_v59 = vadd.f32 %v4867_v62, %v4866_v17  ;;  %v6193_v61 = vadd.f32 %v3866_v53, %v2158_v10  ;;  %vm9438_vm14 = vmmov %vm9434_vm6  ;;  %v6157_v49 = vpop.f32.mrb[30].mxu0 }
 0x22c   : > { %vm4418_vm15 = vcmp.ne.s32.totalorder %v8840_v50, 0  ;;  %vm4454_vm5 = vcmp.lt.s32.totalorder %v8840_v50, 0  ;;  %v4758_v63 = vsel %vm9425_vm13, %v4697_v45, 0.0  ;;  %v4757_v35 = vadd.f32 %v4756_v9, %v4755_v37  ;;  %vm9435_vm13 = vmmov %vm9417_vm2 }
 0x22d   : > { %v4869_v24 = vsel %vm9417_vm2, %v4810_v52, 0.0  ;;  %v4699_v36 = vsel %vm8782_vm9, %v6192_v28, 0.0  ;;  %v4871_v7 = vsel %vm9426_vm11, %v4811_v44, 0.0  ;;  %v4698_v6 = vsel %vm8792_vm3, %v6193_v61, 0.0  ;;  %vm9429_vm9 = vmmov %vm9417_vm2 }
 0x22e   : > { %v4870_v57 = vadd.f32 %v4869_v24, %v4868_v59  ;;  %v4813_v25 = vmul.f32 %v4699_v36, %v4699_v36  ;;  %vm8882_vm4 = vcmp.lt.s32.totalorder %v4561_v46, 16  ;;  %v4759_v56 = vadd.f32 %v4758_v63, %v4757_v35  ;;  %vm8908_vm2 = vmand %vm4454_vm5, %vm4418_vm15 }
 0x22f   : > { %v4760_v31 = vsel %vm9429_vm9, %v4698_v6, 0.0  ;;  %v4812_v38 = vmul.f32 %v4698_v6, %v4698_v6  ;;  %v6194_v58 = vadd.f32 %v6154_v39, %v5930_v29  ;;  %v6195_v12 = vadd.f32 %v3876_v1, %v2168_v20  ;;  %vm9439_vm10 = vmmov %vm9434_vm6 }
 0x230   : > { %v4872_v27 = vadd.f32 %v4871_v7, %v4870_v57  ;;  %vm8887_vm3 = vcmp.lt.s32.totalorder %v4560_v8, 16  ;;  %v4526_v34 = vadd.s32 18, %v8840_v50  ;;  %v4762_v14 = vsel %vm9434_vm6, %v4699_v36, 0.0  ;;  %v3886_v8 = vpop.f32.mrb[31].mxu0 }
 0x231   : > { %v4761_v46 = vadd.f32 %v4760_v31, %v4759_v56  ;;  %v4873_v48 = vsel %vm9435_vm13, %v4812_v38, 0.0  ;;  %v4701_v55 = vsel %vm8821_vm1, %v6194_v58, 0.0  ;;  %v4875_v15 = vsel %vm9438_vm14, %v4813_v25, 0.0  ;;  %vm9440_vm1 = vmmov %vm9434_vm6 }
 0x232   : > { %v4874_v2 = vadd.f32 %v4873_v48, %v4872_v27  ;;  %v4815_v42 = vmul.f32 %v4701_v55, %v4701_v55  ;;  %v4700_v11 = vsel %vm8831_vm8, %v6195_v12, 0.0  ;;  %v6196_v0 = vadd.f32 %v6157_v49, %v5933_v40  ;;  %vm9441_vm8 = vmmov %vm9440_vm1 }
 0x233   : > { %v4763_v54 = vadd.f32 %v4762_v14, %v4761_v46  ;;  %v4764_v5 = vsel %vm9439_vm10, %v4700_v11, 0.0  ;;  %v4814_v22 = vmul.f32 %v4700_v11, %v4700_v11  ;;  %v6197_v21 = vadd.f32 %v3886_v8, %v2178_v33  ;;  %vm9442_vm15 = vmmov %vm9440_vm1 }
 0x234   : > { %v4876_v19 = vadd.f32 %v4875_v15, %v4874_v2  ;;  %v4563_v13 = vsel %vm8895_vm12, %v8797_v4, %v8710_v51  ;;  %v4562_v3 = vsel %vm8908_vm2, %v4526_v34, %v8840_v50  ;;  %v4766_v41 = vsel %vm9440_vm1, %v4701_v55, 0.0  ;;  %v5936_v51 = vpop.f32.mrb[32].mxu1  ;;  %v6160_v4 = vpop.f32.mrb[32].mxu0  ;;  %vm9443_vm5 = vmmov %vm9440_vm1 }
 0x235   : > { %v4765_v45 = vadd.f32 %v4764_v5, %v4763_v54  ;;  %v4877_v62 = vsel %vm9441_vm8, %v4814_v22, 0.0  ;;  %v4703_v17 = vsel %vm8854_vm7, %v6196_v0, 0.0  ;;  %v4879_v44 = vsel %vm9442_vm15, %v4815_v42, 0.0  ;;  %v2188_v28 = vpop.f32.mrb[33].mxu1  ;;  %v3896_v10 = vpop.f32.mrb[33].mxu0 }
 0x236   : > { %v4878_v43 = vadd.f32 %v4877_v62, %v4876_v19  ;;  %v4817_v32 = vmul.f32 %v4703_v17, %v4703_v17  ;;  %v4702_v23 = vsel %vm8864_vm0, %v6197_v21, 0.0  ;;  %v6198_v52 = vadd.f32 %v6160_v4, %v5936_v51  ;;  %vm9448_vm0 = vmmov %vm9440_vm1  ;;  %v5939_v6 = vpop.f32.mrb[34].mxu1  ;;  %v6163_v29 = vpop.f32.mrb[34].mxu0 }
 0x237   : > { %v4767_v37 = vadd.f32 %v4766_v41, %v4765_v45  ;;  %v4768_v50 = vsel %vm9443_vm5, %v4702_v23, 0.0  ;;  %v4816_v9 = vmul.f32 %v4702_v23, %v4702_v23  ;;  %v6199_v59 = vadd.f32 %v3896_v10, %v2188_v28  ;;  %vm9449_vm9 = vmmov %vm9448_vm0  ;;  %v2198_v58 = vpop.f32.mrb[35].mxu1  ;;  %v3906_v20 = vpop.f32.mrb[35].mxu0 }
 0x238   : > { %v4880_v53 = vadd.f32 %v4879_v44, %v4878_v43  ;;  %vm8931_vm11 = vcmp.lt.s32.totalorder %v4563_v13, 16  ;;  %vm8935_vm7 = vcmp.lt.s32.totalorder %v4562_v3, 16  ;;  %v4770_v16 = vsel %vm9448_vm0, %v4703_v17, 0.0  ;;  %vm9450_vm12 = vmmov %vm9448_vm0 }
 0x239   : > { %v4769_v63 = vadd.f32 %v4768_v50, %v4767_v37  ;;  %v4881_v35 = vsel %vm9449_vm9, %v4816_v9, 0.0  ;;  %v4705_v24 = vsel %vm8882_vm4, %v6198_v52, 0.0  ;;  %v4883_v36 = vsel %vm9450_vm12, %v4817_v32, 0.0  ;;  %vm9451_vm6 = vmmov %vm9448_vm0 }
 0x23a   : > { %v4882_v7 = vadd.f32 %v4881_v35, %v4880_v53  ;;  %v4819_v57 = vmul.f32 %v4705_v24, %v4705_v24  ;;  %v4704_v25 = vsel %vm8887_vm3, %v6199_v59, 0.0  ;;  %v6200_v38 = vadd.f32 %v6163_v29, %v5939_v6  ;;  %vm9452_vm4 = vmmov %vm9448_vm0 }
 0x23b   : > { %v4771_v39 = vadd.f32 %v4770_v16, %v4769_v63  ;;  %v4772_v56 = vsel %vm9451_vm6, %v4704_v25, 0.0  ;;  %v4818_v31 = vmul.f32 %v4704_v25, %v4704_v25  ;;  %v6201_v27 = vadd.f32 %v3906_v20, %v2198_v58  ;;  %vm9453_vm13 = vmmov %vm9448_vm0 }
 0x23c   : > { %v4884_v1 = vadd.f32 %v4883_v36, %v4882_v7  ;;  %v4707_v60 = vsel %vm8931_vm11, %v6200_v38, 0.0  ;;  %v4774_v30 = vsel %vm9453_vm13, %v4705_v24, 0.0  ;;  %vm9454_vm3 = vmmov %vm9448_vm0 }
 0x23d   : > { %v4773_v47 = vadd.f32 %v4772_v56, %v4771_v39  ;;  %v4885_v12 = vsel %vm9452_vm4, %v4818_v31, 0.0  ;;  %v4887_v34 = vsel %vm9454_vm3, %v4819_v57, 0.0  ;;  %v4706_v46 = vsel %vm8935_vm7, %v6201_v27, 0.0  ;;  %vm9455_vm2 = vmmov %vm9448_vm0 }
 0x23e   : > { %v4886_v14 = vadd.f32 %v4885_v12, %v4884_v1  ;;  %v4821_v48 = vmul.f32 %v4707_v60, %v4707_v60  ;;  %v4776_v18 = vsel %vm9455_vm2, %v4706_v46, 0.0  ;;  %v4820_v15 = vmul.f32 %v4706_v46, %v4706_v46  ;;  %vm9456_vm14 = vmmov %vm9448_vm0 }
 0x23f   : > { %v4775_v55 = vadd.f32 %v4774_v30, %v4773_v47  ;;  %vm9457_vm10 = vmmov %vm9448_vm0 }
 0x240   : > { %v4888_v2 = vadd.f32 %v4887_v34, %v4886_v14  ;;  %v4889_v11 = vsel %vm9456_vm14, %v4820_v15, 0.0  ;;  %v4778_v40 = vsel %vm9457_vm10, %v4707_v60, 0.0  ;;  %vm9458_vm1 = vmmov %vm9448_vm0 }
 0x241   : > { %v4777_v42 = vadd.f32 %v4776_v18, %v4775_v55  ;;  %v4891_v54 = vsel %vm9458_vm1, %v4821_v48, 0.0  ;;  %vm9459_vm8 = vmmov %vm9448_vm0 }
 0x242   : > { %v4890_v49 = vadd.f32 %v4889_v11, %v4888_v2  ;;  %vm9460_vm15 = vmmov %vm9448_vm0 }
 0x243   : > { %v4779_v5 = vadd.f32 %v4778_v40, %v4777_v42 }
 0x244   : > { %v4892_v22 = vadd.f32 %v4891_v54, %v4890_v49 }
 0x245   : > { %v4780_v0 = vrot.slane %v4779_v5, 4 }
 0x246   : > { %v4893_v33 = vrot.slane %v4892_v22, 4 }
 0x247   : > { %v4781_v8 = vadd.f32 %v4780_v0, %v4779_v5 }
 0x248   : > { %v4894_v19 = vadd.f32 %v4893_v33, %v4892_v22 }
 0x249   : > { %v4782_v21 = vrot.slane %v4781_v8, 2 }
 0x24a   : > { %v4895_v13 = vrot.slane %v4894_v19, 2 }
 0x24b   : > { %v4783_v3 = vadd.f32 %v4782_v21, %v4781_v8 }
 0x24c   : > { %v4896_v41 = vadd.f32 %v4895_v13, %v4894_v19 }
 0x24d   : > { %v4784_v45 = vrot.slane %v4783_v3, 1 }
 0x24e   : > { %v4897_v62 = vrot.slane %v4896_v41, 1 }
 0x24f   : > { %v4785_v17 = vadd.f32 %v4784_v45, %v4783_v3 }
 0x250   : > { %v4898_v44 = vadd.f32 %v4897_v62, %v4896_v41 }
 0x251   : > { %4899 = vst.msk [vmem:[%s175_s14] sm:$0xff] %vm9459_vm8, %v4785_v17 }
 0x252   : > { %4900 = vst.msk [vmem:[%s179_s17] sm:$0xff] %vm9460_vm15, %v4898_v44 }
 0x253 PF: > { %s14_s12 = sadd.s32 1, %s6541_s12  }
 0x254   : > { %p11_p4 = scmp.ge.s32.totalorder %s14_s12, 4  }
 0x256   :  { %13 = sbr.rel (!%p11_p4) target bundleno = 1 (0x1), region = 78 }

// kernel: encoder_forward.4
= control target key start
LH: loop header
LB: loop body
LE: loop exit
PB: predicated region body
PF: predicated region fallthrough
CT: control target
= control target key end

     0   :  { %s6562_s12 = smov 0   ;;  %s8965_s0 = inlined_call_operand.vmem [shape: f32[2,328,8], index: 0, kind: input, shape index: {}]   ;;  %s8966_s1 = inlined_call_operand.vmem [shape: f32[9,8,8], index: 1, kind: input, shape index: {}]   ;;  %s8967_s2 = inlined_call_operand.vmem [shape: f32[2,8,8], index: 2, kind: output, shape index: {0}]   ;;  %s8968_s3 = inlined_call_operand.vmem [shape: f32[2,8,8], index: 3, kind: output, shape index: {1}]  }
   0x1 LB: > { %s4984_s13 = sadd.s32 4294967295, %s6540_s12   ;;  %p4988_p0 = scmp.ge.s32.totalorder %s6540_s12, 1  ;;  %s6540_s12 = sphi %s6562_s12, %s14_s12  }
   0x2   : > { %p140_p1 = scmp.lt.s32.totalorder %s6540_s12, 3 }
   0x4   : > { %p141_p2 = pnand %p4988_p0, %p140_p1 }
   0x6   : > { %144 = sbr.rel (%p141_p2) target bundleno = 597 (0x255), region = 28 }
   0xd   : > { %v4992_v0 = vld [vmem:[%s8966_s1 + $0x8] sm:$0xff]  ;;  %v6576_v1 = vld [vmem:[%s8966_s1 + $0x20] sm:$0xff]  ;;  %p167_p3 = scmp.lt.s32.totalorder %s4984_s13, 1  ;;  %vm8969_vm0 = vcmask 64512   ;;  %v6607_v10 = vld [vmem:[%s8966_s1 + $0x30] sm:$0xff] }
   0xe   : > { %v216_v2 = vld [vmem:[%s8966_s1] sm:$0xff]  ;;  %5659 = vmatprep.subr.mxu1 %v4992_v0  ;;  %5883 = vmatprep.subr.mxu0 %v6576_v1  ;;  %v5176_v3 = vld [vmem:[%s8966_s1 + $0x28] sm:$0xff]  ;;  %v6612_v11 = vld [vmem:[%s8966_s1 + $0x10] sm:$0xff] }
   0xf   : > { %5660 = vmatpush3.msra.mxu1 %v4992_v0  ;;  %5884 = vmatpush3.msra.mxu0 %v6576_v1  ;;  %s9450_s13 = smov (!%p167_p3, %s4984_s13), 1  ;;  %v6691_v48 = vld [vmem:[%s8966_s1 + $0x38] sm:$0xff] }
  0x10   : > { %5715 = vmatprep.subr.mxu1 %v216_v2  ;;  %5939 = vmatprep.subr.mxu0 %v5176_v3  ;;  %s6453_s22 = smul.u32 328, %s9450_s13  ;;  %s4990_s9 = sshll.u32 %s9450_s13, 3 }
  0x11   : > { %s175_s14 = scalar_lea.vmem %s8967_s2, %s4990_s9  ;;  %s179_s17 = scalar_lea.vmem %s8968_s3, %s4990_s9 }
  0x12   : > { %s6592_s25 = scalar_lea.vmem %s8965_s0, %s6453_s22 }
  0x13   : > { %v217_v4 = vld [vmem:[%s6592_s25 + $0x1] sm:$0xff]  ;;  %v1816_v5 = vld [vmem:[%s6592_s25 + $0x13] sm:$0xff]  ;;  %v218_v6 = vld [vmem:[%s6592_s25 + $0x9] sm:$0xff] }
  0x14   : > { %5661 = vmatprep.mubr.msk.f32.mxu1 %vm8969_vm0, %v217_v4  ;;  %5885 = vmatprep.mubr.msk.f32.mxu0 %vm8969_vm0, %v1816_v5  ;;  %v1817_v7 = vld [vmem:[%s6592_s25 + $0x1b] sm:$0xff]  ;;  %v219_v8 = vld [vmem:[%s6592_s25 + $0x11] sm:$0xff]  ;;  %v1818_v9 = vld [vmem:[%s6592_s25 + $0x23] sm:$0xff] }
  0x15   : > { %5662 = vmatmul.mubr.msk.f32.vlgmr.msra.gmra.mrb[0].mxu1 %vm8969_vm0, %v218_v6  ;;  %5886 = vmatmul.mubr.msk.f32.vlgmr.msra.gmra.mrb[0].mxu0 %vm8969_vm0, %v1817_v7  ;;  %v220_v12 = vld [vmem:[%s6592_s25 + $0x19] sm:$0xff]  ;;  %v1819_v13 = vld [vmem:[%s6592_s25 + $0x2b] sm:$0xff]  ;;  %v221_v14 = vld [vmem:[%s6592_s25 + $0x21] sm:$0xff] }
  0x16   : > { %5716 = vmatpush3.msra.mxu1 %v216_v2  ;;  %5940 = vmatpush3.msra.mxu0 %v5176_v3  ;;  %v1820_v15 = vld [vmem:[%s6592_s25 + $0x33] sm:$0xff]  ;;  %v222_v16 = vld [vmem:[%s6592_s25 + $0x29] sm:$0xff]  ;;  %v1821_v17 = vld [vmem:[%s6592_s25 + $0x3b] sm:$0xff] }
  0x17   : > { %5664 = vmatprep.mubr.msk.f32.mxu1 %vm8969_vm0, %v219_v8  ;;  %5888 = vmatprep.mubr.msk.f32.mxu0 %vm8969_vm0, %v1818_v9  ;;  %v223_v18 = vld [vmem:[%s6592_s25 + $0x31] sm:$0xff]  ;;  %v1822_v19 = vld [vmem:[%s6592_s25 + $0x43] sm:$0xff]  ;;  %v224_v20 = vld [vmem:[%s6592_s25 + $0x39] sm:$0xff] }
  0x18   : > { %5995 = vmatprep.subr.mxu0 %v6607_v10  ;;  %5771 = vmatprep.subr.mxu1 %v6612_v11  ;;  %v1823_v21 = vld [vmem:[%s6592_s25 + $0x4b] sm:$0xff]  ;;  %v225_v22 = vld [vmem:[%s6592_s25 + $0x41] sm:$0xff]  ;;  %v1824_v23 = vld [vmem:[%s6592_s25 + $0x53] sm:$0xff] }
  0x19   : > { %5665 = vmatmul.mubr.msk.f32.gmra.mrb[2].mxu1 %vm8969_vm0, %v220_v12  ;;  %5889 = vmatmul.mubr.msk.f32.gmra.mrb[2].mxu0 %vm8969_vm0, %v1819_v13  ;;  %v226_v24 = vld [vmem:[%s6592_s25 + $0x49] sm:$0xff]  ;;  %v1825_v25 = vld [vmem:[%s6592_s25 + $0x5b] sm:$0xff]  ;;  %v227_v26 = vld [vmem:[%s6592_s25 + $0x51] sm:$0xff] }
  0x1a   : > { %5667 = vmatprep.mubr.msk.f32.mxu1 %vm8969_vm0, %v221_v14  ;;  %5891 = vmatprep.mubr.msk.f32.mxu0 %vm8969_vm0, %v1820_v15  ;;  %v1826_v27 = vld [vmem:[%s6592_s25 + $0x63] sm:$0xff]  ;;  %v228_v28 = vld [vmem:[%s6592_s25 + $0x59] sm:$0xff]  ;;  %v1827_v29 = vld [vmem:[%s6592_s25 + $0x6b] sm:$0xff] }
  0x1b   : > { %v229_v30 = vld [vmem:[%s6592_s25 + $0x61] sm:$0xff]  ;;  %v1828_v31 = vld [vmem:[%s6592_s25 + $0x73] sm:$0xff]  ;;  %v230_v32 = vld [vmem:[%s6592_s25 + $0x69] sm:$0xff] }
  0x1c   : > { %v1829_v33 = vld [vmem:[%s6592_s25 + $0x7b] sm:$0xff]  ;;  %v231_v34 = vld [vmem:[%s6592_s25 + $0x71] sm:$0xff]  ;;  %v1830_v35 = vld [vmem:[%s6592_s25 + $0x83] sm:$0xff] }
  0x1d   : > { %5668 = vmatmul.mubr.msk.f32.gmra.mrb[4].mxu1 %vm8969_vm0, %v222_v16  ;;  %5892 = vmatmul.mubr.msk.f32.gmra.mrb[4].mxu0 %vm8969_vm0, %v1821_v17  ;;  %v232_v36 = vld [vmem:[%s6592_s25 + $0x79] sm:$0xff]  ;;  %v1831_v37 = vld [vmem:[%s6592_s25 + $0x8b] sm:$0xff]  ;;  %v233_v38 = vld [vmem:[%s6592_s25 + $0x81] sm:$0xff] }
  0x1e   : > { %5670 = vmatprep.mubr.msk.f32.mxu1 %vm8969_vm0, %v223_v18  ;;  %5894 = vmatprep.mubr.msk.f32.mxu0 %vm8969_vm0, %v1822_v19  ;;  %v1832_v39 = vld [vmem:[%s6592_s25 + $0x93] sm:$0xff]  ;;  %v234_v40 = vld [vmem:[%s6592_s25 + $0x89] sm:$0xff]  ;;  %v1833_v41 = vld [vmem:[%s6592_s25 + $0x9b] sm:$0xff] }
  0x1f   : > { %v235_v42 = vld [vmem:[%s6592_s25 + $0x91] sm:$0xff]  ;;  %v236_v44 = vld [vmem:[%s6592_s25 + $0x99] sm:$0xff]  ;;  %v237_v46 = vld [vmem:[%s6592_s25 + $0xa1] sm:$0xff] }
  0x20   : > { %v2243_v43 = vld [vmem:[%s6592_s25 + $0x14] sm:$0xff]  ;;  %v2244_v45 = vld [vmem:[%s6592_s25 + $0x1c] sm:$0xff]  ;;  %v6686_v47 = vld [vmem:[%s6592_s25 + $0x24] sm:$0xff] }
  0x21   : > { %5671 = vmatmul.mubr.msk.f32.gmra.mrb[6].mxu1 %vm8969_vm0, %v224_v20  ;;  %5895 = vmatmul.mubr.msk.f32.gmra.mrb[6].mxu0 %vm8969_vm0, %v1823_v21  ;;  %v238_v49 = vld [vmem:[%s6592_s25 + $0xa9] sm:$0xff]  ;;  %v239_v51 = vld [vmem:[%s6592_s25 + $0xb1] sm:$0xff]  ;;  %v240_v53 = vld [vmem:[%s6592_s25 + $0xb9] sm:$0xff] }
  0x22   : > { %5673 = vmatprep.mubr.msk.f32.mxu1 %vm8969_vm0, %v225_v22  ;;  %5897 = vmatprep.mubr.msk.f32.mxu0 %vm8969_vm0, %v1824_v23  ;;  %v6699_v50 = vld [vmem:[%s6592_s25 + $0x2c] sm:$0xff]  ;;  %v6705_v52 = vld [vmem:[%s6592_s25 + $0x34] sm:$0xff]  ;;  %v6716_v54 = vld [vmem:[%s6592_s25 + $0x3c] sm:$0xff] }
  0x23   : > { %v241_v55 = vld [vmem:[%s6592_s25 + $0xc1] sm:$0xff]  ;;  %v242_v57 = vld [vmem:[%s6592_s25 + $0xc9] sm:$0xff]  ;;  %v243_v59 = vld [vmem:[%s6592_s25 + $0xd1] sm:$0xff] }
  0x24   : > { %v6720_v56 = vld [vmem:[%s6592_s25 + $0x44] sm:$0xff]  ;;  %v6730_v58 = vld [vmem:[%s6592_s25 + $0x4c] sm:$0xff]  ;;  %v6734_v60 = vld [vmem:[%s6592_s25 + $0x54] sm:$0xff] }
  0x25   : > { %5674 = vmatmul.mubr.msk.f32.gmra.mrb[8].mxu1 %vm8969_vm0, %v226_v24  ;;  %5898 = vmatmul.mubr.msk.f32.gmra.mrb[8].mxu0 %vm8969_vm0, %v1825_v25  ;;  %v244_v61 = vld [vmem:[%s6592_s25 + $0xd9] sm:$0xff]  ;;  %v245_v63 = vld [vmem:[%s6592_s25 + $0xe1] sm:$0xff]  ;;  %v246_v2 = vld [vmem:[%s6592_s25 + $0xe9] sm:$0xff] }
  0x26   : > { %5676 = vmatprep.mubr.msk.f32.mxu1 %vm8969_vm0, %v227_v26  ;;  %5900 = vmatprep.mubr.msk.f32.mxu0 %vm8969_vm0, %v1826_v27  ;;  %v6744_v62 = vld [vmem:[%s6592_s25 + $0x5c] sm:$0xff]  ;;  %v6748_v0 = vld [vmem:[%s6592_s25 + $0x64] sm:$0xff]  ;;  %v6758_v3 = vld [vmem:[%s6592_s25 + $0x6c] sm:$0xff] }
  0x27   : > { %v247_v4 = vld [vmem:[%s6592_s25 + $0xf1] sm:$0xff]  ;;  %v248_v6 = vld [vmem:[%s6592_s25 + $0xf9] sm:$0xff]  ;;  %v249_v8 = vld [vmem:[%s6592_s25 + $0x101] sm:$0xff] }
  0x28   : > { %v6762_v5 = vld [vmem:[%s6592_s25 + $0x74] sm:$0xff]  ;;  %v6772_v7 = vld [vmem:[%s6592_s25 + $0x7c] sm:$0xff]  ;;  %v6776_v9 = vld [vmem:[%s6592_s25 + $0x84] sm:$0xff] }
  0x29   : > { %5677 = vmatmul.mubr.msk.f32.gmra.mrb[10].mxu1 %vm8969_vm0, %v228_v28  ;;  %5901 = vmatmul.mubr.msk.f32.gmra.mrb[10].mxu0 %vm8969_vm0, %v1827_v29  ;;  %v6786_v12 = vld [vmem:[%s6592_s25 + $0x8c] sm:$0xff]  ;;  %v6790_v14 = vld [vmem:[%s6592_s25 + $0x94] sm:$0xff]  ;;  %v6800_v16 = vld [vmem:[%s6592_s25 + $0x9c] sm:$0xff] }
  0x2a   : > { %5679 = vmatprep.mubr.msk.f32.mxu1 %vm8969_vm0, %v229_v30  ;;  %5903 = vmatprep.mubr.msk.f32.mxu0 %vm8969_vm0, %v1828_v31  ;;  %v251_v13 = vld [vmem:[%s6592_s25 + $0x111] sm:$0xff]  ;;  %v252_v15 = vld [vmem:[%s6592_s25 + $0x119] sm:$0xff]  ;;  %v6804_v18 = vld [vmem:[%s6592_s25 + $0xa4] sm:$0xff] }
  0x2b   : > { %v180_v17 = vld [vmem:[%s6592_s25] sm:$0xff]  ;;  %v181_v19 = vld [vmem:[%s6592_s25 + $0x8] sm:$0xff]  ;;  %v182_v21 = vld [vmem:[%s6592_s25 + $0x10] sm:$0xff] }
  0x2c   : > { %v6814_v20 = vld [vmem:[%s6592_s25 + $0xac] sm:$0xff]  ;;  %v6818_v22 = vld [vmem:[%s6592_s25 + $0xb4] sm:$0xff]  ;;  %v6832_v25 = vld [vmem:[%s6592_s25 + $0xbc] sm:$0xff] }
  0x2d   : > { %5680 = vmatmul.mubr.msk.f32.gmra.mrb[12].mxu1 %vm8969_vm0, %v230_v32  ;;  %5904 = vmatmul.mubr.msk.f32.gmra.mrb[12].mxu0 %vm8969_vm0, %v1829_v33  ;;  %v6823_v23 = vld [vmem:[%s8966_s1 + $0x18] sm:$0xff]  ;;  %v184_v26 = vld [vmem:[%s6592_s25 + $0x20] sm:$0xff]  ;;  %v6849_v28 = vld [vmem:[%s6592_s25 + $0xcc] sm:$0xff] }
  0x2e   : > { %5682 = vmatprep.mubr.msk.f32.mxu1 %vm8969_vm0, %v231_v34  ;;  %5906 = vmatprep.mubr.msk.f32.mxu0 %vm8969_vm0, %v1830_v35  ;;  %v183_v24 = vld [vmem:[%s6592_s25 + $0x18] sm:$0xff]  ;;  %v6838_v27 = vld [vmem:[%s6592_s25 + $0xc4] sm:$0xff]  ;;  %v186_v29 = vld [vmem:[%s6592_s25 + $0x30] sm:$0xff] }
  0x2f   : > { %v6853_v30 = vld [vmem:[%s6592_s25 + $0xd4] sm:$0xff]  ;;  %v6863_v32 = vld [vmem:[%s6592_s25 + $0xdc] sm:$0xff]  ;;  %v6867_v34 = vld [vmem:[%s6592_s25 + $0xe4] sm:$0xff] }
  0x30   : > { %v187_v31 = vld [vmem:[%s6592_s25 + $0x38] sm:$0xff]  ;;  %v188_v33 = vld [vmem:[%s6592_s25 + $0x40] sm:$0xff]  ;;  %v189_v35 = vld [vmem:[%s6592_s25 + $0x48] sm:$0xff] }
  0x31   : > { %5683 = vmatmul.mubr.msk.f32.gmra.mrb[14].mxu1 %vm8969_vm0, %v232_v36  ;;  %5907 = vmatmul.mubr.msk.f32.gmra.mrb[14].mxu0 %vm8969_vm0, %v1831_v37  ;;  %v6877_v36 = vld [vmem:[%s6592_s25 + $0xec] sm:$0xff] }
  0x32   : > { %5685 = vmatprep.mubr.msk.f32.mxu1 %vm8969_vm0, %v233_v38  ;;  %5909 = vmatprep.mubr.msk.f32.mxu0 %vm8969_vm0, %v1832_v39  ;;  %v190_v37 = vld [vmem:[%s6592_s25 + $0x50] sm:$0xff]  ;;  %v191_v39 = vld [vmem:[%s6592_s25 + $0x58] sm:$0xff] }
  0x33   : > { %v6881_v38 = vld [vmem:[%s6592_s25 + $0xf4] sm:$0xff] }
  0x35   : > { %5686 = vmatmul.mubr.msk.f32.gmra.mrb[16].mxu1 %vm8969_vm0, %v234_v40  ;;  %5910 = vmatmul.mubr.msk.f32.gmra.mrb[16].mxu0 %vm8969_vm0, %v1833_v41  ;;  %v6891_v40 = vld [vmem:[%s6592_s25 + $0xfc] sm:$0xff] }
  0x36   : > { %5688 = vmatprep.mubr.msk.f32.mxu1 %vm8969_vm0, %v235_v42  ;;  %5941 = vmatprep.mubr.msk.f32.mxu0 %vm8969_vm0, %v2243_v43  ;;  %v192_v41 = vld [vmem:[%s6592_s25 + $0x60] sm:$0xff]  ;;  %v193_v43 = vld [vmem:[%s6592_s25 + $0x68] sm:$0xff] }
  0x37   : > { %v6895_v42 = vld [vmem:[%s6592_s25 + $0x104] sm:$0xff] }
  0x39   : > { %5689 = vmatmul.mubr.msk.f32.gmra.mrb[18].mxu1 %vm8969_vm0, %v236_v44  ;;  %5942 = vmatmul.mubr.msk.f32.vlgmr.msra.gmra.mrb[0].mxu0 %vm8969_vm0, %v2244_v45  ;;  %v6905_v44 = vld [vmem:[%s6592_s25 + $0x10c] sm:$0xff] }
  0x3a   : > { %5996 = vmatpush3.msra.mxu0 %v6607_v10  ;;  %5691 = vmatprep.mubr.msk.f32.mxu1 %vm8969_vm0, %v237_v46  ;;  %v250_v10 = vld [vmem:[%s6592_s25 + $0x109] sm:$0xff]  ;;  %v6909_v46 = vld [vmem:[%s6592_s25 + $0x114] sm:$0xff] }
  0x3b   : > { %5944 = vmatprep.mubr.msk.f32.mxu0 %vm8969_vm0, %v6686_v47  ;;  %6051 = vmatprep.subr.mxu0 %v6691_v48  ;;  %v194_v45 = vld [vmem:[%s6592_s25 + $0x70] sm:$0xff] }
  0x3d   : > { %5692 = vmatmul.mubr.msk.f32.gmra.mrb[20].mxu1 %vm8969_vm0, %v238_v49  ;;  %5945 = vmatmul.mubr.msk.f32.gmra.mrb[2].mxu0 %vm8969_vm0, %v6699_v50  ;;  %v195_v49 = vld [vmem:[%s6592_s25 + $0x78] sm:$0xff] }
  0x3e   : > { %5694 = vmatprep.mubr.msk.f32.mxu1 %vm8969_vm0, %v239_v51  ;;  %5947 = vmatprep.mubr.msk.f32.mxu0 %vm8969_vm0, %v6705_v52  ;;  %v6919_v51 = vld [vmem:[%s6592_s25 + $0x11c] sm:$0xff] }
  0x41   : > { %5695 = vmatmul.mubr.msk.f32.gmra.mrb[22].mxu1 %vm8969_vm0, %v240_v53  ;;  %5948 = vmatmul.mubr.msk.f32.gmra.mrb[4].mxu0 %vm8969_vm0, %v6716_v54  ;;  %v196_v53 = vld [vmem:[%s6592_s25 + $0x80] sm:$0xff] }
  0x42   : > { %5697 = vmatprep.mubr.msk.f32.mxu1 %vm8969_vm0, %v241_v55  ;;  %5950 = vmatprep.mubr.msk.f32.mxu0 %vm8969_vm0, %v6720_v56  ;;  %v6923_v55 = vld [vmem:[%s6592_s25 + $0x124] sm:$0xff] }
  0x45   : > { %5698 = vmatmul.mubr.msk.f32.gmra.mrb[24].mxu1 %vm8969_vm0, %v242_v57  ;;  %5951 = vmatmul.mubr.msk.f32.gmra.mrb[6].mxu0 %vm8969_vm0, %v6730_v58  ;;  %v197_v57 = vld [vmem:[%s6592_s25 + $0x88] sm:$0xff] }
  0x46   : > { %5700 = vmatprep.mubr.msk.f32.mxu1 %vm8969_vm0, %v243_v59  ;;  %5953 = vmatprep.mubr.msk.f32.mxu0 %vm8969_vm0, %v6734_v60  ;;  %v6933_v59 = vld [vmem:[%s6592_s25 + $0x12c] sm:$0xff] }
  0x49   : > { %5701 = vmatmul.mubr.msk.f32.gmra.mrb[26].mxu1 %vm8969_vm0, %v244_v61  ;;  %5954 = vmatmul.mubr.msk.f32.gmra.mrb[8].mxu0 %vm8969_vm0, %v6744_v62  ;;  %v198_v61 = vld [vmem:[%s6592_s25 + $0x90] sm:$0xff] }
  0x4a   : > { %5703 = vmatprep.mubr.msk.f32.mxu1 %vm8969_vm0, %v245_v63  ;;  %5956 = vmatprep.mubr.msk.f32.mxu0 %vm8969_vm0, %v6748_v0  ;;  %v199_v63 = vld [vmem:[%s6592_s25 + $0x98] sm:$0xff] }
  0x4d   : > { %5704 = vmatmul.mubr.msk.f32.gmra.mrb[28].mxu1 %vm8969_vm0, %v246_v2  ;;  %5957 = vmatmul.mubr.msk.f32.gmra.mrb[10].mxu0 %vm8969_vm0, %v6758_v3  ;;  %v200_v2 = vld [vmem:[%s6592_s25 + $0xa0] sm:$0xff] }
  0x4e   : > { %5706 = vmatprep.mubr.msk.f32.mxu1 %vm8969_vm0, %v247_v4  ;;  %5959 = vmatprep.mubr.msk.f32.mxu0 %vm8969_vm0, %v6762_v5  ;;  %v6947_v4 = vld [vmem:[%s8966_s1 + $0x40] sm:$0xff] }
  0x51   : > { %5707 = vmatmul.mubr.msk.f32.gmra.mrb[30].mxu1 %vm8969_vm0, %v248_v6  ;;  %5960 = vmatmul.mubr.msk.f32.gmra.mrb[12].mxu0 %vm8969_vm0, %v6772_v7  ;;  %v202_v6 = vld [vmem:[%s6592_s25 + $0xb0] sm:$0xff] }
  0x52   : > { %5709 = vmatprep.mubr.msk.f32.mxu1 %vm8969_vm0, %v249_v8  ;;  %5962 = vmatprep.mubr.msk.f32.mxu0 %vm8969_vm0, %v6776_v9  ;;  %v215_v8 = vld [vmem:[%s6592_s25 + $0x118] sm:$0xff] }
  0x55   : > { %5710 = vmatmul.mubr.msk.f32.gmra.mrb[32].mxu1 %vm8969_vm0, %v250_v10  ;;  %5963 = vmatmul.mubr.msk.f32.gmra.mrb[14].mxu0 %vm8969_vm0, %v6786_v12  ;;  %v963_v10 = vld [vmem:[%s6592_s25 + $0xa] sm:$0xff] }
  0x56   : > { %5712 = vmatprep.mubr.msk.f32.mxu1 %vm8969_vm0, %v251_v13  ;;  %5965 = vmatprep.mubr.msk.f32.mxu0 %vm8969_vm0, %v6790_v14  ;;  %v7032_v13 = vld [vmem:[%s6592_s25 + $0x1a] sm:$0xff] }
  0x59   : > { %5713 = vmatmul.mubr.msk.f32.gmra.mrb[34].mxu1 %vm8969_vm0, %v252_v15  ;;  %5966 = vmatmul.mubr.msk.f32.gmra.mrb[16].mxu0 %vm8969_vm0, %v6800_v16  ;;  %v7049_v15 = vld [vmem:[%s6592_s25 + $0x2a] sm:$0xff] }
  0x5a   : > { %5717 = vmatprep.mubr.msk.f32.mxu1 %vm8969_vm0, %v180_v17  ;;  %5968 = vmatprep.mubr.msk.f32.mxu0 %vm8969_vm0, %v6804_v18  ;;  %v7063_v17 = vld [vmem:[%s6592_s25 + $0x3a] sm:$0xff] }
  0x5d   : > { %5718 = vmatmul.mubr.msk.f32.vlgmr.msra.gmra.mrb[0].mxu1 %vm8969_vm0, %v181_v19  ;;  %5969 = vmatmul.mubr.msk.f32.gmra.mrb[18].mxu0 %vm8969_vm0, %v6814_v20  ;;  %v7077_v19 = vld [vmem:[%s6592_s25 + $0x4a] sm:$0xff] }
  0x5e   : > { %5772 = vmatpush3.msra.mxu1 %v6612_v11  ;;  %5720 = vmatprep.mubr.msk.f32.mxu1 %vm8969_vm0, %v182_v21  ;;  %v185_v11 = vld [vmem:[%s6592_s25 + $0x28] sm:$0xff]  ;;  %v7091_v21 = vld [vmem:[%s6592_s25 + $0x5a] sm:$0xff] }
  0x5f   : > { %5971 = vmatprep.mubr.msk.f32.mxu0 %vm8969_vm0, %v6818_v22  ;;  %5827 = vmatprep.subr.mxu1 %v6823_v23 }
  0x61   : > { %5721 = vmatmul.mubr.msk.f32.gmra.mrb[2].mxu1 %vm8969_vm0, %v183_v24  ;;  %5972 = vmatmul.mubr.msk.f32.gmra.mrb[20].mxu0 %vm8969_vm0, %v6832_v25  ;;  %v7108_v24 = vld [vmem:[%s6592_s25 + $0x72] sm:$0xff] }
  0x62   : > { %5723 = vmatprep.mubr.msk.f32.mxu1 %vm8969_vm0, %v184_v26  ;;  %5974 = vmatprep.mubr.msk.f32.mxu0 %vm8969_vm0, %v6838_v27  ;;  %v7122_v26 = vld [vmem:[%s6592_s25 + $0x82] sm:$0xff] }
  0x65   : > { %5724 = vmatmul.mubr.msk.f32.gmra.mrb[4].mxu1 %vm8969_vm0, %v185_v11  ;;  %5975 = vmatmul.mubr.msk.f32.gmra.mrb[22].mxu0 %vm8969_vm0, %v6849_v28  ;;  %v7133_v11 = vld [vmem:[%s6592_s25 + $0x8a] sm:$0xff] }
  0x66   : > { %5726 = vmatprep.mubr.msk.f32.mxu1 %vm8969_vm0, %v186_v29  ;;  %5977 = vmatprep.mubr.msk.f32.mxu0 %vm8969_vm0, %v6853_v30  ;;  %v7137_v29 = vld [vmem:[%s6592_s25 + $0x92] sm:$0xff] }
  0x69   : > { %5727 = vmatmul.mubr.msk.f32.gmra.mrb[6].mxu1 %vm8969_vm0, %v187_v31  ;;  %5978 = vmatmul.mubr.msk.f32.gmra.mrb[24].mxu0 %vm8969_vm0, %v6863_v32  ;;  %v7147_v31 = vld [vmem:[%s6592_s25 + $0x9a] sm:$0xff] }
  0x6a   : > { %5729 = vmatprep.mubr.msk.f32.mxu1 %vm8969_vm0, %v188_v33  ;;  %5980 = vmatprep.mubr.msk.f32.mxu0 %vm8969_vm0, %v6867_v34  ;;  %v7151_v33 = vld [vmem:[%s6592_s25 + $0xa2] sm:$0xff] }
  0x6d   : > { %5730 = vmatmul.mubr.msk.f32.gmra.mrb[8].mxu1 %vm8969_vm0, %v189_v35  ;;  %5981 = vmatmul.mubr.msk.f32.gmra.mrb[26].mxu0 %vm8969_vm0, %v6877_v36  ;;  %v7161_v35 = vld [vmem:[%s6592_s25 + $0xaa] sm:$0xff] }
  0x6e   : > { %5732 = vmatprep.mubr.msk.f32.mxu1 %vm8969_vm0, %v190_v37  ;;  %5983 = vmatprep.mubr.msk.f32.mxu0 %vm8969_vm0, %v6881_v38  ;;  %v7166_v37 = vld [vmem:[%s6592_s25 + $0xb2] sm:$0xff] }
  0x71   : > { %5733 = vmatmul.mubr.msk.f32.gmra.mrb[10].mxu1 %vm8969_vm0, %v191_v39  ;;  %5984 = vmatmul.mubr.msk.f32.gmra.mrb[28].mxu0 %vm8969_vm0, %v6891_v40  ;;  %v7176_v39 = vld [vmem:[%s6592_s25 + $0xba] sm:$0xff] }
  0x72   : > { %5735 = vmatprep.mubr.msk.f32.mxu1 %vm8969_vm0, %v192_v41  ;;  %5986 = vmatprep.mubr.msk.f32.mxu0 %vm8969_vm0, %v6895_v42  ;;  %v7180_v41 = vld [vmem:[%s6592_s25 + $0xc2] sm:$0xff] }
  0x75   : > { %5736 = vmatmul.mubr.msk.f32.gmra.mrb[12].mxu1 %vm8969_vm0, %v193_v43  ;;  %5987 = vmatmul.mubr.msk.f32.gmra.mrb[30].mxu0 %vm8969_vm0, %v6905_v44  ;;  %v7190_v43 = vld [vmem:[%s6592_s25 + $0xca] sm:$0xff] }
  0x76   : > { %5738 = vmatprep.mubr.msk.f32.mxu1 %vm8969_vm0, %v194_v45  ;;  %5989 = vmatprep.mubr.msk.f32.mxu0 %vm8969_vm0, %v6909_v46  ;;  %v7194_v45 = vld [vmem:[%s6592_s25 + $0xd2] sm:$0xff] }
  0x79   : > { %5739 = vmatmul.mubr.msk.f32.gmra.mrb[14].mxu1 %vm8969_vm0, %v195_v49  ;;  %5990 = vmatmul.mubr.msk.f32.gmra.mrb[32].mxu0 %vm8969_vm0, %v6919_v51  ;;  %v7204_v49 = vld [vmem:[%s6592_s25 + $0xda] sm:$0xff] }
  0x7a   : > { %5741 = vmatprep.mubr.msk.f32.mxu1 %vm8969_vm0, %v196_v53  ;;  %5992 = vmatprep.mubr.msk.f32.mxu0 %vm8969_vm0, %v6923_v55  ;;  %v7208_v53 = vld [vmem:[%s6592_s25 + $0xe2] sm:$0xff] }
  0x7d   : > { %5742 = vmatmul.mubr.msk.f32.gmra.mrb[16].mxu1 %vm8969_vm0, %v197_v57  ;;  %5993 = vmatmul.mubr.msk.f32.gmra.mrb[34].mxu0 %vm8969_vm0, %v6933_v59  ;;  %v7218_v57 = vld [vmem:[%s6592_s25 + $0xea] sm:$0xff] }
  0x7e   : > { %5744 = vmatprep.mubr.msk.f32.mxu1 %vm8969_vm0, %v198_v61  ;;  %5997 = vmatprep.mubr.msk.f32.mxu0 %vm8969_vm0, %v6686_v47  ;;  %v201_v47 = vld [vmem:[%s6592_s25 + $0xa8] sm:$0xff]  ;;  %v7222_v61 = vld [vmem:[%s6592_s25 + $0xf2] sm:$0xff] }
  0x81   : > { %5745 = vmatmul.mubr.msk.f32.gmra.mrb[18].mxu1 %vm8969_vm0, %v199_v63  ;;  %5998 = vmatmul.mubr.msk.f32.vlgmr.msra.gmra.mrb[0].mxu0 %vm8969_vm0, %v6699_v50  ;;  %v204_v50 = vld [vmem:[%s6592_s25 + $0xc0] sm:$0xff] }
  0x82   : > { %6052 = vmatpush3.msra.mxu0 %v6691_v48  ;;  %5747 = vmatprep.mubr.msk.f32.mxu1 %vm8969_vm0, %v200_v2  ;;  %v203_v48 = vld [vmem:[%s6592_s25 + $0xb8] sm:$0xff]  ;;  %v3109_v63 = vld [vmem:[%s6592_s25 + $0x85] sm:$0xff] }
  0x83   : > { %6000 = vmatprep.mubr.msk.f32.mxu0 %vm8969_vm0, %v6705_v52  ;;  %6107 = vmatprep.subr.mxu0 %v6947_v4  ;;  %v205_v52 = vld [vmem:[%s6592_s25 + $0xc8] sm:$0xff]  ;;  %v7232_v2 = vld [vmem:[%s6592_s25 + $0xfa] sm:$0xff] }
  0x85   : > { %5748 = vmatmul.mubr.msk.f32.gmra.mrb[20].mxu1 %vm8969_vm0, %v201_v47  ;;  %6001 = vmatmul.mubr.msk.f32.gmra.mrb[2].mxu0 %vm8969_vm0, %v6716_v54  ;;  %v206_v54 = vld [vmem:[%s6592_s25 + $0xd0] sm:$0xff]  ;;  %v7236_v47 = vld [vmem:[%s6592_s25 + $0x102] sm:$0xff] }
  0x86   : > { %5750 = vmatprep.mubr.msk.f32.mxu1 %vm8969_vm0, %v202_v6  ;;  %6003 = vmatprep.mubr.msk.f32.mxu0 %vm8969_vm0, %v6720_v56  ;;  %v207_v56 = vld [vmem:[%s6592_s25 + $0xd8] sm:$0xff] }
  0x87   : > { %v3111_v6 = vld [vmem:[%s6592_s25 + $0x95] sm:$0xff] }
  0x89   : > { %5751 = vmatmul.mubr.msk.f32.gmra.mrb[22].mxu1 %vm8969_vm0, %v203_v48  ;;  %6004 = vmatmul.mubr.msk.f32.gmra.mrb[4].mxu0 %vm8969_vm0, %v6730_v58  ;;  %v208_v58 = vld [vmem:[%s6592_s25 + $0xe0] sm:$0xff]  ;;  %v7246_v48 = vld [vmem:[%s6592_s25 + $0x10a] sm:$0xff] }
  0x8a   : > { %5753 = vmatprep.mubr.msk.f32.mxu1 %vm8969_vm0, %v204_v50  ;;  %6006 = vmatprep.mubr.msk.f32.mxu0 %vm8969_vm0, %v6734_v60  ;;  %v209_v60 = vld [vmem:[%s6592_s25 + $0xe8] sm:$0xff]  ;;  %v3112_v50 = vld [vmem:[%s6592_s25 + $0x9d] sm:$0xff] }
  0x8d   : > { %5754 = vmatmul.mubr.msk.f32.gmra.mrb[24].mxu1 %vm8969_vm0, %v205_v52  ;;  %6007 = vmatmul.mubr.msk.f32.gmra.mrb[6].mxu0 %vm8969_vm0, %v6744_v62  ;;  %v210_v62 = vld [vmem:[%s6592_s25 + $0xf0] sm:$0xff] }
  0x8e   : > { %5756 = vmatprep.mubr.msk.f32.mxu1 %vm8969_vm0, %v206_v54  ;;  %6009 = vmatprep.mubr.msk.f32.mxu0 %vm8969_vm0, %v6748_v0  ;;  %v211_v0 = vld [vmem:[%s6592_s25 + $0xf8] sm:$0xff]  ;;  %v3113_v54 = vld [vmem:[%s6592_s25 + $0xa5] sm:$0xff] }
  0x8f   : > { %v7250_v52 = vld [vmem:[%s6592_s25 + $0x112] sm:$0xff] }
  0x91   : > { %5757 = vmatmul.mubr.msk.f32.gmra.mrb[26].mxu1 %vm8969_vm0, %v207_v56  ;;  %6010 = vmatmul.mubr.msk.f32.gmra.mrb[8].mxu0 %vm8969_vm0, %v6758_v3  ;;  %v212_v3 = vld [vmem:[%s6592_s25 + $0x100] sm:$0xff] }
  0x92   : > { %5759 = vmatprep.mubr.msk.f32.mxu1 %vm8969_vm0, %v208_v58  ;;  %6012 = vmatprep.mubr.msk.f32.mxu0 %vm8969_vm0, %v6762_v5  ;;  %v213_v5 = vld [vmem:[%s6592_s25 + $0x108] sm:$0xff]  ;;  %v7260_v56 = vld [vmem:[%s6592_s25 + $0x11a] sm:$0xff] }
  0x93   : > { %v3114_v58 = vld [vmem:[%s6592_s25 + $0xad] sm:$0xff] }
  0x95   : > { %5760 = vmatmul.mubr.msk.f32.gmra.mrb[28].mxu1 %vm8969_vm0, %v209_v60  ;;  %6013 = vmatmul.mubr.msk.f32.gmra.mrb[10].mxu0 %vm8969_vm0, %v6772_v7  ;;  %v214_v7 = vld [vmem:[%s6592_s25 + $0x110] sm:$0xff] }
  0x96   : > { %5762 = vmatprep.mubr.msk.f32.mxu1 %vm8969_vm0, %v210_v62  ;;  %6015 = vmatprep.mubr.msk.f32.mxu0 %vm8969_vm0, %v6776_v9  ;;  %v962_v9 = vld [vmem:[%s6592_s25 + $0x2] sm:$0xff]  ;;  %v3115_v60 = vld [vmem:[%s6592_s25 + $0xb5] sm:$0xff] }
  0x97   : > { %v3116_v62 = vld [vmem:[%s6592_s25 + $0xbd] sm:$0xff] }
  0x99   : > { %5763 = vmatmul.mubr.msk.f32.gmra.mrb[30].mxu1 %vm8969_vm0, %v211_v0  ;;  %6016 = vmatmul.mubr.msk.f32.gmra.mrb[12].mxu0 %vm8969_vm0, %v6786_v12  ;;  %v7023_v12 = vld [vmem:[%s6592_s25 + $0x12] sm:$0xff]  ;;  %v3117_v0 = vld [vmem:[%s6592_s25 + $0xc5] sm:$0xff] }
  0x9a   : > { %5765 = vmatprep.mubr.msk.f32.mxu1 %vm8969_vm0, %v212_v3  ;;  %6018 = vmatprep.mubr.msk.f32.mxu0 %vm8969_vm0, %v6790_v14  ;;  %v7037_v14 = vld [vmem:[%s6592_s25 + $0x22] sm:$0xff]  ;;  %v3118_v3 = vld [vmem:[%s6592_s25 + $0xcd] sm:$0xff] }
  0x9d   : > { %5766 = vmatmul.mubr.msk.f32.gmra.mrb[32].mxu1 %vm8969_vm0, %v213_v5  ;;  %6019 = vmatmul.mubr.msk.f32.gmra.mrb[14].mxu0 %vm8969_vm0, %v6800_v16  ;;  %v7052_v16 = vld [vmem:[%s6592_s25 + $0x32] sm:$0xff] }
  0x9e   : > { %5768 = vmatprep.mubr.msk.f32.mxu1 %vm8969_vm0, %v214_v7  ;;  %6021 = vmatprep.mubr.msk.f32.mxu0 %vm8969_vm0, %v6804_v18  ;;  %v7066_v18 = vld [vmem:[%s6592_s25 + $0x42] sm:$0xff]  ;;  %v3119_v5 = vld [vmem:[%s6592_s25 + $0xd5] sm:$0xff] }
  0x9f   : > { %v3121_v7 = vld [vmem:[%s6592_s25 + $0xe5] sm:$0xff] }
  0xa1   : > { %5769 = vmatmul.mubr.msk.f32.gmra.mrb[34].mxu1 %vm8969_vm0, %v215_v8  ;;  %6022 = vmatmul.mubr.msk.f32.gmra.mrb[16].mxu0 %vm8969_vm0, %v6814_v20  ;;  %v7080_v20 = vld [vmem:[%s6592_s25 + $0x52] sm:$0xff] }
  0xa2   : > { %5773 = vmatprep.mubr.msk.f32.mxu1 %vm8969_vm0, %v962_v9  ;;  %6024 = vmatprep.mubr.msk.f32.mxu0 %vm8969_vm0, %v6818_v22  ;;  %v7094_v22 = vld [vmem:[%s6592_s25 + $0x62] sm:$0xff]  ;;  %v3122_v8 = vld [vmem:[%s6592_s25 + $0xed] sm:$0xff]  ;;  %v3123_v9 = vld [vmem:[%s6592_s25 + $0xf5] sm:$0xff] }
  0xa5   : > { %5774 = vmatmul.mubr.msk.f32.vlgmr.msra.gmra.mrb[0].mxu1 %vm8969_vm0, %v963_v10  ;;  %6025 = vmatmul.mubr.msk.f32.gmra.mrb[18].mxu0 %vm8969_vm0, %v6832_v25  ;;  %v7119_v25 = vld [vmem:[%s6592_s25 + $0x7a] sm:$0xff] }
  0xa6   : > { %5828 = vmatpush3.msra.mxu1 %v6823_v23  ;;  %5776 = vmatprep.mubr.msk.f32.mxu1 %vm8969_vm0, %v7023_v12  ;;  %v7105_v23 = vld [vmem:[%s6592_s25 + $0x6a] sm:$0xff]  ;;  %v3124_v10 = vld [vmem:[%s6592_s25 + $0xfd] sm:$0xff] }
  0xa7   : > { %6027 = vmatprep.mubr.msk.f32.mxu0 %vm8969_vm0, %v6838_v27  ;;  %6163 = vmatprep.subr.mxu1 %v6576_v1  ;;  %v2704_v27 = vld [vmem:[%s6592_s25 + $0x134] sm:$0xff] }
  0xa9   : > { %5777 = vmatmul.mubr.msk.f32.gmra.mrb[2].mxu1 %vm8969_vm0, %v7032_v13  ;;  %6028 = vmatmul.mubr.msk.f32.gmra.mrb[20].mxu0 %vm8969_vm0, %v6849_v28  ;;  %v2705_v28 = vld [vmem:[%s6592_s25 + $0x13c] sm:$0xff] }
  0xaa   : > { %5779 = vmatprep.mubr.msk.f32.mxu1 %vm8969_vm0, %v7037_v14  ;;  %6030 = vmatprep.mubr.msk.f32.mxu0 %vm8969_vm0, %v6853_v30  ;;  %v3097_v30 = vld [vmem:[%s6592_s25 + $0x25] sm:$0xff] }
  0xad   : > { %5780 = vmatmul.mubr.msk.f32.gmra.mrb[4].mxu1 %vm8969_vm0, %v7049_v15  ;;  %6031 = vmatmul.mubr.msk.f32.gmra.mrb[22].mxu0 %vm8969_vm0, %v6863_v32  ;;  %v3098_v32 = vld [vmem:[%s6592_s25 + $0x2d] sm:$0xff] }
  0xae   : > { %5782 = vmatprep.mubr.msk.f32.mxu1 %vm8969_vm0, %v7052_v16  ;;  %6033 = vmatprep.mubr.msk.f32.mxu0 %vm8969_vm0, %v6867_v34  ;;  %v3099_v34 = vld [vmem:[%s6592_s25 + $0x35] sm:$0xff] }
  0xb1   : > { %5783 = vmatmul.mubr.msk.f32.gmra.mrb[6].mxu1 %vm8969_vm0, %v7063_v17  ;;  %6034 = vmatmul.mubr.msk.f32.gmra.mrb[24].mxu0 %vm8969_vm0, %v6877_v36  ;;  %v3100_v36 = vld [vmem:[%s6592_s25 + $0x3d] sm:$0xff] }
  0xb2   : > { %5785 = vmatprep.mubr.msk.f32.mxu1 %vm8969_vm0, %v7066_v18  ;;  %6036 = vmatprep.mubr.msk.f32.mxu0 %vm8969_vm0, %v6881_v38  ;;  %v3101_v38 = vld [vmem:[%s6592_s25 + $0x45] sm:$0xff] }
  0xb5   : > { %5786 = vmatmul.mubr.msk.f32.gmra.mrb[8].mxu1 %vm8969_vm0, %v7077_v19  ;;  %6037 = vmatmul.mubr.msk.f32.gmra.mrb[26].mxu0 %vm8969_vm0, %v6891_v40  ;;  %v3102_v40 = vld [vmem:[%s6592_s25 + $0x4d] sm:$0xff] }
  0xb6   : > { %5788 = vmatprep.mubr.msk.f32.mxu1 %vm8969_vm0, %v7080_v20  ;;  %6039 = vmatprep.mubr.msk.f32.mxu0 %vm8969_vm0, %v6895_v42  ;;  %v3103_v42 = vld [vmem:[%s6592_s25 + $0x55] sm:$0xff] }
  0xb9   : > { %5789 = vmatmul.mubr.msk.f32.gmra.mrb[10].mxu1 %vm8969_vm0, %v7091_v21  ;;  %6040 = vmatmul.mubr.msk.f32.gmra.mrb[28].mxu0 %vm8969_vm0, %v6905_v44  ;;  %v3104_v44 = vld [vmem:[%s6592_s25 + $0x5d] sm:$0xff] }
  0xba   : > { %5791 = vmatprep.mubr.msk.f32.mxu1 %vm8969_vm0, %v7094_v22  ;;  %6042 = vmatprep.mubr.msk.f32.mxu0 %vm8969_vm0, %v6909_v46  ;;  %v3105_v46 = vld [vmem:[%s6592_s25 + $0x65] sm:$0xff] }
  0xbd   : > { %5792 = vmatmul.mubr.msk.f32.gmra.mrb[12].mxu1 %vm8969_vm0, %v7105_v23  ;;  %6043 = vmatmul.mubr.msk.f32.gmra.mrb[30].mxu0 %vm8969_vm0, %v6919_v51  ;;  %v3106_v51 = vld [vmem:[%s6592_s25 + $0x6d] sm:$0xff] }
  0xbe   : > { %5794 = vmatprep.mubr.msk.f32.mxu1 %vm8969_vm0, %v7108_v24  ;;  %6045 = vmatprep.mubr.msk.f32.mxu0 %vm8969_vm0, %v6923_v55  ;;  %v3107_v55 = vld [vmem:[%s6592_s25 + $0x75] sm:$0xff] }
  0xc1   : > { %5795 = vmatmul.mubr.msk.f32.gmra.mrb[14].mxu1 %vm8969_vm0, %v7119_v25  ;;  %6046 = vmatmul.mubr.msk.f32.gmra.mrb[32].mxu0 %vm8969_vm0, %v6933_v59  ;;  %v3108_v59 = vld [vmem:[%s6592_s25 + $0x7d] sm:$0xff] }
  0xc2   : > { %5797 = vmatprep.mubr.msk.f32.mxu1 %vm8969_vm0, %v7122_v26  ;;  %6048 = vmatprep.mubr.msk.f32.mxu0 %vm8969_vm0, %v2704_v27  ;;  %v3531_v27 = vld [vmem:[%s6592_s25 + $0x5e] sm:$0xff] }
  0xc5   : > { %5798 = vmatmul.mubr.msk.f32.gmra.mrb[16].mxu1 %vm8969_vm0, %v7133_v11  ;;  %6049 = vmatmul.mubr.msk.f32.gmra.mrb[34].mxu0 %vm8969_vm0, %v2705_v28  ;;  %v3533_v28 = vld [vmem:[%s6592_s25 + $0x6e] sm:$0xff] }
  0xc6   : > { %5800 = vmatprep.mubr.msk.f32.mxu1 %vm8969_vm0, %v7137_v29  ;;  %6053 = vmatprep.mubr.msk.f32.mxu0 %vm8969_vm0, %v3097_v30  ;;  %v3535_v30 = vld [vmem:[%s6592_s25 + $0x7e] sm:$0xff] }
  0xc9   : > { %5801 = vmatmul.mubr.msk.f32.gmra.mrb[18].mxu1 %vm8969_vm0, %v7147_v31  ;;  %6054 = vmatmul.mubr.msk.f32.vlgmr.msra.gmra.mrb[0].mxu0 %vm8969_vm0, %v3098_v32  ;;  %v3537_v32 = vld [vmem:[%s6592_s25 + $0x8e] sm:$0xff] }
  0xca   : > { %6108 = vmatpush3.msra.mxu0 %v6947_v4  ;;  %5803 = vmatprep.mubr.msk.f32.mxu1 %vm8969_vm0, %v7151_v33  ;;  %v3110_v4 = vld [vmem:[%s6592_s25 + $0x8d] sm:$0xff] }
  0xcb   : > { %6056 = vmatprep.mubr.msk.f32.mxu0 %vm8969_vm0, %v3099_v34  ;;  %v3539_v34 = vld [vmem:[%s6592_s25 + $0x9e] sm:$0xff] }
  0xcd   : > { %5804 = vmatmul.mubr.msk.f32.gmra.mrb[20].mxu1 %vm8969_vm0, %v7161_v35  ;;  %6057 = vmatmul.mubr.msk.f32.gmra.mrb[2].mxu0 %vm8969_vm0, %v3100_v36  ;;  %v3540_v36 = vld [vmem:[%s6592_s25 + $0xa6] sm:$0xff] }
  0xce   : > { %5806 = vmatprep.mubr.msk.f32.mxu1 %vm8969_vm0, %v7166_v37  ;;  %6059 = vmatprep.mubr.msk.f32.mxu0 %vm8969_vm0, %v3101_v38  ;;  %v3541_v38 = vld [vmem:[%s6592_s25 + $0xae] sm:$0xff] }
  0xd1   : > { %5807 = vmatmul.mubr.msk.f32.gmra.mrb[22].mxu1 %vm8969_vm0, %v7176_v39  ;;  %6060 = vmatmul.mubr.msk.f32.gmra.mrb[4].mxu0 %vm8969_vm0, %v3102_v40  ;;  %v3542_v40 = vld [vmem:[%s6592_s25 + $0xb6] sm:$0xff] }
  0xd2   : > { %5809 = vmatprep.mubr.msk.f32.mxu1 %vm8969_vm0, %v7180_v41  ;;  %6062 = vmatprep.mubr.msk.f32.mxu0 %vm8969_vm0, %v3103_v42  ;;  %v3543_v42 = vld [vmem:[%s6592_s25 + $0xbe] sm:$0xff] }
  0xd5   : > { %5810 = vmatmul.mubr.msk.f32.gmra.mrb[24].mxu1 %vm8969_vm0, %v7190_v43  ;;  %6063 = vmatmul.mubr.msk.f32.gmra.mrb[6].mxu0 %vm8969_vm0, %v3104_v44  ;;  %v3544_v44 = vld [vmem:[%s6592_s25 + $0xc6] sm:$0xff] }
  0xd6   : > { %5812 = vmatprep.mubr.msk.f32.mxu1 %vm8969_vm0, %v7194_v45  ;;  %6065 = vmatprep.mubr.msk.f32.mxu0 %vm8969_vm0, %v3105_v46  ;;  %v3545_v46 = vld [vmem:[%s6592_s25 + $0xce] sm:$0xff] }
  0xd9   : > { %5813 = vmatmul.mubr.msk.f32.gmra.mrb[26].mxu1 %vm8969_vm0, %v7204_v49  ;;  %6066 = vmatmul.mubr.msk.f32.gmra.mrb[8].mxu0 %vm8969_vm0, %v3106_v51  ;;  %v3546_v51 = vld [vmem:[%s6592_s25 + $0xd6] sm:$0xff] }
  0xda   : > { %5815 = vmatprep.mubr.msk.f32.mxu1 %vm8969_vm0, %v7208_v53  ;;  %6068 = vmatprep.mubr.msk.f32.mxu0 %vm8969_vm0, %v3107_v55  ;;  %v3547_v55 = vld [vmem:[%s6592_s25 + $0xde] sm:$0xff] }
  0xdd   : > { %5816 = vmatmul.mubr.msk.f32.gmra.mrb[28].mxu1 %vm8969_vm0, %v7218_v57  ;;  %6069 = vmatmul.mubr.msk.f32.gmra.mrb[10].mxu0 %vm8969_vm0, %v3108_v59  ;;  %v3548_v59 = vld [vmem:[%s6592_s25 + $0xe6] sm:$0xff] }
  0xde   : > { %5818 = vmatprep.mubr.msk.f32.mxu1 %vm8969_vm0, %v7222_v61  ;;  %6071 = vmatprep.mubr.msk.f32.mxu0 %vm8969_vm0, %v3109_v63  ;;  %v3549_v63 = vld [vmem:[%s6592_s25 + $0xee] sm:$0xff] }
  0xe1   : > { %5819 = vmatmul.mubr.msk.f32.gmra.mrb[30].mxu1 %vm8969_vm0, %v7232_v2  ;;  %6072 = vmatmul.mubr.msk.f32.gmra.mrb[12].mxu0 %vm8969_vm0, %v3110_v4  ;;  %v3550_v4 = vld [vmem:[%s6592_s25 + $0xf6] sm:$0xff] }
  0xe2   : > { %5821 = vmatprep.mubr.msk.f32.mxu1 %vm8969_vm0, %v7236_v47  ;;  %6074 = vmatprep.mubr.msk.f32.mxu0 %vm8969_vm0, %v3111_v6  ;;  %v3551_v6 = vld [vmem:[%s6592_s25 + $0xfe] sm:$0xff] }
  0xe5   : > { %5822 = vmatmul.mubr.msk.f32.gmra.mrb[32].mxu1 %vm8969_vm0, %v7246_v48  ;;  %6075 = vmatmul.mubr.msk.f32.gmra.mrb[14].mxu0 %vm8969_vm0, %v3112_v50  ;;  %v3552_v50 = vld [vmem:[%s6592_s25 + $0x106] sm:$0xff] }
  0xe6   : > { %5824 = vmatprep.mubr.msk.f32.mxu1 %vm8969_vm0, %v7250_v52  ;;  %6077 = vmatprep.mubr.msk.f32.mxu0 %vm8969_vm0, %v3113_v54  ;;  %v3553_v54 = vld [vmem:[%s6592_s25 + $0x10e] sm:$0xff] }
  0xe9   : > { %5825 = vmatmul.mubr.msk.f32.gmra.mrb[34].mxu1 %vm8969_vm0, %v7260_v56  ;;  %6078 = vmatmul.mubr.msk.f32.gmra.mrb[16].mxu0 %vm8969_vm0, %v3114_v58  ;;  %v3554_v58 = vld [vmem:[%s6592_s25 + $0x116] sm:$0xff] }
  0xea   : > { %5829 = vmatprep.mubr.msk.f32.mxu1 %vm8969_vm0, %v7023_v12  ;;  %6080 = vmatprep.mubr.msk.f32.mxu0 %vm8969_vm0, %v3115_v60  ;;  %v3125_v12 = vld [vmem:[%s6592_s25 + $0x105] sm:$0xff] }
  0xeb   : > { %v1847_v60 = vld [vmem:[%s6592_s25 + $0x10b] sm:$0xff] }
  0xed   : > { %5830 = vmatmul.mubr.msk.f32.vlgmr.msra.gmra.mrb[0].mxu1 %vm8969_vm0, %v7032_v13  ;;  %6081 = vmatmul.mubr.msk.f32.gmra.mrb[18].mxu0 %vm8969_vm0, %v3116_v62  ;;  %v3126_v13 = vld [vmem:[%s6592_s25 + $0x10d] sm:$0xff]  ;;  %v3555_v62 = vld [vmem:[%s6592_s25 + $0x11e] sm:$0xff] }
  0xee   : > { %6164 = vmatpush3.msra.mxu1 %v6576_v1  ;;  %5832 = vmatprep.mubr.msk.f32.mxu1 %vm8969_vm0, %v7037_v14  ;;  %v3120_v1 = vld [vmem:[%s6592_s25 + $0xdd] sm:$0xff]  ;;  %v3127_v14 = vld [vmem:[%s6592_s25 + $0x115] sm:$0xff] }
  0xef   : > { %6083 = vmatprep.mubr.msk.f32.mxu0 %vm8969_vm0, %v3117_v0  ;;  %v1848_v0 = vld [vmem:[%s6592_s25 + $0x113] sm:$0xff] }
  0xf1   : > { %5833 = vmatmul.mubr.msk.f32.gmra.mrb[2].mxu1 %vm8969_vm0, %v7049_v15  ;;  %6084 = vmatmul.mubr.msk.f32.gmra.mrb[20].mxu0 %vm8969_vm0, %v3118_v3  ;;  %v3128_v15 = vld [vmem:[%s6592_s25 + $0x11d] sm:$0xff]  ;;  %v3556_v3 = vld [vmem:[%s6592_s25 + $0x126] sm:$0xff] }
  0xf2   : > { %5835 = vmatprep.mubr.msk.f32.mxu1 %vm8969_vm0, %v7052_v16  ;;  %6086 = vmatprep.mubr.msk.f32.mxu0 %vm8969_vm0, %v3119_v5  ;;  %v3129_v16 = vld [vmem:[%s6592_s25 + $0x125] sm:$0xff]  ;;  %v1849_v5 = vld [vmem:[%s6592_s25 + $0x11b] sm:$0xff] }
  0xf5   : > { %5836 = vmatmul.mubr.msk.f32.gmra.mrb[4].mxu1 %vm8969_vm0, %v7063_v17  ;;  %6087 = vmatmul.mubr.msk.f32.gmra.mrb[22].mxu0 %vm8969_vm0, %v3120_v1  ;;  %v3130_v17 = vld [vmem:[%s6592_s25 + $0x12d] sm:$0xff] }
  0xf6   : > { %5838 = vmatprep.mubr.msk.f32.mxu1 %vm8969_vm0, %v7066_v18  ;;  %6089 = vmatprep.mubr.msk.f32.mxu0 %vm8969_vm0, %v3121_v7  ;;  %v3131_v18 = vld [vmem:[%s6592_s25 + $0x135] sm:$0xff]  ;;  %v1850_v7 = vld [vmem:[%s6592_s25 + $0x123] sm:$0xff] }
  0xf7   : > { %v3557_v1 = vld [vmem:[%s6592_s25 + $0x12e] sm:$0xff] }
  0xf9   : > { %5839 = vmatmul.mubr.msk.f32.gmra.mrb[6].mxu1 %vm8969_vm0, %v7077_v19  ;;  %6090 = vmatmul.mubr.msk.f32.gmra.mrb[24].mxu0 %vm8969_vm0, %v3122_v8  ;;  %v3132_v19 = vld [vmem:[%s6592_s25 + $0x13d] sm:$0xff] }
  0xfa   : > { %5841 = vmatprep.mubr.msk.f32.mxu1 %vm8969_vm0, %v7080_v20  ;;  %6092 = vmatprep.mubr.msk.f32.mxu0 %vm8969_vm0, %v3123_v9  ;;  %v3524_v20 = vld [vmem:[%s6592_s25 + $0x26] sm:$0xff]  ;;  %v3558_v8 = vld [vmem:[%s6592_s25 + $0x136] sm:$0xff] }
  0xfb   : > { %v1851_v9 = vld [vmem:[%s6592_s25 + $0x12b] sm:$0xff] }
  0xfd   : > { %5842 = vmatmul.mubr.msk.f32.gmra.mrb[8].mxu1 %vm8969_vm0, %v7091_v21  ;;  %6093 = vmatmul.mubr.msk.f32.gmra.mrb[26].mxu0 %vm8969_vm0, %v3124_v10  ;;  %v3525_v21 = vld [vmem:[%s6592_s25 + $0x2e] sm:$0xff]  ;;  %v3559_v10 = vld [vmem:[%s6592_s25 + $0x13e] sm:$0xff] }
  0xfe   : > { %5844 = vmatprep.mubr.msk.f32.mxu1 %vm8969_vm0, %v7094_v22  ;;  %6095 = vmatprep.mubr.msk.f32.mxu0 %vm8969_vm0, %v3125_v12  ;;  %v3526_v22 = vld [vmem:[%s6592_s25 + $0x36] sm:$0xff]  ;;  %v3951_v12 = vlaneseq }
 0x101   : > { %5845 = vmatmul.mubr.msk.f32.gmra.mrb[10].mxu1 %vm8969_vm0, %v7105_v23  ;;  %6096 = vmatmul.mubr.msk.f32.gmra.mrb[28].mxu0 %vm8969_vm0, %v3126_v13  ;;  %v3527_v23 = vld [vmem:[%s6592_s25 + $0x3e] sm:$0xff]  ;;  %v7483_v13 = vshrl.u32 %v3951_v12, 7 }
 0x102   : > { %5847 = vmatprep.mubr.msk.f32.mxu1 %vm8969_vm0, %v7108_v24  ;;  %6098 = vmatprep.mubr.msk.f32.mxu0 %vm8969_vm0, %v3127_v14  ;;  %v3528_v24 = vld [vmem:[%s6592_s25 + $0x46] sm:$0xff] }
 0x103   : > { %v3953_v14 = vadd.s32 8, %v7483_v13 }
 0x105   : > { %5848 = vmatmul.mubr.msk.f32.gmra.mrb[12].mxu1 %vm8969_vm0, %v7119_v25  ;;  %6099 = vmatmul.mubr.msk.f32.gmra.mrb[30].mxu0 %vm8969_vm0, %v3128_v15  ;;  %v3529_v25 = vld [vmem:[%s6592_s25 + $0x4e] sm:$0xff] }
 0x106   : > { %5850 = vmatprep.mubr.msk.f32.mxu1 %vm8969_vm0, %v7122_v26  ;;  %6101 = vmatprep.mubr.msk.f32.mxu0 %vm8969_vm0, %v3129_v16  ;;  %v3530_v26 = vld [vmem:[%s6592_s25 + $0x56] sm:$0xff]  ;;  %v7486_v15 = vmul.u32.u64.low 3817748708, %v3953_v14  ;;  %v7487_v16 = vmul.u32.u64.high 3817748708, %v3953_v14, %v7486_v15 }
 0x109   : > { %5851 = vmatmul.mubr.msk.f32.gmra.mrb[14].mxu1 %vm8969_vm0, %v7133_v11  ;;  %6102 = vmatmul.mubr.msk.f32.gmra.mrb[32].mxu0 %vm8969_vm0, %v3130_v17  ;;  %v3532_v11 = vld [vmem:[%s6592_s25 + $0x66] sm:$0xff]  ;;  %v3955_v17 = vadd.s32 24, %v7483_v13 }
 0x10a   : > { %5853 = vmatprep.mubr.msk.f32.mxu1 %vm8969_vm0, %v7137_v29  ;;  %6104 = vmatprep.mubr.msk.f32.mxu0 %vm8969_vm0, %v3131_v18  ;;  %v3534_v29 = vld [vmem:[%s6592_s25 + $0x76] sm:$0xff] }
 0x10d   : > { %5854 = vmatmul.mubr.msk.f32.gmra.mrb[16].mxu1 %vm8969_vm0, %v7147_v31  ;;  %6105 = vmatmul.mubr.msk.f32.gmra.mrb[34].mxu0 %vm8969_vm0, %v3132_v19  ;;  %v3536_v31 = vld [vmem:[%s6592_s25 + $0x86] sm:$0xff]  ;;  %v7491_v18 = vmul.u32.u64.low 3817748708, %v7483_v13  ;;  %v7492_v19 = vmul.u32.u64.high 3817748708, %v7483_v13, %v7491_v18 }
 0x10e   : > { %5856 = vmatprep.mubr.msk.f32.mxu1 %vm8969_vm0, %v7151_v33  ;;  %6109 = vmatprep.mubr.msk.f32.mxu0 %vm8969_vm0, %v3524_v20  ;;  %v3538_v33 = vld [vmem:[%s6592_s25 + $0x96] sm:$0xff]  ;;  %v3954_v20 = vadd.s32 16, %v7483_v13 }
 0x111   : > { %5857 = vmatmul.mubr.msk.f32.gmra.mrb[18].mxu1 %vm8969_vm0, %v7161_v35  ;;  %6110 = vmatmul.mubr.msk.f32.vlgmr.msra.gmra.mrb[0].mxu0 %vm8969_vm0, %v3525_v21  ;;  %v1423_v35 = vld [vmem:[%s6592_s25 + $0x122] sm:$0xff] }
 0x112   : > { %5859 = vmatprep.mubr.msk.f32.mxu1 %vm8969_vm0, %v7166_v37  ;;  %6112 = vmatprep.mubr.msk.f32.mxu0 %vm8969_vm0, %v3526_v22  ;;  %v1424_v37 = vld [vmem:[%s6592_s25 + $0x12a] sm:$0xff]  ;;  %v7495_v21 = vmul.u32.u64.low 3817748708, %v3955_v17  ;;  %v7496_v22 = vmul.u32.u64.high 3817748708, %v3955_v17, %v7495_v21 }
 0x113   : > { %v7629_v21 = vadd.s32 120, %v7483_v13 }
 0x115   : > { %5860 = vmatmul.mubr.msk.f32.gmra.mrb[20].mxu1 %vm8969_vm0, %v7176_v39  ;;  %6113 = vmatmul.mubr.msk.f32.gmra.mrb[2].mxu0 %vm8969_vm0, %v3527_v23  ;;  %v1834_v39 = vld [vmem:[%s6592_s25 + $0xa3] sm:$0xff]  ;;  %v3957_v23 = vadd.s32 40, %v7483_v13 }
 0x116   : > { %5862 = vmatprep.mubr.msk.f32.mxu1 %vm8969_vm0, %v7180_v41  ;;  %6115 = vmatprep.mubr.msk.f32.mxu0 %vm8969_vm0, %v3528_v24  ;;  %v1835_v41 = vld [vmem:[%s6592_s25 + $0xab] sm:$0xff]  ;;  %v4005_v24 = vshrl.u32 %v7487_v16, 4 }
 0x119   : > { %5863 = vmatmul.mubr.msk.f32.gmra.mrb[22].mxu1 %vm8969_vm0, %v7190_v43  ;;  %6116 = vmatmul.mubr.msk.f32.gmra.mrb[4].mxu0 %vm8969_vm0, %v3529_v25  ;;  %v1836_v43 = vld [vmem:[%s6592_s25 + $0xb3] sm:$0xff]  ;;  %v3956_v25 = vadd.s32 32, %v7483_v13 }
 0x11a   : > { %5865 = vmatprep.mubr.msk.f32.mxu1 %vm8969_vm0, %v7194_v45  ;;  %6118 = vmatprep.mubr.msk.f32.mxu0 %vm8969_vm0, %v3530_v26  ;;  %v1837_v45 = vld [vmem:[%s6592_s25 + $0xbb] sm:$0xff] }
 0x11d   : > { %5866 = vmatmul.mubr.msk.f32.gmra.mrb[24].mxu1 %vm8969_vm0, %v7204_v49  ;;  %6119 = vmatmul.mubr.msk.f32.gmra.mrb[6].mxu0 %vm8969_vm0, %v3531_v27  ;;  %v1838_v49 = vld [vmem:[%s6592_s25 + $0xc3] sm:$0xff]  ;;  %v7501_v26 = vmul.u32.u64.low 3817748708, %v3954_v20  ;;  %v7502_v27 = vmul.u32.u64.high 3817748708, %v3954_v20, %v7501_v26 }
 0x11e   : > { %5868 = vmatprep.mubr.msk.f32.mxu1 %vm8969_vm0, %v7208_v53  ;;  %6121 = vmatprep.mubr.msk.f32.mxu0 %vm8969_vm0, %v3532_v11  ;;  %v1839_v53 = vld [vmem:[%s6592_s25 + $0xcb] sm:$0xff]  ;;  %v3994_v11 = vshrl.u32 %v7492_v19, 4 }
 0x121   : > { %5869 = vmatmul.mubr.msk.f32.gmra.mrb[26].mxu1 %vm8969_vm0, %v7218_v57  ;;  %6122 = vmatmul.mubr.msk.f32.gmra.mrb[8].mxu0 %vm8969_vm0, %v3533_v28  ;;  %v1840_v57 = vld [vmem:[%s6592_s25 + $0xd3] sm:$0xff] }
 0x122   : > { %5871 = vmatprep.mubr.msk.f32.mxu1 %vm8969_vm0, %v7222_v61  ;;  %6124 = vmatprep.mubr.msk.f32.mxu0 %vm8969_vm0, %v3534_v29  ;;  %v1841_v61 = vld [vmem:[%s6592_s25 + $0xdb] sm:$0xff]  ;;  %v7505_v28 = vmul.u32.u64.low 3817748708, %v3957_v23  ;;  %v7506_v29 = vmul.u32.u64.high 3817748708, %v3957_v23, %v7505_v28 }
 0x125   : > { %5872 = vmatmul.mubr.msk.f32.gmra.mrb[28].mxu1 %vm8969_vm0, %v7232_v2  ;;  %6125 = vmatmul.mubr.msk.f32.gmra.mrb[10].mxu0 %vm8969_vm0, %v3535_v30  ;;  %v1842_v2 = vld [vmem:[%s6592_s25 + $0xe3] sm:$0xff]  ;;  %v4006_v30 = vmul.u32 18, %v4005_v24 }
 0x126   : > { %5874 = vmatprep.mubr.msk.f32.mxu1 %vm8969_vm0, %v7236_v47  ;;  %6127 = vmatprep.mubr.msk.f32.mxu0 %vm8969_vm0, %v3536_v31  ;;  %v1843_v47 = vld [vmem:[%s6592_s25 + $0xeb] sm:$0xff] }
 0x129   : > { %5875 = vmatmul.mubr.msk.f32.gmra.mrb[30].mxu1 %vm8969_vm0, %v7246_v48  ;;  %6128 = vmatmul.mubr.msk.f32.gmra.mrb[12].mxu0 %vm8969_vm0, %v3537_v32  ;;  %v1844_v48 = vld [vmem:[%s6592_s25 + $0xf3] sm:$0xff]  ;;  %v7508_v31 = vmul.u32.u64.low 3817748708, %v3956_v25  ;;  %v7509_v32 = vmul.u32.u64.high 3817748708, %v3956_v25, %v7508_v31 }
 0x12a   : > { %5877 = vmatprep.mubr.msk.f32.mxu1 %vm8969_vm0, %v7250_v52  ;;  %6130 = vmatprep.mubr.msk.f32.mxu0 %vm8969_vm0, %v3538_v33  ;;  %v1845_v52 = vld [vmem:[%s6592_s25 + $0xfb] sm:$0xff]  ;;  %v4027_v33 = vshrl.u32 %v7496_v22, 4  ;;  %v9049_v22 = vmov 0  ;;  %v9053_v31 = vmov 0 }
 0x12d   : > { %5878 = vmatmul.mubr.msk.f32.gmra.mrb[32].mxu1 %vm8969_vm0, %v7260_v56  ;;  %6131 = vmatmul.mubr.msk.f32.gmra.mrb[14].mxu0 %vm8969_vm0, %v3539_v34  ;;  %v1846_v56 = vld [vmem:[%s6592_s25 + $0x103] sm:$0xff]  ;;  %v7513_v34 = vadd.s32 56, %v7483_v13 }
 0x12e   : > { %5880 = vmatprep.mubr.msk.f32.mxu1 %vm8969_vm0, %v1423_v35  ;;  %6133 = vmatprep.mubr.msk.f32.mxu0 %vm8969_vm0, %v3540_v36  ;;  %v3995_v35 = vmul.u32 18, %v3994_v11  ;;  %v7516_v36 = vadd.s32 48, %v7483_v13 }
 0x131   : > { %5881 = vmatmul.mubr.msk.f32.gmra.mrb[34].mxu1 %vm8969_vm0, %v1424_v37  ;;  %6134 = vmatmul.mubr.msk.f32.gmra.mrb[16].mxu0 %vm8969_vm0, %v3541_v38  ;;  %v7518_v37 = vsub.s32 %v3953_v14, %v4006_v30  ;;  %v4016_v38 = vshrl.u32 %v7502_v27, 4  ;;  %v7652_v27 = vadd.s32 112, %v7483_v13 }
 0x132   : > { %5912 = vmatprep.mubr.msk.f32.mxu1 %vm8969_vm0, %v1834_v39  ;;  %6136 = vmatprep.mubr.msk.f32.mxu0 %vm8969_vm0, %v3542_v40  ;;  %v7522_v39 = vadd.s32 72, %v7483_v13  ;;  %v4028_v40 = vmul.u32 18, %v4027_v33 }
 0x133   : > { %vm4385_vm1 = vcmp.ne.s32.totalorder %v7518_v37, 0  ;;  %vm4421_vm2 = vcmp.lt.s32.totalorder %v7518_v37, 0 }
 0x134   : > { %vm7582_vm5 = vmand %vm4421_vm2, %vm4385_vm1 }
 0x135   : > { %5913 = vmatmul.mubr.msk.f32.vlgmr.msra.gmra.mrb[18].mxu1 %vm8969_vm0, %v1835_v41  ;;  %6137 = vmatmul.mubr.msk.f32.gmra.mrb[18].mxu0 %vm8969_vm0, %v3543_v42  ;;  %v7525_v41 = vmul.u32.u64.low 3817748708, %v7513_v34  ;;  %v7526_v42 = vmul.u32.u64.high 3817748708, %v7513_v34, %v7525_v41 }
 0x136   : > { %5915 = vmatprep.mubr.msk.f32.mxu1 %vm8969_vm0, %v1836_v43  ;;  %6139 = vmatprep.mubr.msk.f32.mxu0 %vm8969_vm0, %v3544_v44  ;;  %v7529_v43 = vsub.s32 %v7483_v13, %v3995_v35  ;;  %v4049_v44 = vshrl.u32 %v7506_v29, 4 }
 0x138   : > { %vm4384_vm3 = vcmp.ne.s32.totalorder %v7529_v43, 0  ;;  %vm4420_vm4 = vcmp.lt.s32.totalorder %v7529_v43, 0 }
 0x139   : > { %5916 = vmatmul.mubr.msk.f32.gmra.mrb[20].mxu1 %vm8969_vm0, %v1837_v45  ;;  %6140 = vmatmul.mubr.msk.f32.gmra.mrb[20].mxu0 %vm8969_vm0, %v3545_v46  ;;  %v7533_v45 = vmul.u32.u64.low 3817748708, %v7516_v36  ;;  %v7534_v46 = vmul.u32.u64.high 3817748708, %v7516_v36, %v7533_v45  ;;  %vm7596_vm7 = vmand %vm4420_vm4, %vm4384_vm3 }
 0x13a   : > { %5918 = vmatprep.mubr.msk.f32.mxu1 %vm8969_vm0, %v1838_v49  ;;  %6142 = vmatprep.mubr.msk.f32.mxu0 %vm8969_vm0, %v3546_v51  ;;  %v4038_v49 = vshrl.u32 %v7509_v32, 4  ;;  %v7539_v51 = vadd.s32 64, %v7483_v13 }
 0x13d   : > { %5919 = vmatmul.mubr.msk.f32.gmra.mrb[22].mxu1 %vm8969_vm0, %v1839_v53  ;;  %6143 = vmatmul.mubr.msk.f32.gmra.mrb[22].mxu0 %vm8969_vm0, %v3547_v55  ;;  %v4017_v53 = vmul.u32 18, %v4016_v38  ;;  %v7670_v35 = vmul.u32.u64.low 3817748708, %v7629_v21  ;;  %v7671_v38 = vmul.u32.u64.high 3817748708, %v7629_v21, %v7670_v35 }
 0x13e   : > { %5921 = vmatprep.mubr.msk.f32.mxu1 %vm8969_vm0, %v1840_v57  ;;  %6145 = vmatprep.mubr.msk.f32.mxu0 %vm8969_vm0, %v3548_v59  ;;  %v7542_v55 = vmul.u32.u64.low 3817748708, %v7522_v39  ;;  %v7543_v57 = vmul.u32.u64.high 3817748708, %v7522_v39, %v7542_v55  ;;  %v7546_v59 = vadd.s32 88, %v7483_v13  ;;  %v7793_v35 = vadd.s32 144, %v7483_v13 }
 0x141   : > { %5922 = vmatmul.mubr.msk.f32.gmra.mrb[24].mxu1 %vm8969_vm0, %v1841_v61  ;;  %6146 = vmatmul.mubr.msk.f32.gmra.mrb[24].mxu0 %vm8969_vm0, %v3549_v63  ;;  %v7550_v61 = vadd.s32 18, %v7518_v37  ;;  %v7552_v63 = vsub.s32 %v3955_v17, %v4028_v40  ;;  %v4093_v17 = vshrl.u32 %v7543_v57, 4  ;;  %v7916_v40 = vadd.s32 200, %v7483_v13 }
 0x142   : > { %5924 = vmatprep.mubr.msk.f32.mxu1 %vm8969_vm0, %v1842_v2  ;;  %6148 = vmatprep.mubr.msk.f32.mxu0 %vm8969_vm0, %v3550_v4  ;;  %v7555_v2 = vadd.s32 80, %v7483_v13  ;;  %v4050_v4 = vmul.u32 18, %v4049_v44 }
 0x143   : > { %vm4387_vm6 = vcmp.ne.s32.totalorder %v7552_v63, 0  ;;  %vm4423_vm8 = vcmp.lt.s32.totalorder %v7552_v63, 0  ;;  %v7626_v19 = vadd.s32 18, %v7552_v63  ;;  %v4094_v29 = vmul.u32 18, %v4093_v17 }
 0x144   : > { %vm7633_vm11 = vmand %vm4423_vm8, %vm4387_vm6 }
 0x145   : > { %5925 = vmatmul.mubr.msk.f32.gmra.mrb[26].mxu1 %vm8969_vm0, %v1843_v47  ;;  %6149 = vmatmul.mubr.msk.f32.gmra.mrb[26].mxu0 %vm8969_vm0, %v3551_v6  ;;  %v7560_v47 = vadd.s32 104, %v7483_v13  ;;  %v4039_v6 = vmul.u32 18, %v4038_v49  ;;  %v9050_v22 = vsel %vm7633_vm11, 4294967295, %v9049_v22  ;;  %v7701_v57 = vsub.s32 %v7522_v39, %v4094_v29 }
 0x146   : > { %5927 = vmatprep.mubr.msk.f32.mxu1 %vm8969_vm0, %v1844_v48  ;;  %6151 = vmatprep.mubr.msk.f32.mxu0 %vm8969_vm0, %v3552_v50  ;;  %v7563_v48 = vmul.u32.u64.low 3817748708, %v7539_v51  ;;  %v7564_v50 = vmul.u32.u64.high 3817748708, %v7539_v51, %v7563_v48 }
 0x147   : > { %v7608_v12 = vsub.s32 %v3956_v25, %v4039_v6  ;;  %v9051_v25 = vmov 0  ;;  %9058 = vst [vmem:[#allocation3_spill] sm:$0xff] %v7701_v57 }
 0x148   : > { %v4082_v26 = vshrl.u32 %v7564_v50, 4  ;;  %v7712_v50 = vadd.s32 128, %v7483_v13 }
 0x149   : > { %5928 = vmatmul.mubr.msk.f32.gmra.mrb[28].mxu1 %vm8969_vm0, %v1845_v52  ;;  %6152 = vmatmul.mubr.msk.f32.gmra.mrb[28].mxu0 %vm8969_vm0, %v3553_v54  ;;  %v7567_v52 = vadd.s32 96, %v7483_v13  ;;  %v7570_v54 = vadd.s32 18, %v7529_v43  ;;  %vm4388_vm15 = vcmp.ne.s32.totalorder %v7608_v12, 0  ;;  %vm4424_vm1 = vcmp.lt.s32.totalorder %v7608_v12, 0 }
 0x14a   : > { %5930 = vmatprep.mubr.msk.f32.mxu1 %vm8969_vm0, %v1846_v56  ;;  %6154 = vmatprep.mubr.msk.f32.mxu0 %vm8969_vm0, %v3554_v58  ;;  %v7572_v56 = vsub.s32 %v3954_v20, %v4017_v53  ;;  %v7658_v28 = vadd.s32 18, %v7608_v12  ;;  %vm7683_vm3 = vmand %vm4424_vm1, %vm4388_vm15  ;;  %v4083_v45 = vmul.u32 18, %v4082_v26  ;;  %v9068_v26 = vmov 0 }
 0x14b   : > { %v7611_v14 = vmul.u32.u64.low 3817748708, %v7567_v52  ;;  %v7612_v15 = vmul.u32.u64.high 3817748708, %v7567_v52, %v7611_v14  ;;  %v7693_v49 = vmul.u32.u64.low 3817748708, %v7652_v27  ;;  %v7694_v53 = vmul.u32.u64.high 3817748708, %v7652_v27, %v7693_v49 }
 0x14c   : > { %vm4386_vm9 = vcmp.ne.s32.totalorder %v7572_v56, 0  ;;  %vm4422_vm10 = vcmp.lt.s32.totalorder %v7572_v56, 0  ;;  %v4159_v14 = vshrl.u32 %v7671_v38, 4  ;;  %v9076_v38 = vmov 0 }
 0x14d   : > { %5931 = vmatmul.mubr.msk.f32.gmra.mrb[30].mxu1 %vm8969_vm0, %v1847_v60  ;;  %6155 = vmatmul.mubr.msk.f32.gmra.mrb[30].mxu0 %vm8969_vm0, %v3555_v62  ;;  %v7575_v58 = vmul.u32.u64.low 3817748708, %v7546_v59  ;;  %v7576_v60 = vmul.u32.u64.high 3817748708, %v7546_v59, %v7575_v58  ;;  %vm7644_vm14 = vmand %vm4422_vm10, %vm4386_vm9  ;;  %vm4393_vm10 = vcmp.ne.s32.totalorder %v7701_v57, 0 }
 0x14e   : > { %5933 = vmatprep.mubr.msk.f32.mxu1 %vm8969_vm0, %v1848_v0  ;;  %6157 = vmatprep.mubr.msk.f32.mxu0 %vm8969_vm0, %v3556_v3  ;;  %v4071_v0 = vshrl.u32 %v7526_v42, 4  ;;  %v9052_v25 = vsel %vm7644_vm14, 4294967295, %v9051_v25 }
 0x14f   : > { %v4115_v30 = vshrl.u32 %v7576_v60, 4 }
 0x150   : > { %v4072_v20 = vmul.u32 18, %v4071_v0  ;;  %v7724_v0 = vsub.s32 %v7539_v51, %v4083_v45  ;;  %v7744_v51 = vadd.s32 18, %v7701_v57 }
 0x151   : > { %5934 = vmatmul.mubr.msk.f32.gmra.mrb[32].mxu1 %vm8969_vm0, %v1849_v5  ;;  %6158 = vmatmul.mubr.msk.f32.gmra.mrb[32].mxu0 %vm8969_vm0, %v3557_v1  ;;  %v7589_v3 = vmul.u32.u64.low 3817748708, %v7555_v2  ;;  %v7590_v5 = vmul.u32.u64.high 3817748708, %v7555_v2, %v7589_v3  ;;  %v9047_v1 = vmov 0 }
 0x152   : > { %5936 = vmatprep.mubr.msk.f32.mxu1 %vm8969_vm0, %v1850_v7  ;;  %6160 = vmatprep.mubr.msk.f32.mxu0 %vm8969_vm0, %v3558_v8  ;;  %v9048_v1 = vsel %vm7596_vm7, 4294967295, %v9047_v1  ;;  %v7600_v7 = vsub.s32 %v3957_v23, %v4050_v4  ;;  %v4060_v8 = vshrl.u32 %v7534_v46, 4  ;;  %v7638_v23 = vadd.s32 18, %v7572_v56  ;;  %9060 = vst [vmem:[#allocation5_spill] sm:$0xff] %v7724_v0  ;;  %9063 = vst [vmem:[#allocation8_spill] sm:$0xff] %v7744_v51 }
 0x153   : > { %v7666_v32 = vsub.s32 %v7513_v34, %v4072_v20  ;;  %v4104_v33 = vshrl.u32 %v7590_v5, 4  ;;  %v9055_v34 = vmov 0  ;;  %v4126_v46 = vshrl.u32 %v7612_v15, 4 }
 0x154   : > { %vm4389_vm12 = vcmp.ne.s32.totalorder %v7600_v7, 0  ;;  %vm4425_vm13 = vcmp.lt.s32.totalorder %v7600_v7, 0  ;;  %v4061_v24 = vmul.u32 18, %v4060_v8  ;;  %v7655_v11 = vadd.s32 18, %v7600_v7 }
 0x155   : > { %5937 = vmatmul.mubr.msk.f32.gmra.mrb[34].mxu1 %vm8969_vm0, %v1851_v9  ;;  %6161 = vmatmul.mubr.msk.f32.gmra.mrb[34].mxu0 %vm8969_vm0, %v3559_v10  ;;  %v7604_v9 = vmul.u32.u64.low 3817748708, %v7560_v47  ;;  %v7605_v10 = vmul.u32.u64.high 3817748708, %v7560_v47, %v7604_v9  ;;  %vm7661_vm2 = vmand %vm4425_vm13, %vm4389_vm12  ;;  %v9056_v34 = vsel %vm7683_vm3, 4294967295, %v9055_v34  ;;  %v4116_v4 = vmul.u32 18, %v4115_v30 }
 0x156   : > { %v9054_v31 = vsel %vm7661_vm2, 4294967295, %v9053_v31  ;;  %v7688_v42 = vsub.s32 %v7516_v36, %v4061_v24  ;;  %v7704_v36 = vadd.s32 136, %v7483_v13  ;;  %vm4391_vm4 = vcmp.ne.s32.totalorder %v7666_v32, 0 }
 0x157   : > { %v4137_v44 = vshrl.u32 %v7605_v10, 4  ;;  %v4105_v48 = vmul.u32 18, %v4104_v33  ;;  %vm4427_vm6 = vcmp.lt.s32.totalorder %v7666_v32, 0  ;;  %v7716_v39 = vadd.s32 18, %v7666_v32 }
 0x158   : > { %9057 = vst [vmem:[#allocation2_spill] sm:$0xff] %v7688_v42  ;;  %vm4390_vm8 = vcmp.ne.s32.totalorder %v7688_v42, 0  ;;  %vm4426_vm9 = vcmp.lt.s32.totalorder %v7688_v42, 0  ;;  %v7721_v60 = vadd.s32 18, %v7688_v42  ;;  %v4127_v3 = vmul.u32 18, %v4126_v46  ;;  %vm7756_vm13 = vmand %vm4427_vm6, %vm4391_vm4 }
 0x159   : > { %v4138_v58 = vmul.u32 18, %v4137_v44  ;;  %v7728_v5 = vsub.s32 %v7546_v59, %v4116_v4  ;;  %v7731_v8 = vmul.u32.u64.low 3817748708, %v7704_v36  ;;  %v7732_v9 = vmul.u32.u64.high 3817748708, %v7704_v36, %v7731_v8  ;;  %vm7770_vm0 = vmand %vm4426_vm9, %vm4390_vm8 }
 0x15a   : > { %9059 = vst [vmem:[#allocation4_spill] sm:$0xff] %v7721_v60  ;;  %v7735_v10 = vsub.s32 %v7555_v2, %v4105_v48  ;;  %v7739_v15 = vmul.u32.u64.low 3817748708, %v7712_v50  ;;  %v7740_v17 = vmul.u32.u64.high 3817748708, %v7712_v50, %v7739_v15  ;;  %vm4429_vm12 = vcmp.lt.s32.totalorder %v7701_v57, 0 }
 0x15b   : > { %9061 = vst [vmem:[#allocation6_spill] sm:$0xff] %v7728_v5  ;;  %v7747_v59 = vsub.s32 %v7560_v47, %v4138_v58  ;;  %v7750_v20 = vadd.s32 152, %v7483_v13  ;;  %v9065_v2 = vmov 0  ;;  %vm4392_vm15 = vcmp.ne.s32.totalorder %v7724_v0, 0  ;;  %vm7786_vm1 = vmand %vm4429_vm12, %vm4393_vm10 }
 0x15c   : > { %9062 = vst [vmem:[#allocation7_spill] sm:$0xff] %v7735_v10  ;;  %v9066_v2 = vsel %vm7756_vm13, 4294967295, %v9065_v2  ;;  %v7763_v24 = vsub.s32 %v7567_v52, %v4127_v3  ;;  %v4148_v47 = vshrl.u32 %v7694_v53, 4  ;;  %v9069_v26 = vsel %vm7770_vm0, 4294967295, %v9068_v26 }
 0x15d   : > { %9064 = vst [vmem:[#allocation9_spill] sm:$0xff] %v7747_v59  ;;  %v7775_v29 = vadd.s32 18, %v7724_v0  ;;  %vm4395_vm4 = vcmp.ne.s32.totalorder %v7728_v5, 0  ;;  %vm4431_vm6 = vcmp.lt.s32.totalorder %v7728_v5, 0  ;;  %v7780_v52 = vadd.s32 18, %v7728_v5 }
 0x15e   : > { %9067 = vst [vmem:[#allocation10_spill] sm:$0xff] %v7763_v24  ;;  %v9072_v30 = vmov 0  ;;  %vm4394_vm8 = vcmp.ne.s32.totalorder %v7735_v10, 0  ;;  %vm4430_vm9 = vcmp.lt.s32.totalorder %v7735_v10, 0  ;;  %v4160_v33 = vmul.u32 18, %v4159_v14  ;;  %vm7809_vm14 = vmand %vm4431_vm6, %vm4395_vm4 }
 0x15f   : > { %9070 = vst [vmem:[#allocation11_spill] sm:$0xff] %v7775_v29  ;;  %9071 = vst [vmem:[#allocation12_spill] sm:$0xff] %v7780_v52  ;;  %v9073_v30 = vsel %vm7786_vm1, 4294967295, %v9072_v30  ;;  %vm9075_vm3 = vcmp.lt.s32.totalorder %v7724_v0, 0  ;;  %vm4397_vm10 = vcmp.ne.s32.totalorder %v7747_v59, 0  ;;  %vm4433_vm12 = vcmp.lt.s32.totalorder %v7747_v59, 0 }
 0x160   : > { %9074 = vst [vmem:[#allocation13_spill] sm:$0xff] %v9073_v30  ;;  %vm7799_vm2 = vmand %vm9075_vm3, %vm4392_vm15  ;;  %v7806_v44 = vmul.u32.u64.low 3817748708, %v7750_v20  ;;  %v7807_v45 = vmul.u32.u64.high 3817748708, %v7750_v20, %v7806_v44  ;;  %v9079_v46 = vmov 0  ;;  %vm4396_vm11 = vcmp.ne.s32.totalorder %v7763_v24, 0 }
 0x161   : > { %v9077_v38 = vsel %vm7799_vm2, 4294967295, %v9076_v38  ;;  %v9080_v46 = vsel %vm7809_vm14, 4294967295, %v9079_v46  ;;  %vm4432_vm7 = vcmp.lt.s32.totalorder %v7763_v24, 0  ;;  %v4149_v49 = vmul.u32 18, %v4148_v47  ;;  %vm7818_vm3 = vmand %vm4430_vm9, %vm4394_vm8 }
 0x162   : > { %9078 = vst [vmem:[#allocation14_spill] sm:$0xff] %v9077_v38  ;;  %9081 = vst [vmem:[#allocation15_spill] sm:$0xff] %v9080_v46  ;;  %v7816_v53 = vadd.s32 168, %v7483_v13  ;;  %v9082_v4 = vmov 0  ;;  %v7823_v48 = vadd.s32 18, %v7735_v10  ;;  %v7826_v58 = vadd.s32 18, %v7747_v59 }
 0x163   : > { %v9083_v4 = vsel %vm7818_vm3, 4294967295, %v9082_v4  ;;  %v7829_v3 = vadd.s32 18, %v7763_v24  ;;  %v4181_v8 = vshrl.u32 %v7732_v9, 4  ;;  %vm7832_vm15 = vmand %vm4433_vm12, %vm4397_vm10  ;;  %v9088_v14 = vmov 0 }
 0x164   : > { %9084 = vst [vmem:[#allocation16_spill] sm:$0xff] %v9083_v4  ;;  %9085 = vst [vmem:[#allocation17_spill] sm:$0xff] %v7823_v48  ;;  %v9089_v14 = vsel %vm7832_vm15, 4294967295, %v9088_v14  ;;  %v7837_v15 = vsub.s32 %v7629_v21, %v4160_v33  ;;  %v4170_v47 = vshrl.u32 %v7740_v17, 4  ;;  %v9092_v17 = vmov 0 }
 0x165   : > { %9086 = vst [vmem:[#allocation18_spill] sm:$0xff] %v7826_v58  ;;  %9087 = vst [vmem:[#allocation19_spill] sm:$0xff] %v7829_v3  ;;  %v7841_v44 = vmul.u32.u64.low 3817748708, %v7793_v35  ;;  %v7842_v6 = vmul.u32.u64.high 3817748708, %v7793_v35, %v7841_v44  ;;  %v7865_v33 = vadd.s32 160, %v7483_v13  ;;  %v7872_v9 = vsub.s32 %v7652_v27, %v4149_v49 }
 0x166   : > { %9090 = vst [vmem:[#allocation20_spill] sm:$0xff] %v9089_v14  ;;  %9091 = vst [vmem:[#allocation21_spill] sm:$0xff] %v7837_v15  ;;  %v7875_v21 = vmul.u32.u64.low 3817748708, %v7816_v53  ;;  %v7876_v55 = vmul.u32.u64.high 3817748708, %v7816_v53, %v7875_v21  ;;  %v4182_v44 = vmul.u32 18, %v4181_v8  ;;  %v7889_v27 = vadd.s32 184, %v7483_v13 }
 0x167   : > { %vm7860_vm4 = vmand %vm4432_vm7, %vm4396_vm11  ;;  %9095 = vst [vmem:[#allocation23_spill] sm:$0xff] %v7872_v9  ;;  %vm4399_vm7 = vcmp.ne.s32.totalorder %v7837_v15, 0  ;;  %v4171_v16 = vmul.u32 18, %v4170_v47  ;;  %v4203_v8 = vshrl.u32 %v7807_v45, 4  ;;  %v7908_v48 = vadd.s32 176, %v7483_v13 }
 0x168   : > { %v9093_v17 = vsel %vm7860_vm4, 4294967295, %v9092_v17  ;;  %v7904_v18 = vmul.u32.u64.low 3817748708, %v7865_v33  ;;  %v7905_v10 = vmul.u32.u64.high 3817748708, %v7865_v33, %v7904_v18  ;;  %vm4435_vm11 = vcmp.lt.s32.totalorder %v7837_v15, 0 }
 0x169   : > { %9094 = vst [vmem:[#allocation22_spill] sm:$0xff] %v9093_v17  ;;  %v7912_v21 = vadd.s32 18, %v7837_v15  ;;  %vm4398_vm6 = vcmp.ne.s32.totalorder %v7872_v9, 0  ;;  %v7921_v45 = vsub.s32 %v7704_v36, %v4182_v44  ;;  %v7928_v3 = vadd.s32 192, %v7483_v13  ;;  %vm7961_vm9 = vmand %vm4435_vm11, %vm4399_vm7 }
 0x16a   : > { %v7924_v18 = vmul.u32.u64.low 3817748708, %v7889_v27  ;;  %v7925_v24 = vmul.u32.u64.high 3817748708, %v7889_v27, %v7924_v18  ;;  %vm4434_vm8 = vcmp.lt.s32.totalorder %v7872_v9, 0  ;;  %v7934_v59 = vsub.s32 %v7712_v50, %v4171_v16 }
 0x16b   : > { %9096 = vst [vmem:[#allocation24_spill] sm:$0xff] %v7912_v21  ;;  %9097 = vst [vmem:[#allocation25_spill] sm:$0xff] %v7921_v45  ;;  %v4192_v58 = vshrl.u32 %v7842_v6, 4  ;;  %v7938_v14 = vadd.s32 216, %v7483_v13  ;;  %v4204_v36 = vmul.u32 18, %v4203_v8  ;;  %v7945_v18 = vadd.s32 208, %v7483_v13 }
 0x16c   : > { %v7941_v44 = vmul.u32.u64.low 3817748708, %v7908_v48  ;;  %v7942_v4 = vmul.u32.u64.high 3817748708, %v7908_v48, %v7941_v44  ;;  %v4225_v5 = vshrl.u32 %v7876_v55, 4  ;;  %v7953_v16 = vadd.s32 232, %v7483_v13  ;;  %vm8005_vm7 = vmand %vm4434_vm8, %vm4398_vm6 }
 0x16d   : > { %v7949_v52 = vmul.u32.u64.low 3817748708, %v7916_v40  ;;  %v7950_v46 = vmul.u32.u64.high 3817748708, %v7916_v40, %v7949_v52  ;;  %v9100_v50 = vmov 0  ;;  %vm4401_vm10 = vcmp.ne.s32.totalorder %v7921_v45, 0 }
 0x16e   : > { %v9101_v50 = vsel %vm7961_vm9, 4294967295, %v9100_v50  ;;  %v7968_v55 = vmul.u32.u64.low 3817748708, %v7928_v3  ;;  %v7969_v52 = vmul.u32.u64.high 3817748708, %v7928_v3, %v7968_v55  ;;  %v4193_v44 = vmul.u32 18, %v4192_v58 }
 0x16f   : > { %9102 = vst [vmem:[#allocation28_spill] sm:$0xff] %v9101_v50  ;;  %v7974_v0 = vmul.u32.u64.low 3817748708, %v7938_v14  ;;  %v7975_v29 = vmul.u32.u64.high 3817748708, %v7938_v14, %v7974_v0  ;;  %v7978_v38 = vadd.s32 224, %v7483_v13  ;;  %v4214_v57 = vshrl.u32 %v7905_v10, 4 }
 0x170   : > { %v7985_v51 = vmul.u32.u64.low 3817748708, %v7945_v18  ;;  %v7986_v30 = vmul.u32.u64.high 3817748708, %v7945_v18, %v7985_v51  ;;  %v7993_v55 = vadd.s32 18, %v7872_v9  ;;  %v9107_v10 = vmov 0 }
 0x171   : > { %v9108_v10 = vsel %vm8005_vm7, 4294967295, %v9107_v10  ;;  %v8010_v51 = vadd.s32 18, %v7921_v45  ;;  %vm4400_vm11 = vcmp.ne.s32.totalorder %v7934_v59, 0  ;;  %vm4436_vm12 = vcmp.lt.s32.totalorder %v7934_v59, 0 }
 0x172   : > { %9105 = vst [vmem:[#allocation31_spill] sm:$0xff] %v7993_v55  ;;  %9109 = vst [vmem:[#allocation33_spill] sm:$0xff] %v9108_v10  ;;  %vm9112_vm9 = vcmp.lt.s32.totalorder %v7921_v45, 0  ;;  %v9113_v58 = vmov 0  ;;  %v8026_v15 = vsub.s32 %v7793_v35, %v4193_v44  ;;  %v4226_v21 = vmul.u32 18, %v4225_v5 }
 0x173   : > { %9110 = vst [vmem:[#allocation34_spill] sm:$0xff] %v8010_v51  ;;  %vm8021_vm4 = vmand %vm9112_vm9, %vm4401_vm10  ;;  %v8040_v35 = vadd.s32 18, %v7934_v59  ;;  %v4269_v5 = vshrl.u32 %v7950_v46, 4  ;;  %v8044_v44 = vadd.s32 248, %v7483_v13  ;;  %v4258_v9 = vshrl.u32 %v7969_v52, 4 }
 0x174   : > { %v9114_v58 = vsel %vm8021_vm4, 4294967295, %v9113_v58  ;;  %9116 = vst [vmem:[#allocation37_spill] sm:$0xff] %v8026_v15  ;;  %vm8056_vm9 = vmand %vm4436_vm12, %vm4400_vm11  ;;  %vm4402_vm12 = vcmp.ne.s32.totalorder %v8026_v15, 0  ;;  %vm4438_vm11 = vcmp.lt.s32.totalorder %v8026_v15, 0  ;;  %v8077_v45 = vsub.s32 %v7816_v53, %v4226_v21 }
 0x175   : > { %9115 = vst [vmem:[#allocation36_spill] sm:$0xff] %v9114_v58  ;;  %v8081_v52 = vadd.s32 18, %v8026_v15  ;;  %v4280_v10 = vshrl.u32 %v7986_v30, 4  ;;  %v8089_v42 = vmul.u32.u64.low 3817748708, %v8044_v44  ;;  %v8090_v60 = vmul.u32.u64.high 3817748708, %v8044_v44, %v8089_v42 }
 0x176   : > { %v9126_v30 = vmov 0  ;;  %v4259_v21 = vmul.u32 18, %v4258_v9 }
 0x177   : > { %9125 = vst [vmem:[#allocation42_spill] sm:$0xff] %v8081_v52 }
 0x1c0   : > { %v7878_v41 = vpop.f32.mrb[0].mxu1 }
 0x1c1   : > { %v7891_v49 = vpop.f32.mrb[1].mxu1 }
 0x1c4   : > { %v7918_v47 = vpop.f32.mrb[2].mxu1 }
 0x1c5   : > { %v7930_v17 = vpop.f32.mrb[3].mxu1 }
 0x1c6   : > { %9098 = vst [vmem:[#allocation26_spill] sm:$0xff] %v7930_v17 }
 0x1c8   : > { %v7955_v6 = vpop.f32.mrb[4].mxu1 }
 0x1c9   : > { %9099 = vst [vmem:[#allocation27_spill] sm:$0xff] %v7955_v6  ;;  %v7971_v8 = vpop.f32.mrb[5].mxu1  ;;  %v7981_v6 = vsub.s32 %v7750_v20, %v4204_v36  ;;  %v4247_v36 = vshrl.u32 %v7925_v24, 4  ;;  %v4215_v24 = vmul.u32 18, %v4214_v57  ;;  %v9122_v57 = vmov 0 }
 0x1ca   : > { %9103 = vst [vmem:[#allocation29_spill] sm:$0xff] %v7971_v8  ;;  %v7996_v0 = vmul.u32.u64.low 3817748708, %v7953_v16  ;;  %v7997_v8 = vmul.u32.u64.high 3817748708, %v7953_v16, %v7996_v0 }
 0x1cb   : > { %9104 = vst [vmem:[#allocation30_spill] sm:$0xff] %v7981_v6  ;;  %vm4403_vm6 = vcmp.ne.s32.totalorder %v7981_v6, 0  ;;  %vm4439_vm8 = vcmp.lt.s32.totalorder %v7981_v6, 0  ;;  %v8061_v46 = vadd.s32 18, %v7981_v6  ;;  %v4248_v17 = vmul.u32 18, %v4247_v36  ;;  %v9234_v6 = vld [vmem:[#allocation11_spill] sm:$0xff] }
 0x1cc   : > { %v7999_v20 = vpop.f32.mrb[6].mxu1  ;;  %vm8070_vm10 = vmand %vm4439_vm8, %vm4403_vm6  ;;  %v4291_v36 = vshrl.u32 %v7975_v29, 4  ;;  %v8084_v51 = vsub.s32 %v7865_v33, %v4215_v24  ;;  %v8120_v33 = vadd.s32 18, %v8077_v45  ;;  %vm9149_vm8 = vnez %v9048_v1 }
 0x1cd   : > { %9106 = vst [vmem:[#allocation32_spill] sm:$0xff] %v7999_v20  ;;  %v8015_v0 = vpop.f32.mrb[7].mxu1  ;;  %v8029_v50 = vmul.u32.u64.low 3817748708, %v7978_v38  ;;  %v8030_v20 = vmul.u32.u64.high 3817748708, %v7978_v38, %v8029_v50  ;;  %9120 = vst [vmem:[#allocation39_spill] sm:$0xff] %v8061_v46  ;;  %v9123_v57 = vsel %vm8070_vm10, 4294967295, %v9122_v57  ;;  %v8109_v42 = vsub.s32 %v7889_v27, %v4248_v17 }
 0x1ce   : > { %9111 = vst [vmem:[#allocation35_spill] sm:$0xff] %v8015_v0  ;;  %v4236_v0 = vshrl.u32 %v7942_v4, 4  ;;  %v9118_v4 = vmov 0  ;;  %9124 = vst [vmem:[#allocation41_spill] sm:$0xff] %v9123_v57  ;;  %v4281_v17 = vmul.u32 18, %v4280_v10  ;;  %vm9134_vm4 = vcmp.ne.s32.totalorder %v8084_v51, 0 }
 0x1cf   : > { %v9119_v4 = vsel %vm8056_vm9, 4294967295, %v9118_v4  ;;  %vm8104_vm6 = vmand %vm4438_vm11, %vm4402_vm12  ;;  %9129 = vst [vmem:[#allocation44_spill] sm:$0xff] %v8109_v42  ;;  %v4302_v24 = vshrl.u32 %v8030_v20, 4  ;;  %vm4440_vm11 = vcmp.lt.s32.totalorder %v8084_v51, 0  ;;  %vm9130_vm12 = vcmp.ne.s32.totalorder %v8077_v45, 0 }
 0x1d0   : > { %v8046_v50 = vpop.f32.mrb[8].mxu1  ;;  %v4237_v58 = vmul.u32 18, %v4236_v0  ;;  %v9127_v30 = vsel %vm8104_vm6, 4294967295, %v9126_v30  ;;  %v4292_v0 = vmul.u32 18, %v4291_v36  ;;  %vm9131_vm6 = vcmp.lt.s32.totalorder %v8077_v45, 0  ;;  %vm8168_vm7 = vmand %vm4440_vm11, %vm9134_vm4 }
 0x1d1   : > { %9117 = vst [vmem:[#allocation38_spill] sm:$0xff] %v8046_v50  ;;  %v8064_v55 = vpop.f32.mrb[9].mxu1  ;;  %v4313_v50 = vshrl.u32 %v7997_v8, 4  ;;  %9128 = vst [vmem:[#allocation43_spill] sm:$0xff] %v9127_v30  ;;  %v4303_v9 = vmul.u32 18, %v4302_v24  ;;  %v4335_v24 = vshrl.u32 %v8090_v60, 4 }
 0x1d2   : > { %9121 = vst [vmem:[#allocation40_spill] sm:$0xff] %v8064_v55  ;;  %v4270_v55 = vmul.u32 18, %v4269_v5  ;;  %v8116_v5 = vadd.s32 240, %v7483_v13  ;;  %v8123_v29 = vsub.s32 %v7908_v48, %v4237_v58  ;;  %v8139_v48 = vsub.s32 %v7928_v3, %v4259_v21  ;;  %vm8154_vm10 = vmand %vm9131_vm6, %vm9130_vm12 }
 0x1d3   : > { %v4314_v20 = vmul.u32 18, %v4313_v50  ;;  %v8144_v10 = vsub.s32 %v7938_v14, %v4292_v0  ;;  %v8161_v3 = vsub.s32 %v7945_v18, %v4281_v17  ;;  %v8164_v14 = vadd.s32 264, %v7483_v13 }
 0x1d4   : > { %v8092_v53 = vpop.f32.mrb[10].mxu1  ;;  %v8131_v27 = vsub.s32 %v7916_v40, %v4270_v55  ;;  %v8147_v40 = vmul.u32.u64.low 3817748708, %v8116_v5  ;;  %v8148_v55 = vmul.u32.u64.high 3817748708, %v8116_v5, %v8147_v40  ;;  %v9139_v17 = vsel %vm7582_vm5, %v7550_v61, %v7518_v37 }
 0x1d5   : > { %v8111_v8 = vpop.f32.mrb[11].mxu1  ;;  %v8175_v0 = vsub.s32 %v7953_v16, %v4314_v20  ;;  %vm8185_vm4 = vcmp.lt.s32.totalorder %v9139_v17, 16  ;;  %v8190_v15 = vadd.s32 18, %v8084_v51  ;;  %vm9142_vm11 = vcmp.ne.s32.totalorder %v8109_v42, 0  ;;  %v9210_v16 = vld [vmem:[#allocation4_spill] sm:$0xff] }
 0x1d6   : > { %vm9143_vm12 = vcmp.lt.s32.totalorder %v8109_v42, 0  ;;  %v9144_v60 = vmov 0  ;;  %v8201_v62 = vadd.s32 18, %v8109_v42  ;;  %vm4444_vm9 = vcmp.lt.s32.totalorder %v8139_v48, 0 }
 0x1d7   : > { %9137 = vst [vmem:[#allocation45_spill] sm:$0xff] %v8175_v0  ;;  %vm8196_vm6 = vmand %vm9143_vm12, %vm9142_vm11  ;;  %v9150_v61 = vsel %vm9149_vm8, %v7570_v54, %v7529_v43  ;;  %vm9153_vm12 = vcmp.ne.s32.totalorder %v8123_v29, 0  ;;  %vm9154_vm11 = vcmp.lt.s32.totalorder %v8123_v29, 0  ;;  %v9155_v20 = vmov 0 }
 0x1d8   : > { %v8133_v36 = vpop.f32.mrb[12].mxu1  ;;  %v9145_v60 = vsel %vm8196_vm6, 4294967295, %v9144_v60  ;;  %9147 = vst [vmem:[#allocation48_spill] sm:$0xff] %v8201_v62  ;;  %vm8212_vm15 = vcmp.lt.s32.totalorder %v9150_v61, 16  ;;  %vm8220_vm3 = vmand %vm9154_vm11, %vm9153_vm12  ;;  %v8225_v17 = vadd.s32 18, %v8123_v29  ;;  %v8230_v43 = vsub.s32 %v7978_v38, %v4303_v9 }
 0x1d9   : > { %v8141_v58 = vpop.f32.mrb[13].mxu1  ;;  %9146 = vst [vmem:[#allocation47_spill] sm:$0xff] %v9145_v60  ;;  %v9156_v20 = vsel %vm8220_vm3, 4294967295, %v9155_v20  ;;  %vm9159_vm8 = vcmp.ne.s32.totalorder %v8131_v27, 0  ;;  %vm9160_vm2 = vcmp.lt.s32.totalorder %v8131_v27, 0  ;;  %v9161_v54 = vmov 0 }
 0x1da   : > { %9157 = vst [vmem:[#allocation50_spill] sm:$0xff] %v9156_v20  ;;  %9158 = vst [vmem:[#allocation51_spill] sm:$0xff] %v8230_v43  ;;  %v8243_v1 = vmul.u32.u64.low 3817748708, %v8164_v14  ;;  %v8244_v61 = vmul.u32.u64.high 3817748708, %v8164_v14, %v8243_v1  ;;  %vm9163_vm14 = vcmp.ne.s32.totalorder %v8139_v48, 0  ;;  %v9164_v38 = vmov 0 }
 0x1db   : > { %vm8236_vm1 = vmand %vm9160_vm2, %vm9159_vm8  ;;  %v4336_v9 = vmul.u32 18, %v4335_v24  ;;  %vm9167_vm11 = vnez %v9050_v22  ;;  %v9169_v30 = vmov 0  ;;  %v9173_v24 = vmov 0 }
 0x1dc   : > { %v8178_v18 = vpop.f32.mrb[14].mxu1  ;;  %v9162_v54 = vsel %vm8236_vm1, 4294967295, %v9161_v54  ;;  %vm8251_vm5 = vmand %vm4444_vm9, %vm9163_vm14  ;;  %v9168_v1 = vsel %vm9167_vm11, %v7626_v19, %v7552_v63  ;;  %vm9171_vm14 = vcmp.ne.s32.totalorder %v8144_v10, 0  ;;  %vm9172_vm9 = vcmp.lt.s32.totalorder %v8144_v10, 0 }
 0x1dd   : > { %9138 = vst [vmem:[#allocation46_spill] sm:$0xff] %v8178_v18  ;;  %v8205_v37 = vpop.f32.mrb[15].mxu1  ;;  %v9165_v38 = vsel %vm8251_vm5, 4294967295, %v9164_v38  ;;  %vm8264_vm12 = vcmp.lt.s32.totalorder %v9168_v1, 16  ;;  %v8269_v18 = vadd.s32 18, %v8139_v48  ;;  %vm8275_vm8 = vmand %vm9172_vm9, %vm9171_vm14  ;;  %v8280_v22 = vadd.s32 18, %v8144_v10 }
 0x1de   : > { %9148 = vst [vmem:[#allocation49_spill] sm:$0xff] %v8205_v37  ;;  %v8247_v37 = vadd.s32 18, %v8131_v27  ;;  %v9170_v30 = vsel %vm8264_vm12, 4294967295, %v9169_v30  ;;  %v9174_v24 = vsel %vm8275_vm8, 4294967295, %v9173_v24  ;;  %v8283_v63 = vadd.s32 18, %v8161_v3 }
 0x1df   : > { %v8286_v19 = vadd.s32 256, %v7483_v13  ;;  %vm9176_vm11 = vnez %v9052_v25  ;;  %vm9180_vm9 = vcmp.ne.s32.totalorder %v8161_v3, 0  ;;  %vm9181_vm2 = vcmp.lt.s32.totalorder %v8161_v3, 0 }
 0x1e0   : > { %v8257_v52 = vpop.f32.mrb[16].mxu1  ;;  %vm8303_vm12 = vmand %vm9181_vm2, %vm9180_vm9  ;;  %v9182_v46 = vmov 0  ;;  %v8308_v57 = vadd.s32 18, %v8175_v0  ;;  %vm4412_vm0 = vcmp.ne.s32.totalorder %v8230_v43, 0  ;;  %vm4448_vm13 = vcmp.lt.s32.totalorder %v8230_v43, 0 }
 0x1e1   : > { %9166 = vst [vmem:[#allocation52_spill] sm:$0xff] %v8257_v52  ;;  %v8288_v1 = vpop.f32.mrb[17].mxu1  ;;  %v9177_v52 = vsel %vm9176_vm11, %v7638_v23, %v7572_v56  ;;  %v9183_v46 = vsel %vm8303_vm12, 4294967295, %v9182_v46  ;;  %v4324_v56 = vshrl.u32 %v8148_v55, 4  ;;  %vm9185_vm2 = vcmp.ne.s32.totalorder %v8175_v0, 0  ;;  %vm8371_vm1 = vmand %vm4448_vm13, %vm4412_vm0 }
 0x1e2   : > { %9175 = vst [vmem:[#allocation53_spill] sm:$0xff] %v8288_v1  ;;  %vm8295_vm14 = vcmp.lt.s32.totalorder %v9177_v52, 16  ;;  %9184 = vst [vmem:[#allocation54_spill] sm:$0xff] %v8308_v57  ;;  %vm9186_vm11 = vcmp.lt.s32.totalorder %v8175_v0, 0  ;;  %v9187_v55 = vmov 0  ;;  %v8334_v23 = vadd.s32 280, %v7483_v13 }
 0x1e3   : > { %vm8329_vm9 = vmand %vm9186_vm11, %vm9185_vm2  ;;  %v8345_v42 = vadd.s32 18, %v8230_v43  ;;  %v8348_v62 = vsub.s32 %v8044_v44, %v4336_v9  ;;  %vm9191_vm2 = vnez %v9054_v31  ;;  %vm9203_vm13 = vcmask 64512   ;;  %v9232_v0 = vld [vmem:[#allocation14_spill] sm:$0xff]  ;;  %v9253_v52 = vld [vmem:[#allocation17_spill] sm:$0xff] }
 0x1e4   : > { %v9188_v55 = vsel %vm8329_vm9, 4294967295, %v9187_v55  ;;  %v6111_v60 = vpop.f32.mrb[0].mxu0  ;;  %v9192_v1 = vsel %vm9191_vm2, %v7655_v11, %v7600_v7  ;;  %v9195_v7 = vmov 0  ;;  %vm9198_vm2 = vnez %v9056_v34  ;;  %v9271_v43 = vld [vmem:[#allocation19_spill] sm:$0xff] }
 0x1e5   : > { %9189 = vst [vmem:[#allocation55_spill] sm:$0xff] %v8345_v42  ;;  %9190 = vst [vmem:[#allocation56_spill] sm:$0xff] %v8348_v62  ;;  %vm8355_vm11 = vcmp.lt.s32.totalorder %v9192_v1, 16  ;;  %v9196_v7 = vsel %vm8371_vm1, 4294967295, %v9195_v7  ;;  %v8376_v11 = vmul.u32.u64.low 3817748708, %v8286_v19  ;;  %v8377_v31 = vmul.u32.u64.high 3817748708, %v8286_v19, %v8376_v11 }
 0x1e6   : > { %9197 = vst [vmem:[#allocation57_spill] sm:$0xff] %v9196_v7  ;;  %v6165_v9 = vadd.f32 %v6111_v60, %v7878_v41  ;;  %v3736_v1 = vpop.f32.mrb[1].mxu0  ;;  %v9199_v44 = vsel %vm9198_vm2, %v7658_v28, %v7608_v12  ;;  %v4325_v60 = vmul.u32 18, %v4324_v56  ;;  %v4357_v11 = vshrl.u32 %v8244_v61, 4  ;;  %vm9208_vm1 = vmmov %vm9203_vm13  ;;  %v9217_v42 = vld [vmem:[#allocation26_spill] sm:$0xff] }
 0x1e7   : > { %vm8385_vm8 = vcmp.lt.s32.totalorder %v9199_v44, 16  ;;  %v6166_v34 = vadd.f32 %v3736_v1, %v7891_v49  ;;  %v8400_v12 = vmul.u32.u64.low 3817748708, %v8334_v23  ;;  %v8401_v28 = vmul.u32.u64.high 3817748708, %v8334_v23, %v8400_v12 }
 0x1e8   : > { %v4673_v44 = vsel %vm8185_vm4, %v6165_v9, 0.0  ;;  %v8412_v56 = vadd.s32 272, %v7483_v13  ;;  %v6114_v12 = vpop.f32.mrb[2].mxu0  ;;  %vm9204_vm2 = vnez %v9066_v2  ;;  %vm4451_vm0 = vcmp.lt.s32.totalorder %v8348_v62, 0 }
 0x1e9   : > { %v4709_v49 = vsel %vm9203_vm13, %v4673_v44, 0.0  ;;  %v4786_v61 = vmul.f32 %v4673_v44, %v4673_v44  ;;  %v4672_v1 = vsel %vm8212_vm15, %v6166_v34, 0.0  ;;  %v9205_v40 = vsel %vm9204_vm2, %v7716_v39, %v7666_v32  ;;  %v3746_v41 = vpop.f32.mrb[3].mxu0  ;;  %v9211_v34 = vld [vmem:[#allocation2_spill] sm:$0xff]  ;;  %vm9216_vm2 = vmmov %vm9208_vm1 }
 0x1ea   : > { %9202 = vst [vmem:[#allocation58_spill] sm:$0xff] %v8412_v56  ;;  %vm8422_vm4 = vcmp.lt.s32.totalorder %v9205_v40, 16  ;;  %v4708_v13 = vsel %vm9208_vm1, %v4672_v1, 0.0  ;;  %v4785_v25 = vmul.f32 %v4672_v1, %v4672_v1  ;;  %v6167_v44 = vadd.f32 %v6114_v12, %v7918_v47 }
 0x1eb   : > { %vm9209_vm15 = vnez %v9069_v26  ;;  %v8439_v32 = vadd.s32 18, %v8348_v62  ;;  %v4822_v39 = vsel %vm9216_vm2, %v4786_v61, 0.0  ;;  %v4710_v40 = vadd.f32 %v4709_v49, %v4708_v13  ;;  %v9226_v49 = vld [vmem:[#allocation3_spill] sm:$0xff] }
 0x1ec   : > { %v9212_v2 = vsel %vm9209_vm15, %v9210_v16, %v9211_v34  ;;  %v6168_v1 = vadd.f32 %v3746_v41, %v9217_v42  ;;  %v8444_v47 = vsub.s32 %v8116_v5, %v4325_v60  ;;  %v4821_v26 = vsel %vm9208_vm1, %v4785_v25, 0.0  ;;  %v6117_v25 = vpop.f32.mrb[4].mxu0  ;;  %v9223_v60 = vld [vmem:[#allocation13_spill] sm:$0xff] }
 0x1ed   : > { %vm8434_vm13 = vcmp.lt.s32.totalorder %v9212_v2, 16  ;;  %9215 = vst [vmem:[#allocation4_spill] sm:$0xff] %v8439_v32  ;;  %vm9218_vm9 = vnez %v9170_v30  ;;  %vm9219_vm15 = vcmp.ne.s32.totalorder %v8348_v62, 0  ;;  %v9220_v16 = vmov 0  ;;  %v9225_v30 = vld [vmem:[#allocation8_spill] sm:$0xff] }
 0x1ee   : > { %v4675_v12 = vsel %vm9218_vm9, %v6167_v44, 0.0  ;;  %vm8451_vm12 = vmand %vm4451_vm0, %vm9219_vm15  ;;  %v8456_v34 = vmul.u32.u64.low 3817748708, %v8412_v56  ;;  %v8457_v61 = vmul.u32.u64.high 3817748708, %v8412_v56, %v8456_v34  ;;  %v4823_v42 = vadd.f32 %v4822_v39, %v4821_v26  ;;  %v3756_v26 = vpop.f32.mrb[5].mxu0  ;;  %v9251_v62 = vld [vmem:[#allocation16_spill] sm:$0xff] }
 0x1ef   : > { %v9221_v16 = vsel %vm8451_vm12, 4294967295, %v9220_v16  ;;  %v4788_v41 = vmul.f32 %v4675_v12, %v4675_v12  ;;  %v4674_v5 = vsel %vm8295_vm14, %v6168_v1, 0.0  ;;  %vm9224_vm2 = vnez %v9223_v60  ;;  %vm9230_vm0 = vmmov %vm9208_vm1  ;;  %v9231_v34 = vld [vmem:[#allocation27_spill] sm:$0xff]  ;;  %v9235_v1 = vld [vmem:[#allocation5_spill] sm:$0xff] }
 0x1f0   : > { %9222 = vst [vmem:[#allocation2_spill] sm:$0xff] %v9221_v16  ;;  %v9227_v13 = vsel %vm9224_vm2, %v9225_v30, %v9226_v49  ;;  %v4358_v2 = vmul.u32 18, %v4357_v11  ;;  %v4711_v56 = vsel %vm9230_vm0, %v4674_v5, 0.0  ;;  %v4787_v7 = vmul.f32 %v4674_v5, %v4674_v5  ;;  %vm9240_vm2 = vmmov %vm9230_vm0  ;;  %v9284_v44 = vld [vmem:[#allocation24_spill] sm:$0xff]  ;;  %v9292_v60 = vld [vmem:[#allocation31_spill] sm:$0xff] }
 0x1f1   : > { %vm8467_vm9 = vcmp.lt.s32.totalorder %v9227_v13, 16  ;;  %v6169_v39 = vadd.f32 %v6117_v25, %v9231_v34  ;;  %vm9233_vm1 = vnez %v9232_v0  ;;  %v4346_v30 = vshrl.u32 %v8377_v31, 4  ;;  %v9239_v13 = vld [vmem:[#allocation29_spill] sm:$0xff]  ;;  %vm9241_vm5 = vmmov %vm9230_vm0 }
 0x1f2   : > { %v9236_v57 = vsel %vm9233_vm1, %v9234_v6, %v9235_v1  ;;  %v4712_v49 = vadd.f32 %v4711_v56, %v4710_v40  ;;  %v6170_v11 = vadd.f32 %v3756_v26, %v9239_v13  ;;  %vm4414_vm15 = vcmp.ne.s32.totalorder %v8444_v47, 0  ;;  %v6120_v26 = vpop.f32.mrb[6].mxu0  ;;  %v9242_v6 = vld [vmem:[#allocation15_spill] sm:$0xff]  ;;  %v9244_v1 = vld [vmem:[#allocation12_spill] sm:$0xff]  ;;  %v9245_v13 = vld [vmem:[#allocation6_spill] sm:$0xff] }
 0x1f3   : > { %vm8478_vm14 = vcmp.lt.s32.totalorder %v9236_v57, 16  ;;  %v4713_v0 = vsel %vm9240_vm2, %v4675_v12, 0.0  ;;  %v4824_v25 = vsel %vm9230_vm0, %v4787_v7, 0.0  ;;  %v4677_v57 = vsel %vm8355_vm11, %v6169_v39, 0.0  ;;  %vm9249_vm11 = vmmov %vm9230_vm0 }
 0x1f4   : > { %vm4450_vm1 = vcmp.lt.s32.totalorder %v8444_v47, 0  ;;  %v4826_v31 = vsel %vm9241_vm5, %v4788_v41, 0.0  ;;  %v4825_v56 = vadd.f32 %v4824_v25, %v4823_v42  ;;  %v4790_v40 = vmul.f32 %v4677_v57, %v4677_v57  ;;  %v9250_v41 = vld [vmem:[#allocation32_spill] sm:$0xff]  ;;  %v3766_v25 = vpop.f32.mrb[7].mxu0 }
 0x1f5   : > { %v4676_v34 = vsel %vm8385_vm8, %v6170_v11, 0.0  ;;  %vm9243_vm12 = vnez %v9242_v6  ;;  %v4714_v20 = vadd.f32 %v4713_v0, %v4712_v49  ;;  %v6171_v42 = vadd.f32 %v6120_v26, %v9250_v41  ;;  %v9254_v11 = vld [vmem:[#allocation7_spill] sm:$0xff] }
 0x1f6   : > { %v9246_v12 = vsel %vm9243_vm12, %v9244_v1, %v9245_v13  ;;  %v4715_v39 = vsel %vm9249_vm11, %v4676_v34, 0.0  ;;  %v4789_v5 = vmul.f32 %v4676_v34, %v4676_v34  ;;  %vm9252_vm5 = vnez %v9251_v62  ;;  %v9258_v13 = vld [vmem:[#allocation35_spill] sm:$0xff]  ;;  %vm9259_vm12 = vmmov %vm9230_vm0 }
 0x1f7   : > { %vm8502_vm2 = vcmp.lt.s32.totalorder %v9246_v12, 16  ;;  %v9255_v32 = vsel %vm9252_vm5, %v9253_v52, %v9254_v11  ;;  %v4827_v1 = vadd.f32 %v4826_v31, %v4825_v56  ;;  %v6172_v12 = vadd.f32 %v3766_v25, %v9258_v13  ;;  %vm9260_vm11 = vmmov %vm9230_vm0  ;;  %v6123_v25 = vpop.f32.mrb[8].mxu0  ;;  %v9261_v11 = vld [vmem:[#allocation20_spill] sm:$0xff] }
 0x1f8   : > { %vm8513_vm8 = vcmp.lt.s32.totalorder %v9255_v32, 16  ;;  %v8519_v49 = vadd.s32 18, %v8444_v47  ;;  %v8522_v0 = vsub.s32 %v8164_v14, %v4358_v2  ;;  %v4717_v34 = vsel %vm9259_vm12, %v4677_v57, 0.0  ;;  %v9263_v14 = vld [vmem:[#allocation18_spill] sm:$0xff]  ;;  %v9264_v2 = vld [vmem:[#allocation9_spill] sm:$0xff] }
 0x1f9   : > { %v4716_v26 = vadd.f32 %v4715_v39, %v4714_v20  ;;  %v4828_v62 = vsel %vm9230_vm0, %v4789_v5, 0.0  ;;  %v4679_v32 = vsel %vm8422_vm4, %v6171_v42, 0.0  ;;  %v4830_v41 = vsel %vm9260_vm11, %v4790_v40, 0.0  ;;  %v9268_v40 = vld [vmem:[#allocation38_spill] sm:$0xff]  ;;  %v3776_v42 = vpop.f32.mrb[9].mxu0  ;;  %vm9277_vm11 = vmmov %vm9230_vm0 }
 0x1fa   : > { %v4829_v52 = vadd.f32 %v4828_v62, %v4827_v1  ;;  %v4792_v31 = vmul.f32 %v4679_v32, %v4679_v32  ;;  %v4678_v56 = vsel %vm8434_vm13, %v6172_v12, 0.0  ;;  %vm9262_vm5 = vnez %v9261_v11  ;;  %v9269_v1 = vld [vmem:[#allocation22_spill] sm:$0xff] }
 0x1fb   : > { %v9265_v13 = vsel %vm9262_vm5, %v9263_v14, %v9264_v2  ;;  %v4718_v5 = vadd.f32 %v4717_v34, %v4716_v26  ;;  %v4719_v9 = vsel %vm9230_vm0, %v4678_v56, 0.0  ;;  %v4791_v20 = vmul.f32 %v4678_v56, %v4678_v56  ;;  %v9272_v12 = vld [vmem:[#allocation10_spill] sm:$0xff]  ;;  %v9276_v2 = vld [vmem:[#allocation40_spill] sm:$0xff]  ;;  %vm9278_vm5 = vmmov %vm9230_vm0 }
 0x1fc   : > { %vm8536_vm12 = vcmp.lt.s32.totalorder %v9265_v13, 16  ;;  %v6173_v39 = vadd.f32 %v6123_v25, %v9268_v40  ;;  %vm9270_vm4 = vnez %v9269_v1  ;;  %v4831_v14 = vadd.f32 %v4830_v41, %v4829_v52  ;;  %vm8561_vm0 = vmand %vm4450_vm1, %vm4414_vm15  ;;  %v6126_v52 = vpop.f32.mrb[10].mxu0  ;;  %v9324_v11 = vld [vmem:[#allocation42_spill] sm:$0xff] }
 0x1fd   : > { %v9273_v62 = vsel %vm9270_vm4, %v9271_v43, %v9272_v12  ;;  %v6174_v13 = vadd.f32 %v3776_v42, %v9276_v2  ;;  %v4347_v16 = vmul.u32 18, %v4346_v30  ;;  %v4379_v34 = vshrl.u32 %v8401_v28, 4  ;;  %vm9281_vm4 = vmmov %vm9278_vm5  ;;  %v9293_v2 = vld [vmem:[#allocation23_spill] sm:$0xff] }
 0x1fe   : > { %vm8547_vm13 = vcmp.lt.s32.totalorder %v9273_v62, 16  ;;  %v4721_v26 = vsel %vm9277_vm11, %v4679_v32, 0.0  ;;  %v4720_v56 = vadd.f32 %v4719_v9, %v4718_v5  ;;  %v4832_v25 = vsel %vm9278_vm5, %v4791_v20, 0.0  ;;  %v9282_v5 = vld [vmem:[#allocation28_spill] sm:$0xff]  ;;  %v9285_v9 = vld [vmem:[#allocation21_spill] sm:$0xff]  ;;  %vm9289_vm15 = vmmov %vm9281_vm4  ;;  %v3786_v62 = vpop.f32.mrb[11].mxu0 }
 0x1ff   : > { %v4681_v40 = vsel %vm8467_vm9, %v6173_v39, 0.0  ;;  %v4834_v30 = vsel %vm9281_vm4, %v4792_v31, 0.0  ;;  %v4833_v41 = vadd.f32 %v4832_v25, %v4831_v14  ;;  %v4680_v32 = vsel %vm8478_vm14, %v6174_v13, 0.0  ;;  %v9290_v14 = vld [vmem:[#allocation33_spill] sm:$0xff] }
 0x200   : > { %v4794_v28 = vmul.f32 %v4681_v40, %v4681_v40  ;;  %vm9283_vm11 = vnez %v9282_v5  ;;  %v4722_v42 = vadd.f32 %v4721_v26, %v4720_v56  ;;  %v4723_v43 = vsel %vm9289_vm15, %v4680_v32, 0.0  ;;  %vm9298_vm15 = vmmov %vm9281_vm4 }
 0x201   : > { %v9286_v20 = vsel %vm9283_vm11, %v9284_v44, %v9285_v9  ;;  %v4793_v12 = vmul.f32 %v4680_v32, %v4680_v32  ;;  %v6175_v31 = vadd.f32 %v6126_v52, %v8092_v53  ;;  %vm9291_vm1 = vnez %v9290_v14  ;;  %vm9297_vm11 = vmmov %vm9281_vm4  ;;  %v9301_v14 = vld [vmem:[#allocation34_spill] sm:$0xff] }
 0x202   : > { %vm8573_vm9 = vcmp.lt.s32.totalorder %v9286_v20, 16  ;;  %v9294_v13 = vsel %vm9291_vm1, %v9292_v60, %v9293_v2  ;;  %v4835_v5 = vadd.f32 %v4834_v30, %v4833_v41  ;;  %v6176_v44 = vadd.f32 %v3786_v62, %v8111_v8  ;;  %v6129_v20 = vpop.f32.mrb[12].mxu0  ;;  %v9299_v62 = vld [vmem:[#allocation36_spill] sm:$0xff]  ;;  %v9302_v60 = vld [vmem:[#allocation25_spill] sm:$0xff] }
 0x203   : > { %vm8584_vm14 = vcmp.lt.s32.totalorder %v9294_v13, 16  ;;  %v4558_v26 = vsel %vm8561_vm0, %v8519_v49, %v8444_v47  ;;  %vm4417_vm5 = vcmp.ne.s32.totalorder %v8522_v0, 0  ;;  %v4725_v53 = vsel %vm9281_vm4, %v4681_v40, 0.0 }
 0x204   : > { %v4724_v56 = vadd.f32 %v4723_v43, %v4722_v42  ;;  %v4836_v32 = vsel %vm9297_vm11, %v4793_v12, 0.0  ;;  %v4683_v52 = vsel %vm8502_vm2, %v6175_v31, 0.0  ;;  %v4838_v9 = vsel %vm9298_vm15, %v4794_v28, 0.0  ;;  %v3796_v12 = vpop.f32.mrb[13].mxu0 }
 0x205   : > { %v4837_v30 = vadd.f32 %v4836_v32, %v4835_v5  ;;  %v4796_v41 = vmul.f32 %v4683_v52, %v4683_v52  ;;  %v4682_v8 = vsel %vm8513_vm8, %v6176_v44, 0.0  ;;  %vm9300_vm1 = vnez %v9299_v62 }
 0x206   : > { %v9303_v2 = vsel %vm9300_vm1, %v9301_v14, %v9302_v60  ;;  %v4726_v42 = vadd.f32 %v4725_v53, %v4724_v56  ;;  %v4727_v7 = vsel %vm9297_vm11, %v4682_v8, 0.0  ;;  %v4795_v43 = vmul.f32 %v4682_v8, %v4682_v8  ;;  %vm9310_vm1 = vmmov %vm9297_vm11  ;;  %v9315_v8 = vld [vmem:[#allocation39_spill] sm:$0xff] }
 0x207   : > { %vm8606_vm4 = vcmp.lt.s32.totalorder %v9303_v2, 16  ;;  %v6177_v28 = vadd.f32 %v6129_v20, %v8133_v36  ;;  %vm9306_vm2 = vnez %v9119_v4  ;;  %v4839_v13 = vadd.f32 %v4838_v9, %v4837_v30  ;;  %vm9311_vm11 = vmmov %vm9310_vm1  ;;  %v6132_v9 = vpop.f32.mrb[14].mxu0  ;;  %v9313_v30 = vld [vmem:[#allocation41_spill] sm:$0xff]  ;;  %v9316_v20 = vld [vmem:[#allocation30_spill] sm:$0xff] }
 0x208   : > { %v9307_v6 = vsel %vm9306_vm2, %v8040_v35, %v7934_v59  ;;  %v6178_v5 = vadd.f32 %v3796_v12, %v8141_v58  ;;  %v8624_v44 = vadd.s32 18, %v8522_v0  ;;  %v4729_v36 = vsel %vm9310_vm1, %v4683_v52, 0.0  ;;  %vm9312_vm2 = vmmov %vm9310_vm1 }
 0x209   : > { %vm8617_vm8 = vcmp.lt.s32.totalorder %v9307_v6, 16  ;;  %v4728_v53 = vadd.f32 %v4727_v7, %v4726_v42  ;;  %v4840_v4 = vsel %vm9311_vm11, %v4795_v43, 0.0  ;;  %v4685_v59 = vsel %vm8536_vm12, %v6177_v28, 0.0  ;;  %vm9320_vm11 = vmmov %vm9312_vm2  ;;  %v3806_v42 = vpop.f32.mrb[15].mxu0  ;;  %v9322_v7 = vld [vmem:[#allocation43_spill] sm:$0xff]  ;;  %v9325_v43 = vld [vmem:[#allocation37_spill] sm:$0xff] }
 0x20a   : > { %v4842_v35 = vsel %vm9312_vm2, %v4796_v41, 0.0  ;;  %v4841_v56 = vadd.f32 %v4840_v4, %v4839_v13  ;;  %v4798_v32 = vmul.f32 %v4685_v59, %v4685_v59  ;;  %v4684_v58 = vsel %vm8547_vm13, %v6178_v5, 0.0  ;;  %v9321_v41 = vld [vmem:[#allocation46_spill] sm:$0xff]  ;;  %v9329_v13 = vld [vmem:[#allocation49_spill] sm:$0xff]  ;;  %vm9334_vm0 = vmmov %vm9312_vm2 }
 0x20b   : > { %vm9314_vm15 = vnez %v9313_v30  ;;  %v4730_v14 = vadd.f32 %v4729_v36, %v4728_v53  ;;  %v4731_v57 = vsel %vm9320_vm11, %v4684_v58, 0.0  ;;  %v4797_v60 = vmul.f32 %v4684_v58, %v4684_v58 }
 0x20c   : > { %v9317_v62 = vsel %vm9314_vm15, %v9315_v8, %v9316_v20  ;;  %v6179_v2 = vadd.f32 %v6132_v9, %v9321_v41  ;;  %vm9323_vm12 = vnez %v9322_v7  ;;  %v4843_v6 = vadd.f32 %v4842_v35, %v4841_v56  ;;  %vm9330_vm15 = vmmov %vm9312_vm2  ;;  %v6135_v56 = vpop.f32.mrb[16].mxu0 }
 0x20d   : > { %vm8638_vm1 = vcmp.lt.s32.totalorder %v9317_v62, 16  ;;  %v9326_v28 = vsel %vm9323_vm12, %v9324_v11, %v9325_v43  ;;  %v6180_v5 = vadd.f32 %v3806_v42, %v9329_v13  ;;  %v8655_v36 = vsub.s32 %v8286_v19, %v4347_v16  ;;  %v5914_v13 = vpop.f32.mrb[18].mxu1 }
 0x20e   : > { %vm8649_vm13 = vcmp.lt.s32.totalorder %v9326_v28, 16  ;;  %v8657_v53 = vmul.u32 18, %v4379_v34  ;;  %v4733_v4 = vsel %vm9330_vm15, %v4685_v59, 0.0  ;;  %v4732_v58 = vadd.f32 %v4731_v57, %v4730_v14 }
 0x20f   : > { %v4844_v9 = vsel %vm9312_vm2, %v4797_v60, 0.0  ;;  %v4687_v30 = vsel %vm8573_vm9, %v6179_v2, 0.0  ;;  %vm9331_vm11 = vcmp.lt.s32.totalorder %v8522_v0, 0  ;;  %v4846_v19 = vsel %vm9334_vm0, %v4798_v32, 0.0  ;;  %v9339_v32 = vld [vmem:[#allocation52_spill] sm:$0xff]  ;;  %v3816_v60 = vpop.f32.mrb[17].mxu0 }
 0x210   : > { %vm8667_vm12 = vmand %vm9331_vm11, %vm4417_vm5  ;;  %v4845_v16 = vadd.f32 %v4844_v9, %v4843_v6  ;;  %v4800_v34 = vmul.f32 %v4687_v30, %v4687_v30  ;;  %v4686_v59 = vsel %vm8584_vm14, %v6180_v5, 0.0  ;;  %v9335_v39 = vsel %vm8154_vm10, %v8120_v33, %v8077_v45  ;;  %v9343_v33 = vld [vmem:[#allocation53_spill] sm:$0xff]  ;;  %v6138_v5 = vpop.f32.mrb[18].mxu0  ;;  %v9349_v9 = vld [vmem:[#allocation44_spill] sm:$0xff] }
 0x211   : > { %vm8679_vm9 = vcmp.lt.s32.totalorder %v9335_v39, 16  ;;  %v4734_v20 = vadd.f32 %v4733_v4, %v4732_v58  ;;  %vm9338_vm5 = vmmov %vm9334_vm0  ;;  %v4799_v14 = vmul.f32 %v4686_v59, %v4686_v59  ;;  %v6181_v57 = vadd.f32 %v6135_v56, %v9339_v32  ;;  %v9348_v58 = vld [vmem:[#allocation48_spill] sm:$0xff]  ;;  %v2118_v56 = vpop.f32.mrb[19].mxu1  ;;  %v3826_v39 = vpop.f32.mrb[19].mxu0 }
 0x212   : > { %v4735_v62 = vsel %vm9338_vm5, %v4686_v59, 0.0  ;;  %v9340_v25 = vsel %vm8168_vm7, %v8190_v15, %v8084_v51  ;;  %v4847_v45 = vadd.f32 %v4846_v19, %v4845_v16  ;;  %v6182_v41 = vadd.f32 %v3816_v60, %v9343_v33  ;;  %vm9344_vm10 = vmmov %vm9312_vm2 }
 0x213   : > { %vm8690_vm0 = vcmp.lt.s32.totalorder %v9340_v25, 16  ;;  %v4561_v2 = vsel %vm8667_vm12, %v8624_v44, %v8522_v0  ;;  %v4368_v42 = vshrl.u32 %v8457_v61, 4  ;;  %v4737_v7 = vsel %vm9344_vm10, %v4687_v30, 0.0  ;;  %vm9345_vm14 = vmmov %vm9312_vm2 }
 0x214   : > { %v4736_v21 = vadd.f32 %v4735_v62, %v4734_v20  ;;  %v4848_v11 = vsel %vm9345_vm14, %v4799_v14, 0.0  ;;  %v4689_v15 = vsel %vm8606_vm4, %v6181_v57, 0.0  ;;  %vm9346_vm7 = vmmov %vm9312_vm2  ;;  %v4688_v6 = vsel %vm8617_vm8, %v6182_v41, 0.0  ;;  %v9393_v62 = vld [vmem:[#allocation57_spill] sm:$0xff] }
 0x215   : > { %v4850_v51 = vsel %vm9346_vm7, %v4800_v34, 0.0  ;;  %v4849_v43 = vadd.f32 %v4848_v11, %v4847_v45  ;;  %v4802_v28 = vmul.f32 %v4689_v15, %v4689_v15  ;;  %v9350_v30 = vsel %vm8196_vm6, %v9348_v58, %v9349_v9  ;;  %vm9353_vm4 = vmmov %vm9312_vm2 }
 0x216   : > { %vm8712_vm15 = vcmp.lt.s32.totalorder %v9350_v30, 16  ;;  %v4738_v40 = vadd.f32 %v4737_v7, %v4736_v21  ;;  %v4739_v16 = vsel %vm9353_vm4, %v4688_v6, 0.0  ;;  %v4801_v34 = vmul.f32 %v4688_v6, %v4688_v6  ;;  %vm9358_vm11 = vmmov %vm9353_vm4  ;;  %v5917_v7 = vpop.f32.mrb[20].mxu1  ;;  %v6141_v21 = vpop.f32.mrb[20].mxu0 }
 0x217   : > { %v6183_v59 = vadd.f32 %v6138_v5, %v5914_v13  ;;  %v9355_v20 = vsel %vm8220_vm3, %v8225_v17, %v8123_v29  ;;  %v4851_v14 = vadd.f32 %v4850_v51, %v4849_v43  ;;  %v6184_v32 = vadd.f32 %v3826_v39, %v2118_v56  ;;  %vm9359_vm5 = vmmov %vm9353_vm4  ;;  %v2128_v6 = vpop.f32.mrb[21].mxu1  ;;  %v3836_v13 = vpop.f32.mrb[21].mxu0 }
 0x218   : > { %vm8722_vm8 = vcmp.lt.s32.totalorder %v9355_v20, 16  ;;  %vm4416_vm6 = vcmp.ne.s32.totalorder %v8655_v36, 0  ;;  %vm4452_vm2 = vcmp.lt.s32.totalorder %v8655_v36, 0  ;;  %v4741_v57 = vsel %vm9358_vm11, %v4689_v15, 0.0  ;;  %vm9360_vm10 = vmmov %vm9353_vm4 }
 0x219   : > { %v4740_v60 = vadd.f32 %v4739_v16, %v4738_v40  ;;  %v4852_v25 = vsel %vm9359_vm5, %v4801_v34, 0.0  ;;  %v4691_v45 = vsel %vm8638_vm1, %v6183_v59, 0.0  ;;  %v4854_v29 = vsel %vm9360_vm10, %v4802_v28, 0.0  ;;  %vm9365_vm1 = vmmov %vm9353_vm4  ;;  %v5920_v16 = vpop.f32.mrb[22].mxu1  ;;  %v6144_v34 = vpop.f32.mrb[22].mxu0 }
 0x21a   : > { %v4853_v17 = vadd.f32 %v4852_v25, %v4851_v14  ;;  %v4804_v33 = vmul.f32 %v4691_v45, %v4691_v45  ;;  %v4690_v41 = vsel %vm8649_vm13, %v6184_v32, 0.0  ;;  %vm9361_vm3 = vnez %v9162_v54  ;;  %vm9370_vm4 = vmmov %vm9365_vm1  ;;  %v2138_v14 = vpop.f32.mrb[23].mxu1  ;;  %v3846_v32 = vpop.f32.mrb[23].mxu0 }
 0x21b   : > { %v9362_v11 = vsel %vm9361_vm3, %v8247_v37, %v8131_v27  ;;  %v4742_v52 = vadd.f32 %v4741_v57, %v4740_v60  ;;  %v4743_v51 = vsel %vm9365_vm1, %v4690_v41, 0.0  ;;  %v4803_v43 = vmul.f32 %v4690_v41, %v4690_v41  ;;  %vm9371_vm11 = vmmov %vm9365_vm1  ;;  %v5923_v41 = vpop.f32.mrb[24].mxu1  ;;  %v6147_v61 = vpop.f32.mrb[24].mxu0 }
 0x21c   : > { %vm8740_vm14 = vcmp.lt.s32.totalorder %v9362_v11, 16  ;;  %v6185_v28 = vadd.f32 %v6141_v21, %v5917_v7  ;;  %vm9366_vm13 = vnez %v9165_v38  ;;  %v4855_v27 = vadd.f32 %v4854_v29, %v4853_v17  ;;  %vm8769_vm5 = vmand %vm4452_vm2, %vm4416_vm6  ;;  %v9388_v7 = vld [vmem:[#allocation45_spill] sm:$0xff] }
 0x21d   : > { %v9367_v12 = vsel %vm9366_vm13, %v8269_v18, %v8139_v48  ;;  %v6186_v37 = vadd.f32 %v3836_v13, %v2128_v6  ;;  %v8755_v5 = vadd.s32 18, %v8655_v36  ;;  %v8759_v4 = vsub.s32 %v8334_v23, %v8657_v53  ;;  %vm9374_vm10 = vmmov %vm9365_vm1  ;;  %v3856_v6 = vpop.f32.mrb[25].mxu0  ;;  %v9395_v13 = vld [vmem:[#allocation55_spill] sm:$0xff] }
 0x21e   : > { %vm8750_vm7 = vcmp.lt.s32.totalorder %v9367_v12, 16  ;;  %v4745_v58 = vsel %vm9370_vm4, %v4691_v45, 0.0  ;;  %v4744_v9 = vadd.f32 %v4743_v51, %v4742_v52  ;;  %v4856_v38 = vsel %vm9371_vm11, %v4803_v43, 0.0  ;;  %vm9379_vm6 = vmmov %vm9365_vm1  ;;  %v9396_v12 = vld [vmem:[#allocation51_spill] sm:$0xff] }
 0x21f   : > { %v4693_v48 = vsel %vm8679_vm9, %v6185_v28, 0.0  ;;  %v4858_v30 = vsel %vm9374_vm10, %v4804_v33, 0.0  ;;  %v4857_v23 = vadd.f32 %v4856_v38, %v4855_v27  ;;  %v4692_v40 = vsel %vm8690_vm0, %v6186_v37, 0.0  ;;  %vm9384_vm13 = vmmov %vm9365_vm1  ;;  %v2148_v28 = vpop.f32.mrb[25].mxu1 }
 0x220   : > { %v4806_v53 = vmul.f32 %v4693_v48, %v4693_v48  ;;  %vm9375_vm3 = vnez %v9174_v24  ;;  %v4746_v56 = vadd.f32 %v4745_v58, %v4744_v9  ;;  %v4747_v39 = vsel %vm9379_vm6, %v4692_v40, 0.0  ;;  %vm9385_vm11 = vmmov %vm9365_vm1  ;;  %v9400_v9 = vld [vmem:[#allocation58_spill] sm:$0xff] }
 0x221   : > { %v9376_v8 = vsel %vm9375_vm3, %v8280_v22, %v8144_v10  ;;  %v4805_v31 = vmul.f32 %v4692_v40, %v4692_v40  ;;  %v6187_v20 = vadd.f32 %v6144_v34, %v5920_v16  ;;  %vm9380_vm0 = vnez %v9183_v46 }
 0x222   : > { %vm8781_vm9 = vcmp.lt.s32.totalorder %v9376_v8, 16  ;;  %v9381_v50 = vsel %vm9380_vm0, %v8283_v63, %v8161_v3  ;;  %v4859_v10 = vadd.f32 %v4858_v30, %v4857_v23  ;;  %v6188_v22 = vadd.f32 %v3846_v32, %v2138_v14  ;;  %v9406_v14 = vld [vmem:[#allocation56_spill] sm:$0xff] }
 0x223   : > { %vm8791_vm2 = vcmp.lt.s32.totalorder %v9381_v50, 16  ;;  %v4560_v57 = vsel %vm8769_vm5, %v8755_v5, %v8655_v36  ;;  %v4369_v60 = vmul.u32 18, %v4368_v42  ;;  %v4749_v25 = vsel %vm9365_vm1, %v4693_v48, 0.0  ;;  %v9387_v42 = vld [vmem:[#allocation54_spill] sm:$0xff] }
 0x224   : > { %v4748_v46 = vadd.f32 %v4747_v39, %v4746_v56  ;;  %v4860_v45 = vsel %vm9384_vm13, %v4805_v31, 0.0  ;;  %v4695_v3 = vsel %vm8712_vm15, %v6187_v20, 0.0  ;;  %vm4419_vm4 = vcmp.ne.s32.totalorder %v8759_v4, 0  ;;  %vm9392_vm15 = vmmov %vm9365_vm1  ;;  %v5926_v56 = vpop.f32.mrb[26].mxu1  ;;  %v6150_v39 = vpop.f32.mrb[26].mxu0  ;;  %v9403_v31 = vld [vmem:[#allocation2_spill] sm:$0xff] }
 0x225   : > { %v4862_v63 = vsel %vm9385_vm11, %v4806_v53, 0.0  ;;  %v4861_v29 = vadd.f32 %v4860_v45, %v4859_v10  ;;  %v4808_v17 = vmul.f32 %v4695_v3, %v4695_v3  ;;  %v4694_v33 = vsel %vm8722_vm8, %v6188_v22, 0.0  ;;  %vm9401_vm13 = vmmov %vm9365_vm1  ;;  %v9405_v20 = vld [vmem:[#allocation4_spill] sm:$0xff] }
 0x226   : > { %vm9386_vm10 = vnez %v9188_v55  ;;  %v4750_v19 = vadd.f32 %v4749_v25, %v4748_v46  ;;  %v4751_v52 = vsel %vm9392_vm15, %v4694_v33, 0.0  ;;  %v4807_v51 = vmul.f32 %v4694_v33, %v4694_v33  ;;  %vm9402_vm11 = vmmov %vm9365_vm1  ;;  %v2158_v25 = vpop.f32.mrb[27].mxu1  ;;  %v3866_v46 = vpop.f32.mrb[27].mxu0 }
 0x227   : > { %v9389_v21 = vsel %vm9386_vm10, %v9387_v42, %v9388_v7  ;;  %v6189_v43 = vadd.f32 %v6147_v61, %v5923_v41  ;;  %vm9394_vm8 = vnez %v9393_v62  ;;  %v4863_v37 = vadd.f32 %v4862_v63, %v4861_v29  ;;  %v5929_v41 = vpop.f32.mrb[28].mxu1  ;;  %v6153_v61 = vpop.f32.mrb[28].mxu0 }
 0x228   : > { %vm8814_vm3 = vcmp.lt.s32.totalorder %v9389_v21, 16  ;;  %v9397_v27 = vsel %vm9394_vm8, %v9395_v13, %v9396_v12  ;;  %v6190_v58 = vadd.f32 %v3856_v6, %v2148_v28  ;;  %vm4455_vm0 = vcmp.lt.s32.totalorder %v8759_v4, 0 }
 0x229   : > { %vm8824_vm6 = vcmp.lt.s32.totalorder %v9397_v27, 16  ;;  %v8830_v38 = vsub.s32 %v9400_v9, %v4369_v60  ;;  %v4753_v48 = vsel %vm9365_vm1, %v4695_v3, 0.0  ;;  %v4752_v30 = vadd.f32 %v4751_v52, %v4750_v19  ;;  %v2168_v52 = vpop.f32.mrb[29].mxu1  ;;  %vm8890_vm12 = vmand %vm4455_vm0, %vm4419_vm4 }
 0x22a   : > { %v4864_v23 = vsel %vm9401_vm13, %v4807_v51, 0.0  ;;  %v4697_v53 = vsel %vm8740_vm14, %v6189_v43, 0.0  ;;  %v4866_v40 = vsel %vm9402_vm11, %v4808_v17, 0.0  ;;  %v4696_v8 = vsel %vm8750_vm7, %v6190_v58, 0.0  ;;  %vm9410_vm14 = vmmov %vm9365_vm1  ;;  %v3876_v51 = vpop.f32.mrb[29].mxu0  ;;  %v5932_v27 = vpop.f32.mrb[30].mxu1 }
 0x22b   : > { %v4865_v16 = vadd.f32 %v4864_v23, %v4863_v37  ;;  %v4810_v34 = vmul.f32 %v4697_v53, %v4697_v53  ;;  %vm9404_vm10 = vnez %v9403_v31  ;;  %v4754_v15 = vadd.f32 %v4753_v48, %v4752_v30  ;;  %v6156_v37 = vpop.f32.mrb[30].mxu0  ;;  %v2178_v30 = vpop.f32.mrb[31].mxu1 }
 0x22c   : > { %v9407_v32 = vsel %vm9404_vm10, %v9405_v20, %v9406_v14  ;;  %v4755_v10 = vsel %vm9410_vm14, %v4696_v8, 0.0  ;;  %v4809_v22 = vmul.f32 %v4696_v8, %v4696_v8  ;;  %v6191_v60 = vadd.f32 %v6150_v39, %v5926_v56  ;;  %vm9414_vm10 = vmmov %vm9402_vm11  ;;  %v3886_v23 = vpop.f32.mrb[31].mxu0 }
 0x22d   : > { %vm8844_vm15 = vcmp.lt.s32.totalorder %v9407_v32, 16  ;;  %vm8854_vm8 = vcmp.lt.s32.totalorder %v4558_v26, 16  ;;  %v4867_v45 = vadd.f32 %v4866_v40, %v4865_v16  ;;  %v6192_v3 = vadd.f32 %v3866_v46, %v2158_v25  ;;  %vm9415_vm14 = vmmov %vm9414_vm10 }
 0x22e   : > { %vm4418_vm1 = vcmp.ne.s32.totalorder %v8830_v38, 0  ;;  %vm4454_vm13 = vcmp.lt.s32.totalorder %v8830_v38, 0  ;;  %v4757_v63 = vsel %vm9402_vm11, %v4697_v53, 0.0  ;;  %v4756_v29 = vadd.f32 %v4755_v10, %v4754_v15  ;;  %v6159_v15 = vpop.f32.mrb[32].mxu0 }
 0x22f   : > { %v4868_v17 = vsel %vm9414_vm10, %v4809_v22, 0.0  ;;  %v4699_v1 = vsel %vm8781_vm9, %v6191_v60, 0.0  ;;  %v4870_v47 = vsel %vm9415_vm14, %v4810_v34, 0.0  ;;  %v4698_v33 = vsel %vm8791_vm2, %v6192_v3, 0.0  ;;  %vm9418_vm9 = vmmov %vm9414_vm10  ;;  %v3896_v46 = vpop.f32.mrb[33].mxu0 }
 0x230   : > { %v4869_v49 = vadd.f32 %v4868_v17, %v4867_v45  ;;  %v4812_v26 = vmul.f32 %v4699_v1, %v4699_v1  ;;  %vm8872_vm7 = vcmp.lt.s32.totalorder %v4561_v2, 16  ;;  %v4758_v59 = vadd.f32 %v4757_v63, %v4756_v29  ;;  %vm9423_vm11 = vmmov %vm9418_vm9 }
 0x231   : > { %v4759_v7 = vsel %vm9418_vm9, %v4698_v33, 0.0  ;;  %v4811_v21 = vmul.f32 %v4698_v33, %v4698_v33  ;;  %v6193_v19 = vadd.f32 %v6153_v61, %v5929_v41  ;;  %vm8882_vm2 = vcmp.lt.s32.totalorder %v4560_v57, 16  ;;  %vm9424_vm5 = vmmov %vm9418_vm9  ;;  %v6162_v61 = vpop.f32.mrb[34].mxu0 }
 0x232   : > { %v4871_v0 = vadd.f32 %v4870_v47, %v4869_v49  ;;  %v6194_v44 = vadd.f32 %v3876_v51, %v2168_v52  ;;  %v4527_v24 = vadd.s32 18, %v8759_v4  ;;  %v4526_v18 = vadd.s32 18, %v8830_v38  ;;  %vm8904_vm4 = vmand %vm4454_vm13, %vm4418_vm1  ;;  %v3906_v51 = vpop.f32.mrb[35].mxu0 }
 0x233   : > { %v4761_v36 = vsel %vm9423_vm11, %v4699_v1, 0.0  ;;  %v4760_v5 = vadd.f32 %v4759_v7, %v4758_v59  ;;  %v4872_v57 = vsel %vm9424_vm5, %v4811_v21, 0.0  ;;  %v4701_v43 = vsel %vm8814_vm3, %v6193_v19, 0.0  ;;  %vm9427_vm0 = vmmov %vm9424_vm5 }
 0x234   : > { %v4874_v6 = vsel %vm9427_vm0, %v4812_v26, 0.0  ;;  %v4873_v62 = vadd.f32 %v4872_v57, %v4871_v0  ;;  %v4814_v13 = vmul.f32 %v4701_v43, %v4701_v43  ;;  %v4700_v12 = vsel %vm8824_vm6, %v6194_v44, 0.0  ;;  %vm9428_vm10 = vmmov %vm9427_vm0 }
 0x235   : > { %v4762_v58 = vadd.f32 %v4761_v36, %v4760_v5  ;;  %v4763_v11 = vsel %vm9428_vm10, %v4700_v12, 0.0  ;;  %v4813_v9 = vmul.f32 %v4700_v12, %v4700_v12  ;;  %v6195_v48 = vadd.f32 %v6156_v37, %v5932_v27  ;;  %vm9429_vm3 = vmmov %vm9427_vm0 }
 0x236   : > { %v4875_v53 = vadd.f32 %v4874_v6, %v4873_v62  ;;  %v6196_v40 = vadd.f32 %v3886_v23, %v2178_v30  ;;  %v4563_v16 = vsel %vm8890_vm12, %v4527_v24, %v8759_v4  ;;  %v4562_v55 = vsel %vm8904_vm4, %v4526_v18, %v8830_v38  ;;  %vm9430_vm6 = vmmov %vm9427_vm0  ;;  %v5935_v4 = vpop.f32.mrb[32].mxu1 }
 0x237   : > { %v4765_v34 = vsel %vm9429_vm3, %v4701_v43, 0.0  ;;  %v4764_v8 = vadd.f32 %v4763_v11, %v4762_v58  ;;  %v4876_v56 = vsel %vm9430_vm6, %v4813_v9, 0.0  ;;  %v4703_v39 = vsel %vm8844_vm15, %v6195_v48, 0.0  ;;  %vm9431_vm1 = vmmov %vm9427_vm0  ;;  %v2188_v25 = vpop.f32.mrb[33].mxu1 }
 0x238   : > { %v4878_v31 = vsel %vm9431_vm1, %v4814_v13, 0.0  ;;  %v4877_v20 = vadd.f32 %v4876_v56, %v4875_v53  ;;  %v4816_v14 = vmul.f32 %v4703_v39, %v4703_v39  ;;  %v4702_v32 = vsel %vm8854_vm8, %v6196_v40, 0.0  ;;  %vm9432_vm13 = vmmov %vm9427_vm0  ;;  %v5938_v41 = vpop.f32.mrb[34].mxu1 }
 0x239   : > { %v4766_v10 = vadd.f32 %v4765_v34, %v4764_v8  ;;  %v4767_v38 = vsel %vm9432_vm13, %v4702_v32, 0.0  ;;  %v4815_v22 = vmul.f32 %v4702_v32, %v4702_v32  ;;  %v6197_v60 = vadd.f32 %v6159_v15, %v5935_v4  ;;  %vm9437_vm8 = vmmov %vm9427_vm0  ;;  %v2198_v52 = vpop.f32.mrb[35].mxu1 }
 0x23a   : > { %v4879_v45 = vadd.f32 %v4878_v31, %v4877_v20  ;;  %v6198_v3 = vadd.f32 %v3896_v46, %v2188_v25  ;;  %vm8926_vm14 = vcmp.lt.s32.totalorder %v4563_v16, 16  ;;  %vm8930_vm15 = vcmp.lt.s32.totalorder %v4562_v55, 16  ;;  %vm9438_vm9 = vmmov %vm9427_vm0 }
 0x23b   : > { %v4769_v54 = vsel %vm9437_vm8, %v4703_v39, 0.0  ;;  %v4768_v29 = vadd.f32 %v4767_v38, %v4766_v10  ;;  %v4880_v17 = vsel %vm9438_vm9, %v4815_v22, 0.0  ;;  %v4705_v1 = vsel %vm8872_vm7, %v6197_v60, 0.0  ;;  %vm9439_vm12 = vmmov %vm9427_vm0 }
 0x23c   : > { %v4882_v47 = vsel %vm9439_vm12, %v4816_v14, 0.0  ;;  %v4881_v49 = vadd.f32 %v4880_v17, %v4879_v45  ;;  %v4818_v26 = vmul.f32 %v4705_v1, %v4705_v1  ;;  %v4704_v33 = vsel %vm8882_vm2, %v6198_v3, 0.0  ;;  %vm9440_vm11 = vmmov %vm9427_vm0 }
 0x23d   : > { %v4770_v59 = vadd.f32 %v4769_v54, %v4768_v29  ;;  %v4771_v7 = vsel %vm9440_vm11, %v4704_v33, 0.0  ;;  %v4817_v21 = vmul.f32 %v4704_v33, %v4704_v33  ;;  %v6199_v19 = vadd.f32 %v6162_v61, %v5938_v41  ;;  %vm9441_vm7 = vmmov %vm9427_vm0 }
 0x23e   : > { %v4883_v0 = vadd.f32 %v4882_v47, %v4881_v49  ;;  %v6200_v44 = vadd.f32 %v3906_v51, %v2198_v52  ;;  %vm9442_vm5 = vmmov %vm9427_vm0 }
 0x23f   : > { %v4772_v42 = vadd.f32 %v4771_v7, %v4770_v59  ;;  %v4884_v2 = vsel %vm9441_vm7, %v4817_v21, 0.0  ;;  %v4707_v24 = vsel %vm8926_vm14, %v6199_v19, 0.0  ;;  %v4773_v35 = vsel %vm9442_vm5, %v4705_v1, 0.0  ;;  %vm9443_vm2 = vmmov %vm9427_vm0 }
 0x240   : > { %v4886_v18 = vsel %vm9443_vm2, %v4818_v26, 0.0  ;;  %v4885_v36 = vadd.f32 %v4884_v2, %v4883_v0  ;;  %v4706_v5 = vsel %vm8930_vm15, %v6200_v44, 0.0  ;;  %v4820_v57 = vmul.f32 %v4707_v24, %v4707_v24  ;;  %vm9444_vm4 = vmmov %vm9427_vm0 }
 0x241   : > { %v4774_v43 = vadd.f32 %v4773_v35, %v4772_v42  ;;  %v4775_v28 = vsel %vm9444_vm4, %v4706_v5, 0.0  ;;  %v4819_v6 = vmul.f32 %v4706_v5, %v4706_v5  ;;  %vm9445_vm10 = vmmov %vm9427_vm0 }
 0x242   : > { %v4887_v62 = vadd.f32 %v4886_v18, %v4885_v36  ;;  %v4777_v27 = vsel %vm9445_vm10, %v4707_v24, 0.0  ;;  %vm9446_vm3 = vmmov %vm9427_vm0 }
 0x243   : > { %v4776_v13 = vadd.f32 %v4775_v28, %v4774_v43  ;;  %v4888_v12 = vsel %vm9427_vm0, %v4819_v6, 0.0  ;;  %v4890_v58 = vsel %vm9446_vm3, %v4820_v57, 0.0  ;;  %vm9447_vm6 = vmmov %vm9427_vm0 }
 0x244   : > { %v4889_v37 = vadd.f32 %v4888_v12, %v4887_v62  ;;  %vm9448_vm1 = vmmov %vm9427_vm0 }
 0x245   : > { %v4778_v11 = vadd.f32 %v4777_v27, %v4776_v13 }
 0x246   : > { %v4891_v9 = vadd.f32 %v4890_v58, %v4889_v37 }
 0x247   : > { %v4779_v48 = vrot.slane %v4778_v11, 4 }
 0x248   : > { %v4892_v30 = vrot.slane %v4891_v9, 4 }
 0x249   : > { %v4780_v23 = vadd.f32 %v4779_v48, %v4778_v11 }
 0x24a   : > { %v4893_v53 = vadd.f32 %v4892_v30, %v4891_v9 }
 0x24b   : > { %v4781_v40 = vrot.slane %v4780_v23, 2 }
 0x24c   : > { %v4894_v16 = vrot.slane %v4893_v53, 2 }
 0x24d   : > { %v4782_v55 = vadd.f32 %v4781_v40, %v4780_v23 }
 0x24e   : > { %v4895_v34 = vadd.f32 %v4894_v16, %v4893_v53 }
 0x24f   : > { %v4783_v8 = vrot.slane %v4782_v55, 1 }
 0x250   : > { %v4896_v56 = vrot.slane %v4895_v34, 1 }
 0x251   : > { %v4784_v39 = vadd.f32 %v4783_v8, %v4782_v55 }
 0x252   : > { %v4897_v31 = vadd.f32 %v4896_v56, %v4895_v34 }
 0x253   : > { %4898 = vst.msk [vmem:[%s175_s14] sm:$0xff] %vm9447_vm6, %v4784_v39 }
 0x254   : > { %4899 = vst.msk [vmem:[%s179_s17] sm:$0xff] %vm9448_vm1, %v4897_v31 }
 0x255 PF: > { %s14_s12 = sadd.s32 1, %s6540_s12  }
 0x256   : > { %p11_p4 = scmp.ge.s32.totalorder %s14_s12, 4  }
 0x258   :  { %13 = sbr.rel (!%p11_p4) target bundleno = 1 (0x1), region = 78 }

// kernel: encoder_forward.7
= control target key start
LH: loop header
LB: loop body
LE: loop exit
PB: predicated region body
PF: predicated region fallthrough
CT: control target
= control target key end

     0   :  { %s5696_s15 = smov 0   ;;  %s6804_s0 = inlined_call_operand.vmem [shape: f32[2,328,8], index: 0, kind: input, shape index: {}]   ;;  %s6805_s1 = inlined_call_operand.vmem [shape: f32[9,8,16], index: 1, kind: input, shape index: {}]   ;;  %s6806_s2 = inlined_call_operand.vmem [shape: f32[1,16], index: 2, kind: input, shape index: {}]   ;;  %s6807_s3 = inlined_call_operand.vmem [shape: f32[1,16], index: 3, kind: input, shape index: {}]   ;;  %s6808_s4 = inlined_call_operand.vmem [shape: f32[2,288,16], index: 4, kind: output, shape index: {}]  }
   0x1 LB: > { %s4183_s16 = sadd.s32 4294967295, %s5669_s15   ;;  %p4187_p0 = scmp.ge.s32.totalorder %s5669_s15, 1  ;;  %s5669_s15 = sphi %s5696_s15, %s14_s15  }
   0x2   : > { %p162_p1 = scmp.lt.s32.totalorder %s5669_s15, 3 }
   0x4   : > { %p163_p2 = pnand %p4187_p0, %p162_p1 }
   0x5   : > { %v4190_v0 = vld [vmem:[%s6805_s1 + $0x8] sm:$0xff] (!%p163_p2)  ;;  %v5710_v1 = vld [vmem:[%s6805_s1 + $0x20] sm:$0xff] (!%p163_p2)  ;;  %p188_p3 = scmp.lt.s32.totalorder (!%p163_p2), %s4183_s16, 1  ;;  %vm273_vm0 = vcmask (!%p163_p2), 64512   ;;  %v5741_v10 = vld [vmem:[%s6805_s1 + $0x30] sm:$0xff] (!%p163_p2)  ;;  %vm4091_vm1 = vcmask (!%p163_p2), 130048  }
   0x6   : > { %166 = sbr.rel (%p163_p2) target bundleno = 561 (0x231), region = 36  ;;  %v234_v2 = vld [vmem:[%s6805_s1] sm:$0xff] (!%p163_p2)  ;;  %4859 = vmatprep.subr.mxu1 (!%p163_p2), %v4190_v0  ;;  %5083 = vmatprep.subr.mxu0 (!%p163_p2), %v5710_v1  ;;  %v4374_v3 = vld [vmem:[%s6805_s1 + $0x28] sm:$0xff] (!%p163_p2)  ;;  %v5746_v11 = vld [vmem:[%s6805_s1 + $0x10] sm:$0xff] (!%p163_p2) }
   0x7   : > { %4860 = vmatpush3.msra.mxu1 (!%p163_p2), %v4190_v0  ;;  %5084 = vmatpush3.msra.mxu0 (!%p163_p2), %v5710_v1  ;;  %v5825_v48 = vld [vmem:[%s6805_s1 + $0x38] sm:$0xff] (!%p163_p2) }
   0x8   : > { %4915 = vmatprep.subr.mxu1 (!%p163_p2), %v234_v2  ;;  %5139 = vmatprep.subr.mxu0 (!%p163_p2), %v4374_v3 }
   0xd   : > { %s6810_s16 = smov (!%p188_p3, %s4183_s16), 1 }
   0xe   : > { %s5653_s25 = smul.u32 328, %s6810_s16 }
   0xf   : > { %s5654_s17 = smul.u32 288, %s6810_s16 }
  0x10   : > { %s5726_s28 = scalar_lea.vmem %s6804_s0, %s5653_s25 }
  0x11   : > { %v235_v4 = vld [vmem:[%s5726_s28 + $0x1] sm:$0xff]  ;;  %v1834_v5 = vld [vmem:[%s5726_s28 + $0x13] sm:$0xff]  ;;  %v236_v6 = vld [vmem:[%s5726_s28 + $0x9] sm:$0xff]  ;;  %s6650_s22 = scalar_lea.vmem %s6808_s4, %s5654_s17 }
  0x12   : > { %4861 = vmatprep.mubr.msk.f32.mxu1 %vm273_vm0, %v235_v4  ;;  %5085 = vmatprep.mubr.msk.f32.mxu0 %vm273_vm0, %v1834_v5  ;;  %v1835_v7 = vld [vmem:[%s5726_s28 + $0x1b] sm:$0xff]  ;;  %v237_v8 = vld [vmem:[%s5726_s28 + $0x11] sm:$0xff]  ;;  %v1836_v9 = vld [vmem:[%s5726_s28 + $0x23] sm:$0xff] }
  0x13   : > { %4862 = vmatmul.mubr.msk.f32.vlgmr.msra.gmra.mrb[0].mxu1 %vm273_vm0, %v236_v6  ;;  %5086 = vmatmul.mubr.msk.f32.vlgmr.msra.gmra.mrb[0].mxu0 %vm273_vm0, %v1835_v7  ;;  %v238_v12 = vld [vmem:[%s5726_s28 + $0x19] sm:$0xff]  ;;  %v1837_v13 = vld [vmem:[%s5726_s28 + $0x2b] sm:$0xff]  ;;  %v239_v14 = vld [vmem:[%s5726_s28 + $0x21] sm:$0xff] }
  0x14   : > { %4916 = vmatpush3.msra.mxu1 %v234_v2  ;;  %5140 = vmatpush3.msra.mxu0 %v4374_v3  ;;  %v1838_v15 = vld [vmem:[%s5726_s28 + $0x33] sm:$0xff]  ;;  %v240_v16 = vld [vmem:[%s5726_s28 + $0x29] sm:$0xff]  ;;  %v1839_v17 = vld [vmem:[%s5726_s28 + $0x3b] sm:$0xff] }
  0x15   : > { %4864 = vmatprep.mubr.msk.f32.mxu1 %vm273_vm0, %v237_v8  ;;  %5088 = vmatprep.mubr.msk.f32.mxu0 %vm273_vm0, %v1836_v9  ;;  %v241_v18 = vld [vmem:[%s5726_s28 + $0x31] sm:$0xff]  ;;  %v1840_v19 = vld [vmem:[%s5726_s28 + $0x43] sm:$0xff]  ;;  %v242_v20 = vld [vmem:[%s5726_s28 + $0x39] sm:$0xff] }
  0x16   : > { %5195 = vmatprep.subr.mxu0 %v5741_v10  ;;  %4971 = vmatprep.subr.mxu1 %v5746_v11  ;;  %v1841_v21 = vld [vmem:[%s5726_s28 + $0x4b] sm:$0xff]  ;;  %v243_v22 = vld [vmem:[%s5726_s28 + $0x41] sm:$0xff]  ;;  %v1842_v23 = vld [vmem:[%s5726_s28 + $0x53] sm:$0xff] }
  0x17   : > { %4865 = vmatmul.mubr.msk.f32.gmra.mrb[2].mxu1 %vm273_vm0, %v238_v12  ;;  %5089 = vmatmul.mubr.msk.f32.gmra.mrb[2].mxu0 %vm273_vm0, %v1837_v13  ;;  %v244_v24 = vld [vmem:[%s5726_s28 + $0x49] sm:$0xff]  ;;  %v1843_v25 = vld [vmem:[%s5726_s28 + $0x5b] sm:$0xff]  ;;  %v245_v26 = vld [vmem:[%s5726_s28 + $0x51] sm:$0xff] }
  0x18   : > { %4867 = vmatprep.mubr.msk.f32.mxu1 %vm273_vm0, %v239_v14  ;;  %5091 = vmatprep.mubr.msk.f32.mxu0 %vm273_vm0, %v1838_v15  ;;  %v1844_v27 = vld [vmem:[%s5726_s28 + $0x63] sm:$0xff]  ;;  %v246_v28 = vld [vmem:[%s5726_s28 + $0x59] sm:$0xff]  ;;  %v1845_v29 = vld [vmem:[%s5726_s28 + $0x6b] sm:$0xff] }
  0x19   : > { %v247_v30 = vld [vmem:[%s5726_s28 + $0x61] sm:$0xff]  ;;  %v1846_v31 = vld [vmem:[%s5726_s28 + $0x73] sm:$0xff]  ;;  %v248_v32 = vld [vmem:[%s5726_s28 + $0x69] sm:$0xff] }
  0x1a   : > { %v1847_v33 = vld [vmem:[%s5726_s28 + $0x7b] sm:$0xff]  ;;  %v249_v34 = vld [vmem:[%s5726_s28 + $0x71] sm:$0xff]  ;;  %v1848_v35 = vld [vmem:[%s5726_s28 + $0x83] sm:$0xff] }
  0x1b   : > { %4868 = vmatmul.mubr.msk.f32.gmra.mrb[4].mxu1 %vm273_vm0, %v240_v16  ;;  %5092 = vmatmul.mubr.msk.f32.gmra.mrb[4].mxu0 %vm273_vm0, %v1839_v17  ;;  %v250_v36 = vld [vmem:[%s5726_s28 + $0x79] sm:$0xff]  ;;  %v1849_v37 = vld [vmem:[%s5726_s28 + $0x8b] sm:$0xff]  ;;  %v251_v38 = vld [vmem:[%s5726_s28 + $0x81] sm:$0xff] }
  0x1c   : > { %4870 = vmatprep.mubr.msk.f32.mxu1 %vm273_vm0, %v241_v18  ;;  %5094 = vmatprep.mubr.msk.f32.mxu0 %vm273_vm0, %v1840_v19  ;;  %v1850_v39 = vld [vmem:[%s5726_s28 + $0x93] sm:$0xff]  ;;  %v252_v40 = vld [vmem:[%s5726_s28 + $0x89] sm:$0xff]  ;;  %v1851_v41 = vld [vmem:[%s5726_s28 + $0x9b] sm:$0xff] }
  0x1d   : > { %v253_v42 = vld [vmem:[%s5726_s28 + $0x91] sm:$0xff]  ;;  %v254_v44 = vld [vmem:[%s5726_s28 + $0x99] sm:$0xff]  ;;  %v255_v46 = vld [vmem:[%s5726_s28 + $0xa1] sm:$0xff] }
  0x1e   : > { %v2261_v43 = vld [vmem:[%s5726_s28 + $0x14] sm:$0xff]  ;;  %v2262_v45 = vld [vmem:[%s5726_s28 + $0x1c] sm:$0xff]  ;;  %v5820_v47 = vld [vmem:[%s5726_s28 + $0x24] sm:$0xff] }
  0x1f   : > { %4871 = vmatmul.mubr.msk.f32.gmra.mrb[6].mxu1 %vm273_vm0, %v242_v20  ;;  %5095 = vmatmul.mubr.msk.f32.gmra.mrb[6].mxu0 %vm273_vm0, %v1841_v21  ;;  %v256_v49 = vld [vmem:[%s5726_s28 + $0xa9] sm:$0xff]  ;;  %v257_v51 = vld [vmem:[%s5726_s28 + $0xb1] sm:$0xff]  ;;  %v258_v53 = vld [vmem:[%s5726_s28 + $0xb9] sm:$0xff] }
  0x20   : > { %4873 = vmatprep.mubr.msk.f32.mxu1 %vm273_vm0, %v243_v22  ;;  %5097 = vmatprep.mubr.msk.f32.mxu0 %vm273_vm0, %v1842_v23  ;;  %v5833_v50 = vld [vmem:[%s5726_s28 + $0x2c] sm:$0xff]  ;;  %v5839_v52 = vld [vmem:[%s5726_s28 + $0x34] sm:$0xff]  ;;  %v5850_v54 = vld [vmem:[%s5726_s28 + $0x3c] sm:$0xff] }
  0x21   : > { %v259_v55 = vld [vmem:[%s5726_s28 + $0xc1] sm:$0xff]  ;;  %v260_v57 = vld [vmem:[%s5726_s28 + $0xc9] sm:$0xff]  ;;  %v261_v59 = vld [vmem:[%s5726_s28 + $0xd1] sm:$0xff] }
  0x22   : > { %v5854_v56 = vld [vmem:[%s5726_s28 + $0x44] sm:$0xff]  ;;  %v5864_v58 = vld [vmem:[%s5726_s28 + $0x4c] sm:$0xff]  ;;  %v5868_v60 = vld [vmem:[%s5726_s28 + $0x54] sm:$0xff] }
  0x23   : > { %4874 = vmatmul.mubr.msk.f32.gmra.mrb[8].mxu1 %vm273_vm0, %v244_v24  ;;  %5098 = vmatmul.mubr.msk.f32.gmra.mrb[8].mxu0 %vm273_vm0, %v1843_v25  ;;  %v262_v61 = vld [vmem:[%s5726_s28 + $0xd9] sm:$0xff]  ;;  %v263_v63 = vld [vmem:[%s5726_s28 + $0xe1] sm:$0xff]  ;;  %v264_v2 = vld [vmem:[%s5726_s28 + $0xe9] sm:$0xff] }
  0x24   : > { %4876 = vmatprep.mubr.msk.f32.mxu1 %vm273_vm0, %v245_v26  ;;  %5100 = vmatprep.mubr.msk.f32.mxu0 %vm273_vm0, %v1844_v27  ;;  %v5878_v62 = vld [vmem:[%s5726_s28 + $0x5c] sm:$0xff]  ;;  %v5882_v0 = vld [vmem:[%s5726_s28 + $0x64] sm:$0xff]  ;;  %v5892_v3 = vld [vmem:[%s5726_s28 + $0x6c] sm:$0xff] }
  0x25   : > { %v265_v4 = vld [vmem:[%s5726_s28 + $0xf1] sm:$0xff]  ;;  %v266_v6 = vld [vmem:[%s5726_s28 + $0xf9] sm:$0xff]  ;;  %v267_v8 = vld [vmem:[%s5726_s28 + $0x101] sm:$0xff] }
  0x26   : > { %v5896_v5 = vld [vmem:[%s5726_s28 + $0x74] sm:$0xff]  ;;  %v5906_v7 = vld [vmem:[%s5726_s28 + $0x7c] sm:$0xff]  ;;  %v5910_v9 = vld [vmem:[%s5726_s28 + $0x84] sm:$0xff] }
  0x27   : > { %4877 = vmatmul.mubr.msk.f32.gmra.mrb[10].mxu1 %vm273_vm0, %v246_v28  ;;  %5101 = vmatmul.mubr.msk.f32.gmra.mrb[10].mxu0 %vm273_vm0, %v1845_v29  ;;  %v5920_v12 = vld [vmem:[%s5726_s28 + $0x8c] sm:$0xff]  ;;  %v5924_v14 = vld [vmem:[%s5726_s28 + $0x94] sm:$0xff]  ;;  %v5934_v16 = vld [vmem:[%s5726_s28 + $0x9c] sm:$0xff] }
  0x28   : > { %4879 = vmatprep.mubr.msk.f32.mxu1 %vm273_vm0, %v247_v30  ;;  %5103 = vmatprep.mubr.msk.f32.mxu0 %vm273_vm0, %v1846_v31  ;;  %v269_v13 = vld [vmem:[%s5726_s28 + $0x111] sm:$0xff]  ;;  %v270_v15 = vld [vmem:[%s5726_s28 + $0x119] sm:$0xff]  ;;  %v5938_v18 = vld [vmem:[%s5726_s28 + $0xa4] sm:$0xff] }
  0x29   : > { %v198_v17 = vld [vmem:[%s5726_s28] sm:$0xff]  ;;  %v199_v19 = vld [vmem:[%s5726_s28 + $0x8] sm:$0xff]  ;;  %v200_v21 = vld [vmem:[%s5726_s28 + $0x10] sm:$0xff] }
  0x2a   : > { %v5948_v20 = vld [vmem:[%s5726_s28 + $0xac] sm:$0xff]  ;;  %v5952_v22 = vld [vmem:[%s5726_s28 + $0xb4] sm:$0xff]  ;;  %v5966_v25 = vld [vmem:[%s5726_s28 + $0xbc] sm:$0xff] }
  0x2b   : > { %4880 = vmatmul.mubr.msk.f32.gmra.mrb[12].mxu1 %vm273_vm0, %v248_v32  ;;  %5104 = vmatmul.mubr.msk.f32.gmra.mrb[12].mxu0 %vm273_vm0, %v1847_v33  ;;  %v5957_v23 = vld [vmem:[%s6805_s1 + $0x18] sm:$0xff]  ;;  %v202_v26 = vld [vmem:[%s5726_s28 + $0x20] sm:$0xff]  ;;  %v5983_v28 = vld [vmem:[%s5726_s28 + $0xcc] sm:$0xff] }
  0x2c   : > { %4882 = vmatprep.mubr.msk.f32.mxu1 %vm273_vm0, %v249_v34  ;;  %5106 = vmatprep.mubr.msk.f32.mxu0 %vm273_vm0, %v1848_v35  ;;  %v201_v24 = vld [vmem:[%s5726_s28 + $0x18] sm:$0xff]  ;;  %v5972_v27 = vld [vmem:[%s5726_s28 + $0xc4] sm:$0xff]  ;;  %v204_v29 = vld [vmem:[%s5726_s28 + $0x30] sm:$0xff] }
  0x2d   : > { %v5987_v30 = vld [vmem:[%s5726_s28 + $0xd4] sm:$0xff]  ;;  %v5997_v32 = vld [vmem:[%s5726_s28 + $0xdc] sm:$0xff]  ;;  %v6001_v34 = vld [vmem:[%s5726_s28 + $0xe4] sm:$0xff] }
  0x2e   : > { %v205_v31 = vld [vmem:[%s5726_s28 + $0x38] sm:$0xff]  ;;  %v206_v33 = vld [vmem:[%s5726_s28 + $0x40] sm:$0xff]  ;;  %v207_v35 = vld [vmem:[%s5726_s28 + $0x48] sm:$0xff] }
  0x2f   : > { %4883 = vmatmul.mubr.msk.f32.gmra.mrb[14].mxu1 %vm273_vm0, %v250_v36  ;;  %5107 = vmatmul.mubr.msk.f32.gmra.mrb[14].mxu0 %vm273_vm0, %v1849_v37  ;;  %v6011_v36 = vld [vmem:[%s5726_s28 + $0xec] sm:$0xff] }
  0x30   : > { %4885 = vmatprep.mubr.msk.f32.mxu1 %vm273_vm0, %v251_v38  ;;  %5109 = vmatprep.mubr.msk.f32.mxu0 %vm273_vm0, %v1850_v39  ;;  %v208_v37 = vld [vmem:[%s5726_s28 + $0x50] sm:$0xff]  ;;  %v209_v39 = vld [vmem:[%s5726_s28 + $0x58] sm:$0xff] }
  0x31   : > { %v6015_v38 = vld [vmem:[%s5726_s28 + $0xf4] sm:$0xff] }
  0x33   : > { %4886 = vmatmul.mubr.msk.f32.gmra.mrb[16].mxu1 %vm273_vm0, %v252_v40  ;;  %5110 = vmatmul.mubr.msk.f32.gmra.mrb[16].mxu0 %vm273_vm0, %v1851_v41  ;;  %v6025_v40 = vld [vmem:[%s5726_s28 + $0xfc] sm:$0xff] }
  0x34   : > { %4888 = vmatprep.mubr.msk.f32.mxu1 %vm273_vm0, %v253_v42  ;;  %5141 = vmatprep.mubr.msk.f32.mxu0 %vm273_vm0, %v2261_v43  ;;  %v210_v41 = vld [vmem:[%s5726_s28 + $0x60] sm:$0xff]  ;;  %v211_v43 = vld [vmem:[%s5726_s28 + $0x68] sm:$0xff] }
  0x35   : > { %v6029_v42 = vld [vmem:[%s5726_s28 + $0x104] sm:$0xff] }
  0x37   : > { %4889 = vmatmul.mubr.msk.f32.gmra.mrb[18].mxu1 %vm273_vm0, %v254_v44  ;;  %5142 = vmatmul.mubr.msk.f32.vlgmr.msra.gmra.mrb[0].mxu0 %vm273_vm0, %v2262_v45  ;;  %v6039_v44 = vld [vmem:[%s5726_s28 + $0x10c] sm:$0xff] }
  0x38   : > { %5196 = vmatpush3.msra.mxu0 %v5741_v10  ;;  %4891 = vmatprep.mubr.msk.f32.mxu1 %vm273_vm0, %v255_v46  ;;  %v268_v10 = vld [vmem:[%s5726_s28 + $0x109] sm:$0xff]  ;;  %v6043_v46 = vld [vmem:[%s5726_s28 + $0x114] sm:$0xff] }
  0x39   : > { %5144 = vmatprep.mubr.msk.f32.mxu0 %vm273_vm0, %v5820_v47  ;;  %5251 = vmatprep.subr.mxu0 %v5825_v48  ;;  %v212_v45 = vld [vmem:[%s5726_s28 + $0x70] sm:$0xff] }
  0x3b   : > { %4892 = vmatmul.mubr.msk.f32.gmra.mrb[20].mxu1 %vm273_vm0, %v256_v49  ;;  %5145 = vmatmul.mubr.msk.f32.gmra.mrb[2].mxu0 %vm273_vm0, %v5833_v50  ;;  %v213_v49 = vld [vmem:[%s5726_s28 + $0x78] sm:$0xff] }
  0x3c   : > { %4894 = vmatprep.mubr.msk.f32.mxu1 %vm273_vm0, %v257_v51  ;;  %5147 = vmatprep.mubr.msk.f32.mxu0 %vm273_vm0, %v5839_v52  ;;  %v6053_v51 = vld [vmem:[%s5726_s28 + $0x11c] sm:$0xff] }
  0x3f   : > { %4895 = vmatmul.mubr.msk.f32.gmra.mrb[22].mxu1 %vm273_vm0, %v258_v53  ;;  %5148 = vmatmul.mubr.msk.f32.gmra.mrb[4].mxu0 %vm273_vm0, %v5850_v54  ;;  %v214_v53 = vld [vmem:[%s5726_s28 + $0x80] sm:$0xff] }
  0x40   : > { %4897 = vmatprep.mubr.msk.f32.mxu1 %vm273_vm0, %v259_v55  ;;  %5150 = vmatprep.mubr.msk.f32.mxu0 %vm273_vm0, %v5854_v56  ;;  %v6057_v55 = vld [vmem:[%s5726_s28 + $0x124] sm:$0xff] }
  0x43   : > { %4898 = vmatmul.mubr.msk.f32.gmra.mrb[24].mxu1 %vm273_vm0, %v260_v57  ;;  %5151 = vmatmul.mubr.msk.f32.gmra.mrb[6].mxu0 %vm273_vm0, %v5864_v58  ;;  %v215_v57 = vld [vmem:[%s5726_s28 + $0x88] sm:$0xff] }
  0x44   : > { %4900 = vmatprep.mubr.msk.f32.mxu1 %vm273_vm0, %v261_v59  ;;  %5153 = vmatprep.mubr.msk.f32.mxu0 %vm273_vm0, %v5868_v60  ;;  %v6067_v59 = vld [vmem:[%s5726_s28 + $0x12c] sm:$0xff] }
  0x47   : > { %4901 = vmatmul.mubr.msk.f32.gmra.mrb[26].mxu1 %vm273_vm0, %v262_v61  ;;  %5154 = vmatmul.mubr.msk.f32.gmra.mrb[8].mxu0 %vm273_vm0, %v5878_v62  ;;  %v216_v61 = vld [vmem:[%s5726_s28 + $0x90] sm:$0xff] }
  0x48   : > { %4903 = vmatprep.mubr.msk.f32.mxu1 %vm273_vm0, %v263_v63  ;;  %5156 = vmatprep.mubr.msk.f32.mxu0 %vm273_vm0, %v5882_v0  ;;  %v217_v63 = vld [vmem:[%s5726_s28 + $0x98] sm:$0xff] }
  0x4b   : > { %4904 = vmatmul.mubr.msk.f32.gmra.mrb[28].mxu1 %vm273_vm0, %v264_v2  ;;  %5157 = vmatmul.mubr.msk.f32.gmra.mrb[10].mxu0 %vm273_vm0, %v5892_v3  ;;  %v218_v2 = vld [vmem:[%s5726_s28 + $0xa0] sm:$0xff] }
  0x4c   : > { %4906 = vmatprep.mubr.msk.f32.mxu1 %vm273_vm0, %v265_v4  ;;  %5159 = vmatprep.mubr.msk.f32.mxu0 %vm273_vm0, %v5896_v5  ;;  %v6081_v4 = vld [vmem:[%s6805_s1 + $0x40] sm:$0xff] }
  0x4f   : > { %4907 = vmatmul.mubr.msk.f32.gmra.mrb[30].mxu1 %vm273_vm0, %v266_v6  ;;  %5160 = vmatmul.mubr.msk.f32.gmra.mrb[12].mxu0 %vm273_vm0, %v5906_v7  ;;  %v220_v6 = vld [vmem:[%s5726_s28 + $0xb0] sm:$0xff] }
  0x50   : > { %4909 = vmatprep.mubr.msk.f32.mxu1 %vm273_vm0, %v267_v8  ;;  %5162 = vmatprep.mubr.msk.f32.mxu0 %vm273_vm0, %v5910_v9  ;;  %v233_v8 = vld [vmem:[%s5726_s28 + $0x118] sm:$0xff] }
  0x53   : > { %4910 = vmatmul.mubr.msk.f32.gmra.mrb[32].mxu1 %vm273_vm0, %v268_v10  ;;  %5163 = vmatmul.mubr.msk.f32.gmra.mrb[14].mxu0 %vm273_vm0, %v5920_v12  ;;  %v981_v10 = vld [vmem:[%s5726_s28 + $0xa] sm:$0xff] }
  0x54   : > { %4912 = vmatprep.mubr.msk.f32.mxu1 %vm273_vm0, %v269_v13  ;;  %5165 = vmatprep.mubr.msk.f32.mxu0 %vm273_vm0, %v5924_v14  ;;  %v6166_v13 = vld [vmem:[%s5726_s28 + $0x1a] sm:$0xff] }
  0x57   : > { %4913 = vmatmul.mubr.msk.f32.gmra.mrb[34].mxu1 %vm273_vm0, %v270_v15  ;;  %5166 = vmatmul.mubr.msk.f32.gmra.mrb[16].mxu0 %vm273_vm0, %v5934_v16  ;;  %v6183_v15 = vld [vmem:[%s5726_s28 + $0x2a] sm:$0xff] }
  0x58   : > { %4917 = vmatprep.mubr.msk.f32.mxu1 %vm273_vm0, %v198_v17  ;;  %5168 = vmatprep.mubr.msk.f32.mxu0 %vm273_vm0, %v5938_v18  ;;  %v6197_v17 = vld [vmem:[%s5726_s28 + $0x3a] sm:$0xff] }
  0x5b   : > { %4918 = vmatmul.mubr.msk.f32.vlgmr.msra.gmra.mrb[0].mxu1 %vm273_vm0, %v199_v19  ;;  %5169 = vmatmul.mubr.msk.f32.gmra.mrb[18].mxu0 %vm273_vm0, %v5948_v20  ;;  %v6211_v19 = vld [vmem:[%s5726_s28 + $0x4a] sm:$0xff] }
  0x5c   : > { %4972 = vmatpush3.msra.mxu1 %v5746_v11  ;;  %4920 = vmatprep.mubr.msk.f32.mxu1 %vm273_vm0, %v200_v21  ;;  %v203_v11 = vld [vmem:[%s5726_s28 + $0x28] sm:$0xff]  ;;  %v6225_v21 = vld [vmem:[%s5726_s28 + $0x5a] sm:$0xff] }
  0x5d   : > { %5171 = vmatprep.mubr.msk.f32.mxu0 %vm273_vm0, %v5952_v22  ;;  %5027 = vmatprep.subr.mxu1 %v5957_v23 }
  0x5f   : > { %4921 = vmatmul.mubr.msk.f32.gmra.mrb[2].mxu1 %vm273_vm0, %v201_v24  ;;  %5172 = vmatmul.mubr.msk.f32.gmra.mrb[20].mxu0 %vm273_vm0, %v5966_v25  ;;  %v6242_v24 = vld [vmem:[%s5726_s28 + $0x72] sm:$0xff] }
  0x60   : > { %4923 = vmatprep.mubr.msk.f32.mxu1 %vm273_vm0, %v202_v26  ;;  %5174 = vmatprep.mubr.msk.f32.mxu0 %vm273_vm0, %v5972_v27  ;;  %v6256_v26 = vld [vmem:[%s5726_s28 + $0x82] sm:$0xff] }
  0x63   : > { %4924 = vmatmul.mubr.msk.f32.gmra.mrb[4].mxu1 %vm273_vm0, %v203_v11  ;;  %5175 = vmatmul.mubr.msk.f32.gmra.mrb[22].mxu0 %vm273_vm0, %v5983_v28  ;;  %v6267_v11 = vld [vmem:[%s5726_s28 + $0x8a] sm:$0xff] }
  0x64   : > { %4926 = vmatprep.mubr.msk.f32.mxu1 %vm273_vm0, %v204_v29  ;;  %5177 = vmatprep.mubr.msk.f32.mxu0 %vm273_vm0, %v5987_v30  ;;  %v6271_v29 = vld [vmem:[%s5726_s28 + $0x92] sm:$0xff] }
  0x67   : > { %4927 = vmatmul.mubr.msk.f32.gmra.mrb[6].mxu1 %vm273_vm0, %v205_v31  ;;  %5178 = vmatmul.mubr.msk.f32.gmra.mrb[24].mxu0 %vm273_vm0, %v5997_v32  ;;  %v6281_v31 = vld [vmem:[%s5726_s28 + $0x9a] sm:$0xff] }
  0x68   : > { %4929 = vmatprep.mubr.msk.f32.mxu1 %vm273_vm0, %v206_v33  ;;  %5180 = vmatprep.mubr.msk.f32.mxu0 %vm273_vm0, %v6001_v34  ;;  %v6285_v33 = vld [vmem:[%s5726_s28 + $0xa2] sm:$0xff] }
  0x6b   : > { %4930 = vmatmul.mubr.msk.f32.gmra.mrb[8].mxu1 %vm273_vm0, %v207_v35  ;;  %5181 = vmatmul.mubr.msk.f32.gmra.mrb[26].mxu0 %vm273_vm0, %v6011_v36  ;;  %v6295_v35 = vld [vmem:[%s5726_s28 + $0xaa] sm:$0xff] }
  0x6c   : > { %4932 = vmatprep.mubr.msk.f32.mxu1 %vm273_vm0, %v208_v37  ;;  %5183 = vmatprep.mubr.msk.f32.mxu0 %vm273_vm0, %v6015_v38  ;;  %v6300_v37 = vld [vmem:[%s5726_s28 + $0xb2] sm:$0xff] }
  0x6f   : > { %4933 = vmatmul.mubr.msk.f32.gmra.mrb[10].mxu1 %vm273_vm0, %v209_v39  ;;  %5184 = vmatmul.mubr.msk.f32.gmra.mrb[28].mxu0 %vm273_vm0, %v6025_v40  ;;  %v6310_v39 = vld [vmem:[%s5726_s28 + $0xba] sm:$0xff] }
  0x70   : > { %4935 = vmatprep.mubr.msk.f32.mxu1 %vm273_vm0, %v210_v41  ;;  %5186 = vmatprep.mubr.msk.f32.mxu0 %vm273_vm0, %v6029_v42  ;;  %v6314_v41 = vld [vmem:[%s5726_s28 + $0xc2] sm:$0xff] }
  0x73   : > { %4936 = vmatmul.mubr.msk.f32.gmra.mrb[12].mxu1 %vm273_vm0, %v211_v43  ;;  %5187 = vmatmul.mubr.msk.f32.gmra.mrb[30].mxu0 %vm273_vm0, %v6039_v44  ;;  %v6324_v43 = vld [vmem:[%s5726_s28 + $0xca] sm:$0xff] }
  0x74   : > { %4938 = vmatprep.mubr.msk.f32.mxu1 %vm273_vm0, %v212_v45  ;;  %5189 = vmatprep.mubr.msk.f32.mxu0 %vm273_vm0, %v6043_v46  ;;  %v6328_v45 = vld [vmem:[%s5726_s28 + $0xd2] sm:$0xff] }
  0x77   : > { %4939 = vmatmul.mubr.msk.f32.gmra.mrb[14].mxu1 %vm273_vm0, %v213_v49  ;;  %5190 = vmatmul.mubr.msk.f32.gmra.mrb[32].mxu0 %vm273_vm0, %v6053_v51  ;;  %v6338_v49 = vld [vmem:[%s5726_s28 + $0xda] sm:$0xff] }
  0x78   : > { %4941 = vmatprep.mubr.msk.f32.mxu1 %vm273_vm0, %v214_v53  ;;  %5192 = vmatprep.mubr.msk.f32.mxu0 %vm273_vm0, %v6057_v55  ;;  %v6342_v53 = vld [vmem:[%s5726_s28 + $0xe2] sm:$0xff] }
  0x7b   : > { %4942 = vmatmul.mubr.msk.f32.gmra.mrb[16].mxu1 %vm273_vm0, %v215_v57  ;;  %5193 = vmatmul.mubr.msk.f32.gmra.mrb[34].mxu0 %vm273_vm0, %v6067_v59  ;;  %v6352_v57 = vld [vmem:[%s5726_s28 + $0xea] sm:$0xff] }
  0x7c   : > { %4944 = vmatprep.mubr.msk.f32.mxu1 %vm273_vm0, %v216_v61  ;;  %5197 = vmatprep.mubr.msk.f32.mxu0 %vm273_vm0, %v5820_v47  ;;  %v219_v47 = vld [vmem:[%s5726_s28 + $0xa8] sm:$0xff]  ;;  %v6356_v61 = vld [vmem:[%s5726_s28 + $0xf2] sm:$0xff] }
  0x7f   : > { %4945 = vmatmul.mubr.msk.f32.gmra.mrb[18].mxu1 %vm273_vm0, %v217_v63  ;;  %5198 = vmatmul.mubr.msk.f32.vlgmr.msra.gmra.mrb[0].mxu0 %vm273_vm0, %v5833_v50  ;;  %v222_v50 = vld [vmem:[%s5726_s28 + $0xc0] sm:$0xff] }
  0x80   : > { %5252 = vmatpush3.msra.mxu0 %v5825_v48  ;;  %4947 = vmatprep.mubr.msk.f32.mxu1 %vm273_vm0, %v218_v2  ;;  %v221_v48 = vld [vmem:[%s5726_s28 + $0xb8] sm:$0xff]  ;;  %v3127_v63 = vld [vmem:[%s5726_s28 + $0x85] sm:$0xff] }
  0x81   : > { %5200 = vmatprep.mubr.msk.f32.mxu0 %vm273_vm0, %v5839_v52  ;;  %5307 = vmatprep.subr.mxu0 %v6081_v4  ;;  %v223_v52 = vld [vmem:[%s5726_s28 + $0xc8] sm:$0xff]  ;;  %v6366_v2 = vld [vmem:[%s5726_s28 + $0xfa] sm:$0xff] }
  0x83   : > { %4948 = vmatmul.mubr.msk.f32.gmra.mrb[20].mxu1 %vm273_vm0, %v219_v47  ;;  %5201 = vmatmul.mubr.msk.f32.gmra.mrb[2].mxu0 %vm273_vm0, %v5850_v54  ;;  %v224_v54 = vld [vmem:[%s5726_s28 + $0xd0] sm:$0xff]  ;;  %v6370_v47 = vld [vmem:[%s5726_s28 + $0x102] sm:$0xff] }
  0x84   : > { %4950 = vmatprep.mubr.msk.f32.mxu1 %vm273_vm0, %v220_v6  ;;  %5203 = vmatprep.mubr.msk.f32.mxu0 %vm273_vm0, %v5854_v56  ;;  %v225_v56 = vld [vmem:[%s5726_s28 + $0xd8] sm:$0xff] }
  0x85   : > { %v3129_v6 = vld [vmem:[%s5726_s28 + $0x95] sm:$0xff] }
  0x87   : > { %4951 = vmatmul.mubr.msk.f32.gmra.mrb[22].mxu1 %vm273_vm0, %v221_v48  ;;  %5204 = vmatmul.mubr.msk.f32.gmra.mrb[4].mxu0 %vm273_vm0, %v5864_v58  ;;  %v226_v58 = vld [vmem:[%s5726_s28 + $0xe0] sm:$0xff]  ;;  %v6380_v48 = vld [vmem:[%s5726_s28 + $0x10a] sm:$0xff] }
  0x88   : > { %4953 = vmatprep.mubr.msk.f32.mxu1 %vm273_vm0, %v222_v50  ;;  %5206 = vmatprep.mubr.msk.f32.mxu0 %vm273_vm0, %v5868_v60  ;;  %v227_v60 = vld [vmem:[%s5726_s28 + $0xe8] sm:$0xff]  ;;  %v3130_v50 = vld [vmem:[%s5726_s28 + $0x9d] sm:$0xff] }
  0x8b   : > { %4954 = vmatmul.mubr.msk.f32.gmra.mrb[24].mxu1 %vm273_vm0, %v223_v52  ;;  %5207 = vmatmul.mubr.msk.f32.gmra.mrb[6].mxu0 %vm273_vm0, %v5878_v62  ;;  %v228_v62 = vld [vmem:[%s5726_s28 + $0xf0] sm:$0xff] }
  0x8c   : > { %4956 = vmatprep.mubr.msk.f32.mxu1 %vm273_vm0, %v224_v54  ;;  %5209 = vmatprep.mubr.msk.f32.mxu0 %vm273_vm0, %v5882_v0  ;;  %v229_v0 = vld [vmem:[%s5726_s28 + $0xf8] sm:$0xff]  ;;  %v3131_v54 = vld [vmem:[%s5726_s28 + $0xa5] sm:$0xff] }
  0x8d   : > { %v6384_v52 = vld [vmem:[%s5726_s28 + $0x112] sm:$0xff] }
  0x8f   : > { %4957 = vmatmul.mubr.msk.f32.gmra.mrb[26].mxu1 %vm273_vm0, %v225_v56  ;;  %5210 = vmatmul.mubr.msk.f32.gmra.mrb[8].mxu0 %vm273_vm0, %v5892_v3  ;;  %v230_v3 = vld [vmem:[%s5726_s28 + $0x100] sm:$0xff] }
  0x90   : > { %4959 = vmatprep.mubr.msk.f32.mxu1 %vm273_vm0, %v226_v58  ;;  %5212 = vmatprep.mubr.msk.f32.mxu0 %vm273_vm0, %v5896_v5  ;;  %v231_v5 = vld [vmem:[%s5726_s28 + $0x108] sm:$0xff]  ;;  %v6394_v56 = vld [vmem:[%s5726_s28 + $0x11a] sm:$0xff] }
  0x91   : > { %v3132_v58 = vld [vmem:[%s5726_s28 + $0xad] sm:$0xff] }
  0x93   : > { %4960 = vmatmul.mubr.msk.f32.gmra.mrb[28].mxu1 %vm273_vm0, %v227_v60  ;;  %5213 = vmatmul.mubr.msk.f32.gmra.mrb[10].mxu0 %vm273_vm0, %v5906_v7  ;;  %v232_v7 = vld [vmem:[%s5726_s28 + $0x110] sm:$0xff] }
  0x94   : > { %4962 = vmatprep.mubr.msk.f32.mxu1 %vm273_vm0, %v228_v62  ;;  %5215 = vmatprep.mubr.msk.f32.mxu0 %vm273_vm0, %v5910_v9  ;;  %v980_v9 = vld [vmem:[%s5726_s28 + $0x2] sm:$0xff]  ;;  %v3133_v60 = vld [vmem:[%s5726_s28 + $0xb5] sm:$0xff] }
  0x95   : > { %v3134_v62 = vld [vmem:[%s5726_s28 + $0xbd] sm:$0xff] }
  0x97   : > { %4963 = vmatmul.mubr.msk.f32.gmra.mrb[30].mxu1 %vm273_vm0, %v229_v0  ;;  %5216 = vmatmul.mubr.msk.f32.gmra.mrb[12].mxu0 %vm273_vm0, %v5920_v12  ;;  %v6157_v12 = vld [vmem:[%s5726_s28 + $0x12] sm:$0xff]  ;;  %v3135_v0 = vld [vmem:[%s5726_s28 + $0xc5] sm:$0xff] }
  0x98   : > { %4965 = vmatprep.mubr.msk.f32.mxu1 %vm273_vm0, %v230_v3  ;;  %5218 = vmatprep.mubr.msk.f32.mxu0 %vm273_vm0, %v5924_v14  ;;  %v6171_v14 = vld [vmem:[%s5726_s28 + $0x22] sm:$0xff]  ;;  %v3136_v3 = vld [vmem:[%s5726_s28 + $0xcd] sm:$0xff] }
  0x9b   : > { %4966 = vmatmul.mubr.msk.f32.gmra.mrb[32].mxu1 %vm273_vm0, %v231_v5  ;;  %5219 = vmatmul.mubr.msk.f32.gmra.mrb[14].mxu0 %vm273_vm0, %v5934_v16  ;;  %v6186_v16 = vld [vmem:[%s5726_s28 + $0x32] sm:$0xff] }
  0x9c   : > { %4968 = vmatprep.mubr.msk.f32.mxu1 %vm273_vm0, %v232_v7  ;;  %5221 = vmatprep.mubr.msk.f32.mxu0 %vm273_vm0, %v5938_v18  ;;  %v6200_v18 = vld [vmem:[%s5726_s28 + $0x42] sm:$0xff]  ;;  %v3137_v5 = vld [vmem:[%s5726_s28 + $0xd5] sm:$0xff] }
  0x9d   : > { %v3139_v7 = vld [vmem:[%s5726_s28 + $0xe5] sm:$0xff] }
  0x9f   : > { %4969 = vmatmul.mubr.msk.f32.gmra.mrb[34].mxu1 %vm273_vm0, %v233_v8  ;;  %5222 = vmatmul.mubr.msk.f32.gmra.mrb[16].mxu0 %vm273_vm0, %v5948_v20  ;;  %v6214_v20 = vld [vmem:[%s5726_s28 + $0x52] sm:$0xff] }
  0xa0   : > { %4973 = vmatprep.mubr.msk.f32.mxu1 %vm273_vm0, %v980_v9  ;;  %5224 = vmatprep.mubr.msk.f32.mxu0 %vm273_vm0, %v5952_v22  ;;  %v6228_v22 = vld [vmem:[%s5726_s28 + $0x62] sm:$0xff]  ;;  %v3140_v8 = vld [vmem:[%s5726_s28 + $0xed] sm:$0xff]  ;;  %v3141_v9 = vld [vmem:[%s5726_s28 + $0xf5] sm:$0xff] }
  0xa3   : > { %4974 = vmatmul.mubr.msk.f32.vlgmr.msra.gmra.mrb[0].mxu1 %vm273_vm0, %v981_v10  ;;  %5225 = vmatmul.mubr.msk.f32.gmra.mrb[18].mxu0 %vm273_vm0, %v5966_v25  ;;  %v6253_v25 = vld [vmem:[%s5726_s28 + $0x7a] sm:$0xff] }
  0xa4   : > { %5028 = vmatpush3.msra.mxu1 %v5957_v23  ;;  %4976 = vmatprep.mubr.msk.f32.mxu1 %vm273_vm0, %v6157_v12  ;;  %v6239_v23 = vld [vmem:[%s5726_s28 + $0x6a] sm:$0xff]  ;;  %v3142_v10 = vld [vmem:[%s5726_s28 + $0xfd] sm:$0xff] }
  0xa5   : > { %5227 = vmatprep.mubr.msk.f32.mxu0 %vm273_vm0, %v5972_v27  ;;  %5363 = vmatprep.subr.mxu1 %v5710_v1  ;;  %v2722_v27 = vld [vmem:[%s5726_s28 + $0x134] sm:$0xff] }
  0xa7   : > { %4977 = vmatmul.mubr.msk.f32.gmra.mrb[2].mxu1 %vm273_vm0, %v6166_v13  ;;  %5228 = vmatmul.mubr.msk.f32.gmra.mrb[20].mxu0 %vm273_vm0, %v5983_v28  ;;  %v2723_v28 = vld [vmem:[%s5726_s28 + $0x13c] sm:$0xff] }
  0xa8   : > { %4979 = vmatprep.mubr.msk.f32.mxu1 %vm273_vm0, %v6171_v14  ;;  %5230 = vmatprep.mubr.msk.f32.mxu0 %vm273_vm0, %v5987_v30  ;;  %v3115_v30 = vld [vmem:[%s5726_s28 + $0x25] sm:$0xff] }
  0xab   : > { %4980 = vmatmul.mubr.msk.f32.gmra.mrb[4].mxu1 %vm273_vm0, %v6183_v15  ;;  %5231 = vmatmul.mubr.msk.f32.gmra.mrb[22].mxu0 %vm273_vm0, %v5997_v32  ;;  %v3116_v32 = vld [vmem:[%s5726_s28 + $0x2d] sm:$0xff] }
  0xac   : > { %4982 = vmatprep.mubr.msk.f32.mxu1 %vm273_vm0, %v6186_v16  ;;  %5233 = vmatprep.mubr.msk.f32.mxu0 %vm273_vm0, %v6001_v34  ;;  %v3117_v34 = vld [vmem:[%s5726_s28 + $0x35] sm:$0xff] }
  0xaf   : > { %4983 = vmatmul.mubr.msk.f32.gmra.mrb[6].mxu1 %vm273_vm0, %v6197_v17  ;;  %5234 = vmatmul.mubr.msk.f32.gmra.mrb[24].mxu0 %vm273_vm0, %v6011_v36  ;;  %v3118_v36 = vld [vmem:[%s5726_s28 + $0x3d] sm:$0xff] }
  0xb0   : > { %4985 = vmatprep.mubr.msk.f32.mxu1 %vm273_vm0, %v6200_v18  ;;  %5236 = vmatprep.mubr.msk.f32.mxu0 %vm273_vm0, %v6015_v38  ;;  %v3119_v38 = vld [vmem:[%s5726_s28 + $0x45] sm:$0xff] }
  0xb3   : > { %4986 = vmatmul.mubr.msk.f32.gmra.mrb[8].mxu1 %vm273_vm0, %v6211_v19  ;;  %5237 = vmatmul.mubr.msk.f32.gmra.mrb[26].mxu0 %vm273_vm0, %v6025_v40  ;;  %v3120_v40 = vld [vmem:[%s5726_s28 + $0x4d] sm:$0xff] }
  0xb4   : > { %4988 = vmatprep.mubr.msk.f32.mxu1 %vm273_vm0, %v6214_v20  ;;  %5239 = vmatprep.mubr.msk.f32.mxu0 %vm273_vm0, %v6029_v42  ;;  %v3121_v42 = vld [vmem:[%s5726_s28 + $0x55] sm:$0xff] }
  0xb7   : > { %4989 = vmatmul.mubr.msk.f32.gmra.mrb[10].mxu1 %vm273_vm0, %v6225_v21  ;;  %5240 = vmatmul.mubr.msk.f32.gmra.mrb[28].mxu0 %vm273_vm0, %v6039_v44  ;;  %v3122_v44 = vld [vmem:[%s5726_s28 + $0x5d] sm:$0xff] }
  0xb8   : > { %4991 = vmatprep.mubr.msk.f32.mxu1 %vm273_vm0, %v6228_v22  ;;  %5242 = vmatprep.mubr.msk.f32.mxu0 %vm273_vm0, %v6043_v46  ;;  %v3123_v46 = vld [vmem:[%s5726_s28 + $0x65] sm:$0xff] }
  0xbb   : > { %4992 = vmatmul.mubr.msk.f32.gmra.mrb[12].mxu1 %vm273_vm0, %v6239_v23  ;;  %5243 = vmatmul.mubr.msk.f32.gmra.mrb[30].mxu0 %vm273_vm0, %v6053_v51  ;;  %v3124_v51 = vld [vmem:[%s5726_s28 + $0x6d] sm:$0xff] }
  0xbc   : > { %4994 = vmatprep.mubr.msk.f32.mxu1 %vm273_vm0, %v6242_v24  ;;  %5245 = vmatprep.mubr.msk.f32.mxu0 %vm273_vm0, %v6057_v55  ;;  %v3125_v55 = vld [vmem:[%s5726_s28 + $0x75] sm:$0xff] }
  0xbf   : > { %4995 = vmatmul.mubr.msk.f32.gmra.mrb[14].mxu1 %vm273_vm0, %v6253_v25  ;;  %5246 = vmatmul.mubr.msk.f32.gmra.mrb[32].mxu0 %vm273_vm0, %v6067_v59  ;;  %v3126_v59 = vld [vmem:[%s5726_s28 + $0x7d] sm:$0xff] }
  0xc0   : > { %4997 = vmatprep.mubr.msk.f32.mxu1 %vm273_vm0, %v6256_v26  ;;  %5248 = vmatprep.mubr.msk.f32.mxu0 %vm273_vm0, %v2722_v27  ;;  %v3549_v27 = vld [vmem:[%s5726_s28 + $0x5e] sm:$0xff] }
  0xc3   : > { %4998 = vmatmul.mubr.msk.f32.gmra.mrb[16].mxu1 %vm273_vm0, %v6267_v11  ;;  %5249 = vmatmul.mubr.msk.f32.gmra.mrb[34].mxu0 %vm273_vm0, %v2723_v28  ;;  %v3551_v28 = vld [vmem:[%s5726_s28 + $0x6e] sm:$0xff] }
  0xc4   : > { %5000 = vmatprep.mubr.msk.f32.mxu1 %vm273_vm0, %v6271_v29  ;;  %5253 = vmatprep.mubr.msk.f32.mxu0 %vm273_vm0, %v3115_v30  ;;  %v3553_v30 = vld [vmem:[%s5726_s28 + $0x7e] sm:$0xff] }
  0xc7   : > { %5001 = vmatmul.mubr.msk.f32.gmra.mrb[18].mxu1 %vm273_vm0, %v6281_v31  ;;  %5254 = vmatmul.mubr.msk.f32.vlgmr.msra.gmra.mrb[0].mxu0 %vm273_vm0, %v3116_v32  ;;  %v3555_v32 = vld [vmem:[%s5726_s28 + $0x8e] sm:$0xff] }
  0xc8   : > { %5308 = vmatpush3.msra.mxu0 %v6081_v4  ;;  %5003 = vmatprep.mubr.msk.f32.mxu1 %vm273_vm0, %v6285_v33  ;;  %v3128_v4 = vld [vmem:[%s5726_s28 + $0x8d] sm:$0xff] }
  0xc9   : > { %5256 = vmatprep.mubr.msk.f32.mxu0 %vm273_vm0, %v3117_v34  ;;  %v3557_v34 = vld [vmem:[%s5726_s28 + $0x9e] sm:$0xff] }
  0xcb   : > { %5004 = vmatmul.mubr.msk.f32.gmra.mrb[20].mxu1 %vm273_vm0, %v6295_v35  ;;  %5257 = vmatmul.mubr.msk.f32.gmra.mrb[2].mxu0 %vm273_vm0, %v3118_v36  ;;  %v3558_v36 = vld [vmem:[%s5726_s28 + $0xa6] sm:$0xff] }
  0xcc   : > { %5006 = vmatprep.mubr.msk.f32.mxu1 %vm273_vm0, %v6300_v37  ;;  %5259 = vmatprep.mubr.msk.f32.mxu0 %vm273_vm0, %v3119_v38  ;;  %v3559_v38 = vld [vmem:[%s5726_s28 + $0xae] sm:$0xff] }
  0xcf   : > { %5007 = vmatmul.mubr.msk.f32.gmra.mrb[22].mxu1 %vm273_vm0, %v6310_v39  ;;  %5260 = vmatmul.mubr.msk.f32.gmra.mrb[4].mxu0 %vm273_vm0, %v3120_v40  ;;  %v3560_v40 = vld [vmem:[%s5726_s28 + $0xb6] sm:$0xff] }
  0xd0   : > { %5009 = vmatprep.mubr.msk.f32.mxu1 %vm273_vm0, %v6314_v41  ;;  %5262 = vmatprep.mubr.msk.f32.mxu0 %vm273_vm0, %v3121_v42  ;;  %v3561_v42 = vld [vmem:[%s5726_s28 + $0xbe] sm:$0xff] }
  0xd3   : > { %5010 = vmatmul.mubr.msk.f32.gmra.mrb[24].mxu1 %vm273_vm0, %v6324_v43  ;;  %5263 = vmatmul.mubr.msk.f32.gmra.mrb[6].mxu0 %vm273_vm0, %v3122_v44  ;;  %v3562_v44 = vld [vmem:[%s5726_s28 + $0xc6] sm:$0xff] }
  0xd4   : > { %5012 = vmatprep.mubr.msk.f32.mxu1 %vm273_vm0, %v6328_v45  ;;  %5265 = vmatprep.mubr.msk.f32.mxu0 %vm273_vm0, %v3123_v46  ;;  %v3563_v46 = vld [vmem:[%s5726_s28 + $0xce] sm:$0xff] }
  0xd7   : > { %5013 = vmatmul.mubr.msk.f32.gmra.mrb[26].mxu1 %vm273_vm0, %v6338_v49  ;;  %5266 = vmatmul.mubr.msk.f32.gmra.mrb[8].mxu0 %vm273_vm0, %v3124_v51  ;;  %v3564_v51 = vld [vmem:[%s5726_s28 + $0xd6] sm:$0xff] }
  0xd8   : > { %5015 = vmatprep.mubr.msk.f32.mxu1 %vm273_vm0, %v6342_v53  ;;  %5268 = vmatprep.mubr.msk.f32.mxu0 %vm273_vm0, %v3125_v55  ;;  %v3565_v55 = vld [vmem:[%s5726_s28 + $0xde] sm:$0xff] }
  0xdb   : > { %5016 = vmatmul.mubr.msk.f32.gmra.mrb[28].mxu1 %vm273_vm0, %v6352_v57  ;;  %5269 = vmatmul.mubr.msk.f32.gmra.mrb[10].mxu0 %vm273_vm0, %v3126_v59  ;;  %v3566_v59 = vld [vmem:[%s5726_s28 + $0xe6] sm:$0xff] }
  0xdc   : > { %5018 = vmatprep.mubr.msk.f32.mxu1 %vm273_vm0, %v6356_v61  ;;  %5271 = vmatprep.mubr.msk.f32.mxu0 %vm273_vm0, %v3127_v63  ;;  %v3567_v63 = vld [vmem:[%s5726_s28 + $0xee] sm:$0xff] }
  0xdf   : > { %5019 = vmatmul.mubr.msk.f32.gmra.mrb[30].mxu1 %vm273_vm0, %v6366_v2  ;;  %5272 = vmatmul.mubr.msk.f32.gmra.mrb[12].mxu0 %vm273_vm0, %v3128_v4  ;;  %v3568_v4 = vld [vmem:[%s5726_s28 + $0xf6] sm:$0xff] }
  0xe0   : > { %5021 = vmatprep.mubr.msk.f32.mxu1 %vm273_vm0, %v6370_v47  ;;  %5274 = vmatprep.mubr.msk.f32.mxu0 %vm273_vm0, %v3129_v6  ;;  %v3569_v6 = vld [vmem:[%s5726_s28 + $0xfe] sm:$0xff] }
  0xe3   : > { %5022 = vmatmul.mubr.msk.f32.gmra.mrb[32].mxu1 %vm273_vm0, %v6380_v48  ;;  %5275 = vmatmul.mubr.msk.f32.gmra.mrb[14].mxu0 %vm273_vm0, %v3130_v50  ;;  %v3570_v50 = vld [vmem:[%s5726_s28 + $0x106] sm:$0xff] }
  0xe4   : > { %5024 = vmatprep.mubr.msk.f32.mxu1 %vm273_vm0, %v6384_v52  ;;  %5277 = vmatprep.mubr.msk.f32.mxu0 %vm273_vm0, %v3131_v54  ;;  %v3571_v54 = vld [vmem:[%s5726_s28 + $0x10e] sm:$0xff] }
  0xe7   : > { %5025 = vmatmul.mubr.msk.f32.gmra.mrb[34].mxu1 %vm273_vm0, %v6394_v56  ;;  %5278 = vmatmul.mubr.msk.f32.gmra.mrb[16].mxu0 %vm273_vm0, %v3132_v58  ;;  %v3572_v58 = vld [vmem:[%s5726_s28 + $0x116] sm:$0xff] }
  0xe8   : > { %5029 = vmatprep.mubr.msk.f32.mxu1 %vm273_vm0, %v6157_v12  ;;  %5280 = vmatprep.mubr.msk.f32.mxu0 %vm273_vm0, %v3133_v60  ;;  %v3143_v12 = vld [vmem:[%s5726_s28 + $0x105] sm:$0xff] }
  0xe9   : > { %v1865_v60 = vld [vmem:[%s5726_s28 + $0x10b] sm:$0xff] }
  0xeb   : > { %5030 = vmatmul.mubr.msk.f32.vlgmr.msra.gmra.mrb[0].mxu1 %vm273_vm0, %v6166_v13  ;;  %5281 = vmatmul.mubr.msk.f32.gmra.mrb[18].mxu0 %vm273_vm0, %v3134_v62  ;;  %v3144_v13 = vld [vmem:[%s5726_s28 + $0x10d] sm:$0xff]  ;;  %v3573_v62 = vld [vmem:[%s5726_s28 + $0x11e] sm:$0xff] }
  0xec   : > { %5364 = vmatpush3.msra.mxu1 %v5710_v1  ;;  %5032 = vmatprep.mubr.msk.f32.mxu1 %vm273_vm0, %v6171_v14  ;;  %v3138_v1 = vld [vmem:[%s5726_s28 + $0xdd] sm:$0xff]  ;;  %v3145_v14 = vld [vmem:[%s5726_s28 + $0x115] sm:$0xff] }
  0xed   : > { %5283 = vmatprep.mubr.msk.f32.mxu0 %vm273_vm0, %v3135_v0  ;;  %v1866_v0 = vld [vmem:[%s5726_s28 + $0x113] sm:$0xff] }
  0xef   : > { %5033 = vmatmul.mubr.msk.f32.gmra.mrb[2].mxu1 %vm273_vm0, %v6183_v15  ;;  %5284 = vmatmul.mubr.msk.f32.gmra.mrb[20].mxu0 %vm273_vm0, %v3136_v3  ;;  %v3146_v15 = vld [vmem:[%s5726_s28 + $0x11d] sm:$0xff]  ;;  %v3574_v3 = vld [vmem:[%s5726_s28 + $0x126] sm:$0xff] }
  0xf0   : > { %5035 = vmatprep.mubr.msk.f32.mxu1 %vm273_vm0, %v6186_v16  ;;  %5286 = vmatprep.mubr.msk.f32.mxu0 %vm273_vm0, %v3137_v5  ;;  %v3147_v16 = vld [vmem:[%s5726_s28 + $0x125] sm:$0xff]  ;;  %v1867_v5 = vld [vmem:[%s5726_s28 + $0x11b] sm:$0xff] }
  0xf3   : > { %5036 = vmatmul.mubr.msk.f32.gmra.mrb[4].mxu1 %vm273_vm0, %v6197_v17  ;;  %5287 = vmatmul.mubr.msk.f32.gmra.mrb[22].mxu0 %vm273_vm0, %v3138_v1  ;;  %v3148_v17 = vld [vmem:[%s5726_s28 + $0x12d] sm:$0xff] }
  0xf4   : > { %5038 = vmatprep.mubr.msk.f32.mxu1 %vm273_vm0, %v6200_v18  ;;  %5289 = vmatprep.mubr.msk.f32.mxu0 %vm273_vm0, %v3139_v7  ;;  %v3149_v18 = vld [vmem:[%s5726_s28 + $0x135] sm:$0xff]  ;;  %v1868_v7 = vld [vmem:[%s5726_s28 + $0x123] sm:$0xff] }
  0xf5   : > { %v3575_v1 = vld [vmem:[%s5726_s28 + $0x12e] sm:$0xff] }
  0xf7   : > { %5039 = vmatmul.mubr.msk.f32.gmra.mrb[6].mxu1 %vm273_vm0, %v6211_v19  ;;  %5290 = vmatmul.mubr.msk.f32.gmra.mrb[24].mxu0 %vm273_vm0, %v3140_v8  ;;  %v3150_v19 = vld [vmem:[%s5726_s28 + $0x13d] sm:$0xff] }
  0xf8   : > { %5041 = vmatprep.mubr.msk.f32.mxu1 %vm273_vm0, %v6214_v20  ;;  %5292 = vmatprep.mubr.msk.f32.mxu0 %vm273_vm0, %v3141_v9  ;;  %v3542_v20 = vld [vmem:[%s5726_s28 + $0x26] sm:$0xff]  ;;  %v3576_v8 = vld [vmem:[%s5726_s28 + $0x136] sm:$0xff] }
  0xf9   : > { %v1869_v9 = vld [vmem:[%s5726_s28 + $0x12b] sm:$0xff] }
  0xfb   : > { %5042 = vmatmul.mubr.msk.f32.gmra.mrb[8].mxu1 %vm273_vm0, %v6225_v21  ;;  %5293 = vmatmul.mubr.msk.f32.gmra.mrb[26].mxu0 %vm273_vm0, %v3142_v10  ;;  %v3543_v21 = vld [vmem:[%s5726_s28 + $0x2e] sm:$0xff]  ;;  %v3577_v10 = vld [vmem:[%s5726_s28 + $0x13e] sm:$0xff] }
  0xfc   : > { %5044 = vmatprep.mubr.msk.f32.mxu1 %vm273_vm0, %v6228_v22  ;;  %5295 = vmatprep.mubr.msk.f32.mxu0 %vm273_vm0, %v3143_v12  ;;  %v3544_v22 = vld [vmem:[%s5726_s28 + $0x36] sm:$0xff] }
  0xff   : > { %5045 = vmatmul.mubr.msk.f32.gmra.mrb[10].mxu1 %vm273_vm0, %v6239_v23  ;;  %5296 = vmatmul.mubr.msk.f32.gmra.mrb[28].mxu0 %vm273_vm0, %v3144_v13  ;;  %v3545_v23 = vld [vmem:[%s5726_s28 + $0x3e] sm:$0xff] }
 0x100   : > { %5047 = vmatprep.mubr.msk.f32.mxu1 %vm273_vm0, %v6242_v24  ;;  %5298 = vmatprep.mubr.msk.f32.mxu0 %vm273_vm0, %v3145_v14  ;;  %v3546_v24 = vld [vmem:[%s5726_s28 + $0x46] sm:$0xff] }
 0x103   : > { %5048 = vmatmul.mubr.msk.f32.gmra.mrb[12].mxu1 %vm273_vm0, %v6253_v25  ;;  %5299 = vmatmul.mubr.msk.f32.gmra.mrb[30].mxu0 %vm273_vm0, %v3146_v15  ;;  %v3547_v25 = vld [vmem:[%s5726_s28 + $0x4e] sm:$0xff] }
 0x104   : > { %5050 = vmatprep.mubr.msk.f32.mxu1 %vm273_vm0, %v6256_v26  ;;  %5301 = vmatprep.mubr.msk.f32.mxu0 %vm273_vm0, %v3147_v16  ;;  %v3548_v26 = vld [vmem:[%s5726_s28 + $0x56] sm:$0xff] }
 0x107   : > { %5051 = vmatmul.mubr.msk.f32.gmra.mrb[14].mxu1 %vm273_vm0, %v6267_v11  ;;  %5302 = vmatmul.mubr.msk.f32.gmra.mrb[32].mxu0 %vm273_vm0, %v3148_v17  ;;  %v3550_v11 = vld [vmem:[%s5726_s28 + $0x66] sm:$0xff] }
 0x108   : > { %5053 = vmatprep.mubr.msk.f32.mxu1 %vm273_vm0, %v6271_v29  ;;  %5304 = vmatprep.mubr.msk.f32.mxu0 %vm273_vm0, %v3149_v18  ;;  %v3552_v29 = vld [vmem:[%s5726_s28 + $0x76] sm:$0xff] }
 0x10b   : > { %5054 = vmatmul.mubr.msk.f32.gmra.mrb[16].mxu1 %vm273_vm0, %v6281_v31  ;;  %5305 = vmatmul.mubr.msk.f32.gmra.mrb[34].mxu0 %vm273_vm0, %v3150_v19  ;;  %v3554_v31 = vld [vmem:[%s5726_s28 + $0x86] sm:$0xff] }
 0x10c   : > { %5056 = vmatprep.mubr.msk.f32.mxu1 %vm273_vm0, %v6285_v33  ;;  %5309 = vmatprep.mubr.msk.f32.mxu0 %vm273_vm0, %v3542_v20  ;;  %v3556_v33 = vld [vmem:[%s5726_s28 + $0x96] sm:$0xff] }
 0x10f   : > { %5057 = vmatmul.mubr.msk.f32.gmra.mrb[18].mxu1 %vm273_vm0, %v6295_v35  ;;  %5310 = vmatmul.mubr.msk.f32.vlgmr.msra.gmra.mrb[0].mxu0 %vm273_vm0, %v3543_v21  ;;  %v1441_v35 = vld [vmem:[%s5726_s28 + $0x122] sm:$0xff] }
 0x110   : > { %5059 = vmatprep.mubr.msk.f32.mxu1 %vm273_vm0, %v6300_v37  ;;  %5312 = vmatprep.mubr.msk.f32.mxu0 %vm273_vm0, %v3544_v22  ;;  %v1442_v37 = vld [vmem:[%s5726_s28 + $0x12a] sm:$0xff] }
 0x113   : > { %5060 = vmatmul.mubr.msk.f32.gmra.mrb[20].mxu1 %vm273_vm0, %v6310_v39  ;;  %5313 = vmatmul.mubr.msk.f32.gmra.mrb[2].mxu0 %vm273_vm0, %v3545_v23  ;;  %v1852_v39 = vld [vmem:[%s5726_s28 + $0xa3] sm:$0xff] }
 0x114   : > { %5062 = vmatprep.mubr.msk.f32.mxu1 %vm273_vm0, %v6314_v41  ;;  %5315 = vmatprep.mubr.msk.f32.mxu0 %vm273_vm0, %v3546_v24  ;;  %v1853_v41 = vld [vmem:[%s5726_s28 + $0xab] sm:$0xff] }
 0x117   : > { %5063 = vmatmul.mubr.msk.f32.gmra.mrb[22].mxu1 %vm273_vm0, %v6324_v43  ;;  %5316 = vmatmul.mubr.msk.f32.gmra.mrb[4].mxu0 %vm273_vm0, %v3547_v25  ;;  %v1854_v43 = vld [vmem:[%s5726_s28 + $0xb3] sm:$0xff] }
 0x118   : > { %5065 = vmatprep.mubr.msk.f32.mxu1 %vm273_vm0, %v6328_v45  ;;  %5318 = vmatprep.mubr.msk.f32.mxu0 %vm273_vm0, %v3548_v26  ;;  %v1855_v45 = vld [vmem:[%s5726_s28 + $0xbb] sm:$0xff] }
 0x11b   : > { %5066 = vmatmul.mubr.msk.f32.gmra.mrb[24].mxu1 %vm273_vm0, %v6338_v49  ;;  %5319 = vmatmul.mubr.msk.f32.gmra.mrb[6].mxu0 %vm273_vm0, %v3549_v27  ;;  %v1856_v49 = vld [vmem:[%s5726_s28 + $0xc3] sm:$0xff] }
 0x11c   : > { %5068 = vmatprep.mubr.msk.f32.mxu1 %vm273_vm0, %v6342_v53  ;;  %5321 = vmatprep.mubr.msk.f32.mxu0 %vm273_vm0, %v3550_v11  ;;  %v1857_v53 = vld [vmem:[%s5726_s28 + $0xcb] sm:$0xff] }
 0x11f   : > { %5069 = vmatmul.mubr.msk.f32.gmra.mrb[26].mxu1 %vm273_vm0, %v6352_v57  ;;  %5322 = vmatmul.mubr.msk.f32.gmra.mrb[8].mxu0 %vm273_vm0, %v3551_v28  ;;  %v1858_v57 = vld [vmem:[%s5726_s28 + $0xd3] sm:$0xff] }
 0x120   : > { %5071 = vmatprep.mubr.msk.f32.mxu1 %vm273_vm0, %v6356_v61  ;;  %5324 = vmatprep.mubr.msk.f32.mxu0 %vm273_vm0, %v3552_v29  ;;  %v1859_v61 = vld [vmem:[%s5726_s28 + $0xdb] sm:$0xff] }
 0x123   : > { %5072 = vmatmul.mubr.msk.f32.gmra.mrb[28].mxu1 %vm273_vm0, %v6366_v2  ;;  %5325 = vmatmul.mubr.msk.f32.gmra.mrb[10].mxu0 %vm273_vm0, %v3553_v30  ;;  %v1860_v2 = vld [vmem:[%s5726_s28 + $0xe3] sm:$0xff]  ;;  %v6636_v30 = vld [vmem:[%s6806_s2] ss:$0 sm:$0xff] }
 0x124   : > { %5074 = vmatprep.mubr.msk.f32.mxu1 %vm273_vm0, %v6370_v47  ;;  %5327 = vmatprep.mubr.msk.f32.mxu0 %vm273_vm0, %v3554_v31  ;;  %v1861_v47 = vld [vmem:[%s5726_s28 + $0xeb] sm:$0xff] }
 0x127   : > { %5075 = vmatmul.mubr.msk.f32.gmra.mrb[30].mxu1 %vm273_vm0, %v6380_v48  ;;  %5328 = vmatmul.mubr.msk.f32.gmra.mrb[12].mxu0 %vm273_vm0, %v3555_v32  ;;  %v1862_v48 = vld [vmem:[%s5726_s28 + $0xf3] sm:$0xff] }
 0x128   : > { %5077 = vmatprep.mubr.msk.f32.mxu1 %vm273_vm0, %v6384_v52  ;;  %5330 = vmatprep.mubr.msk.f32.mxu0 %vm273_vm0, %v3556_v33  ;;  %v1863_v52 = vld [vmem:[%s5726_s28 + $0xfb] sm:$0xff] }
 0x129   : > { %v6642_v33 = vld [vmem:[%s6807_s3] ss:$0 sm:$0xff] }
 0x12b   : > { %5078 = vmatmul.mubr.msk.f32.gmra.mrb[32].mxu1 %vm273_vm0, %v6394_v56  ;;  %5331 = vmatmul.mubr.msk.f32.gmra.mrb[14].mxu0 %vm273_vm0, %v3557_v34  ;;  %v1864_v56 = vld [vmem:[%s5726_s28 + $0x103] sm:$0xff] }
 0x12c   : > { %5080 = vmatprep.mubr.msk.f32.mxu1 %vm273_vm0, %v1441_v35  ;;  %5333 = vmatprep.mubr.msk.f32.mxu0 %vm273_vm0, %v3558_v36 }
 0x12f   : > { %5081 = vmatmul.mubr.msk.f32.gmra.mrb[34].mxu1 %vm273_vm0, %v1442_v37  ;;  %5334 = vmatmul.mubr.msk.f32.gmra.mrb[16].mxu0 %vm273_vm0, %v3559_v38 }
 0x130   : > { %5112 = vmatprep.mubr.msk.f32.mxu1 %vm273_vm0, %v1852_v39  ;;  %5336 = vmatprep.mubr.msk.f32.mxu0 %vm273_vm0, %v3560_v40 }
 0x133   : > { %5113 = vmatmul.mubr.msk.f32.vlgmr.msra.gmra.mrb[18].mxu1 %vm273_vm0, %v1853_v41  ;;  %5337 = vmatmul.mubr.msk.f32.gmra.mrb[18].mxu0 %vm273_vm0, %v3561_v42 }
 0x134   : > { %5115 = vmatprep.mubr.msk.f32.mxu1 %vm273_vm0, %v1854_v43  ;;  %5339 = vmatprep.mubr.msk.f32.mxu0 %vm273_vm0, %v3562_v44 }
 0x137   : > { %5116 = vmatmul.mubr.msk.f32.gmra.mrb[20].mxu1 %vm273_vm0, %v1855_v45  ;;  %5340 = vmatmul.mubr.msk.f32.gmra.mrb[20].mxu0 %vm273_vm0, %v3563_v46 }
 0x138   : > { %5118 = vmatprep.mubr.msk.f32.mxu1 %vm273_vm0, %v1856_v49  ;;  %5342 = vmatprep.mubr.msk.f32.mxu0 %vm273_vm0, %v3564_v51 }
 0x13b   : > { %5119 = vmatmul.mubr.msk.f32.gmra.mrb[22].mxu1 %vm273_vm0, %v1857_v53  ;;  %5343 = vmatmul.mubr.msk.f32.gmra.mrb[22].mxu0 %vm273_vm0, %v3565_v55 }
 0x13c   : > { %5121 = vmatprep.mubr.msk.f32.mxu1 %vm273_vm0, %v1858_v57  ;;  %5345 = vmatprep.mubr.msk.f32.mxu0 %vm273_vm0, %v3566_v59 }
 0x13f   : > { %5122 = vmatmul.mubr.msk.f32.gmra.mrb[24].mxu1 %vm273_vm0, %v1859_v61  ;;  %5346 = vmatmul.mubr.msk.f32.gmra.mrb[24].mxu0 %vm273_vm0, %v3567_v63 }
 0x140   : > { %5124 = vmatprep.mubr.msk.f32.mxu1 %vm273_vm0, %v1860_v2  ;;  %5348 = vmatprep.mubr.msk.f32.mxu0 %vm273_vm0, %v3568_v4 }
 0x143   : > { %5125 = vmatmul.mubr.msk.f32.gmra.mrb[26].mxu1 %vm273_vm0, %v1861_v47  ;;  %5349 = vmatmul.mubr.msk.f32.gmra.mrb[26].mxu0 %vm273_vm0, %v3569_v6 }
 0x144   : > { %5127 = vmatprep.mubr.msk.f32.mxu1 %vm273_vm0, %v1862_v48  ;;  %5351 = vmatprep.mubr.msk.f32.mxu0 %vm273_vm0, %v3570_v50 }
 0x147   : > { %5128 = vmatmul.mubr.msk.f32.gmra.mrb[28].mxu1 %vm273_vm0, %v1863_v52  ;;  %5352 = vmatmul.mubr.msk.f32.gmra.mrb[28].mxu0 %vm273_vm0, %v3571_v54 }
 0x148   : > { %5130 = vmatprep.mubr.msk.f32.mxu1 %vm273_vm0, %v1864_v56  ;;  %5354 = vmatprep.mubr.msk.f32.mxu0 %vm273_vm0, %v3572_v58 }
 0x14b   : > { %5131 = vmatmul.mubr.msk.f32.gmra.mrb[30].mxu1 %vm273_vm0, %v1865_v60  ;;  %5355 = vmatmul.mubr.msk.f32.gmra.mrb[30].mxu0 %vm273_vm0, %v3573_v62 }
 0x14c   : > { %5133 = vmatprep.mubr.msk.f32.mxu1 %vm273_vm0, %v1866_v0  ;;  %5357 = vmatprep.mubr.msk.f32.mxu0 %vm273_vm0, %v3574_v3 }
 0x14f   : > { %5134 = vmatmul.mubr.msk.f32.gmra.mrb[32].mxu1 %vm273_vm0, %v1867_v5  ;;  %5358 = vmatmul.mubr.msk.f32.gmra.mrb[32].mxu0 %vm273_vm0, %v3575_v1 }
 0x150   : > { %5136 = vmatprep.mubr.msk.f32.mxu1 %vm273_vm0, %v1868_v7  ;;  %5360 = vmatprep.mubr.msk.f32.mxu0 %vm273_vm0, %v3576_v8 }
 0x153   : > { %5137 = vmatmul.mubr.msk.f32.gmra.mrb[34].mxu1 %vm273_vm0, %v1869_v9  ;;  %5361 = vmatmul.mubr.msk.f32.gmra.mrb[34].mxu0 %vm273_vm0, %v3577_v10 }
 0x1be   : > { %v5031_v12 = vpop.f32.mrb[0].mxu1 }
 0x1bf   : > { %v1619_v13 = vpop.f32.mrb[1].mxu1 }
 0x1c2   : > { %v5034_v14 = vpop.f32.mrb[2].mxu1 }
 0x1c3   : > { %v1629_v15 = vpop.f32.mrb[3].mxu1 }
 0x1c6   : > { %v5037_v16 = vpop.f32.mrb[4].mxu1 }
 0x1c7   : > { %v1639_v17 = vpop.f32.mrb[5].mxu1 }
 0x1ca   : > { %v5040_v18 = vpop.f32.mrb[6].mxu1 }
 0x1cb   : > { %v1649_v19 = vpop.f32.mrb[7].mxu1 }
 0x1ce   : > { %v5043_v20 = vpop.f32.mrb[8].mxu1 }
 0x1cf   : > { %v1659_v21 = vpop.f32.mrb[9].mxu1 }
 0x1d2   : > { %v6617_v22 = vpop.f32.mrb[10].mxu1 }
 0x1d3   : > { %v6619_v23 = vpop.f32.mrb[11].mxu1 }
 0x1d6   : > { %v6621_v24 = vpop.f32.mrb[12].mxu1 }
 0x1d7   : > { %v6623_v25 = vpop.f32.mrb[13].mxu1 }
 0x1da   : > { %v6625_v26 = vpop.f32.mrb[14].mxu1 }
 0x1db   : > { %v6627_v27 = vpop.f32.mrb[15].mxu1 }
 0x1de   : > { %v6629_v11 = vpop.f32.mrb[16].mxu1 }
 0x1df   : > { %v6631_v28 = vpop.f32.mrb[17].mxu1 }
 0x1e2   : > { %v5311_v29 = vpop.f32.mrb[0].mxu0 }
 0x1e3   : > { %v5365_v31 = vadd.f32 %v5311_v29, %v5031_v12  ;;  %v3754_v32 = vpop.f32.mrb[1].mxu0 }
 0x1e4   : > { %v5366_v34 = vadd.f32 %v3754_v32, %v1619_v13 }
 0x1e5   : > { %v3977_v35 = vmul.f32 %v5365_v31, %v6636_v30 }
 0x1e6   : > { %v3976_v36 = vmul.f32 %v5366_v34, %v6636_v30  ;;  %v5314_v37 = vpop.f32.mrb[2].mxu0 }
 0x1e7   : > { %v4020_v38 = vadd.f32 %v6642_v33, %v3977_v35  ;;  %v5367_v39 = vadd.f32 %v5314_v37, %v5034_v14  ;;  %v3764_v40 = vpop.f32.mrb[3].mxu0 }
 0x1e8   : > { %v4019_v41 = vadd.f32 %v6642_v33, %v3976_v36  ;;  %v5368_v42 = vadd.f32 %v3764_v40, %v1629_v15 }
 0x1e9   : > { %v4056_v43 = vmax.f32 %v4020_v38, 0.0  ;;  %v3979_v44 = vmul.f32 %v5367_v39, %v6636_v30 }
 0x1ea   : > { %v4055_v45 = vmax.f32 %v4019_v41, 0.0  ;;  %v3978_v46 = vmul.f32 %v5368_v42, %v6636_v30  ;;  %v5317_v49 = vpop.f32.mrb[4].mxu0 }
 0x1eb   : > { %4093 = vst.msk [vmem:[%s6650_s22 + $0x8] sm:$0xff] %vm4091_vm1, %v4056_v43  ;;  %v4022_v51 = vadd.f32 %v6642_v33, %v3979_v44  ;;  %v5369_v53 = vadd.f32 %v5317_v49, %v5037_v16  ;;  %v3774_v55 = vpop.f32.mrb[5].mxu0 }
 0x1ec   : > { %4092 = vst.msk [vmem:[%s6650_s22] sm:$0xff] %vm4091_vm1, %v4055_v45  ;;  %v4021_v57 = vadd.f32 %v6642_v33, %v3978_v46  ;;  %v5370_v59 = vadd.f32 %v3774_v55, %v1639_v17 }
 0x1ed   : > { %v4058_v61 = vmax.f32 %v4022_v51, 0.0  ;;  %v3981_v63 = vmul.f32 %v5369_v53, %v6636_v30 }
 0x1ee   : > { %v4057_v2 = vmax.f32 %v4021_v57, 0.0  ;;  %v3980_v4 = vmul.f32 %v5370_v59, %v6636_v30  ;;  %v5320_v47 = vpop.f32.mrb[6].mxu0 }
 0x1ef   : > { %4095 = vst.msk [vmem:[%s6650_s22 + $0x18] sm:$0xff] %vm4091_vm1, %v4058_v61  ;;  %v4024_v6 = vadd.f32 %v6642_v33, %v3981_v63  ;;  %v5371_v48 = vadd.f32 %v5320_v47, %v5040_v18  ;;  %v3784_v50 = vpop.f32.mrb[7].mxu0 }
 0x1f0   : > { %4094 = vst.msk [vmem:[%s6650_s22 + $0x10] sm:$0xff] %vm4091_vm1, %v4057_v2  ;;  %v4023_v52 = vadd.f32 %v6642_v33, %v3980_v4  ;;  %v5372_v54 = vadd.f32 %v3784_v50, %v1649_v19 }
 0x1f1   : > { %v4060_v56 = vmax.f32 %v4024_v6, 0.0  ;;  %v3983_v58 = vmul.f32 %v5371_v48, %v6636_v30 }
 0x1f2   : > { %v4059_v60 = vmax.f32 %v4023_v52, 0.0  ;;  %v3982_v62 = vmul.f32 %v5372_v54, %v6636_v30  ;;  %v5323_v0 = vpop.f32.mrb[8].mxu0 }
 0x1f3   : > { %4097 = vst.msk [vmem:[%s6650_s22 + $0x28] sm:$0xff] %vm4091_vm1, %v4060_v56  ;;  %v4026_v3 = vadd.f32 %v6642_v33, %v3983_v58  ;;  %v5373_v5 = vadd.f32 %v5323_v0, %v5043_v20  ;;  %v3794_v1 = vpop.f32.mrb[9].mxu0 }
 0x1f4   : > { %4096 = vst.msk [vmem:[%s6650_s22 + $0x20] sm:$0xff] %vm4091_vm1, %v4059_v60  ;;  %v4025_v7 = vadd.f32 %v6642_v33, %v3982_v62  ;;  %v5374_v8 = vadd.f32 %v3794_v1, %v1659_v21 }
 0x1f5   : > { %v4062_v9 = vmax.f32 %v4026_v3, 0.0  ;;  %v3985_v10 = vmul.f32 %v5373_v5, %v6636_v30 }
 0x1f6   : > { %v4061_v12 = vmax.f32 %v4025_v7, 0.0  ;;  %v3984_v13 = vmul.f32 %v5374_v8, %v6636_v30  ;;  %v5326_v14 = vpop.f32.mrb[10].mxu0 }
 0x1f7   : > { %4099 = vst.msk [vmem:[%s6650_s22 + $0x38] sm:$0xff] %vm4091_vm1, %v4062_v9  ;;  %v4028_v15 = vadd.f32 %v6642_v33, %v3985_v10  ;;  %v5375_v16 = vadd.f32 %v5326_v14, %v6617_v22  ;;  %v3804_v17 = vpop.f32.mrb[11].mxu0 }
 0x1f8   : > { %4098 = vst.msk [vmem:[%s6650_s22 + $0x30] sm:$0xff] %vm4091_vm1, %v4061_v12  ;;  %v4027_v18 = vadd.f32 %v6642_v33, %v3984_v13  ;;  %v5376_v19 = vadd.f32 %v3804_v17, %v6619_v23 }
 0x1f9   : > { %v4064_v20 = vmax.f32 %v4028_v15, 0.0  ;;  %v3987_v21 = vmul.f32 %v5375_v16, %v6636_v30 }
 0x1fa   : > { %v4063_v29 = vmax.f32 %v4027_v18, 0.0  ;;  %v3986_v31 = vmul.f32 %v5376_v19, %v6636_v30  ;;  %v5329_v32 = vpop.f32.mrb[12].mxu0 }
 0x1fb   : > { %4101 = vst.msk [vmem:[%s6650_s22 + $0x48] sm:$0xff] %vm4091_vm1, %v4064_v20  ;;  %v4030_v22 = vadd.f32 %v6642_v33, %v3987_v21  ;;  %v5377_v34 = vadd.f32 %v5329_v32, %v6621_v24  ;;  %v3814_v35 = vpop.f32.mrb[13].mxu0 }
 0x1fc   : > { %4100 = vst.msk [vmem:[%s6650_s22 + $0x40] sm:$0xff] %vm4091_vm1, %v4063_v29  ;;  %v4029_v23 = vadd.f32 %v6642_v33, %v3986_v31  ;;  %v5378_v36 = vadd.f32 %v3814_v35, %v6623_v25 }
 0x1fd   : > { %v4066_v37 = vmax.f32 %v4030_v22, 0.0  ;;  %v3989_v38 = vmul.f32 %v5377_v34, %v6636_v30 }
 0x1fe   : > { %v4065_v39 = vmax.f32 %v4029_v23, 0.0  ;;  %v3988_v40 = vmul.f32 %v5378_v36, %v6636_v30  ;;  %v5332_v41 = vpop.f32.mrb[14].mxu0 }
 0x1ff   : > { %4103 = vst.msk [vmem:[%s6650_s22 + $0x58] sm:$0xff] %vm4091_vm1, %v4066_v37  ;;  %v4032_v24 = vadd.f32 %v6642_v33, %v3989_v38  ;;  %v5379_v42 = vadd.f32 %v5332_v41, %v6625_v26  ;;  %v3824_v43 = vpop.f32.mrb[15].mxu0 }
 0x200   : > { %4102 = vst.msk [vmem:[%s6650_s22 + $0x50] sm:$0xff] %vm4091_vm1, %v4065_v39  ;;  %v4031_v25 = vadd.f32 %v6642_v33, %v3988_v40  ;;  %v5380_v44 = vadd.f32 %v3824_v43, %v6627_v27 }
 0x201   : > { %v4068_v45 = vmax.f32 %v4032_v24, 0.0  ;;  %v3991_v46 = vmul.f32 %v5379_v42, %v6636_v30 }
 0x202   : > { %v4067_v49 = vmax.f32 %v4031_v25, 0.0  ;;  %v3990_v51 = vmul.f32 %v5380_v44, %v6636_v30  ;;  %v5335_v53 = vpop.f32.mrb[16].mxu0 }
 0x203   : > { %4105 = vst.msk [vmem:[%s6650_s22 + $0x68] sm:$0xff] %vm4091_vm1, %v4068_v45  ;;  %v4034_v55 = vadd.f32 %v6642_v33, %v3991_v46  ;;  %v5381_v26 = vadd.f32 %v5335_v53, %v6629_v11  ;;  %v3834_v57 = vpop.f32.mrb[17].mxu0 }
 0x204   : > { %4104 = vst.msk [vmem:[%s6650_s22 + $0x60] sm:$0xff] %vm4091_vm1, %v4067_v49  ;;  %v4033_v27 = vadd.f32 %v6642_v33, %v3990_v51  ;;  %v5382_v59 = vadd.f32 %v3834_v57, %v6631_v28 }
 0x205   : > { %v4070_v61 = vmax.f32 %v4034_v55, 0.0  ;;  %v3993_v63 = vmul.f32 %v5381_v26, %v6636_v30 }
 0x206   : > { %v4069_v2 = vmax.f32 %v4033_v27, 0.0  ;;  %v3992_v4 = vmul.f32 %v5382_v59, %v6636_v30  ;;  %v5114_v47 = vpop.f32.mrb[18].mxu1  ;;  %v5338_v6 = vpop.f32.mrb[18].mxu0 }
 0x207   : > { %4107 = vst.msk [vmem:[%s6650_s22 + $0x78] sm:$0xff] %vm4091_vm1, %v4070_v61  ;;  %v4036_v11 = vadd.f32 %v6642_v33, %v3993_v63  ;;  %v5383_v48 = vadd.f32 %v5338_v6, %v5114_v47  ;;  %v2136_v50 = vpop.f32.mrb[19].mxu1  ;;  %v3844_v52 = vpop.f32.mrb[19].mxu0 }
 0x208   : > { %4106 = vst.msk [vmem:[%s6650_s22 + $0x70] sm:$0xff] %vm4091_vm1, %v4069_v2  ;;  %v4035_v28 = vadd.f32 %v6642_v33, %v3992_v4  ;;  %v5384_v54 = vadd.f32 %v3844_v52, %v2136_v50 }
 0x209   : > { %v4072_v56 = vmax.f32 %v4036_v11, 0.0  ;;  %v3995_v58 = vmul.f32 %v5383_v48, %v6636_v30 }
 0x20a   : > { %v4071_v60 = vmax.f32 %v4035_v28, 0.0  ;;  %v3994_v62 = vmul.f32 %v5384_v54, %v6636_v30  ;;  %v5117_v0 = vpop.f32.mrb[20].mxu1  ;;  %v5341_v3 = vpop.f32.mrb[20].mxu0 }
 0x20b   : > { %4109 = vst.msk [vmem:[%s6650_s22 + $0x88] sm:$0xff] %vm4091_vm1, %v4072_v56  ;;  %v4038_v5 = vadd.f32 %v6642_v33, %v3995_v58  ;;  %v5385_v1 = vadd.f32 %v5341_v3, %v5117_v0  ;;  %v2146_v7 = vpop.f32.mrb[21].mxu1  ;;  %v3854_v8 = vpop.f32.mrb[21].mxu0 }
 0x20c   : > { %4108 = vst.msk [vmem:[%s6650_s22 + $0x80] sm:$0xff] %vm4091_vm1, %v4071_v60  ;;  %v4037_v9 = vadd.f32 %v6642_v33, %v3994_v62  ;;  %v5386_v10 = vadd.f32 %v3854_v8, %v2146_v7 }
 0x20d   : > { %v4074_v12 = vmax.f32 %v4038_v5, 0.0  ;;  %v3997_v13 = vmul.f32 %v5385_v1, %v6636_v30 }
 0x20e   : > { %v4073_v14 = vmax.f32 %v4037_v9, 0.0  ;;  %v3996_v15 = vmul.f32 %v5386_v10, %v6636_v30  ;;  %v5120_v16 = vpop.f32.mrb[22].mxu1  ;;  %v5344_v17 = vpop.f32.mrb[22].mxu0 }
 0x20f   : > { %4111 = vst.msk [vmem:[%s6650_s22 + $0x98] sm:$0xff] %vm4091_vm1, %v4074_v12  ;;  %v4040_v18 = vadd.f32 %v6642_v33, %v3997_v13  ;;  %v5387_v19 = vadd.f32 %v5344_v17, %v5120_v16  ;;  %v2156_v20 = vpop.f32.mrb[23].mxu1  ;;  %v3864_v21 = vpop.f32.mrb[23].mxu0 }
 0x210   : > { %4110 = vst.msk [vmem:[%s6650_s22 + $0x90] sm:$0xff] %vm4091_vm1, %v4073_v14  ;;  %v4039_v29 = vadd.f32 %v6642_v33, %v3996_v15  ;;  %v5388_v31 = vadd.f32 %v3864_v21, %v2156_v20 }
 0x211   : > { %v4076_v32 = vmax.f32 %v4040_v18, 0.0  ;;  %v3999_v22 = vmul.f32 %v5387_v19, %v6636_v30 }
 0x212   : > { %v4075_v34 = vmax.f32 %v4039_v29, 0.0  ;;  %v3998_v35 = vmul.f32 %v5388_v31, %v6636_v30  ;;  %v5123_v23 = vpop.f32.mrb[24].mxu1  ;;  %v5347_v36 = vpop.f32.mrb[24].mxu0 }
 0x213   : > { %4113 = vst.msk [vmem:[%s6650_s22 + $0xa8] sm:$0xff] %vm4091_vm1, %v4076_v32  ;;  %v4042_v37 = vadd.f32 %v6642_v33, %v3999_v22  ;;  %v5389_v38 = vadd.f32 %v5347_v36, %v5123_v23  ;;  %v2166_v39 = vpop.f32.mrb[25].mxu1  ;;  %v3874_v40 = vpop.f32.mrb[25].mxu0 }
 0x214   : > { %4112 = vst.msk [vmem:[%s6650_s22 + $0xa0] sm:$0xff] %vm4091_vm1, %v4075_v34  ;;  %v4041_v41 = vadd.f32 %v6642_v33, %v3998_v35  ;;  %v5390_v24 = vadd.f32 %v3874_v40, %v2166_v39 }
 0x215   : > { %v4078_v42 = vmax.f32 %v4042_v37, 0.0  ;;  %v4001_v43 = vmul.f32 %v5389_v38, %v6636_v30 }
 0x216   : > { %v4077_v25 = vmax.f32 %v4041_v41, 0.0  ;;  %v4000_v44 = vmul.f32 %v5390_v24, %v6636_v30  ;;  %v5126_v45 = vpop.f32.mrb[26].mxu1  ;;  %v5350_v46 = vpop.f32.mrb[26].mxu0 }
 0x217   : > { %4115 = vst.msk [vmem:[%s6650_s22 + $0xb8] sm:$0xff] %vm4091_vm1, %v4078_v42  ;;  %v4044_v49 = vadd.f32 %v6642_v33, %v4001_v43  ;;  %v5391_v51 = vadd.f32 %v5350_v46, %v5126_v45  ;;  %v2176_v53 = vpop.f32.mrb[27].mxu1  ;;  %v3884_v55 = vpop.f32.mrb[27].mxu0 }
 0x218   : > { %4114 = vst.msk [vmem:[%s6650_s22 + $0xb0] sm:$0xff] %vm4091_vm1, %v4077_v25  ;;  %v4043_v26 = vadd.f32 %v6642_v33, %v4000_v44  ;;  %v5392_v57 = vadd.f32 %v3884_v55, %v2176_v53 }
 0x219   : > { %v4080_v27 = vmax.f32 %v4044_v49, 0.0  ;;  %v4003_v59 = vmul.f32 %v5391_v51, %v6636_v30 }
 0x21a   : > { %v4079_v61 = vmax.f32 %v4043_v26, 0.0  ;;  %v4002_v63 = vmul.f32 %v5392_v57, %v6636_v30  ;;  %v5129_v2 = vpop.f32.mrb[28].mxu1  ;;  %v5353_v4 = vpop.f32.mrb[28].mxu0 }
 0x21b   : > { %4117 = vst.msk [vmem:[%s6650_s22 + $0xc8] sm:$0xff] %vm4091_vm1, %v4080_v27  ;;  %v4046_v47 = vadd.f32 %v6642_v33, %v4003_v59  ;;  %v5393_v6 = vadd.f32 %v5353_v4, %v5129_v2  ;;  %v2186_v11 = vpop.f32.mrb[29].mxu1  ;;  %v3894_v48 = vpop.f32.mrb[29].mxu0 }
 0x21c   : > { %4116 = vst.msk [vmem:[%s6650_s22 + $0xc0] sm:$0xff] %vm4091_vm1, %v4079_v61  ;;  %v4045_v50 = vadd.f32 %v6642_v33, %v4002_v63  ;;  %v5394_v52 = vadd.f32 %v3894_v48, %v2186_v11 }
 0x21d   : > { %v4082_v28 = vmax.f32 %v4046_v47, 0.0  ;;  %v4005_v54 = vmul.f32 %v5393_v6, %v6636_v30 }
 0x21e   : > { %v4081_v56 = vmax.f32 %v4045_v50, 0.0  ;;  %v4004_v58 = vmul.f32 %v5394_v52, %v6636_v30  ;;  %v5132_v60 = vpop.f32.mrb[30].mxu1  ;;  %v5356_v62 = vpop.f32.mrb[30].mxu0 }
 0x21f   : > { %4119 = vst.msk [vmem:[%s6650_s22 + $0xd8] sm:$0xff] %vm4091_vm1, %v4082_v28  ;;  %v4048_v0 = vadd.f32 %v6642_v33, %v4005_v54  ;;  %v5395_v3 = vadd.f32 %v5356_v62, %v5132_v60  ;;  %v2196_v5 = vpop.f32.mrb[31].mxu1  ;;  %v3904_v1 = vpop.f32.mrb[31].mxu0 }
 0x220   : > { %4118 = vst.msk [vmem:[%s6650_s22 + $0xd0] sm:$0xff] %vm4091_vm1, %v4081_v56  ;;  %v4047_v7 = vadd.f32 %v6642_v33, %v4004_v58  ;;  %v5396_v8 = vadd.f32 %v3904_v1, %v2196_v5 }
 0x221   : > { %v4084_v9 = vmax.f32 %v4048_v0, 0.0  ;;  %v4007_v10 = vmul.f32 %v5395_v3, %v6636_v30 }
 0x222   : > { %v4083_v12 = vmax.f32 %v4047_v7, 0.0  ;;  %v4006_v13 = vmul.f32 %v5396_v8, %v6636_v30  ;;  %v5135_v14 = vpop.f32.mrb[32].mxu1  ;;  %v5359_v15 = vpop.f32.mrb[32].mxu0 }
 0x223   : > { %4121 = vst.msk [vmem:[%s6650_s22 + $0xe8] sm:$0xff] %vm4091_vm1, %v4084_v9  ;;  %v4050_v16 = vadd.f32 %v6642_v33, %v4007_v10  ;;  %v5397_v17 = vadd.f32 %v5359_v15, %v5135_v14  ;;  %v2206_v18 = vpop.f32.mrb[33].mxu1  ;;  %v3914_v19 = vpop.f32.mrb[33].mxu0 }
 0x224   : > { %4120 = vst.msk [vmem:[%s6650_s22 + $0xe0] sm:$0xff] %vm4091_vm1, %v4083_v12  ;;  %v4049_v20 = vadd.f32 %v6642_v33, %v4006_v13  ;;  %v5398_v21 = vadd.f32 %v3914_v19, %v2206_v18 }
 0x225   : > { %v4086_v29 = vmax.f32 %v4050_v16, 0.0  ;;  %v4009_v31 = vmul.f32 %v5397_v17, %v6636_v30 }
 0x226   : > { %v4085_v32 = vmax.f32 %v4049_v20, 0.0  ;;  %v4008_v22 = vmul.f32 %v5398_v21, %v6636_v30  ;;  %v5138_v34 = vpop.f32.mrb[34].mxu1  ;;  %v5362_v35 = vpop.f32.mrb[34].mxu0 }
 0x227   : > { %4123 = vst.msk [vmem:[%s6650_s22 + $0xf8] sm:$0xff] %vm4091_vm1, %v4086_v29  ;;  %v4052_v23 = vadd.f32 %v6642_v33, %v4009_v31  ;;  %v5399_v36 = vadd.f32 %v5362_v35, %v5138_v34  ;;  %v2216_v37 = vpop.f32.mrb[35].mxu1  ;;  %v3924_v38 = vpop.f32.mrb[35].mxu0 }
 0x228   : > { %4122 = vst.msk [vmem:[%s6650_s22 + $0xf0] sm:$0xff] %vm4091_vm1, %v4085_v32  ;;  %v4051_v39 = vadd.f32 %v6642_v33, %v4008_v22  ;;  %v5400_v40 = vadd.f32 %v3924_v38, %v2216_v37 }
 0x229   : > { %v4088_v41 = vmax.f32 %v4052_v23, 0.0  ;;  %v4011_v24 = vmul.f32 %v5399_v36, %v6636_v30 }
 0x22a   : > { %v4087_v42 = vmax.f32 %v4051_v39, 0.0  ;;  %v4010_v43 = vmul.f32 %v5400_v40, %v6636_v30 }
 0x22b   : > { %4125 = vst.msk [vmem:[%s6650_s22 + $0x108] sm:$0xff] %vm4091_vm1, %v4088_v41  ;;  %v4054_v25 = vadd.f32 %v6642_v33, %v4011_v24 }
 0x22c   : > { %4124 = vst.msk [vmem:[%s6650_s22 + $0x100] sm:$0xff] %vm4091_vm1, %v4087_v42  ;;  %v4053_v44 = vadd.f32 %v6642_v33, %v4010_v43 }
 0x22d   : > { %v4090_v45 = vmax.f32 %v4054_v25, 0.0 }
 0x22e   : > { %v4089_v46 = vmax.f32 %v4053_v44, 0.0 }
 0x22f   : > { %4127 = vst.msk [vmem:[%s6650_s22 + $0x118] sm:$0xff] %vm4091_vm1, %v4090_v45 }
 0x230   : > { %4126 = vst.msk [vmem:[%s6650_s22 + $0x110] sm:$0xff] %vm4091_vm1, %v4089_v46 }
 0x231 PF: > { %s14_s15 = sadd.s32 1, %s5669_s15  }
 0x232   : > { %p11_p4 = scmp.ge.s32.totalorder %s14_s15, 4  }
 0x234   :  { %13 = sbr.rel (!%p11_p4) target bundleno = 1 (0x1), region = 74 }

</bundles_post_ra>
